<compile_context>
chip_gen: v5e
topology: v5e:2x2
jax: 0.10.0
libtpu: 0.0.40
codegen_flags: <defaults>
</compile_context>

<pallas_src>
import math

import jax
import jax.numpy as jnp
from jax.experimental import pallas as pl
from jax.experimental.pallas import tpu as pltpu

# ---------------- config (DeiT-tiny) ----------------
NUM_CLASSES = 87
IN_CHANS = 15
IMG_SIZE = 32
PATCH = 16
EMBED_DIM = 192
DEPTH = 12
NUM_HEADS = 3
HEAD_DIM = EMBED_DIM // NUM_HEADS          # 64
MLP_HIDDEN = EMBED_DIM * 4                 # 768
GRID_HW = IMG_SIZE // PATCH                # 2
NUM_PATCHES = GRID_HW * GRID_HW            # 4
SEQ = NUM_PATCHES + 1                      # 5 (cls token)
PATCH_DIM = IN_CHANS * PATCH * PATCH       # 3840
LN_EPS = 1e-6
ATTN_SCALE = 1.0 / math.sqrt(HEAD_DIM)
INV_SQRT2 = 1.0 / math.sqrt(2.0)


# ---------------- kernel ----------------
def _layernorm(v, g, b):
    mu = jnp.mean(v, axis=-1, keepdims=True)
    var = jnp.mean(jnp.square(v - mu), axis=-1, keepdims=True)
    return (v - mu) * jax.lax.rsqrt(var + LN_EPS) * g + b


def deit_kernel(patches_ref, cls_ref, pos_ref, pw_ref, pb_ref,
                g1_ref, b1_ref, wqkv_ref, bqkv_ref, wproj_ref, bproj_ref,
                g2_ref, b2_ref, wfc1_ref, bfc1_ref, wfc2_ref, bfc2_ref,
                ng_ref, nb_ref, hw_ref, hb_ref,
                logits_ref, x_scratch):
    d = pl.program_id(1)                       # transformer depth (streamed axis)
    bb = x_scratch.shape[0]                    # samples in this batch block
    rows = bb * SEQ

    # ---- d == 0: patch embed (conv as matmul) + cls token + pos embed ----
    @pl.when(d == 0)
    def _embed():
        p = patches_ref[...].reshape(bb * NUM_PATCHES, PATCH_DIM)        # bf16
        emb = (jnp.dot(p, pw_ref[...], preferred_element_type=jnp.float32)
               + pb_ref[...])
        emb = emb.reshape(bb, NUM_PATCHES, EMBED_DIM)
        cls_tok = jnp.broadcast_to(cls_ref[...][None, :, :], (bb, 1, EMBED_DIM))
        x_scratch[...] = (jnp.concatenate([cls_tok, emb], axis=1)
                          + pos_ref[...][None, :, :])

    # ---- transformer block d (residual stream stays f32 in VMEM scratch) ----
    x = x_scratch[...].reshape(rows, EMBED_DIM)                          # (B*S, D)

    # attention
    xn = _layernorm(x, g1_ref[...], b1_ref[...]).astype(jnp.bfloat16)
    qkv = (jnp.dot(xn, wqkv_ref[...], preferred_element_type=jnp.float32)
           + bqkv_ref[...])                    # (B*S, 3D); 1/sqrt(hd) folded into W_q
    qkv = qkv.reshape(bb, SEQ, 3 * EMBED_DIM)

    attn = jnp.zeros((rows, EMBED_DIM), jnp.float32)
    for h in range(NUM_HEADS):
        q = qkv[:, :, h * HEAD_DIM:(h + 1) * HEAD_DIM]
        k = qkv[:, :, EMBED_DIM + h * HEAD_DIM:EMBED_DIM + (h + 1) * HEAD_DIM]
        v = qkv[:, :, 2 * EMBED_DIM + h * HEAD_DIM:2 * EMBED_DIM + (h + 1) * HEAD_DIM]
        s = jnp.einsum('bqd,bkd->bqk', q, k, preferred_element_type=jnp.float32)
        s = s - jnp.max(s, axis=-1, keepdims=True)
        p = jnp.exp(s)
        p = p / jnp.sum(p, axis=-1, keepdims=True)
        ctx = jnp.einsum('bqk,bkd->bqd', p, v, preferred_element_type=jnp.float32)
        ctx = ctx.reshape(rows, HEAD_DIM).astype(jnp.bfloat16)
        # accumulate per-head slice of W_proj -> no head concatenate needed
        attn = attn + jnp.dot(ctx, wproj_ref[h * HEAD_DIM:(h + 1) * HEAD_DIM, :],
                              preferred_element_type=jnp.float32)
    x = x + attn + bproj_ref[...]

    # MLP (exact erf GELU, matches torch nn.GELU)
    xn2 = _layernorm(x, g2_ref[...], b2_ref[...]).astype(jnp.bfloat16)
    h1 = (jnp.dot(xn2, wfc1_ref[...], preferred_element_type=jnp.float32)
          + bfc1_ref[...])
    h1 = 0.5 * h1 * (1.0 + jax.lax.erf(h1 * INV_SQRT2))
    h2 = (jnp.dot(h1.astype(jnp.bfloat16), wfc2_ref[...],
                  preferred_element_type=jnp.float32) + bfc2_ref[...])
    x = x + h2

    x_scratch[...] = x.reshape(bb, SEQ, EMBED_DIM)

    # ---- d == DEPTH-1: final LN on cls token + classification head ----
    @pl.when(d == DEPTH - 1)
    def _head():
        cls = x.reshape(bb, SEQ, EMBED_DIM)[:, 0, :]                     # token pool
        cls = _layernorm(cls, ng_ref[...], nb_ref[...]).astype(jnp.bfloat16)
        logits_ref[...] = (jnp.dot(cls, hw_ref[...],
                                   preferred_element_type=jnp.float32)
                           + hb_ref[...])


# ---------------- wrapper ----------------
def deit_forward(x_img, kp):
    """x_img: (B, C, H, W) NCHW float32; kp: prepared (bf16/folded) params."""
    B = x_img.shape[0]
    # Whole batch per grid block at this tiny size (maximizes M = B*SEQ rows and
    # avoids duplicating the per-layer weight stream).  For large B, shrink
    # block_b so the leading "parallel" axis splits across v7x's 2 TensorCores.
    block_b = B
    assert B % block_b == 0

    # non-overlapping 16x16 patches flattened as (c, kh, kw) -- matches the
    # Conv2d(k=16, s=16) weight flattening, so the conv is a single matmul.
    patches = x_img.reshape(B, IN_CHANS, GRID_HW, PATCH, GRID_HW, PATCH)
    patches = patches.transpose(0, 2, 4, 1, 3, 5).reshape(
        B, NUM_PATCHES, PATCH_DIM).astype(jnp.bfloat16)

    def fixed(shape):                       # fetched once, resident across depth
        return pl.BlockSpec(shape, lambda bi, d, s=shape: (0,) * len(s))

    def per_layer(full_shape):              # streamed (double-buffered) per layer
        return pl.BlockSpec((None,) + full_shape[1:], lambda bi, d: (d, 0, 0))

    grid = (B // block_b, DEPTH)
    in_specs = [
        pl.BlockSpec((block_b, NUM_PATCHES, PATCH_DIM), lambda bi, d: (bi, 0, 0)),
        fixed((1, EMBED_DIM)),                        # cls token
        fixed((SEQ, EMBED_DIM)),                      # pos embed
        fixed((PATCH_DIM, EMBED_DIM)),                # patch_w (bf16)
        fixed((1, EMBED_DIM)),                        # patch_b
        per_layer(kp["g1"].shape), per_layer(kp["b1"].shape),
        per_layer(kp["wqkv"].shape), per_layer(kp["bqkv"].shape),
        per_layer(kp["wproj"].shape), per_layer(kp["bproj"].shape),
        per_layer(kp["g2"].shape), per_layer(kp["b2"].shape),
        per_layer(kp["wfc1"].shape), per_layer(kp["bfc1"].shape),
        per_layer(kp["wfc2"].shape), per_layer(kp["bfc2"].shape),
        fixed((1, EMBED_DIM)), fixed((1, EMBED_DIM)), # final norm g, b
        fixed((EMBED_DIM, NUM_CLASSES)),              # head_w (bf16)
        fixed((1, NUM_CLASSES)),                      # head_b
    ]

    return pl.pallas_call(
        deit_kernel,
        out_shape=jax.ShapeDtypeStruct((B, NUM_CLASSES), jnp.float32),
        grid=grid,
        in_specs=in_specs,
        out_specs=pl.BlockSpec((block_b, NUM_CLASSES), lambda bi, d: (bi, 0)),
        scratch_shapes=[pltpu.VMEM((block_b, SEQ, EMBED_DIM), jnp.float32)],
        compiler_params=pltpu.CompilerParams(
            dimension_semantics=("parallel", "arbitrary"),
            vmem_limit_bytes=16 * 1024 * 1024),
    )(patches, kp["cls_token"], kp["pos_embed"], kp["patch_w"], kp["patch_b"],
      kp["g1"], kp["b1"], kp["wqkv"], kp["bqkv"], kp["wproj"], kp["bproj"],
      kp["g2"], kp["b2"], kp["wfc1"], kp["bfc1"], kp["wfc2"], kp["bfc2"],
      kp["norm_g"], kp["norm_b"], kp["head_w"], kp["head_b"])


# ---------------- parameters ----------------
def init_params(key):
    """Canonical f32 parameters (same structure/semantics as the torch model)."""
    std = 0.02
    k = jax.random.split(key, 8)

    def nrm(kk, shape):
        return jax.random.normal(kk, shape, jnp.float32) * std

    layers = {
        "g1": jnp.ones((DEPTH, 1, EMBED_DIM), jnp.float32),
        "b1": jnp.zeros((DEPTH, 1, EMBED_DIM), jnp.float32),
        "wqkv": nrm(k[3], (DEPTH, EMBED_DIM, 3 * EMBED_DIM)),
        "bqkv": jnp.zeros((DEPTH, 1, 3 * EMBED_DIM), jnp.float32),
        "wproj": nrm(k[4], (DEPTH, EMBED_DIM, EMBED_DIM)),
        "bproj": jnp.zeros((DEPTH, 1, EMBED_DIM), jnp.float32),
        "g2": jnp.ones((DEPTH, 1, EMBED_DIM), jnp.float32),
        "b2": jnp.zeros((DEPTH, 1, EMBED_DIM), jnp.float32),
        "wfc1": nrm(k[5], (DEPTH, EMBED_DIM, MLP_HIDDEN)),
        "bfc1": jnp.zeros((DEPTH, 1, MLP_HIDDEN), jnp.float32),
        "wfc2": nrm(k[6], (DEPTH, MLP_HIDDEN, EMBED_DIM)),
        "bfc2": jnp.zeros((DEPTH, 1, EMBED_DIM), jnp.float32),
    }
    return {
        "patch_w": nrm(k[0], (PATCH_DIM, EMBED_DIM)),
        "patch_b": jnp.zeros((1, EMBED_DIM), jnp.float32),
        "cls_token": nrm(k[1], (1, 1, EMBED_DIM)),
        "pos_embed": nrm(k[2], (1, SEQ, EMBED_DIM)),
        "norm_g": jnp.ones((1, EMBED_DIM), jnp.float32),
        "norm_b": jnp.zeros((1, EMBED_DIM), jnp.float32),
        "head_w": nrm(k[7], (EMBED_DIM, NUM_CLASSES)),
        "head_b": jnp.zeros((1, NUM_CLASSES), jnp.float32),
        "layers": layers,
    }


def prepare_params(p):
    """Fold attention scale into W_q/b_q and cast streaming weights to bf16.

    Numerically equivalent to the f32 model up to bf16 weight rounding
    (biases, LN params and the f32 residual/accumulator path are unchanged).
    """
    L = p["layers"]
    scale = jnp.concatenate([
        jnp.full((EMBED_DIM,), ATTN_SCALE, jnp.float32),
        jnp.ones((2 * EMBED_DIM,), jnp.float32)])
    wqkv = L["wqkv"] * scale[None, None, :]
    bqkv = L["bqkv"] * scale[None, None, :]
    bf = lambda a: a.astype(jnp.bfloat16)
    return {
        "patch_w": bf(p["patch_w"]), "patch_b": p["patch_b"],
        "cls_token": p["cls_token"].reshape(1, EMBED_DIM),
        "pos_embed": p["pos_embed"].reshape(SEQ, EMBED_DIM),
        "g1": L["g1"], "b1": L["b1"],
        "wqkv": bf(wqkv), "bqkv": bqkv,
        "wproj": bf(L["wproj"]), "bproj": L["bproj"],
        "g2": L["g2"], "b2": L["b2"],
        "wfc1": bf(L["wfc1"]), "bfc1": L["bfc1"],
        "wfc2": bf(L["wfc2"]), "bfc2": L["bfc2"],
        "norm_g": p["norm_g"], "norm_b": p["norm_b"],
        "head_w": bf(p["head_w"]), "head_b": p["head_b"],
    }


if __name__ == "__main__":
    key = jax.random.PRNGKey(0)
    pkey, xkey = jax.random.split(key)
    params = prepare_params(init_params(pkey))

    B = 2
    x = jax.random.normal(xkey, (B, IN_CHANS, IMG_SIZE, IMG_SIZE), jnp.float32)

    fwd = jax.jit(deit_forward)
    logits = fwd(x, params)
    jax.block_until_ready(logits)

    assert logits.shape == (B, NUM_CLASSES), logits.shape
    assert logits.dtype == jnp.float32
    assert bool(jnp.all(jnp.isfinite(logits)))
    print("KERNEL_OK")
</pallas_src>

<mosaic_0001>
module attributes {stable_mosaic.version = 11 : i64} {
  func.func @deit_kernel(%arg0: i32, %arg1: i32, %arg2: memref<2x4x3840xbf16, #tpu.memory_space<vmem>>, %arg3: memref<1x192xf32, #tpu.memory_space<vmem>>, %arg4: memref<5x192xf32, #tpu.memory_space<vmem>>, %arg5: memref<3840x192xbf16, #tpu.memory_space<vmem>>, %arg6: memref<1x192xf32, #tpu.memory_space<vmem>>, %arg7: memref<1x1x192xf32, #tpu.memory_space<vmem>>, %arg8: memref<1x1x192xf32, #tpu.memory_space<vmem>>, %arg9: memref<1x192x576xbf16, #tpu.memory_space<vmem>>, %arg10: memref<1x1x576xf32, #tpu.memory_space<vmem>>, %arg11: memref<1x192x192xbf16, #tpu.memory_space<vmem>>, %arg12: memref<1x1x192xf32, #tpu.memory_space<vmem>>, %arg13: memref<1x1x192xf32, #tpu.memory_space<vmem>>, %arg14: memref<1x1x192xf32, #tpu.memory_space<vmem>>, %arg15: memref<1x192x768xbf16, #tpu.memory_space<vmem>>, %arg16: memref<1x1x768xf32, #tpu.memory_space<vmem>>, %arg17: memref<1x768x192xbf16, #tpu.memory_space<vmem>>, %arg18: memref<1x1x192xf32, #tpu.memory_space<vmem>>, %arg19: memref<1x192xf32, #tpu.memory_space<vmem>>, %arg20: memref<1x192xf32, #tpu.memory_space<vmem>>, %arg21: memref<192x87xbf16, #tpu.memory_space<vmem>>, %arg22: memref<1x87xf32, #tpu.memory_space<vmem>>, %arg23: memref<2x87xf32, #tpu.memory_space<vmem>>, %arg24: memref<2x5x192xf32, #tpu.memory_space<vmem>>) attributes {dimension_semantics = [#tpu.dimension_semantics<parallel>, #tpu.dimension_semantics<arbitrary>], iteration_bounds = array<i64: 1, 12>, scalar_prefetch = 0 : i64, scratch_operands = 1 : i64, tpu.core_type = #tpu.core_type<tc>, window_params = [{transform_indices = @transform_0, window_bounds = array<i64: 2, 4, 3840>}, {pipeline_mode = #tpu.pipeline_mode<synchronous>, transform_indices = @transform_1, window_bounds = array<i64: 1, 192>}, {pipeline_mode = #tpu.pipeline_mode<synchronous>, transform_indices = @transform_2, window_bounds = array<i64: 5, 192>}, {pipeline_mode = #tpu.pipeline_mode<synchronous>, transform_indices = @transform_3, window_bounds = array<i64: 3840, 192>}, {pipeline_mode = #tpu.pipeline_mode<synchronous>, transform_indices = @transform_4, window_bounds = array<i64: 1, 192>}, {transform_indices = @transform_5, window_bounds = array<i64: 1, 1, 192>}, {transform_indices = @transform_6, window_bounds = array<i64: 1, 1, 192>}, {transform_indices = @transform_7, window_bounds = array<i64: 1, 192, 576>}, {transform_indices = @transform_8, window_bounds = array<i64: 1, 1, 576>}, {transform_indices = @transform_9, window_bounds = array<i64: 1, 192, 192>}, {transform_indices = @transform_10, window_bounds = array<i64: 1, 1, 192>}, {transform_indices = @transform_11, window_bounds = array<i64: 1, 1, 192>}, {transform_indices = @transform_12, window_bounds = array<i64: 1, 1, 192>}, {transform_indices = @transform_13, window_bounds = array<i64: 1, 192, 768>}, {transform_indices = @transform_14, window_bounds = array<i64: 1, 1, 768>}, {transform_indices = @transform_15, window_bounds = array<i64: 1, 768, 192>}, {transform_indices = @transform_16, window_bounds = array<i64: 1, 1, 192>}, {pipeline_mode = #tpu.pipeline_mode<synchronous>, transform_indices = @transform_17, window_bounds = array<i64: 1, 192>}, {pipeline_mode = #tpu.pipeline_mode<synchronous>, transform_indices = @transform_18, window_bounds = array<i64: 1, 192>}, {pipeline_mode = #tpu.pipeline_mode<synchronous>, transform_indices = @transform_19, window_bounds = array<i64: 192, 87>}, {pipeline_mode = #tpu.pipeline_mode<synchronous>, transform_indices = @transform_20, window_bounds = array<i64: 1, 87>}, {transform_indices = @transform_21, window_bounds = array<i64: 2, 87>}]} {
    %c0_i32 = arith.constant 0 : i32
    %0 = arith.cmpi eq, %arg1, %c0_i32 : i32
    %1 = arith.extui %0 : i1 to i32
    %c0_i32_0 = arith.constant 0 : i32
    %2 = arith.cmpi ne, %1, %c0_i32_0 : i32
    scf.if %2 {
      %c0_78 = arith.constant 0 : index
      %c0_79 = arith.constant 0 : index
      %c0_80 = arith.constant 0 : index
      %162 = vector.load %arg2[%c0_78, %c0_79, %c0_80] : memref<2x4x3840xbf16, #tpu.memory_space<vmem>>, vector<2x4x3840xbf16>
      %163 = vector.shape_cast %162 : vector<2x4x3840xbf16> to vector<8x3840xbf16>
      %c0_81 = arith.constant 0 : index
      %c0_82 = arith.constant 0 : index
      %164 = vector.load %arg5[%c0_81, %c0_82] : memref<3840x192xbf16, #tpu.memory_space<vmem>>, vector<3840x192xbf16>
      %cst_83 = arith.constant dense<0.000000e+00> : vector<8x192xf32>
      %165 = tpu.matmul %163, %164, %cst_83 {dimension_numbers = #tpu.dot_dimension_numbers<[1], [0], [0], [1], [0, 0, 1, 1], [], []>} : vector<8x3840xbf16>, vector<3840x192xbf16>, vector<8x192xf32> -> vector<8x192xf32>
      %c0_84 = arith.constant 0 : index
      %c0_85 = arith.constant 0 : index
      %166 = vector.load %arg6[%c0_84, %c0_85] : memref<1x192xf32, #tpu.memory_space<vmem>>, vector<1x192xf32>
      %167 = vector.broadcast %166 : vector<1x192xf32> to vector<8x192xf32>
      %168 = arith.addf %165, %167 : vector<8x192xf32>
      %169 = vector.shape_cast %168 : vector<8x192xf32> to vector<2x4x192xf32>
      %c0_86 = arith.constant 0 : index
      %c0_87 = arith.constant 0 : index
      %170 = vector.load %arg3[%c0_86, %c0_87] : memref<1x192xf32, #tpu.memory_space<vmem>>, vector<1x192xf32>
      %171 = vector.shape_cast %170 : vector<1x192xf32> to vector<1x1x192xf32>
      %172 = vector.shape_cast %171 : vector<1x1x192xf32> to vector<1x1x192xf32>
      %173 = vector.broadcast %172 : vector<1x1x192xf32> to vector<2x1x192xf32>
      %174 = tpu.concatenate %173, %169 in 1 : vector<2x1x192xf32>, vector<2x4x192xf32> -> vector<2x5x192xf32>
      %c0_88 = arith.constant 0 : index
      %c0_89 = arith.constant 0 : index
      %175 = vector.load %arg4[%c0_88, %c0_89] : memref<5x192xf32, #tpu.memory_space<vmem>>, vector<5x192xf32>
      %176 = vector.shape_cast %175 : vector<5x192xf32> to vector<1x5x192xf32>
      %177 = vector.broadcast %176 : vector<1x5x192xf32> to vector<2x5x192xf32>
      %178 = arith.addf %174, %177 : vector<2x5x192xf32>
      %c0_90 = arith.constant 0 : index
      %c0_91 = arith.constant 0 : index
      %c0_92 = arith.constant 0 : index
      %179 = vector.load %arg24[%c0_90, %c0_91, %c0_92] : memref<2x5x192xf32, #tpu.memory_space<vmem>>, vector<2x5x192xf32>
      tpu.vector_store %arg24[%c0_90, %c0_91, %c0_92], %178 {strides = array<i32>} : memref<2x5x192xf32, #tpu.memory_space<vmem>>, vector<2x5x192xf32>,
    } else {
    }
    %c0 = arith.constant 0 : index
    %c0_1 = arith.constant 0 : index
    %c0_2 = arith.constant 0 : index
    %3 = vector.load %arg24[%c0, %c0_1, %c0_2] : memref<2x5x192xf32, #tpu.memory_space<vmem>>, vector<2x5x192xf32>
    %4 = vector.shape_cast %3 : vector<2x5x192xf32> to vector<10x192xf32>
    %c0_3 = arith.constant 0 : index
    %c0_4 = arith.constant 0 : index
    %c0_5 = arith.constant 0 : index
    %5 = vector.load %arg7[%c0_3, %c0_4, %c0_5] : memref<1x1x192xf32, #tpu.memory_space<vmem>>, vector<1x1x192xf32>
    %6 = vector.shape_cast %5 : vector<1x1x192xf32> to vector<1x192xf32>
    %c0_6 = arith.constant 0 : index
    %c0_7 = arith.constant 0 : index
    %c0_8 = arith.constant 0 : index
    %7 = vector.load %arg8[%c0_6, %c0_7, %c0_8] : memref<1x1x192xf32, #tpu.memory_space<vmem>>, vector<1x1x192xf32>
    %8 = vector.shape_cast %7 : vector<1x1x192xf32> to vector<1x192xf32>
    %cst = arith.constant dense<0.000000e+00> : vector<10xf32>
    %9 = vector.multi_reduction <add>, %4, %cst [1] : vector<10x192xf32> to vector<10xf32>
    %10 = vector.shape_cast %9 : vector<10xf32> to vector<10x1xf32>
    %cst_9 = arith.constant 1.920000e+02 : f32
    %11 = vector.broadcast %cst_9 : f32 to vector<10x1xf32>
    %12 = arith.divf %10, %11 : vector<10x1xf32>
    %13 = vector.broadcast %12 : vector<10x1xf32> to vector<10x192xf32>
    %14 = arith.subf %4, %13 : vector<10x192xf32>
    %15 = arith.mulf %14, %14 : vector<10x192xf32>
    %cst_10 = arith.constant dense<0.000000e+00> : vector<10xf32>
    %16 = vector.multi_reduction <add>, %15, %cst_10 [1] : vector<10x192xf32> to vector<10xf32>
    %17 = vector.shape_cast %16 : vector<10xf32> to vector<10x1xf32>
    %cst_11 = arith.constant 1.920000e+02 : f32
    %18 = vector.broadcast %cst_11 : f32 to vector<10x1xf32>
    %19 = arith.divf %17, %18 : vector<10x1xf32>
    %20 = vector.broadcast %12 : vector<10x1xf32> to vector<10x192xf32>
    %21 = arith.subf %4, %20 : vector<10x192xf32>
    %cst_12 = arith.constant 9.99999997E-7 : f32
    %22 = vector.broadcast %cst_12 : f32 to vector<10x1xf32>
    %23 = arith.addf %19, %22 : vector<10x1xf32>
    %24 = math.rsqrt %23 : vector<10x1xf32>
    %25 = vector.broadcast %24 : vector<10x1xf32> to vector<10x192xf32>
    %26 = arith.mulf %21, %25 : vector<10x192xf32>
    %27 = vector.broadcast %6 : vector<1x192xf32> to vector<10x192xf32>
    %28 = arith.mulf %26, %27 : vector<10x192xf32>
    %29 = vector.broadcast %8 : vector<1x192xf32> to vector<10x192xf32>
    %30 = arith.addf %28, %29 : vector<10x192xf32>
    %31 = arith.truncf %30 : vector<10x192xf32> to vector<10x192xbf16>
    %c0_13 = arith.constant 0 : index
    %c0_14 = arith.constant 0 : index
    %c0_15 = arith.constant 0 : index
    %32 = vector.load %arg9[%c0_13, %c0_14, %c0_15] : memref<1x192x576xbf16, #tpu.memory_space<vmem>>, vector<1x192x576xbf16>
    %33 = vector.shape_cast %32 : vector<1x192x576xbf16> to vector<192x576xbf16>
    %cst_16 = arith.constant dense<0.000000e+00> : vector<10x576xf32>
    %34 = tpu.matmul %31, %33, %cst_16 {dimension_numbers = #tpu.dot_dimension_numbers<[1], [0], [0], [1], [0, 0, 1, 1], [], []>} : vector<10x192xbf16>, vector<192x576xbf16>, vector<10x576xf32> -> vector<10x576xf32>
    %c0_17 = arith.constant 0 : index
    %c0_18 = arith.constant 0 : index
    %c0_19 = arith.constant 0 : index
    %35 = vector.load %arg10[%c0_17, %c0_18, %c0_19] : memref<1x1x576xf32, #tpu.memory_space<vmem>>, vector<1x1x576xf32>
    %36 = vector.shape_cast %35 : vector<1x1x576xf32> to vector<1x576xf32>
    %37 = vector.broadcast %36 : vector<1x576xf32> to vector<10x576xf32>
    %38 = arith.addf %34, %37 : vector<10x576xf32>
    %39 = vector.shape_cast %38 : vector<10x576xf32> to vector<2x5x576xf32>
    %cst_20 = arith.constant 0.000000e+00 : f32
    %40 = vector.broadcast %cst_20 : f32 to vector<10x192xf32>
    %41 = vector.extract_strided_slice %39 {offsets = [0, 0, 0], sizes = [2, 5, 64], strides = [1, 1, 1]} : vector<2x5x576xf32> to vector<2x5x64xf32>
    %42 = vector.extract_strided_slice %39 {offsets = [0, 0, 192], sizes = [2, 5, 64], strides = [1, 1, 1]} : vector<2x5x576xf32> to vector<2x5x64xf32>
    %43 = vector.extract_strided_slice %39 {offsets = [0, 0, 384], sizes = [2, 5, 64], strides = [1, 1, 1]} : vector<2x5x576xf32> to vector<2x5x64xf32>
    "tpu.trace_start"() <{level = 10 : i32, message = "bqd,bkd->bqk"}> : () -> ()
    %cst_21 = arith.constant dense<0.000000e+00> : vector<2x5x5xf32>
    %44 = tpu.matmul %41, %42, %cst_21 {dimension_numbers = #tpu.dot_dimension_numbers<[2], [2], [1], [1], [0, 0, 0, 1, 1, 1], [0], [0]>} : vector<2x5x64xf32>, vector<2x5x64xf32>, vector<2x5x5xf32> -> vector<2x5x5xf32>
    "tpu.trace_stop"() : () -> ()
    %cst_22 = arith.constant dense<0xFF800000> : vector<2x5xf32>
    %45 = vector.multi_reduction <maximumf>, %44, %cst_22 [2] : vector<2x5x5xf32> to vector<2x5xf32>
    %46 = vector.shape_cast %45 : vector<2x5xf32> to vector<2x5x1xf32>
    %47 = vector.broadcast %46 : vector<2x5x1xf32> to vector<2x5x5xf32>
    %48 = arith.subf %44, %47 : vector<2x5x5xf32>
    %49 = math.exp %48 : vector<2x5x5xf32>
    %cst_23 = arith.constant dense<0.000000e+00> : vector<2x5xf32>
    %50 = vector.multi_reduction <add>, %49, %cst_23 [2] : vector<2x5x5xf32> to vector<2x5xf32>
    %51 = vector.shape_cast %50 : vector<2x5xf32> to vector<2x5x1xf32>
    %52 = vector.broadcast %51 : vector<2x5x1xf32> to vector<2x5x5xf32>
    %53 = arith.divf %49, %52 : vector<2x5x5xf32>
    "tpu.trace_start"() <{level = 10 : i32, message = "bqk,bkd->bqd"}> : () -> ()
    %cst_24 = arith.constant dense<0.000000e+00> : vector<2x5x64xf32>
    %54 = tpu.matmul %53, %43, %cst_24 {dimension_numbers = #tpu.dot_dimension_numbers<[2], [1], [1], [2], [0, 0, 0, 1, 1, 2], [0], [0]>} : vector<2x5x5xf32>, vector<2x5x64xf32>, vector<2x5x64xf32> -> vector<2x5x64xf32>
    "tpu.trace_stop"() : () -> ()
    %55 = vector.shape_cast %54 : vector<2x5x64xf32> to vector<10x64xf32>
    %56 = arith.truncf %55 : vector<10x64xf32> to vector<10x64xbf16>
    %c0_25 = arith.constant 0 : index
    %c0_26 = arith.constant 0 : index
    %c0_27 = arith.constant 0 : index
    %57 = vector.load %arg11[%c0_25, %c0_26, %c0_27] : memref<1x192x192xbf16, #tpu.memory_space<vmem>>, vector<1x64x192xbf16>
    %58 = vector.shape_cast %57 : vector<1x64x192xbf16> to vector<64x192xbf16>
    %cst_28 = arith.constant dense<0.000000e+00> : vector<10x192xf32>
    %59 = tpu.matmul %56, %58, %cst_28 {dimension_numbers = #tpu.dot_dimension_numbers<[1], [0], [0], [1], [0, 0, 1, 1], [], []>} : vector<10x64xbf16>, vector<64x192xbf16>, vector<10x192xf32> -> vector<10x192xf32>
    %60 = arith.addf %40, %59 : vector<10x192xf32>
    %61 = vector.extract_strided_slice %39 {offsets = [0, 0, 64], sizes = [2, 5, 64], strides = [1, 1, 1]} : vector<2x5x576xf32> to vector<2x5x64xf32>
    %62 = vector.extract_strided_slice %39 {offsets = [0, 0, 256], sizes = [2, 5, 64], strides = [1, 1, 1]} : vector<2x5x576xf32> to vector<2x5x64xf32>
    %63 = vector.extract_strided_slice %39 {offsets = [0, 0, 448], sizes = [2, 5, 64], strides = [1, 1, 1]} : vector<2x5x576xf32> to vector<2x5x64xf32>
    "tpu.trace_start"() <{level = 10 : i32, message = "bqd,bkd->bqk"}> : () -> ()
    %cst_29 = arith.constant dense<0.000000e+00> : vector<2x5x5xf32>
    %64 = tpu.matmul %61, %62, %cst_29 {dimension_numbers = #tpu.dot_dimension_numbers<[2], [2], [1], [1], [0, 0, 0, 1, 1, 1], [0], [0]>} : vector<2x5x64xf32>, vector<2x5x64xf32>, vector<2x5x5xf32> -> vector<2x5x5xf32>
    "tpu.trace_stop"() : () -> ()
    %cst_30 = arith.constant dense<0xFF800000> : vector<2x5xf32>
    %65 = vector.multi_reduction <maximumf>, %64, %cst_30 [2] : vector<2x5x5xf32> to vector<2x5xf32>
    %66 = vector.shape_cast %65 : vector<2x5xf32> to vector<2x5x1xf32>
    %67 = vector.broadcast %66 : vector<2x5x1xf32> to vector<2x5x5xf32>
    %68 = arith.subf %64, %67 : vector<2x5x5xf32>
    %69 = math.exp %68 : vector<2x5x5xf32>
    %cst_31 = arith.constant dense<0.000000e+00> : vector<2x5xf32>
    %70 = vector.multi_reduction <add>, %69, %cst_31 [2] : vector<2x5x5xf32> to vector<2x5xf32>
    %71 = vector.shape_cast %70 : vector<2x5xf32> to vector<2x5x1xf32>
    %72 = vector.broadcast %71 : vector<2x5x1xf32> to vector<2x5x5xf32>
    %73 = arith.divf %69, %72 : vector<2x5x5xf32>
    "tpu.trace_start"() <{level = 10 : i32, message = "bqk,bkd->bqd"}> : () -> ()
    %cst_32 = arith.constant dense<0.000000e+00> : vector<2x5x64xf32>
    %74 = tpu.matmul %73, %63, %cst_32 {dimension_numbers = #tpu.dot_dimension_numbers<[2], [1], [1], [2], [0, 0, 0, 1, 1, 2], [0], [0]>} : vector<2x5x5xf32>, vector<2x5x64xf32>, vector<2x5x64xf32> -> vector<2x5x64xf32>
    "tpu.trace_stop"() : () -> ()
    %75 = vector.shape_cast %74 : vector<2x5x64xf32> to vector<10x64xf32>
    %76 = arith.truncf %75 : vector<10x64xf32> to vector<10x64xbf16>
    %c0_33 = arith.constant 0 : index
    %c64 = arith.constant 64 : index
    %c0_34 = arith.constant 0 : index
    %77 = vector.load %arg11[%c0_33, %c64, %c0_34] : memref<1x192x192xbf16, #tpu.memory_space<vmem>>, vector<1x64x192xbf16>
    %78 = vector.shape_cast %77 : vector<1x64x192xbf16> to vector<64x192xbf16>
    %cst_35 = arith.constant dense<0.000000e+00> : vector<10x192xf32>
    %79 = tpu.matmul %76, %78, %cst_35 {dimension_numbers = #tpu.dot_dimension_numbers<[1], [0], [0], [1], [0, 0, 1, 1], [], []>} : vector<10x64xbf16>, vector<64x192xbf16>, vector<10x192xf32> -> vector<10x192xf32>
    %80 = arith.addf %60, %79 : vector<10x192xf32>
    %81 = vector.extract_strided_slice %39 {offsets = [0, 0, 128], sizes = [2, 5, 64], strides = [1, 1, 1]} : vector<2x5x576xf32> to vector<2x5x64xf32>
    %82 = vector.extract_strided_slice %39 {offsets = [0, 0, 320], sizes = [2, 5, 64], strides = [1, 1, 1]} : vector<2x5x576xf32> to vector<2x5x64xf32>
    %83 = vector.extract_strided_slice %39 {offsets = [0, 0, 512], sizes = [2, 5, 64], strides = [1, 1, 1]} : vector<2x5x576xf32> to vector<2x5x64xf32>
    "tpu.trace_start"() <{level = 10 : i32, message = "bqd,bkd->bqk"}> : () -> ()
    %cst_36 = arith.constant dense<0.000000e+00> : vector<2x5x5xf32>
    %84 = tpu.matmul %81, %82, %cst_36 {dimension_numbers = #tpu.dot_dimension_numbers<[2], [2], [1], [1], [0, 0, 0, 1, 1, 1], [0], [0]>} : vector<2x5x64xf32>, vector<2x5x64xf32>, vector<2x5x5xf32> -> vector<2x5x5xf32>
    "tpu.trace_stop"() : () -> ()
    %cst_37 = arith.constant dense<0xFF800000> : vector<2x5xf32>
    %85 = vector.multi_reduction <maximumf>, %84, %cst_37 [2] : vector<2x5x5xf32> to vector<2x5xf32>
    %86 = vector.shape_cast %85 : vector<2x5xf32> to vector<2x5x1xf32>
    %87 = vector.broadcast %86 : vector<2x5x1xf32> to vector<2x5x5xf32>
    %88 = arith.subf %84, %87 : vector<2x5x5xf32>
    %89 = math.exp %88 : vector<2x5x5xf32>
    %cst_38 = arith.constant dense<0.000000e+00> : vector<2x5xf32>
    %90 = vector.multi_reduction <add>, %89, %cst_38 [2] : vector<2x5x5xf32> to vector<2x5xf32>
    %91 = vector.shape_cast %90 : vector<2x5xf32> to vector<2x5x1xf32>
    %92 = vector.broadcast %91 : vector<2x5x1xf32> to vector<2x5x5xf32>
    %93 = arith.divf %89, %92 : vector<2x5x5xf32>
    "tpu.trace_start"() <{level = 10 : i32, message = "bqk,bkd->bqd"}> : () -> ()
    %cst_39 = arith.constant dense<0.000000e+00> : vector<2x5x64xf32>
    %94 = tpu.matmul %93, %83, %cst_39 {dimension_numbers = #tpu.dot_dimension_numbers<[2], [1], [1], [2], [0, 0, 0, 1, 1, 2], [0], [0]>} : vector<2x5x5xf32>, vector<2x5x64xf32>, vector<2x5x64xf32> -> vector<2x5x64xf32>
    "tpu.trace_stop"() : () -> ()
    %95 = vector.shape_cast %94 : vector<2x5x64xf32> to vector<10x64xf32>
    %96 = arith.truncf %95 : vector<10x64xf32> to vector<10x64xbf16>
    %c0_40 = arith.constant 0 : index
    %c128 = arith.constant 128 : index
    %c0_41 = arith.constant 0 : index
    %97 = vector.load %arg11[%c0_40, %c128, %c0_41] : memref<1x192x192xbf16, #tpu.memory_space<vmem>>, vector<1x64x192xbf16>
    %98 = vector.shape_cast %97 : vector<1x64x192xbf16> to vector<64x192xbf16>
    %cst_42 = arith.constant dense<0.000000e+00> : vector<10x192xf32>
    %99 = tpu.matmul %96, %98, %cst_42 {dimension_numbers = #tpu.dot_dimension_numbers<[1], [0], [0], [1], [0, 0, 1, 1], [], []>} : vector<10x64xbf16>, vector<64x192xbf16>, vector<10x192xf32> -> vector<10x192xf32>
    %100 = arith.addf %80, %99 : vector<10x192xf32>
    %101 = arith.addf %4, %100 : vector<10x192xf32>
    %c0_43 = arith.constant 0 : index
    %c0_44 = arith.constant 0 : index
    %c0_45 = arith.constant 0 : index
    %102 = vector.load %arg12[%c0_43, %c0_44, %c0_45] : memref<1x1x192xf32, #tpu.memory_space<vmem>>, vector<1x1x192xf32>
    %103 = vector.shape_cast %102 : vector<1x1x192xf32> to vector<1x192xf32>
    %104 = vector.broadcast %103 : vector<1x192xf32> to vector<10x192xf32>
    %105 = arith.addf %101, %104 : vector<10x192xf32>
    %c0_46 = arith.constant 0 : index
    %c0_47 = arith.constant 0 : index
    %c0_48 = arith.constant 0 : index
    %106 = vector.load %arg13[%c0_46, %c0_47, %c0_48] : memref<1x1x192xf32, #tpu.memory_space<vmem>>, vector<1x1x192xf32>
    %107 = vector.shape_cast %106 : vector<1x1x192xf32> to vector<1x192xf32>
    %c0_49 = arith.constant 0 : index
    %c0_50 = arith.constant 0 : index
    %c0_51 = arith.constant 0 : index
    %108 = vector.load %arg14[%c0_49, %c0_50, %c0_51] : memref<1x1x192xf32, #tpu.memory_space<vmem>>, vector<1x1x192xf32>
    %109 = vector.shape_cast %108 : vector<1x1x192xf32> to vector<1x192xf32>
    %cst_52 = arith.constant dense<0.000000e+00> : vector<10xf32>
    %110 = vector.multi_reduction <add>, %105, %cst_52 [1] : vector<10x192xf32> to vector<10xf32>
    %111 = vector.shape_cast %110 : vector<10xf32> to vector<10x1xf32>
    %cst_53 = arith.constant 1.920000e+02 : f32
    %112 = vector.broadcast %cst_53 : f32 to vector<10x1xf32>
    %113 = arith.divf %111, %112 : vector<10x1xf32>
    %114 = vector.broadcast %113 : vector<10x1xf32> to vector<10x192xf32>
    %115 = arith.subf %105, %114 : vector<10x192xf32>
    %116 = arith.mulf %115, %115 : vector<10x192xf32>
    %cst_54 = arith.constant dense<0.000000e+00> : vector<10xf32>
    %117 = vector.multi_reduction <add>, %116, %cst_54 [1] : vector<10x192xf32> to vector<10xf32>
    %118 = vector.shape_cast %117 : vector<10xf32> to vector<10x1xf32>
    %cst_55 = arith.constant 1.920000e+02 : f32
    %119 = vector.broadcast %cst_55 : f32 to vector<10x1xf32>
    %120 = arith.divf %118, %119 : vector<10x1xf32>
    %121 = vector.broadcast %113 : vector<10x1xf32> to vector<10x192xf32>
    %122 = arith.subf %105, %121 : vector<10x192xf32>
    %cst_56 = arith.constant 9.99999997E-7 : f32
    %123 = vector.broadcast %cst_56 : f32 to vector<10x1xf32>
    %124 = arith.addf %120, %123 : vector<10x1xf32>
    %125 = math.rsqrt %124 : vector<10x1xf32>
    %126 = vector.broadcast %125 : vector<10x1xf32> to vector<10x192xf32>
    %127 = arith.mulf %122, %126 : vector<10x192xf32>
    %128 = vector.broadcast %107 : vector<1x192xf32> to vector<10x192xf32>
    %129 = arith.mulf %127, %128 : vector<10x192xf32>
    %130 = vector.broadcast %109 : vector<1x192xf32> to vector<10x192xf32>
    %131 = arith.addf %129, %130 : vector<10x192xf32>
    %132 = arith.truncf %131 : vector<10x192xf32> to vector<10x192xbf16>
    %c0_57 = arith.constant 0 : index
    %c0_58 = arith.constant 0 : index
    %c0_59 = arith.constant 0 : index
    %133 = vector.load %arg15[%c0_57, %c0_58, %c0_59] : memref<1x192x768xbf16, #tpu.memory_space<vmem>>, vector<1x192x768xbf16>
    %134 = vector.shape_cast %133 : vector<1x192x768xbf16> to vector<192x768xbf16>
    %cst_60 = arith.constant dense<0.000000e+00> : vector<10x768xf32>
    %135 = tpu.matmul %132, %134, %cst_60 {dimension_numbers = #tpu.dot_dimension_numbers<[1], [0], [0], [1], [0, 0, 1, 1], [], []>} : vector<10x192xbf16>, vector<192x768xbf16>, vector<10x768xf32> -> vector<10x768xf32>
    %c0_61 = arith.constant 0 : index
    %c0_62 = arith.constant 0 : index
    %c0_63 = arith.constant 0 : index
    %136 = vector.load %arg16[%c0_61, %c0_62, %c0_63] : memref<1x1x768xf32, #tpu.memory_space<vmem>>, vector<1x1x768xf32>
    %137 = vector.shape_cast %136 : vector<1x1x768xf32> to vector<1x768xf32>
    %138 = vector.broadcast %137 : vector<1x768xf32> to vector<10x768xf32>
    %139 = arith.addf %135, %138 : vector<10x768xf32>
    %cst_64 = arith.constant 5.000000e-01 : f32
    %140 = vector.broadcast %cst_64 : f32 to vector<10x768xf32>
    %141 = arith.mulf %140, %139 : vector<10x768xf32>
    %cst_65 = arith.constant 0.707106769 : f32
    %142 = vector.broadcast %cst_65 : f32 to vector<10x768xf32>
    %143 = arith.mulf %139, %142 : vector<10x768xf32>
    %144 = math.erf %143 : vector<10x768xf32>
    %cst_66 = arith.constant 1.000000e+00 : f32
    %145 = vector.broadcast %cst_66 : f32 to vector<10x768xf32>
    %146 = arith.addf %145, %144 : vector<10x768xf32>
    %147 = arith.mulf %141, %146 : vector<10x768xf32>
    %148 = arith.truncf %147 : vector<10x768xf32> to vector<10x768xbf16>
    %c0_67 = arith.constant 0 : index
    %c0_68 = arith.constant 0 : index
    %c0_69 = arith.constant 0 : index
    %149 = vector.load %arg17[%c0_67, %c0_68, %c0_69] : memref<1x768x192xbf16, #tpu.memory_space<vmem>>, vector<1x768x192xbf16>
    %150 = vector.shape_cast %149 : vector<1x768x192xbf16> to vector<768x192xbf16>
    %cst_70 = arith.constant dense<0.000000e+00> : vector<10x192xf32>
    %151 = tpu.matmul %148, %150, %cst_70 {dimension_numbers = #tpu.dot_dimension_numbers<[1], [0], [0], [1], [0, 0, 1, 1], [], []>} : vector<10x768xbf16>, vector<768x192xbf16>, vector<10x192xf32> -> vector<10x192xf32>
    %c0_71 = arith.constant 0 : index
    %c0_72 = arith.constant 0 : index
    %c0_73 = arith.constant 0 : index
    %152 = vector.load %arg18[%c0_71, %c0_72, %c0_73] : memref<1x1x192xf32, #tpu.memory_space<vmem>>, vector<1x1x192xf32>
    %153 = vector.shape_cast %152 : vector<1x1x192xf32> to vector<1x192xf32>
    %154 = vector.broadcast %153 : vector<1x192xf32> to vector<10x192xf32>
    %155 = arith.addf %151, %154 : vector<10x192xf32>
    %156 = arith.addf %105, %155 : vector<10x192xf32>
    %157 = vector.shape_cast %156 : vector<10x192xf32> to vector<2x5x192xf32>
    %c0_74 = arith.constant 0 : index
    %c0_75 = arith.constant 0 : index
    %c0_76 = arith.constant 0 : index
    %158 = vector.load %arg24[%c0_74, %c0_75, %c0_76] : memref<2x5x192xf32, #tpu.memory_space<vmem>>, vector<2x5x192xf32>
    tpu.vector_store %arg24[%c0_74, %c0_75, %c0_76], %157 {strides = array<i32>} : memref<2x5x192xf32, #tpu.memory_space<vmem>>, vector<2x5x192xf32>,
    %c11_i32 = arith.constant 11 : i32
    %159 = arith.cmpi eq, %arg1, %c11_i32 : i32
    %160 = arith.extui %159 : i1 to i32
    %c0_i32_77 = arith.constant 0 : i32
    %161 = arith.cmpi ne, %160, %c0_i32_77 : i32
    scf.if %161 {
      %162 = vector.shape_cast %156 : vector<10x192xf32> to vector<2x5x192xf32>
      %163 = vector.extract_strided_slice %162 {offsets = [0, 0, 0], sizes = [2, 1, 192], strides = [1, 1, 1]} : vector<2x5x192xf32> to vector<2x1x192xf32>
      %164 = vector.shape_cast %163 : vector<2x1x192xf32> to vector<2x192xf32>
      %c0_78 = arith.constant 0 : index
      %c0_79 = arith.constant 0 : index
      %165 = vector.load %arg19[%c0_78, %c0_79] : memref<1x192xf32, #tpu.memory_space<vmem>>, vector<1x192xf32>
      %c0_80 = arith.constant 0 : index
      %c0_81 = arith.constant 0 : index
      %166 = vector.load %arg20[%c0_80, %c0_81] : memref<1x192xf32, #tpu.memory_space<vmem>>, vector<1x192xf32>
      %cst_82 = arith.constant dense<0.000000e+00> : vector<2xf32>
      %167 = vector.multi_reduction <add>, %164, %cst_82 [1] : vector<2x192xf32> to vector<2xf32>
      %168 = vector.shape_cast %167 : vector<2xf32> to vector<2x1xf32>
      %cst_83 = arith.constant 1.920000e+02 : f32
      %169 = vector.broadcast %cst_83 : f32 to vector<2x1xf32>
      %170 = arith.divf %168, %169 : vector<2x1xf32>
      %171 = vector.broadcast %170 : vector<2x1xf32> to vector<2x192xf32>
      %172 = arith.subf %164, %171 : vector<2x192xf32>
      %173 = arith.mulf %172, %172 : vector<2x192xf32>
      %cst_84 = arith.constant dense<0.000000e+00> : vector<2xf32>
      %174 = vector.multi_reduction <add>, %173, %cst_84 [1] : vector<2x192xf32> to vector<2xf32>
      %175 = vector.shape_cast %174 : vector<2xf32> to vector<2x1xf32>
      %cst_85 = arith.constant 1.920000e+02 : f32
      %176 = vector.broadcast %cst_85 : f32 to vector<2x1xf32>
      %177 = arith.divf %175, %176 : vector<2x1xf32>
      %178 = vector.broadcast %170 : vector<2x1xf32> to vector<2x192xf32>
      %179 = arith.subf %164, %178 : vector<2x192xf32>
      %cst_86 = arith.constant 9.99999997E-7 : f32
      %180 = vector.broadcast %cst_86 : f32 to vector<2x1xf32>
      %181 = arith.addf %177, %180 : vector<2x1xf32>
      %182 = math.rsqrt %181 : vector<2x1xf32>
      %183 = vector.broadcast %182 : vector<2x1xf32> to vector<2x192xf32>
      %184 = arith.mulf %179, %183 : vector<2x192xf32>
      %185 = vector.broadcast %165 : vector<1x192xf32> to vector<2x192xf32>
      %186 = arith.mulf %184, %185 : vector<2x192xf32>
      %187 = vector.broadcast %166 : vector<1x192xf32> to vector<2x192xf32>
      %188 = arith.addf %186, %187 : vector<2x192xf32>
      %189 = arith.truncf %188 : vector<2x192xf32> to vector<2x192xbf16>
      %c0_87 = arith.constant 0 : index
      %c0_88 = arith.constant 0 : index
      %190 = vector.load %arg21[%c0_87, %c0_88] : memref<192x87xbf16, #tpu.memory_space<vmem>>, vector<192x87xbf16>
      %cst_89 = arith.constant dense<0.000000e+00> : vector<2x87xf32>
      %191 = tpu.matmul %189, %190, %cst_89 {dimension_numbers = #tpu.dot_dimension_numbers<[1], [0], [0], [1], [0, 0, 1, 1], [], []>} : vector<2x192xbf16>, vector<192x87xbf16>, vector<2x87xf32> -> vector<2x87xf32>
      %c0_90 = arith.constant 0 : index
      %c0_91 = arith.constant 0 : index
      %192 = vector.load %arg22[%c0_90, %c0_91] : memref<1x87xf32, #tpu.memory_space<vmem>>, vector<1x87xf32>
      %193 = vector.broadcast %192 : vector<1x87xf32> to vector<2x87xf32>
      %194 = arith.addf %191, %193 : vector<2x87xf32>
      %c0_92 = arith.constant 0 : index
      %c0_93 = arith.constant 0 : index
      %195 = vector.load %arg23[%c0_92, %c0_93] : memref<2x87xf32, #tpu.memory_space<vmem>>, vector<2x87xf32>
      tpu.vector_store %arg23[%c0_92, %c0_93], %194 {strides = array<i32>} : memref<2x87xf32, #tpu.memory_space<vmem>>, vector<2x87xf32>,
    } else {
    }
    return
  }
  func.func @transform_0(%arg0: i32, %arg1: i32) -> (i32, i32, i32) {
    %c0_i32 = arith.constant 0 : i32
    %c0_i32_0 = arith.constant 0 : i32
    %c0_i32_1 = arith.constant 0 : i32
    return %arg0, %c0_i32, %c0_i32_0 : i32, i32, i32
  }
  func.func @transform_1(%arg0: i32, %arg1: i32) -> (i32, i32) {
    %c0_i32 = arith.constant 0 : i32
    %c0_i32_0 = arith.constant 0 : i32
    %c0_i32_1 = arith.constant 0 : i32
    return %c0_i32, %c0_i32_0 : i32, i32
  }
  func.func @transform_2(%arg0: i32, %arg1: i32) -> (i32, i32) {
    %c0_i32 = arith.constant 0 : i32
    %c0_i32_0 = arith.constant 0 : i32
    %c0_i32_1 = arith.constant 0 : i32
    return %c0_i32, %c0_i32_0 : i32, i32
  }
  func.func @transform_3(%arg0: i32, %arg1: i32) -> (i32, i32) {
    %c0_i32 = arith.constant 0 : i32
    %c0_i32_0 = arith.constant 0 : i32
    %c0_i32_1 = arith.constant 0 : i32
    return %c0_i32, %c0_i32_0 : i32, i32
  }
  func.func @transform_4(%arg0: i32, %arg1: i32) -> (i32, i32) {
    %c0_i32 = arith.constant 0 : i32
    %c0_i32_0 = arith.constant 0 : i32
    %c0_i32_1 = arith.constant 0 : i32
    return %c0_i32, %c0_i32_0 : i32, i32
  }
  func.func @transform_5(%arg0: i32, %arg1: i32) -> (i32, i32, i32) {
    %c0_i32 = arith.constant 0 : i32
    %c0_i32_0 = arith.constant 0 : i32
    %c0_i32_1 = arith.constant 0 : i32
    return %arg1, %c0_i32, %c0_i32_0 : i32, i32, i32
  }
  func.func @transform_6(%arg0: i32, %arg1: i32) -> (i32, i32, i32) {
    %c0_i32 = arith.constant 0 : i32
    %c0_i32_0 = arith.constant 0 : i32
    %c0_i32_1 = arith.constant 0 : i32
    return %arg1, %c0_i32, %c0_i32_0 : i32, i32, i32
  }
  func.func @transform_7(%arg0: i32, %arg1: i32) -> (i32, i32, i32) {
    %c0_i32 = arith.constant 0 : i32
    %c0_i32_0 = arith.constant 0 : i32
    %c0_i32_1 = arith.constant 0 : i32
    return %arg1, %c0_i32, %c0_i32_0 : i32, i32, i32
  }
  func.func @transform_8(%arg0: i32, %arg1: i32) -> (i32, i32, i32) {
    %c0_i32 = arith.constant 0 : i32
    %c0_i32_0 = arith.constant 0 : i32
    %c0_i32_1 = arith.constant 0 : i32
    return %arg1, %c0_i32, %c0_i32_0 : i32, i32, i32
  }
  func.func @transform_9(%arg0: i32, %arg1: i32) -> (i32, i32, i32) {
    %c0_i32 = arith.constant 0 : i32
    %c0_i32_0 = arith.constant 0 : i32
    %c0_i32_1 = arith.constant 0 : i32
    return %arg1, %c0_i32, %c0_i32_0 : i32, i32, i32
  }
  func.func @transform_10(%arg0: i32, %arg1: i32) -> (i32, i32, i32) {
    %c0_i32 = arith.constant 0 : i32
    %c0_i32_0 = arith.constant 0 : i32
    %c0_i32_1 = arith.constant 0 : i32
    return %arg1, %c0_i32, %c0_i32_0 : i32, i32, i32
  }
  func.func @transform_11(%arg0: i32, %arg1: i32) -> (i32, i32, i32) {
    %c0_i32 = arith.constant 0 : i32
    %c0_i32_0 = arith.constant 0 : i32
    %c0_i32_1 = arith.constant 0 : i32
    return %arg1, %c0_i32, %c0_i32_0 : i32, i32, i32
  }
  func.func @transform_12(%arg0: i32, %arg1: i32) -> (i32, i32, i32) {
    %c0_i32 = arith.constant 0 : i32
    %c0_i32_0 = arith.constant 0 : i32
    %c0_i32_1 = arith.constant 0 : i32
    return %arg1, %c0_i32, %c0_i32_0 : i32, i32, i32
  }
  func.func @transform_13(%arg0: i32, %arg1: i32) -> (i32, i32, i32) {
    %c0_i32 = arith.constant 0 : i32
    %c0_i32_0 = arith.constant 0 : i32
    %c0_i32_1 = arith.constant 0 : i32
    return %arg1, %c0_i32, %c0_i32_0 : i32, i32, i32
  }
  func.func @transform_14(%arg0: i32, %arg1: i32) -> (i32, i32, i32) {
    %c0_i32 = arith.constant 0 : i32
    %c0_i32_0 = arith.constant 0 : i32
    %c0_i32_1 = arith.constant 0 : i32
    return %arg1, %c0_i32, %c0_i32_0 : i32, i32, i32
  }
  func.func @transform_15(%arg0: i32, %arg1: i32) -> (i32, i32, i32) {
    %c0_i32 = arith.constant 0 : i32
    %c0_i32_0 = arith.constant 0 : i32
    %c0_i32_1 = arith.constant 0 : i32
    return %arg1, %c0_i32, %c0_i32_0 : i32, i32, i32
  }
  func.func @transform_16(%arg0: i32, %arg1: i32) -> (i32, i32, i32) {
    %c0_i32 = arith.constant 0 : i32
    %c0_i32_0 = arith.constant 0 : i32
    %c0_i32_1 = arith.constant 0 : i32
    return %arg1, %c0_i32, %c0_i32_0 : i32, i32, i32
  }
  func.func @transform_17(%arg0: i32, %arg1: i32) -> (i32, i32) {
    %c0_i32 = arith.constant 0 : i32
    %c0_i32_0 = arith.constant 0 : i32
    %c0_i32_1 = arith.constant 0 : i32
    return %c0_i32, %c0_i32_0 : i32, i32
  }
  func.func @transform_18(%arg0: i32, %arg1: i32) -> (i32, i32) {
    %c0_i32 = arith.constant 0 : i32
    %c0_i32_0 = arith.constant 0 : i32
    %c0_i32_1 = arith.constant 0 : i32
    return %c0_i32, %c0_i32_0 : i32, i32
  }
  func.func @transform_19(%arg0: i32, %arg1: i32) -> (i32, i32) {
    %c0_i32 = arith.constant 0 : i32
    %c0_i32_0 = arith.constant 0 : i32
    %c0_i32_1 = arith.constant 0 : i32
    return %c0_i32, %c0_i32_0 : i32, i32
  }
  func.func @transform_20(%arg0: i32, %arg1: i32) -> (i32, i32) {
    %c0_i32 = arith.constant 0 : i32
    %c0_i32_0 = arith.constant 0 : i32
    %c0_i32_1 = arith.constant 0 : i32
    return %c0_i32, %c0_i32_0 : i32, i32
  }
  func.func @transform_21(%arg0: i32, %arg1: i32) -> (i32, i32) {
    %c0_i32 = arith.constant 0 : i32
    %c0_i32_0 = arith.constant 0 : i32
    return %arg0, %c0_i32 : i32, i32
  }
}

</mosaic_0001>

<bundles_post_ra>
// kernel: deit_forward.1
= control target key start
LH: loop header
LB: loop body
LE: loop exit
PB: predicated region body
PF: predicated region fallthrough
CT: control target
= control target key end

     0   :  { %s18977_s0 = inlined_call_operand.vmem [shape: bf16[2,4,3840], index: 0, kind: input, shape index: {}]   ;;  %s18978_s1 = inlined_call_operand.vmem [shape: f32[1,192], index: 1, kind: input, shape index: {}]   ;;  %s18979_s2 = inlined_call_operand.vmem [shape: f32[5,192], index: 2, kind: input, shape index: {}]   ;;  %s18980_s3 = inlined_call_operand.vmem [shape: bf16[3840,192], index: 3, kind: input, shape index: {}]   ;;  %s18981_s4 = inlined_call_operand.vmem [shape: f32[1,192], index: 4, kind: input, shape index: {}]   ;;  %s18982_s5 = inlined_call_operand.vmem [shape: f32[12,1,192], index: 5, kind: input, shape index: {}]   ;;  %s18983_s6 = inlined_call_operand.vmem [shape: f32[12,1,192], index: 6, kind: input, shape index: {}]   ;;  %s18984_s7 = inlined_call_operand.vmem [shape: bf16[12,192,576], index: 7, kind: input, shape index: {}]   ;;  %s18985_s8 = inlined_call_operand.vmem [shape: f32[12,1,576], index: 8, kind: input, shape index: {}]   ;;  %s18986_s9 = inlined_call_operand.vmem [shape: bf16[12,192,192], index: 9, kind: input, shape index: {}]   ;;  %s18987_s10 = inlined_call_operand.vmem [shape: f32[12,1,192], index: 10, kind: input, shape index: {}]   ;;  %s18988_s11 = inlined_call_operand.vmem [shape: f32[12,1,192], index: 11, kind: input, shape index: {}]   ;;  %s18989_s12 = inlined_call_operand.vmem [shape: f32[12,1,192], index: 12, kind: input, shape index: {}]   ;;  %s18990_s13 = inlined_call_operand.vmem [shape: bf16[12,192,768], index: 13, kind: input, shape index: {}]   ;;  %s18991_s14 = inlined_call_operand.vmem [shape: f32[12,1,768], index: 14, kind: input, shape index: {}]   ;;  %s18992_s15 = inlined_call_operand.vmem [shape: bf16[12,768,192], index: 15, kind: input, shape index: {}]   ;;  %s18993_s16 = inlined_call_operand.vmem [shape: f32[12,1,192], index: 16, kind: input, shape index: {}]   ;;  %s18994_s17 = inlined_call_operand.vmem [shape: f32[1,192], index: 17, kind: input, shape index: {}]   ;;  %s18995_s18 = inlined_call_operand.vmem [shape: f32[1,192], index: 18, kind: input, shape index: {}]   ;;  %s18996_s19 = inlined_call_operand.vmem [shape: bf16[192,87], index: 19, kind: input, shape index: {}]   ;;  %s18997_s20 = inlined_call_operand.vmem [shape: f32[1,87], index: 20, kind: input, shape index: {}]   ;;  %s18998_s21 = inlined_call_operand.hbm [shape: f32[2,87], index: 21, kind: output, shape index: {}]  }
   0x1   :  { %19015 = sst [smem:[#allocation13_spill]] %s18977_s0 }
   0x2   :  { %19016 = sst [smem:[#allocation14_spill]] %s18978_s1 }
   0x3   :  { %19017 = sst [smem:[#allocation15_spill]] %s18979_s2 }
   0x4   :  { %19018 = sst [smem:[#allocation16_spill]] %s18980_s3 }
   0x5   :  { %19019 = sst [smem:[#allocation17_spill]] %s18981_s4 }
   0x6   :  { %19020 = sst [smem:[#allocation18_spill]] %s18982_s5 }
   0x7   :  { %19021 = sst [smem:[#allocation19_spill]] %s18984_s7 }
   0x8   :  { %19022 = sst [smem:[#allocation20_spill]] %s18985_s8 }
   0x9   :  { %19023 = sst [smem:[#allocation21_spill]] %s18994_s17 }
   0xa   :  { %19024 = sst [smem:[#allocation22_spill]] %s18995_s18 }
   0xb   :  { %19025 = sst [smem:[#allocation23_spill]] %s18996_s19 }
   0xc   :  { %19026 = sst [smem:[#allocation24_spill]] %s18997_s20 }
   0xd   :  { %19027 = sst [smem:[#allocation25_spill]] %s18998_s21 }
   0xe   :  { %26 = vsyncpa [#allocation4], 0  ;;  %s13612_s2 = smov 0   ;;  %s13614_s25 = smov 0  }
   0xf   :  { %s13616_s26 = smov 0  }
  0x10 LB: > { %19028 = sst [smem:[#allocation6_spill]] %s13489_s2  ;;  %s41_s3 = sadd.s32 1, %s13493_s25  ;;  %s13497_s26 = sphi %s13616_s26, %s32_s26   ;;  %s13493_s25 = sphi %s13614_s25, %s19154_s25   ;;  %s13489_s2 = sphi %s13612_s2, %s19153_s2  }
  0x11   : > { %19029 = sst [smem:[#allocation7_spill]] %s13493_s25  ;;  %p42_p0 = scmp.ge.s32.totalorder %s41_s3, 12 }
  0x12   : > { %19030 = sst [smem:[#allocation8_spill]] %s13497_s26  ;;  %p9545_p1 = scmp.ge.s32.totalorder %s13497_s26, 1 }
  0x13   : > { %p714_p2 = scmp.lt.s32.totalorder %s13497_s26, 13  ;;  %s19156_s3 = smov (%p42_p0, %s41_s3), 0 }
  0x14   : > { %19031 = sst [smem:[#allocation9_spill]] %s19156_s3 }
  0x15   : > { %p715_p3 = pnand %p9545_p1, %p714_p2 }
  0x17   : > { %718 = sbr.rel (%p715_p3) target bundleno = 4621 (0x120d), region = 104 }
  0x1c   : > { %p829_p4 = scmp.lt.s32.totalorder %s13489_s2, 11  ;;  %s19033_s7 = sld [smem:[#allocation19_spill]] }
  0x1d   : > { %s19034_s8 = sld [smem:[#allocation20_spill]] }
  0x1e   : > { %s830_s28 = scalar_select %p829_p4, %s13489_s2, 11 }
  0x1f   : > { %s19035_s22 = sld [smem:[#allocation6_spill]] }
  0x20   : > { %s13635_s29 = sshll.u32 %s830_s28, 1  ;;  %s13336_s0 = smul.u32 480, %s830_s28 }
  0x21   : > { %s13337_s21 = smul.u32 5, %s830_s28 }
  0x22   : > { %s13648_s25 = scalar_lea.vmem %s19033_s7, %s13336_s0  ;;  %s13338_s26 = smul.u32 192, %s830_s28 }
  0x23   : > { %s13657_s4 = scalar_lea.vmem %s19034_s8, %s13337_s21  ;;  %s13339_s18 = smul.u32 576, %s830_s28 }
  0x24   : > { %s13666_s27 = scalar_lea.vmem %s18986_s9, %s13338_s26  ;;  %s13340_s21 = smul.u32 6, %s830_s28 }
  0x25   : > { %s13679_s30 = scalar_lea.vmem %s18990_s13, %s13339_s18  ;;  %s13341_s5 = smul.u32 768, %s830_s28 }
  0x26   : > { %s13684_s26 = scalar_lea.vmem %s18991_s14, %s13340_s21  ;;  %p9556_p5 = scmp.ne.s32.totalorder %s19035_s22, 0 }
  0x27   : > { %s13689_s0 = scalar_lea.vmem %s18992_s15, %s13341_s5  ;;  %s19036_s19 = sld [smem:[#allocation16_spill]] (!%p9556_p5) }
  0x28   : > { %885 = sbr.rel (%p9556_p5) target bundleno = 685 (0x2ad), region = 108  ;;  %s19037_s17 = sld [smem:[#allocation13_spill]] (!%p9556_p5) }
  0x29   : > { %s19038_s20 = sld [smem:[#allocation17_spill]] (!%p9556_p5) }
  0x2a   : > { %s19039_s18 = sld [smem:[#allocation14_spill]] (!%p9556_p5) }
  0x2b   : > { %s19040_s21 = sld [smem:[#allocation15_spill]] (!%p9556_p5) }
  0x2d   : > { %v9615_v0 = vld [vmem:[%s19036_s19 + $0x70] sm:$0xf]  ;;  %v12607_v1 = vld [vmem:[%s19036_s19 + $0x74] sm:$0xf0]  ;;  %v9607_v11 = vld [vmem:[%s19036_s19 + $0x60] sm:$0xf] }
  0x2e   : > { %v9679_v2 = vld [vmem:[%s19036_s19 + $0xf0] sm:$0xf]  ;;  %v9616_v3 = vor.u32 %v12607_v1, %v9615_v0  ;;  %v12623_v4 = vld [vmem:[%s19036_s19 + $0xf4] sm:$0xf0]  ;;  %v12605_v13 = vld [vmem:[%s19036_s19 + $0x64] sm:$0xf0] }
  0x2f   : > { %v9743_v5 = vld [vmem:[%s19036_s19 + $0x170] sm:$0xf]  ;;  %v12639_v6 = vld [vmem:[%s19036_s19 + $0x174] sm:$0xf0]  ;;  %v9680_v7 = vor.u32 %v12623_v4, %v9679_v2  ;;  %v9671_v14 = vld [vmem:[%s19036_s19 + $0xe0] sm:$0xf]  ;;  %v9608_v16 = vor.u32 %v12605_v13, %v9607_v11 }
  0x30   : > { %v9744_v8 = vor.u32 %v12639_v6, %v9743_v5  ;;  %v9807_v9 = vld [vmem:[%s19036_s19 + $0x1f0] sm:$0xf]  ;;  %v12655_v10 = vld [vmem:[%s19036_s19 + $0x1f4] sm:$0xf0]  ;;  %3883 = vmatpush.bf16.msra.mxu0 %v9616_v3  ;;  %v12621_v15 = vld [vmem:[%s19036_s19 + $0xe4] sm:$0xf0] }
  0x31   : > { %v9808_v12 = vor.u32 %v12655_v10, %v9807_v9  ;;  %3896 = vmatpush.bf16.msra.mxu1 %v9680_v7  ;;  %v9672_v17 = vor.u32 %v12621_v15, %v9671_v14  ;;  %v9735_v18 = vld [vmem:[%s19036_s19 + $0x160] sm:$0xf]  ;;  %v12637_v19 = vld [vmem:[%s19036_s19 + $0x164] sm:$0xf0]  ;;  %v9599_v23 = vld [vmem:[%s19036_s19 + $0x50] sm:$0xf] }
  0x32   : > { %3909 = vmatpush.bf16.msra.mxu2 %v9744_v8  ;;  %v9799_v20 = vld [vmem:[%s19036_s19 + $0x1e0] sm:$0xf]  ;;  %v9736_v21 = vor.u32 %v12637_v19, %v9735_v18  ;;  %v12653_v22 = vld [vmem:[%s19036_s19 + $0x1e4] sm:$0xf0]  ;;  %v12603_v24 = vld [vmem:[%s19036_s19 + $0x54] sm:$0xf0] }
  0x33   : > { %3922 = vmatpush.bf16.msra.mxu3 %v9808_v12  ;;  %v9800_v25 = vor.u32 %v12653_v22, %v9799_v20  ;;  %v9663_v26 = vld [vmem:[%s19036_s19 + $0xd0] sm:$0xf]  ;;  %v12619_v27 = vld [vmem:[%s19036_s19 + $0xd4] sm:$0xf0]  ;;  %v9600_v29 = vor.u32 %v12603_v24, %v9599_v23  ;;  %v9591_v35 = vld [vmem:[%s19036_s19 + $0x40] sm:$0xf] }
  0x34   : > { %v9727_v28 = vld [vmem:[%s19036_s19 + $0x150] sm:$0xf]  ;;  %3884 = vmatpush.bf16.msra.mxu0 %v9608_v16  ;;  %v12635_v30 = vld [vmem:[%s19036_s19 + $0x154] sm:$0xf0]  ;;  %v9664_v33 = vor.u32 %v12619_v27, %v9663_v26  ;;  %v12601_v36 = vld [vmem:[%s19036_s19 + $0x44] sm:$0xf0] }
  0x35   : > { %v9791_v31 = vld [vmem:[%s19036_s19 + $0x1d0] sm:$0xf]  ;;  %v12651_v32 = vld [vmem:[%s19036_s19 + $0x1d4] sm:$0xf0]  ;;  %3897 = vmatpush.bf16.msra.mxu1 %v9672_v17  ;;  %v9728_v34 = vor.u32 %v12635_v30, %v9727_v28  ;;  %v9655_v37 = vld [vmem:[%s19036_s19 + $0xc0] sm:$0xf]  ;;  %v9592_v44 = vor.u32 %v12601_v36, %v9591_v35 }
  0x36   : > { %3910 = vmatpush.bf16.msra.mxu2 %v9736_v21  ;;  %v9792_v38 = vor.u32 %v12651_v32, %v9791_v31  ;;  %v12617_v39 = vld [vmem:[%s19036_s19 + $0xc4] sm:$0xf0]  ;;  %v9719_v40 = vld [vmem:[%s19036_s19 + $0x140] sm:$0xf]  ;;  %v9583_v47 = vld [vmem:[%s19036_s19 + $0x30] sm:$0xf] }
  0x37   : > { %3923 = vmatpush.bf16.msra.mxu3 %v9800_v25  ;;  %v12633_v41 = vld [vmem:[%s19036_s19 + $0x144] sm:$0xf0]  ;;  %v9783_v42 = vld [vmem:[%s19036_s19 + $0x1c0] sm:$0xf]  ;;  %v9656_v45 = vor.u32 %v12617_v39, %v9655_v37  ;;  %v12599_v48 = vld [vmem:[%s19036_s19 + $0x34] sm:$0xf0] }
  0x38   : > { %v12649_v43 = vld [vmem:[%s19036_s19 + $0x1c4] sm:$0xf0]  ;;  %3885 = vmatpush.bf16.msra.mxu0 %v9600_v29  ;;  %v9720_v46 = vor.u32 %v12633_v41, %v9719_v40  ;;  %v9647_v49 = vld [vmem:[%s19036_s19 + $0xb0] sm:$0xf]  ;;  %v12615_v51 = vld [vmem:[%s19036_s19 + $0xb4] sm:$0xf0]  ;;  %v9584_v56 = vor.u32 %v12599_v48, %v9583_v47 }
  0x39   : > { %3898 = vmatpush.bf16.msra.mxu1 %v9664_v33  ;;  %v9784_v50 = vor.u32 %v12649_v43, %v9783_v42  ;;  %v9711_v52 = vld [vmem:[%s19036_s19 + $0x130] sm:$0xf]  ;;  %v12631_v53 = vld [vmem:[%s19036_s19 + $0x134] sm:$0xf0]  ;;  %v9648_v57 = vor.u32 %v12615_v51, %v9647_v49  ;;  %v9575_v59 = vld [vmem:[%s19036_s19 + $0x20] sm:$0xf] }
  0x3a   : > { %3911 = vmatpush.bf16.msra.mxu2 %v9728_v34  ;;  %v9775_v54 = vld [vmem:[%s19036_s19 + $0x1b0] sm:$0xf]  ;;  %v12647_v55 = vld [vmem:[%s19036_s19 + $0x1b4] sm:$0xf0]  ;;  %v9712_v58 = vor.u32 %v12631_v53, %v9711_v52  ;;  %v12597_v60 = vld [vmem:[%s19036_s19 + $0x24] sm:$0xf0] }
  0x3b   : > { %3924 = vmatpush.bf16.msra.mxu3 %v9792_v38  ;;  %v9639_v61 = vld [vmem:[%s19036_s19 + $0xa0] sm:$0xf]  ;;  %v9776_v62 = vor.u32 %v12647_v55, %v9775_v54  ;;  %v12613_v63 = vld [vmem:[%s19036_s19 + $0xa4] sm:$0xf0]  ;;  %v9576_v4 = vor.u32 %v12597_v60, %v9575_v59  ;;  %v9567_v7 = vld [vmem:[%s19036_s19 + $0x10] sm:$0xf] }
  0x3c   : > { %3886 = vmatpush.bf16.msra.mxu0 %v9592_v44  ;;  %v9703_v0 = vld [vmem:[%s19036_s19 + $0x120] sm:$0xf]  ;;  %v12629_v1 = vld [vmem:[%s19036_s19 + $0x124] sm:$0xf0]  ;;  %v9640_v5 = vor.u32 %v12613_v63, %v9639_v61  ;;  %v12595_v8 = vld [vmem:[%s19036_s19 + $0x14] sm:$0xf0] }
  0x3d   : > { %3899 = vmatpush.bf16.msra.mxu1 %v9656_v45  ;;  %v9767_v2 = vld [vmem:[%s19036_s19 + $0x1a0] sm:$0xf]  ;;  %v12645_v3 = vld [vmem:[%s19036_s19 + $0x1a4] sm:$0xf0]  ;;  %v9704_v6 = vor.u32 %v12629_v1, %v9703_v0  ;;  %v9631_v9 = vld [vmem:[%s19036_s19 + $0x90] sm:$0xf]  ;;  %v9568_v16 = vor.u32 %v12595_v8, %v9567_v7 }
  0x3e   : > { %3912 = vmatpush.bf16.msra.mxu2 %v9720_v46  ;;  %v9768_v10 = vor.u32 %v12645_v3, %v9767_v2  ;;  %v12611_v11 = vld [vmem:[%s19036_s19 + $0x94] sm:$0xf0]  ;;  %v9695_v12 = vld [vmem:[%s19036_s19 + $0x110] sm:$0xf]  ;;  %v9559_v17 = vld [vmem:[%s19036_s19] sm:$0xf] }
  0x3f   : > { %3925 = vmatpush.bf16.msra.mxu3 %v9784_v50  ;;  %v12627_v13 = vld [vmem:[%s19036_s19 + $0x114] sm:$0xf0]  ;;  %v9759_v14 = vld [vmem:[%s19036_s19 + $0x190] sm:$0xf]  ;;  %v12593_v18 = vld [vmem:[%s19036_s19 + $0x4] sm:$0xf0]  ;;  %v9632_v19 = vor.u32 %v12611_v11, %v9631_v9 }
  0x40   : > { %3887 = vmatpush.bf16.msra.mxu0 %v9584_v56  ;;  %v12643_v15 = vld [vmem:[%s19036_s19 + $0x194] sm:$0xf0]  ;;  %v9696_v20 = vor.u32 %v12627_v13, %v9695_v12  ;;  %v9623_v21 = vld [vmem:[%s19036_s19 + $0x80] sm:$0xf]  ;;  %v12609_v22 = vld [vmem:[%s19036_s19 + $0x84] sm:$0xf0]  ;;  %v9560_v31 = vor.u32 %v12593_v18, %v9559_v17 }
  0x41   : > { %3900 = vmatpush.bf16.msra.mxu1 %v9648_v57  ;;  %v9687_v23 = vld [vmem:[%s19036_s19 + $0x100] sm:$0xf]  ;;  %v9760_v24 = vor.u32 %v12643_v15, %v9759_v14  ;;  %v12625_v25 = vld [vmem:[%s19036_s19 + $0x104] sm:$0xf0]  ;;  %v9871_v28 = vld [vmem:[%s19036_s19 + $0x270] sm:$0xf]  ;;  %v9624_v35 = vor.u32 %v12609_v22, %v9623_v21 }
  0x42   : > { %3913 = vmatpush.bf16.msra.mxu2 %v9712_v58  ;;  %v9751_v26 = vld [vmem:[%s19036_s19 + $0x180] sm:$0xf]  ;;  %v12641_v27 = vld [vmem:[%s19036_s19 + $0x184] sm:$0xf0]  ;;  %v12671_v29 = vld [vmem:[%s19036_s19 + $0x274] sm:$0xf0]  ;;  %v9688_v36 = vor.u32 %v12625_v25, %v9687_v23 }
  0x43   : > { %3926 = vmatpush.bf16.msra.mxu3 %v9776_v62  ;;  %v9935_v30 = vld [vmem:[%s19036_s19 + $0x2f0] sm:$0xf]  ;;  %v12687_v32 = vld [vmem:[%s19036_s19 + $0x2f4] sm:$0xf0]  ;;  %v9752_v39 = vor.u32 %v12641_v27, %v9751_v26  ;;  %v9872_v40 = vor.u32 %v12671_v29, %v9871_v28  ;;  %v9863_v43 = vld [vmem:[%s19036_s19 + $0x260] sm:$0xf] }
  0x44   : > { %3888 = vmatpush.bf16.msra.mxu0 %v9576_v4  ;;  %v9999_v33 = vld [vmem:[%s19036_s19 + $0x370] sm:$0xf]  ;;  %v12703_v34 = vld [vmem:[%s19036_s19 + $0x374] sm:$0xf0]  ;;  %v9936_v41 = vor.u32 %v12687_v32, %v9935_v30  ;;  %v12669_v44 = vld [vmem:[%s19036_s19 + $0x264] sm:$0xf0] }
  0x45   : > { %3901 = vmatpush.bf16.msra.mxu1 %v9640_v5  ;;  %v10063_v37 = vld [vmem:[%s19036_s19 + $0x3f0] sm:$0xf]  ;;  %v12719_v38 = vld [vmem:[%s19036_s19 + $0x3f4] sm:$0xf0]  ;;  %v10000_v42 = vor.u32 %v12703_v34, %v9999_v33  ;;  %v9927_v45 = vld [vmem:[%s19036_s19 + $0x2e0] sm:$0xf]  ;;  %v9864_v52 = vor.u32 %v12669_v44, %v9863_v43 }
  0x46   : > { %3914 = vmatpush.bf16.msra.mxu2 %v9704_v6  ;;  %v10064_v46 = vor.u32 %v12719_v38, %v10063_v37  ;;  %v12685_v47 = vld [vmem:[%s19036_s19 + $0x2e4] sm:$0xf0]  ;;  %v9991_v48 = vld [vmem:[%s19036_s19 + $0x360] sm:$0xf]  ;;  %v9855_v55 = vld [vmem:[%s19036_s19 + $0x250] sm:$0xf] }
  0x47   : > { %3927 = vmatpush.bf16.msra.mxu3 %v9768_v10  ;;  %v12701_v49 = vld [vmem:[%s19036_s19 + $0x364] sm:$0xf0]  ;;  %v10055_v50 = vld [vmem:[%s19036_s19 + $0x3e0] sm:$0xf]  ;;  %v9928_v53 = vor.u32 %v12685_v47, %v9927_v45  ;;  %v12667_v56 = vld [vmem:[%s19036_s19 + $0x254] sm:$0xf0] }
  0x48   : > { %3889 = vmatpush.bf16.msra.mxu0 %v9568_v16  ;;  %v12717_v51 = vld [vmem:[%s19036_s19 + $0x3e4] sm:$0xf0]  ;;  %v9992_v54 = vor.u32 %v12701_v49, %v9991_v48  ;;  %v9919_v57 = vld [vmem:[%s19036_s19 + $0x2d0] sm:$0xf]  ;;  %v12683_v59 = vld [vmem:[%s19036_s19 + $0x2d4] sm:$0xf0]  ;;  %v9856_v1 = vor.u32 %v12667_v56, %v9855_v55 }
  0x49   : > { %3902 = vmatpush.bf16.msra.mxu1 %v9632_v19  ;;  %v10056_v58 = vor.u32 %v12717_v51, %v10055_v50  ;;  %v9983_v60 = vld [vmem:[%s19036_s19 + $0x350] sm:$0xf]  ;;  %v12699_v61 = vld [vmem:[%s19036_s19 + $0x354] sm:$0xf0]  ;;  %v9847_v0 = vld [vmem:[%s19036_s19 + $0x240] sm:$0xf]  ;;  %v9920_v5 = vor.u32 %v12683_v59, %v9919_v57 }
  0x4a   : > { %3915 = vmatpush.bf16.msra.mxu2 %v9696_v20  ;;  %v10047_v62 = vld [vmem:[%s19036_s19 + $0x3d0] sm:$0xf]  ;;  %v12715_v63 = vld [vmem:[%s19036_s19 + $0x3d4] sm:$0xf0]  ;;  %v12665_v2 = vld [vmem:[%s19036_s19 + $0x244] sm:$0xf0]  ;;  %v9984_v6 = vor.u32 %v12699_v61, %v9983_v60 }
  0x4b   : > { %3928 = vmatpush.bf16.msra.mxu3 %v9760_v24  ;;  %v886_v3 = vld [vmem:[%s19037_s17] sm:$0xff]  ;;  %v12681_v8 = vld [vmem:[%s19036_s19 + $0x2c4] sm:$0xf0]  ;;  %v10048_v9 = vor.u32 %v12715_v63, %v10047_v62  ;;  %v9848_v14 = vor.u32 %v12665_v2, %v9847_v0  ;;  %v9839_v15 = vld [vmem:[%s19036_s19 + $0x230] sm:$0xf]  ;;  %vm4666_vm0 = vcmask 1043456  }
  0x4c   : > { %3890 = vmatpush.bf16.msra.mxu0 %v9560_v31  ;;  %v894_v4 = vld [vmem:[%s19037_s17 + $0x3c] sm:$0xff]  ;;  %1389 = vst [vmem:[#allocation1] ss:$4 sm:$0xff] %v886_v3  ;;  %v12697_v11 = vld [vmem:[%s19036_s19 + $0x344] sm:$0xf0]  ;;  %v888_v33 = vld [vmem:[%s19037_s17 + $0x10] sm:$0xff] }
  0x4d   : > { %3903 = vmatpush.bf16.msra.mxu1 %v9624_v35  ;;  %v9911_v7 = vld [vmem:[%s19036_s19 + $0x2c0] sm:$0xf]  ;;  %1392 = vst [vmem:[#allocation1 + $0x1] ss:$4 sm:$0xff] %v894_v4  ;;  %v12713_v13 = vld [vmem:[%s19036_s19 + $0x3c4] sm:$0xf0] }
  0x4e   : > { %3916 = vmatpush.bf16.msra.mxu2 %v9688_v36  ;;  %v9975_v10 = vld [vmem:[%s19036_s19 + $0x340] sm:$0xf]  ;;  %v9912_v16 = vor.u32 %v12681_v8, %v9911_v7  ;;  %v12663_v18 = vld [vmem:[%s19036_s19 + $0x234] sm:$0xf0]  ;;  %v9903_v19 = vld [vmem:[%s19036_s19 + $0x2b0] sm:$0xf] }
  0x4f   : > { %3929 = vmatpush.bf16.msra.mxu3 %v9752_v39  ;;  %v10039_v12 = vld [vmem:[%s19036_s19 + $0x3c0] sm:$0xf]  ;;  %v9976_v17 = vor.u32 %v12697_v11, %v9975_v10  ;;  %v12679_v20 = vld [vmem:[%s19036_s19 + $0x2b4] sm:$0xf0]  ;;  %v9967_v22 = vld [vmem:[%s19036_s19 + $0x330] sm:$0xf]  ;;  %v9840_v28 = vor.u32 %v12663_v18, %v9839_v15 }
  0x50   : > { %3935 = vmatpush.bf16.msrb.mxu0 %v9872_v40  ;;  %v10040_v21 = vor.u32 %v12713_v13, %v10039_v12  ;;  %v12695_v23 = vld [vmem:[%s19036_s19 + $0x334] sm:$0xf0]  ;;  %v10031_v24 = vld [vmem:[%s19036_s19 + $0x3b0] sm:$0xf]  ;;  %v9831_v26 = vld [vmem:[%s19036_s19 + $0x220] sm:$0xf]  ;;  %v9904_v35 = vor.u32 %v12679_v20, %v9903_v19 }
  0x51   : > { %3948 = vmatpush.bf16.msrb.mxu1 %v9936_v41  ;;  %v12711_v25 = vld [vmem:[%s19036_s19 + $0x3b4] sm:$0xf0]  ;;  %v12661_v27 = vld [vmem:[%s19036_s19 + $0x224] sm:$0xf0]  ;;  %v9895_v29 = vld [vmem:[%s19036_s19 + $0x2a0] sm:$0xf]  ;;  %v9968_v36 = vor.u32 %v12695_v23, %v9967_v22 }
  0x52   : > { %3961 = vmatpush.bf16.msrb.mxu2 %v10000_v42  ;;  %v12677_v30 = vld [vmem:[%s19036_s19 + $0x2a4] sm:$0xf0]  ;;  %v9959_v31 = vld [vmem:[%s19036_s19 + $0x320] sm:$0xf]  ;;  %v896_v34 = vld [vmem:[%s19037_s17 + $0x4c] sm:$0xff]  ;;  %v10032_v39 = vor.u32 %v12711_v25, %v10031_v24  ;;  %v9832_v44 = vor.u32 %v12661_v27, %v9831_v26  ;;  %vm4691_vm1 = vcmask 1040384  }
  0x53   : > { %3974 = vmatpush.bf16.msrb.mxu3 %v10064_v46  ;;  %v12693_v32 = vld [vmem:[%s19036_s19 + $0x324] sm:$0xf0]  ;;  %v10023_v42 = vld [vmem:[%s19036_s19 + $0x3a0] sm:$0xf]  ;;  %v9823_v45 = vld [vmem:[%s19036_s19 + $0x210] sm:$0xf]  ;;  %v9896_v47 = vor.u32 %v12677_v30, %v9895_v29 }
  0x54   : > { %3936 = vmatpush.bf16.msrb.mxu0 %v9864_v52  ;;  %v14034_v37 = vld.sshfl [vmem:[#allocation1 + $0x10] sm:$0xff pattern:$0x73625140]  ;;  %v14036_v38 = vld.sshfl [vmem:[#allocation1] sm:$0xff pattern:$0x73625140]  ;;  %v9960_v48 = vor.u32 %v12693_v32, %v9959_v31 }
  0x55   : > { %3949 = vmatpush.bf16.msrb.mxu1 %v9928_v53  ;;  %3917 = vmatmul.bf16.vlgmr.msra.gmra.mxu2 %v14034_v37  ;;  %v14039_v40 = vld.sshfl [vmem:[#allocation1 + $0x18] sm:$0xff pattern:$0x73625140]  ;;  %v14041_v41 = vld.sshfl [vmem:[#allocation1 + $0x8] sm:$0xff pattern:$0x73625140] }
  0x56   : > { %3962 = vmatpush.bf16.msrb.mxu2 %v9992_v54  ;;  %v12709_v43 = vld [vmem:[%s19036_s19 + $0x3a4] sm:$0xf0]  ;;  %3891 = vmatmul.bf16.vlgmr.msra.gmra.mxu0 %v14036_v38  ;;  %1408 = vst [vmem:[#allocation1] ss:$4 sm:$0xff] %v888_v33  ;;  %v12659_v46 = vld [vmem:[%s19036_s19 + $0x214] sm:$0xf0] }
  0x57   : > { %3975 = vmatpush.bf16.msrb.mxu3 %v10056_v58  ;;  %1410 = vst [vmem:[#allocation1 + $0x1] ss:$4 sm:$0xff] %v896_v34  ;;  %3904 = vmatmul.bf16.vlgmr.msra.gmra.mxu1 %v14041_v41  ;;  %v9887_v49 = vld [vmem:[%s19036_s19 + $0x290] sm:$0xf]  ;;  %v12675_v50 = vld [vmem:[%s19036_s19 + $0x294] sm:$0xf0]  ;;  %v10024_v52 = vor.u32 %v12709_v43, %v10023_v42  ;;  %v9824_v59 = vor.u32 %v12659_v46, %v9823_v45 }
  0x58   : > { %3937 = vmatpush.bf16.msrb.mxu0 %v9856_v1  ;;  %3930 = vmatmul.bf16.vlgmr.msra.gmra.mxu3 %v14039_v40  ;;  %v9951_v51 = vld [vmem:[%s19036_s19 + $0x310] sm:$0xf]  ;;  %v12691_v53 = vld [vmem:[%s19036_s19 + $0x314] sm:$0xf0]  ;;  %v9815_v56 = vld [vmem:[%s19036_s19 + $0x200] sm:$0xf]  ;;  %v9888_v63 = vor.u32 %v12675_v50, %v9887_v49 }
  0x59   : > { %3950 = vmatpush.bf16.msrb.mxu1 %v9920_v5  ;;  %v10015_v54 = vld [vmem:[%s19036_s19 + $0x390] sm:$0xf]  ;;  %v12707_v55 = vld [vmem:[%s19036_s19 + $0x394] sm:$0xf0]  ;;  %v12657_v57 = vld [vmem:[%s19036_s19 + $0x204] sm:$0xf0]  ;;  %v9952_v0 = vor.u32 %v12691_v53, %v9951_v51 }
  0x5a   : > { %3963 = vmatpush.bf16.msrb.mxu2 %v9984_v6  ;;  %v887_v58 = vld [vmem:[%s19037_s17 + $0x8] sm:$0xff]  ;;  %v9879_v60 = vld [vmem:[%s19036_s19 + $0x280] sm:$0xf]  ;;  %v10016_v3 = vor.u32 %v12707_v55, %v10015_v54  ;;  %v10127_v6 = vld [vmem:[%s19036_s19 + $0x470] sm:$0xf]  ;;  %v9816_v10 = vor.u32 %v12657_v57, %v9815_v56  ;;  %vm4703_vm2 = vcmask 520192  }
  0x5b   : > { %3976 = vmatpush.bf16.msrb.mxu3 %v10048_v9  ;;  %v12673_v61 = vld [vmem:[%s19036_s19 + $0x284] sm:$0xf0]  ;;  %1395 = vst [vmem:[#allocation1 + $0x20] ss:$4 sm:$0xff] %v887_v58  ;;  %v9943_v1 = vld [vmem:[%s19036_s19 + $0x300] sm:$0xf] }
  0x5c   : > { %3938 = vmatpush.bf16.msrb.mxu0 %v9848_v14  ;;  %v895_v62 = vld [vmem:[%s19037_s17 + $0x44] sm:$0xff]  ;;  %v10007_v4 = vld [vmem:[%s19036_s19 + $0x380] sm:$0xf]  ;;  %v12735_v7 = vld [vmem:[%s19036_s19 + $0x474] sm:$0xf0]  ;;  %v9880_v14 = vor.u32 %v12673_v61, %v9879_v60 }
  0x5d   : > { %3951 = vmatpush.bf16.msrb.mxu1 %v9912_v16  ;;  %v12689_v2 = vld [vmem:[%s19036_s19 + $0x304] sm:$0xf0]  ;;  %1398 = vst [vmem:[#allocation1 + $0x21] ss:$4 sm:$0xff] %v895_v62  ;;  %v10191_v8 = vld [vmem:[%s19036_s19 + $0x4f0] sm:$0xf]  ;;  %v10128_v20 = vor.u32 %v12735_v7, %v10127_v6 }
  0x5e   : > { %3964 = vmatpush.bf16.msrb.mxu2 %v9976_v17  ;;  %v12705_v5 = vld [vmem:[%s19036_s19 + $0x384] sm:$0xf0]  ;;  %v12751_v9 = vld [vmem:[%s19036_s19 + $0x4f4] sm:$0xf0]  ;;  %v10255_v11 = vld [vmem:[%s19036_s19 + $0x570] sm:$0xf]  ;;  %v9944_v15 = vor.u32 %v12689_v2, %v9943_v1 }
  0x5f   : > { %3977 = vmatpush.bf16.msrb.mxu3 %v10040_v21  ;;  %v12767_v12 = vld [vmem:[%s19036_s19 + $0x574] sm:$0xf0]  ;;  %v10319_v13 = vld [vmem:[%s19036_s19 + $0x5f0] sm:$0xf]  ;;  %v10119_v17 = vld [vmem:[%s19036_s19 + $0x460] sm:$0xf]  ;;  %v10008_v19 = vor.u32 %v12705_v5, %v10007_v4  ;;  %v10192_v25 = vor.u32 %v12751_v9, %v10191_v8 }
  0x60   : > { %3939 = vmatpush.bf16.msrb.mxu0 %v9840_v28  ;;  %v12783_v16 = vld [vmem:[%s19036_s19 + $0x5f4] sm:$0xf0]  ;;  %v12733_v18 = vld [vmem:[%s19036_s19 + $0x464] sm:$0xf0]  ;;  %v10183_v21 = vld [vmem:[%s19036_s19 + $0x4e0] sm:$0xf]  ;;  %v10256_v26 = vor.u32 %v12767_v12, %v10255_v11 }
  0x61   : > { %3952 = vmatpush.bf16.msrb.mxu1 %v9904_v35  ;;  %v12749_v22 = vld [vmem:[%s19036_s19 + $0x4e4] sm:$0xf0]  ;;  %v10247_v23 = vld [vmem:[%s19036_s19 + $0x560] sm:$0xf]  ;;  %v889_v29 = vld [vmem:[%s19037_s17 + $0x18] sm:$0xff]  ;;  %v10320_v31 = vor.u32 %v12783_v16, %v10319_v13 }
  0x62   : > { %3965 = vmatpush.bf16.msrb.mxu2 %v9968_v36  ;;  %v12765_v24 = vld [vmem:[%s19036_s19 + $0x564] sm:$0xf0]  ;;  %v10311_v27 = vld [vmem:[%s19036_s19 + $0x5e0] sm:$0xf]  ;;  %v897_v30 = vld [vmem:[%s19037_s17 + $0x54] sm:$0xff]  ;;  %v10120_v36 = vor.u32 %v12733_v18, %v10119_v17  ;;  %v10184_v42 = vor.u32 %v12749_v22, %v10183_v21 }
  0x63   : > { %3978 = vmatpush.bf16.msrb.mxu3 %v10032_v39  ;;  %v12781_v28 = vld [vmem:[%s19036_s19 + $0x5e4] sm:$0xf0]  ;;  %v10111_v39 = vld [vmem:[%s19036_s19 + $0x450] sm:$0xf]  ;;  %v10248_v43 = vor.u32 %v12765_v24, %v10247_v23  ;;  %v12763_v49 = vld [vmem:[%s19036_s19 + $0x554] sm:$0xf0] }
  0x64   : > { %3940 = vmatpush.bf16.msrb.mxu0 %v9832_v44  ;;  %v14160_v32 = vld.sshfl [vmem:[#allocation1 + $0x30] sm:$0xff pattern:$0x73625140]  ;;  %v14162_v33 = vld.sshfl [vmem:[#allocation1 + $0x20] sm:$0xff pattern:$0x73625140]  ;;  %v10312_v46 = vor.u32 %v12781_v28, %v10311_v27 }
  0x65   : > { %3953 = vmatpush.bf16.msrb.mxu1 %v9896_v47  ;;  %v14164_v34 = vld.sshfl [vmem:[#allocation1 + $0x38] sm:$0xff pattern:$0x73625140]  ;;  %v14166_v35 = vld.sshfl [vmem:[#allocation1 + $0x28] sm:$0xff pattern:$0x73625140] }
  0x66   : > { %3966 = vmatpush.bf16.msrb.mxu2 %v9960_v48  ;;  %1412 = vst [vmem:[#allocation1 + $0x20] ss:$4 sm:$0xff] %v889_v29  ;;  %v12731_v44 = vld [vmem:[%s19036_s19 + $0x454] sm:$0xf0]  ;;  %v10175_v45 = vld [vmem:[%s19036_s19 + $0x4d0] sm:$0xf] }
  0x67   : > { %3979 = vmatpush.bf16.msrb.mxu3 %v10024_v52  ;;  %1414 = vst [vmem:[#allocation1 + $0x21] ss:$4 sm:$0xff] %v897_v30  ;;  %v12747_v47 = vld [vmem:[%s19036_s19 + $0x4d4] sm:$0xf0]  ;;  %v10239_v48 = vld [vmem:[%s19036_s19 + $0x550] sm:$0xf]  ;;  %v10112_v52 = vor.u32 %v12731_v44, %v10111_v39 }
  0x68   : > { %3941 = vmatpush.bf16.msrb.mxu0 %v9824_v59  ;;  %v10303_v50 = vld [vmem:[%s19036_s19 + $0x5d0] sm:$0xf]  ;;  %v12779_v51 = vld [vmem:[%s19036_s19 + $0x5d4] sm:$0xf0]  ;;  %v10176_v53 = vor.u32 %v12747_v47, %v10175_v45  ;;  %v10240_v54 = vor.u32 %v12763_v49, %v10239_v48  ;;  %v10103_v55 = vld [vmem:[%s19036_s19 + $0x440] sm:$0xf] }
  0x69   : > { %3954 = vmatpush.bf16.msrb.mxu1 %v9888_v63  ;;  %v12729_v56 = vld [vmem:[%s19036_s19 + $0x444] sm:$0xf0]  ;;  %v10167_v57 = vld [vmem:[%s19036_s19 + $0x4c0] sm:$0xf]  ;;  %v10304_v58 = vor.u32 %v12779_v51, %v10303_v50  ;;  %v10095_v1 = vld [vmem:[%s19036_s19 + $0x430] sm:$0xf] }
  0x6a   : > { %3967 = vmatpush.bf16.msrb.mxu2 %v9952_v0  ;;  %v12745_v59 = vld [vmem:[%s19036_s19 + $0x4c4] sm:$0xf0]  ;;  %v10231_v60 = vld [vmem:[%s19036_s19 + $0x540] sm:$0xf]  ;;  %v10104_v0 = vor.u32 %v12729_v56, %v10103_v55  ;;  %v12727_v4 = vld [vmem:[%s19036_s19 + $0x434] sm:$0xf0] }
  0x6b   : > { %3980 = vmatpush.bf16.msrb.mxu3 %v10016_v3  ;;  %v12761_v61 = vld [vmem:[%s19036_s19 + $0x544] sm:$0xf0]  ;;  %v10295_v62 = vld [vmem:[%s19036_s19 + $0x5c0] sm:$0xf]  ;;  %v10168_v2 = vor.u32 %v12745_v59, %v10167_v57  ;;  %v10159_v5 = vld [vmem:[%s19036_s19 + $0x4b0] sm:$0xf] }
  0x6c   : > { %3942 = vmatpush.bf16.msrb.mxu0 %v9816_v10  ;;  %v12777_v63 = vld [vmem:[%s19036_s19 + $0x5c4] sm:$0xf0]  ;;  %v10232_v3 = vor.u32 %v12761_v61, %v10231_v60  ;;  %v12743_v6 = vld [vmem:[%s19036_s19 + $0x4b4] sm:$0xf0]  ;;  %v10223_v8 = vld [vmem:[%s19036_s19 + $0x530] sm:$0xf] }
  0x6d   : > { %3955 = vmatpush.bf16.msrb.mxu1 %v9880_v14  ;;  %v10296_v7 = vor.u32 %v12777_v63, %v10295_v62  ;;  %v12759_v9 = vld [vmem:[%s19036_s19 + $0x534] sm:$0xf0]  ;;  %v10287_v10 = vld [vmem:[%s19036_s19 + $0x5b0] sm:$0xf]  ;;  %v10087_v12 = vld [vmem:[%s19036_s19 + $0x420] sm:$0xf]  ;;  %v10096_v14 = vor.u32 %v12727_v4, %v10095_v1 }
  0x6e   : > { %3968 = vmatpush.bf16.msrb.mxu2 %v9944_v15  ;;  %v12775_v11 = vld [vmem:[%s19036_s19 + $0x5b4] sm:$0xf0]  ;;  %v12725_v13 = vld [vmem:[%s19036_s19 + $0x424] sm:$0xf0]  ;;  %v10151_v15 = vld [vmem:[%s19036_s19 + $0x4a0] sm:$0xf] }
  0x6f   : > { %3981 = vmatpush.bf16.msrb.mxu3 %v10008_v19  ;;  %3943 = vmatmul.bf16.vlgmr.msrb.gmra.mxu0 %v14162_v33  ;;  %v12741_v16 = vld [vmem:[%s19036_s19 + $0x4a4] sm:$0xf0]  ;;  %v10215_v17 = vld [vmem:[%s19036_s19 + $0x520] sm:$0xf]  ;;  %v10160_v19 = vor.u32 %v12743_v6, %v10159_v5  ;;  %v10288_v24 = vor.u32 %v12775_v11, %v10287_v10  ;;  %v10088_v30 = vor.u32 %v12725_v13, %v10087_v12  ;;  %v12739_v45 = vld [vmem:[%s19036_s19 + $0x494] sm:$0xf0] }
  0x70   : > { %3987 = vmatpush.bf16.msra.mxu0 %v10128_v20  ;;  %3956 = vmatmul.bf16.vlgmr.msrb.gmra.mxu1 %v14166_v35  ;;  %v12757_v18 = vld [vmem:[%s19036_s19 + $0x524] sm:$0xf0]  ;;  %v10224_v20 = vor.u32 %v12759_v9, %v10223_v8  ;;  %v10279_v21 = vld [vmem:[%s19036_s19 + $0x5a0] sm:$0xf]  ;;  %v12755_v47 = vld [vmem:[%s19036_s19 + $0x514] sm:$0xf0] }
  0x71   : > { %4000 = vmatpush.bf16.msra.mxu1 %v10192_v25  ;;  %3969 = vmatmul.bf16.vlgmr.msrb.gmra.mxu2 %v14160_v32  ;;  %v14265_v22 = vld.sshfl [vmem:[#allocation1] sm:$0xff pattern:$0x73625140]  ;;  %v12773_v25 = vld [vmem:[%s19036_s19 + $0x5a4] sm:$0xf0]  ;;  %v10216_v39 = vor.u32 %v12757_v18, %v10215_v17 }
  0x72   : > { %4013 = vmatpush.bf16.msra.mxu2 %v10256_v26  ;;  %3982 = vmatmul.bf16.vlgmr.msrb.gmra.mxu3 %v14164_v34  ;;  %v890_v23 = vld [vmem:[%s19037_s17 + $0x20] sm:$0xff]  ;;  %v14273_v26 = vld.sshfl [vmem:[#allocation1 + $0x10] sm:$0xff pattern:$0x73625140]  ;;  %v10280_v44 = vor.u32 %v12773_v25, %v10279_v21  ;;  %v12771_v49 = vld [vmem:[%s19036_s19 + $0x594] sm:$0xf0] }
  0x73   : > { %4026 = vmatpush.bf16.msra.mxu3 %v10320_v31  ;;  %v898_v27 = vld [vmem:[%s19037_s17 + $0x5c] sm:$0xff]  ;;  %v14278_v28 = vld.sshfl [vmem:[#allocation1 + $0x8] sm:$0xff pattern:$0x73625140]  ;;  %v10079_v31 = vld [vmem:[%s19036_s19 + $0x410] sm:$0xf] }
  0x74   : > { %3988 = vmatpush.bf16.msra.mxu0 %v10120_v36  ;;  %v14280_v29 = vld.sshfl [vmem:[#allocation1 + $0x18] sm:$0xff pattern:$0x73625140]  ;;  %v10152_v36 = vor.u32 %v12741_v16, %v10151_v15  ;;  %v10271_v48 = vld [vmem:[%s19036_s19 + $0x590] sm:$0xf] }
  0x75   : > { %4001 = vmatpush.bf16.msra.mxu1 %v10184_v42  ;;  %1424 = vst [vmem:[#allocation1] ss:$4 sm:$0xff] %v890_v23  ;;  %v12723_v42 = vld [vmem:[%s19036_s19 + $0x414] sm:$0xf0]  ;;  %v10071_v51 = vld [vmem:[%s19036_s19 + $0x400] sm:$0xf] }
  0x76   : > { %4014 = vmatpush.bf16.msra.mxu2 %v10248_v43  ;;  %v10143_v43 = vld [vmem:[%s19036_s19 + $0x490] sm:$0xf]  ;;  %1426 = vst [vmem:[#allocation1 + $0x1] ss:$4 sm:$0xff] %v898_v27  ;;  %v10080_v50 = vor.u32 %v12723_v42, %v10079_v31  ;;  %v10135_v55 = vld [vmem:[%s19036_s19 + $0x480] sm:$0xf] }
  0x77   : > { %4027 = vmatpush.bf16.msra.mxu3 %v10312_v46  ;;  %v10207_v46 = vld [vmem:[%s19036_s19 + $0x510] sm:$0xf]  ;;  %v12737_v56 = vld [vmem:[%s19036_s19 + $0x484] sm:$0xf0]  ;;  %v10199_v57 = vld [vmem:[%s19036_s19 + $0x500] sm:$0xf] }
  0x78   : > { %3989 = vmatpush.bf16.msra.mxu0 %v10112_v52  ;;  %v12721_v52 = vld [vmem:[%s19036_s19 + $0x404] sm:$0xf0]  ;;  %v10263_v60 = vld [vmem:[%s19036_s19 + $0x580] sm:$0xf]  ;;  %v10383_v62 = vld [vmem:[%s19036_s19 + $0x670] sm:$0xf]  ;;  %v10136_v5 = vor.u32 %v12737_v56, %v10135_v55 }
  0x79   : > { %4002 = vmatpush.bf16.msra.mxu1 %v10176_v53  ;;  %v10144_v53 = vor.u32 %v12739_v45, %v10143_v43  ;;  %v12753_v59 = vld [vmem:[%s19036_s19 + $0x504] sm:$0xf0]  ;;  %v12799_v63 = vld [vmem:[%s19036_s19 + $0x674] sm:$0xf0]  ;;  %v10072_v1 = vor.u32 %v12721_v52, %v10071_v51  ;;  %v10375_v13 = vld [vmem:[%s19036_s19 + $0x660] sm:$0xf] }
  0x7a   : > { %4015 = vmatpush.bf16.msra.mxu2 %v10240_v54  ;;  %v10208_v54 = vor.u32 %v12755_v47, %v10207_v46  ;;  %v12769_v61 = vld [vmem:[%s19036_s19 + $0x584] sm:$0xf0]  ;;  %v12831_v4 = vld [vmem:[%s19036_s19 + $0x774] sm:$0xf0]  ;;  %v10200_v6 = vor.u32 %v12753_v59, %v10199_v57  ;;  %v10384_v10 = vor.u32 %v12799_v63, %v10383_v62  ;;  %v10439_v15 = vld [vmem:[%s19036_s19 + $0x6e0] sm:$0xf] }
  0x7b   : > { %4028 = vmatpush.bf16.msra.mxu3 %v10304_v58  ;;  %v10272_v58 = vor.u32 %v12771_v49, %v10271_v48  ;;  %v12847_v8 = vld [vmem:[%s19036_s19 + $0x7f4] sm:$0xf0]  ;;  %v10264_v9 = vor.u32 %v12769_v61, %v10263_v60  ;;  %v12813_v17 = vld [vmem:[%s19036_s19 + $0x6e4] sm:$0xf0]  ;;  %v10503_v18 = vld [vmem:[%s19036_s19 + $0x760] sm:$0xf] }
  0x7c   : > { %3990 = vmatpush.bf16.msra.mxu0 %v10104_v0  ;;  %v10447_v0 = vld [vmem:[%s19036_s19 + $0x6f0] sm:$0xf]  ;;  %v12845_v21 = vld [vmem:[%s19036_s19 + $0x7e4] sm:$0xf0]  ;;  %v12827_v43 = vld [vmem:[%s19036_s19 + $0x754] sm:$0xf0] }
  0x7d   : > { %4003 = vmatpush.bf16.msra.mxu1 %v10168_v2  ;;  %v12815_v2 = vld [vmem:[%s19036_s19 + $0x6f4] sm:$0xf0]  ;;  %v10367_v27 = vld [vmem:[%s19036_s19 + $0x650] sm:$0xf]  ;;  %v10359_v47 = vld [vmem:[%s19036_s19 + $0x640] sm:$0xf] }
  0x7e   : > { %4016 = vmatpush.bf16.msra.mxu2 %v10232_v3  ;;  %v10511_v3 = vld [vmem:[%s19036_s19 + $0x770] sm:$0xf]  ;;  %v10448_v11 = vor.u32 %v12815_v2, %v10447_v0  ;;  %v12843_v45 = vld [vmem:[%s19036_s19 + $0x7d4] sm:$0xf0]  ;;  %v12793_v48 = vld [vmem:[%s19036_s19 + $0x644] sm:$0xf0] }
  0x7f   : > { %4029 = vmatpush.bf16.msra.mxu3 %v10296_v7  ;;  %v10575_v7 = vld [vmem:[%s19036_s19 + $0x7f0] sm:$0xf]  ;;  %v10512_v12 = vor.u32 %v12831_v4, %v10511_v3  ;;  %v10423_v51 = vld [vmem:[%s19036_s19 + $0x6c0] sm:$0xf]  ;;  %v12809_v52 = vld [vmem:[%s19036_s19 + $0x6c4] sm:$0xf0]  ;;  %v10360_v62 = vor.u32 %v12793_v48, %v10359_v47 }
  0x80   : > { %3991 = vmatpush.bf16.msra.mxu0 %v10096_v14  ;;  %v12797_v14 = vld [vmem:[%s19036_s19 + $0x664] sm:$0xf0]  ;;  %v10576_v16 = vor.u32 %v12847_v8, %v10575_v7  ;;  %v10431_v31 = vld [vmem:[%s19036_s19 + $0x6d0] sm:$0xf]  ;;  %v10551_v56 = vld [vmem:[%s19036_s19 + $0x7c0] sm:$0xf]  ;;  %v10424_v2 = vor.u32 %v12809_v52, %v10423_v51 }
  0x81   : > { %4004 = vmatpush.bf16.msra.mxu1 %v10160_v19  ;;  %v12829_v19 = vld [vmem:[%s19036_s19 + $0x764] sm:$0xf0]  ;;  %v10376_v23 = vor.u32 %v12797_v14, %v10375_v13  ;;  %v10495_v42 = vld [vmem:[%s19036_s19 + $0x750] sm:$0xf]  ;;  %v12791_v59 = vld [vmem:[%s19036_s19 + $0x634] sm:$0xf0] }
  0x82   : > { %4017 = vmatpush.bf16.msra.mxu2 %v10224_v20  ;;  %v10567_v20 = vld [vmem:[%s19036_s19 + $0x7e0] sm:$0xf]  ;;  %v10504_v25 = vor.u32 %v12829_v19, %v10503_v18  ;;  %v12825_v55 = vld [vmem:[%s19036_s19 + $0x744] sm:$0xf0]  ;;  %v10415_v63 = vld [vmem:[%s19036_s19 + $0x6b0] sm:$0xf] }
  0x83   : > { %4030 = vmatpush.bf16.msra.mxu3 %v10288_v24  ;;  %v10440_v24 = vor.u32 %v12813_v17, %v10439_v15  ;;  %v12841_v57 = vld [vmem:[%s19036_s19 + $0x7c4] sm:$0xf0]  ;;  %v14436_v60 = vld.sshfl [vmem:[#allocation1 + $0x20] sm:$0xff pattern:$0x73625140] }
  0x84   : > { %3992 = vmatpush.bf16.msra.mxu0 %v10088_v30  ;;  %v12795_v30 = vld [vmem:[%s19036_s19 + $0x654] sm:$0xf0]  ;;  %v891_v61 = vld [vmem:[%s19037_s17 + $0x28] sm:$0xff]  ;;  %v14444_v0 = vld.sshfl [vmem:[#allocation1 + $0x30] sm:$0xff pattern:$0x73625140]  ;;  %v10552_v7 = vor.u32 %v12841_v57, %v10551_v56 }
  0x85   : > { %4005 = vmatpush.bf16.msra.mxu1 %v10152_v36  ;;  %v10568_v36 = vor.u32 %v12845_v21, %v10567_v20  ;;  %v10368_v46 = vor.u32 %v12795_v30, %v10367_v27  ;;  %v12807_v4 = vld [vmem:[%s19036_s19 + $0x6b4] sm:$0xf0]  ;;  %v10479_v8 = vld [vmem:[%s19036_s19 + $0x730] sm:$0xf]  ;;  %v10343_v15 = vld [vmem:[%s19036_s19 + $0x620] sm:$0xf] }
  0x86   : > { %4018 = vmatpush.bf16.msra.mxu2 %v10216_v39  ;;  %v12811_v39 = vld [vmem:[%s19036_s19 + $0x6d4] sm:$0xf0]  ;;  %v10416_v13 = vor.u32 %v12807_v4, %v10415_v63  ;;  %v10407_v17 = vld [vmem:[%s19036_s19 + $0x6a0] sm:$0xf]  ;;  %v12805_v19 = vld [vmem:[%s19036_s19 + $0x6a4] sm:$0xf0] }
  0x87   : > { %4031 = vmatpush.bf16.msra.mxu3 %v10280_v44  ;;  %v10559_v44 = vld [vmem:[%s19036_s19 + $0x7d0] sm:$0xf]  ;;  %v10432_v49 = vor.u32 %v12811_v39, %v10431_v31  ;;  %v10471_v20 = vld [vmem:[%s19036_s19 + $0x720] sm:$0xf]  ;;  %v12821_v21 = vld [vmem:[%s19036_s19 + $0x724] sm:$0xf0]  ;;  %v10408_v27 = vor.u32 %v12805_v19, %v10407_v17 }
  0x88   : > { %3993 = vmatpush.bf16.msra.mxu0 %v10080_v50  ;;  %v10496_v50 = vor.u32 %v12827_v43, %v10495_v42  ;;  %v10472_v30 = vor.u32 %v12821_v21, %v10471_v20  ;;  %v10335_v31 = vld [vmem:[%s19036_s19 + $0x610] sm:$0xf]  ;;  %v12803_v43 = vld [vmem:[%s19036_s19 + $0x694] sm:$0xf0]  ;;  %v12817_v57 = vld [vmem:[%s19036_s19 + $0x704] sm:$0xf0] }
  0x89   : > { %4006 = vmatpush.bf16.msra.mxu1 %v10144_v53  ;;  %v10487_v53 = vld [vmem:[%s19036_s19 + $0x740] sm:$0xf]  ;;  %v10399_v39 = vld [vmem:[%s19036_s19 + $0x690] sm:$0xf]  ;;  %v12835_v47 = vld [vmem:[%s19036_s19 + $0x794] sm:$0xf0] }
  0x8a   : > { %4019 = vmatpush.bf16.msra.mxu2 %v10208_v54  ;;  %v10560_v54 = vor.u32 %v12843_v45, %v10559_v44  ;;  %v10488_v3 = vor.u32 %v12825_v55, %v10487_v53  ;;  %v10463_v44 = vld [vmem:[%s19036_s19 + $0x710] sm:$0xf]  ;;  %v12819_v45 = vld [vmem:[%s19036_s19 + $0x714] sm:$0xf0]  ;;  %v10400_v51 = vor.u32 %v12803_v43, %v10399_v39  ;;  %v10391_v53 = vld [vmem:[%s19036_s19 + $0x680] sm:$0xf] }
  0x8b   : > { %4032 = vmatpush.bf16.msra.mxu3 %v10272_v58  ;;  %v10351_v58 = vld [vmem:[%s19036_s19 + $0x630] sm:$0xf]  ;;  %v10464_v52 = vor.u32 %v12819_v45, %v10463_v44  ;;  %v10455_v55 = vld [vmem:[%s19036_s19 + $0x700] sm:$0xf]  ;;  %v12877_v19 = vld [vmem:[%s19036_s19 + $0x8e4] sm:$0xf0] }
  0x8c   : > { %3994 = vmatpush.bf16.msra.mxu0 %v10072_v1  ;;  %v14446_v1 = vld.sshfl [vmem:[#allocation1 + $0x28] sm:$0xff pattern:$0x73625140]  ;;  %v10703_v63 = vld [vmem:[%s19036_s19 + $0x8f0] sm:$0xf] }
  0x8d   : > { %4007 = vmatpush.bf16.msra.mxu1 %v10136_v5  ;;  %v899_v5 = vld [vmem:[%s19037_s17 + $0x64] sm:$0xff]  ;;  %v10767_v4 = vld [vmem:[%s19036_s19 + $0x970] sm:$0xf]  ;;  %v10695_v17 = vld [vmem:[%s19036_s19 + $0x8e0] sm:$0xf] }
  0x8e   : > { %4020 = vmatpush.bf16.msra.mxu2 %v10200_v6  ;;  %v14454_v6 = vld.sshfl [vmem:[#allocation1 + $0x38] sm:$0xff pattern:$0x73625140]  ;;  %v10759_v20 = vld [vmem:[%s19036_s19 + $0x960] sm:$0xf] }
  0x8f   : > { %4033 = vmatpush.bf16.msra.mxu3 %v10264_v9  ;;  %3995 = vmatmul.bf16.vlgmr.msra.gmra.mxu0 %v14265_v22  ;;  %v12823_v9 = vld [vmem:[%s19036_s19 + $0x734] sm:$0xf0]  ;;  %1428 = vst [vmem:[#allocation1 + $0x20] ss:$4 sm:$0xff] %v891_v61  ;;  %v10639_v61 = vld [vmem:[%s19036_s19 + $0x870] sm:$0xf] }
  0x90   : > { %4039 = vmatpush.bf16.msrb.mxu0 %v10384_v10  ;;  %4008 = vmatmul.bf16.vlgmr.msra.gmra.mxu1 %v14278_v28  ;;  %v10543_v10 = vld [vmem:[%s19036_s19 + $0x7b0] sm:$0xf]  ;;  %1430 = vst [vmem:[#allocation1 + $0x21] ss:$4 sm:$0xff] %v899_v5  ;;  %v10480_v14 = vor.u32 %v12823_v9, %v10479_v8  ;;  %v12895_v5 = vld [vmem:[%s19036_s19 + $0x974] sm:$0xf0]  ;;  %v10456_v8 = vor.u32 %v12817_v57, %v10455_v55 }
  0x91   : > { %4052 = vmatpush.bf16.msrb.mxu1 %v10448_v11  ;;  %4021 = vmatmul.bf16.vlgmr.msra.gmra.mxu2 %v14273_v26  ;;  %v12839_v11 = vld [vmem:[%s19036_s19 + $0x7b4] sm:$0xf0]  ;;  %v10831_v9 = vld [vmem:[%s19036_s19 + $0x9f0] sm:$0xf]  ;;  %v12893_v21 = vld [vmem:[%s19036_s19 + $0x964] sm:$0xf0] }
  0x92   : > { %4065 = vmatpush.bf16.msrb.mxu2 %v10512_v12  ;;  %4034 = vmatmul.bf16.vlgmr.msra.gmra.mxu3 %v14280_v29  ;;  %v10352_v12 = vor.u32 %v12791_v59, %v10351_v58  ;;  %v10544_v18 = vor.u32 %v12839_v11, %v10543_v10  ;;  %v10519_v58 = vld [vmem:[%s19036_s19 + $0x780] sm:$0xf]  ;;  %v12833_v59 = vld [vmem:[%s19036_s19 + $0x784] sm:$0xf0]  ;;  %v12911_v10 = vld [vmem:[%s19036_s19 + $0x9f4] sm:$0xf0] }
  0x93   : > { %4078 = vmatpush.bf16.msrb.mxu3 %v10576_v16  ;;  %v12789_v16 = vld [vmem:[%s19036_s19 + $0x624] sm:$0xf0]  ;;  %v10520_v11 = vor.u32 %v12833_v59, %v10519_v58  ;;  %v10687_v39 = vld [vmem:[%s19036_s19 + $0x8d0] sm:$0xf]  ;;  %v12875_v43 = vld [vmem:[%s19036_s19 + $0x8d4] sm:$0xf0] }
  0x94   : > { %4040 = vmatpush.bf16.msrb.mxu0 %v10376_v23  ;;  %v10535_v23 = vld [vmem:[%s19036_s19 + $0x7a0] sm:$0xf]  ;;  %v10751_v44 = vld [vmem:[%s19036_s19 + $0x950] sm:$0xf]  ;;  %v12891_v45 = vld [vmem:[%s19036_s19 + $0x954] sm:$0xf0] }
  0x95   : > { %4053 = vmatpush.bf16.msrb.mxu1 %v10440_v24  ;;  %v12837_v24 = vld [vmem:[%s19036_s19 + $0x7a4] sm:$0xf0]  ;;  %v10807_v58 = vld [vmem:[%s19036_s19 + $0x9c0] sm:$0xf] }
  0x96   : > { %4066 = vmatpush.bf16.msrb.mxu2 %v10504_v25  ;;  %v10344_v25 = vor.u32 %v12789_v16, %v10343_v15  ;;  %v10536_v42 = vor.u32 %v12837_v24, %v10535_v23  ;;  %v10631_v15 = vld [vmem:[%s19036_s19 + $0x860] sm:$0xf]  ;;  %v12861_v16 = vld [vmem:[%s19036_s19 + $0x864] sm:$0xf0] }
  0x97   : > { %4079 = vmatpush.bf16.msrb.mxu3 %v10568_v36  ;;  %v12787_v36 = vld [vmem:[%s19036_s19 + $0x614] sm:$0xf0]  ;;  %v10823_v23 = vld [vmem:[%s19036_s19 + $0x9e0] sm:$0xf]  ;;  %v12909_v24 = vld [vmem:[%s19036_s19 + $0x9e4] sm:$0xf0] }
  0x98   : > { %4041 = vmatpush.bf16.msrb.mxu0 %v10368_v46  ;;  %v10527_v46 = vld [vmem:[%s19036_s19 + $0x790] sm:$0xf]  ;;  %v10336_v48 = vor.u32 %v12787_v36, %v10335_v31  ;;  %v12859_v36 = vld [vmem:[%s19036_s19 + $0x854] sm:$0xf0]  ;;  %v12873_v55 = vld [vmem:[%s19036_s19 + $0x8c4] sm:$0xf0] }
  0x99   : > { %4054 = vmatpush.bf16.msrb.mxu1 %v10432_v49  ;;  %v10327_v49 = vld [vmem:[%s19036_s19 + $0x600] sm:$0xf]  ;;  %v10528_v56 = vor.u32 %v12835_v47, %v10527_v46  ;;  %v10623_v31 = vld [vmem:[%s19036_s19 + $0x850] sm:$0xf]  ;;  %v12907_v47 = vld [vmem:[%s19036_s19 + $0x9d4] sm:$0xf0] }
  0x9a   : > { %4067 = vmatpush.bf16.msrb.mxu2 %v10496_v50  ;;  %v12785_v50 = vld [vmem:[%s19036_s19 + $0x604] sm:$0xf0]  ;;  %v10815_v46 = vld [vmem:[%s19036_s19 + $0x9d0] sm:$0xf] }
  0x9b   : > { %4080 = vmatpush.bf16.msrb.mxu3 %v10560_v54  ;;  %v12801_v54 = vld [vmem:[%s19036_s19 + $0x684] sm:$0xf0] }
  0x9c   : > { %4042 = vmatpush.bf16.msrb.mxu0 %v10360_v62  ;;  %v12863_v62 = vld [vmem:[%s19036_s19 + $0x874] sm:$0xf0]  ;;  %v12889_v57 = vld [vmem:[%s19036_s19 + $0x944] sm:$0xf0] }
  0x9d   : > { %4055 = vmatpush.bf16.msrb.mxu1 %v10424_v2  ;;  %v10328_v2 = vor.u32 %v12785_v50, %v10327_v49  ;;  %v10688_v49 = vor.u32 %v12875_v43, %v10687_v39  ;;  %v10752_v50 = vor.u32 %v12891_v45, %v10751_v44  ;;  %v12905_v59 = vld [vmem:[%s19036_s19 + $0x9c4] sm:$0xf0]  ;;  %v10655_v39 = vld [vmem:[%s19036_s19 + $0x890] sm:$0xf]  ;;  %v12867_v43 = vld [vmem:[%s19036_s19 + $0x894] sm:$0xf0] }
  0x9e   : > { %4068 = vmatpush.bf16.msrb.mxu2 %v10488_v3  ;;  %v12879_v3 = vld [vmem:[%s19036_s19 + $0x8f4] sm:$0xf0]  ;;  %v10719_v44 = vld [vmem:[%s19036_s19 + $0x910] sm:$0xf] }
  0x9f   : > { %4081 = vmatpush.bf16.msrb.mxu3 %v10552_v7  ;;  %v10392_v7 = vor.u32 %v12801_v54, %v10391_v53  ;;  %v10679_v53 = vld [vmem:[%s19036_s19 + $0x8c0] sm:$0xf]  ;;  %v10816_v54 = vor.u32 %v12907_v47, %v10815_v46  ;;  %v12883_v45 = vld [vmem:[%s19036_s19 + $0x914] sm:$0xf0]  ;;  %v10783_v46 = vld [vmem:[%s19036_s19 + $0x990] sm:$0xf] }
  0xa0   : > { %4043 = vmatpush.bf16.msrb.mxu0 %v10352_v12  ;;  %v10640_v12 = vor.u32 %v12863_v62, %v10639_v61  ;;  %v10680_v62 = vor.u32 %v12873_v55, %v10679_v53  ;;  %v12899_v47 = vld [vmem:[%s19036_s19 + $0x994] sm:$0xf0]  ;;  %v10647_v53 = vld [vmem:[%s19036_s19 + $0x880] sm:$0xf] }
  0xa1   : > { %4056 = vmatpush.bf16.msrb.mxu1 %v10416_v13  ;;  %v10704_v13 = vor.u32 %v12879_v3, %v10703_v63  ;;  %v12855_v3 = vld [vmem:[%s19036_s19 + $0x834] sm:$0xf0]  ;;  %v10711_v55 = vld [vmem:[%s19036_s19 + $0x900] sm:$0xf] }
  0xa2   : > { %4069 = vmatpush.bf16.msrb.mxu2 %v10480_v14  ;;  %v10768_v14 = vor.u32 %v12895_v5, %v10767_v4  ;;  %v10671_v4 = vld [vmem:[%s19036_s19 + $0x8b0] sm:$0xf]  ;;  %v10808_v5 = vor.u32 %v12905_v59, %v10807_v58  ;;  %v10775_v58 = vld [vmem:[%s19036_s19 + $0x980] sm:$0xf]  ;;  %v12897_v59 = vld [vmem:[%s19036_s19 + $0x984] sm:$0xf0] }
  0xa3   : > { %4082 = vmatpush.bf16.msrb.mxu3 %v10544_v18  ;;  %v10832_v18 = vor.u32 %v12911_v10, %v10831_v9  ;;  %v12887_v9 = vld [vmem:[%s19036_s19 + $0x934] sm:$0xf0]  ;;  %v10799_v10 = vld [vmem:[%s19036_s19 + $0x9b0] sm:$0xf] }
  0xa4   : > { %4044 = vmatpush.bf16.msrb.mxu0 %v10344_v25  ;;  %v10632_v25 = vor.u32 %v12861_v16, %v10631_v15  ;;  %v10599_v15 = vld [vmem:[%s19036_s19 + $0x820] sm:$0xf]  ;;  %v12853_v16 = vld [vmem:[%s19036_s19 + $0x824] sm:$0xf0] }
  0xa5   : > { %4057 = vmatpush.bf16.msrb.mxu1 %v10408_v27  ;;  %v10696_v27 = vor.u32 %v12877_v19, %v10695_v17  ;;  %v10663_v17 = vld [vmem:[%s19036_s19 + $0x8a0] sm:$0xf]  ;;  %v12869_v19 = vld [vmem:[%s19036_s19 + $0x8a4] sm:$0xf0] }
  0xa6   : > { %4070 = vmatpush.bf16.msrb.mxu2 %v10472_v30  ;;  %v10760_v30 = vor.u32 %v12893_v21, %v10759_v20  ;;  %v10727_v20 = vld [vmem:[%s19036_s19 + $0x920] sm:$0xf]  ;;  %v12885_v21 = vld [vmem:[%s19036_s19 + $0x924] sm:$0xf0] }
  0xa7   : > { %4083 = vmatpush.bf16.msrb.mxu3 %v10536_v42  ;;  %v10824_v42 = vor.u32 %v12909_v24, %v10823_v23  ;;  %v10791_v23 = vld [vmem:[%s19036_s19 + $0x9a0] sm:$0xf]  ;;  %v12901_v24 = vld [vmem:[%s19036_s19 + $0x9a4] sm:$0xf0] }
  0xa8   : > { %4045 = vmatpush.bf16.msrb.mxu0 %v10336_v48  ;;  %v10624_v48 = vor.u32 %v12859_v36, %v10623_v31  ;;  %v10591_v31 = vld [vmem:[%s19036_s19 + $0x810] sm:$0xf]  ;;  %v12851_v36 = vld [vmem:[%s19036_s19 + $0x814] sm:$0xf0] }
  0xa9   : > { %4058 = vmatpush.bf16.msrb.mxu1 %v10400_v51  ;;  %v10615_v51 = vld [vmem:[%s19036_s19 + $0x840] sm:$0xf] }
  0xaa   : > { %4071 = vmatpush.bf16.msrb.mxu2 %v10464_v52  ;;  %v12857_v52 = vld [vmem:[%s19036_s19 + $0x844] sm:$0xf0] }
  0xab   : > { %4084 = vmatpush.bf16.msrb.mxu3 %v10528_v56  ;;  %v10743_v56 = vld [vmem:[%s19036_s19 + $0x940] sm:$0xf]  ;;  %v10616_v61 = vor.u32 %v12857_v52, %v10615_v51  ;;  %v10656_v51 = vor.u32 %v12867_v43, %v10655_v39  ;;  %v10720_v52 = vor.u32 %v12883_v45, %v10719_v44  ;;  %v10879_v43 = vld [vmem:[%s19036_s19 + $0xa50] sm:$0xf]  ;;  %v12923_v44 = vld [vmem:[%s19036_s19 + $0xa54] sm:$0xf0] }
  0xac   : > { %4046 = vmatpush.bf16.msrb.mxu0 %v10328_v2  ;;  %v10744_v63 = vor.u32 %v12889_v57, %v10743_v56  ;;  %v10607_v2 = vld [vmem:[%s19036_s19 + $0x830] sm:$0xf]  ;;  %v10784_v56 = vor.u32 %v12899_v47, %v10783_v46  ;;  %v12881_v57 = vld [vmem:[%s19036_s19 + $0x904] sm:$0xf0]  ;;  %v12939_v47 = vld [vmem:[%s19036_s19 + $0xad4] sm:$0xf0] }
  0xad   : > { %4059 = vmatpush.bf16.msrb.mxu1 %v10392_v7  ;;  %v12871_v7 = vld [vmem:[%s19036_s19 + $0x8b4] sm:$0xf0]  ;;  %v10943_v45 = vld [vmem:[%s19036_s19 + $0xad0] sm:$0xf] }
  0xae   : > { %4072 = vmatpush.bf16.msrb.mxu2 %v10456_v8  ;;  %v10735_v8 = vld [vmem:[%s19036_s19 + $0x930] sm:$0xf] }
  0xaf   : > { %4085 = vmatpush.bf16.msrb.mxu3 %v10520_v11  ;;  %4047 = vmatmul.bf16.vlgmr.msrb.gmra.mxu0 %v14436_v60  ;;  %v12903_v11 = vld [vmem:[%s19036_s19 + $0x9b4] sm:$0xf0] }
  0xb0   : > { %4091 = vmatpush.bf16.msra.mxu0 %v10640_v12  ;;  %4060 = vmatmul.bf16.vlgmr.msrb.gmra.mxu1 %v14446_v1  ;;  %v10608_v12 = vor.u32 %v12855_v3, %v10607_v2  ;;  %v12943_v3 = vld [vmem:[%s19036_s19 + $0xaf4] sm:$0xf0] }
  0xb1   : > { %4104 = vmatpush.bf16.msra.mxu1 %v10704_v13  ;;  %4073 = vmatmul.bf16.vlgmr.msrb.gmra.mxu2 %v14444_v0  ;;  %v10672_v13 = vor.u32 %v12871_v7, %v10671_v4  ;;  %v11023_v4 = vld [vmem:[%s19036_s19 + $0xb70] sm:$0xf] }
  0xb2   : > { %4117 = vmatpush.bf16.msra.mxu2 %v10768_v14  ;;  %4086 = vmatmul.bf16.vlgmr.msrb.gmra.mxu3 %v14454_v6  ;;  %v10736_v14 = vor.u32 %v12887_v9, %v10735_v8  ;;  %v10712_v8 = vor.u32 %v12881_v57, %v10711_v55  ;;  %v11087_v9 = vld [vmem:[%s19036_s19 + $0xbf0] sm:$0xf]  ;;  %v10871_v55 = vld [vmem:[%s19036_s19 + $0xa40] sm:$0xf] }
  0xb3   : > { %4130 = vmatpush.bf16.msra.mxu3 %v10832_v18  ;;  %v10800_v18 = vor.u32 %v12903_v11, %v10799_v10  ;;  %v12975_v10 = vld [vmem:[%s19036_s19 + $0xbf4] sm:$0xf0]  ;;  %v10776_v11 = vor.u32 %v12897_v59, %v10775_v58  ;;  %v10935_v57 = vld [vmem:[%s19036_s19 + $0xac0] sm:$0xf]  ;;  %v12937_v59 = vld [vmem:[%s19036_s19 + $0xac4] sm:$0xf0] }
  0xb4   : > { %4092 = vmatpush.bf16.msra.mxu0 %v10632_v25  ;;  %v10600_v25 = vor.u32 %v12853_v16, %v10599_v15  ;;  %v14760_v15 = vld.sshfl [vmem:[#allocation1] sm:$0xff pattern:$0x73625140] }
  0xb5   : > { %4105 = vmatpush.bf16.msra.mxu1 %v10696_v27  ;;  %v10664_v27 = vor.u32 %v12869_v19, %v10663_v17  ;;  %v10887_v16 = vld [vmem:[%s19036_s19 + $0xa60] sm:$0xf]  ;;  %v12925_v17 = vld [vmem:[%s19036_s19 + $0xa64] sm:$0xf0]  ;;  %v11088_v19 = vor.u32 %v12975_v10, %v11087_v9  ;;  %v10927_v9 = vld [vmem:[%s19036_s19 + $0xab0] sm:$0xf] }
  0xb6   : > { %4118 = vmatpush.bf16.msra.mxu2 %v10760_v30  ;;  %v10728_v30 = vor.u32 %v12885_v21, %v10727_v20  ;;  %v14771_v20 = vld.sshfl [vmem:[#allocation1 + $0x10] sm:$0xff pattern:$0x73625140]  ;;  %v12941_v21 = vld [vmem:[%s19036_s19 + $0xae4] sm:$0xf0] }
  0xb7   : > { %4131 = vmatpush.bf16.msra.mxu3 %v10824_v42  ;;  %v10792_v42 = vor.u32 %v12901_v24, %v10791_v23  ;;  %v11015_v23 = vld [vmem:[%s19036_s19 + $0xb60] sm:$0xf]  ;;  %v12957_v24 = vld [vmem:[%s19036_s19 + $0xb64] sm:$0xf0] }
  0xb8   : > { %4093 = vmatpush.bf16.msra.mxu0 %v10624_v48  ;;  %v10592_v48 = vor.u32 %v12851_v36, %v10591_v31  ;;  %v14790_v31 = vld.sshfl [vmem:[#allocation1 + $0x18] sm:$0xff pattern:$0x73625140]  ;;  %v10888_v36 = vor.u32 %v12925_v17, %v10887_v16 }
  0xb9   : > { %4106 = vmatpush.bf16.msra.mxu1 %v10688_v49  ;;  %v10583_v49 = vld [vmem:[%s19036_s19 + $0x800] sm:$0xf]  ;;  %v12967_v16 = vld [vmem:[%s19036_s19 + $0xbb4] sm:$0xf0] }
  0xba   : > { %4119 = vmatpush.bf16.msra.mxu2 %v10752_v50  ;;  %v12849_v50 = vld [vmem:[%s19036_s19 + $0x804] sm:$0xf0] }
  0xbb   : > { %4132 = vmatpush.bf16.msra.mxu3 %v10816_v54  ;;  %v12865_v54 = vld [vmem:[%s19036_s19 + $0x884] sm:$0xf0]  ;;  %v10584_v2 = vor.u32 %v12849_v50, %v10583_v49  ;;  %v12955_v49 = vld [vmem:[%s19036_s19 + $0xb54] sm:$0xf0]  ;;  %v11071_v50 = vld [vmem:[%s19036_s19 + $0xbd0] sm:$0xf] }
  0xbc   : > { %4094 = vmatpush.bf16.msra.mxu0 %v10616_v61  ;;  %v10895_v61 = vld [vmem:[%s19036_s19 + $0xa70] sm:$0xf]  ;;  %v10648_v7 = vor.u32 %v12865_v54, %v10647_v53  ;;  %v10944_v53 = vor.u32 %v12939_v47, %v10943_v45 }
  0xbd   : > { %4107 = vmatpush.bf16.msra.mxu1 %v10680_v62  ;;  %v12927_v62 = vld [vmem:[%s19036_s19 + $0xa74] sm:$0xf0] }
  0xbe   : > { %4120 = vmatpush.bf16.msra.mxu2 %v10744_v63  ;;  %v10959_v63 = vld [vmem:[%s19036_s19 + $0xaf0] sm:$0xf] }
  0xbf   : > { %4133 = vmatpush.bf16.msra.mxu3 %v10808_v5  ;;  %v12959_v5 = vld [vmem:[%s19036_s19 + $0xb74] sm:$0xf0] }
  0xc0   : > { %4095 = vmatpush.bf16.msra.mxu0 %v10608_v12  ;;  %v10896_v12 = vor.u32 %v12927_v62, %v10895_v61  ;;  %v10999_v61 = vld [vmem:[%s19036_s19 + $0xb40] sm:$0xf]  ;;  %v12953_v62 = vld [vmem:[%s19036_s19 + $0xb44] sm:$0xf0] }
  0xc1   : > { %4108 = vmatpush.bf16.msra.mxu1 %v10672_v13  ;;  %v10960_v13 = vor.u32 %v12943_v3, %v10959_v63  ;;  %v11063_v63 = vld [vmem:[%s19036_s19 + $0xbc0] sm:$0xf] }
  0xc2   : > { %4121 = vmatpush.bf16.msra.mxu2 %v10736_v14  ;;  %v11024_v14 = vor.u32 %v12959_v5, %v11023_v4  ;;  %v10936_v4 = vor.u32 %v12937_v59, %v10935_v57  ;;  %v11000_v5 = vor.u32 %v12953_v62, %v10999_v61  ;;  %v12963_v57 = vld [vmem:[%s19036_s19 + $0xb94] sm:$0xf0]  ;;  %v12913_v61 = vld [vmem:[%s19036_s19 + $0xa04] sm:$0xf0]  ;;  %v10903_v62 = vld [vmem:[%s19036_s19 + $0xa80] sm:$0xf] }
  0xc3   : > { %4134 = vmatpush.bf16.msra.mxu3 %v10800_v18  ;;  %v10951_v18 = vld [vmem:[%s19036_s19 + $0xae0] sm:$0xf] }
  0xc4   : > { %4096 = vmatpush.bf16.msra.mxu0 %v10600_v25  ;;  %v11079_v25 = vld [vmem:[%s19036_s19 + $0xbe0] sm:$0xf]  ;;  %v10952_v39 = vor.u32 %v12941_v21, %v10951_v18 }
  0xc5   : > { %4109 = vmatpush.bf16.msra.mxu1 %v10664_v27  ;;  %v12973_v27 = vld [vmem:[%s19036_s19 + $0xbe4] sm:$0xf0]  ;;  %v10855_v18 = vld [vmem:[%s19036_s19 + $0xa20] sm:$0xf] }
  0xc6   : > { %4122 = vmatpush.bf16.msra.mxu2 %v10728_v30  ;;  %v14788_v30 = vld.sshfl [vmem:[#allocation1 + $0x8] sm:$0xff pattern:$0x73625140]  ;;  %v11080_v46 = vor.u32 %v12973_v27, %v11079_v25 }
  0xc7   : > { %4135 = vmatpush.bf16.msra.mxu3 %v10792_v42  ;;  %v11016_v42 = vor.u32 %v12957_v24, %v11015_v23  ;;  %v12917_v23 = vld [vmem:[%s19036_s19 + $0xa24] sm:$0xf0]  ;;  %v10919_v24 = vld [vmem:[%s19036_s19 + $0xaa0] sm:$0xf] }
  0xc8   : > { %4097 = vmatpush.bf16.msra.mxu0 %v10592_v48  ;;  %v11007_v48 = vld [vmem:[%s19036_s19 + $0xb50] sm:$0xf]  ;;  %v12933_v25 = vld [vmem:[%s19036_s19 + $0xaa4] sm:$0xf0]  ;;  %v10856_v45 = vor.u32 %v12917_v23, %v10855_v18 }
  0xc9   : > { %4110 = vmatpush.bf16.msra.mxu1 %v10656_v51  ;;  %v12971_v51 = vld [vmem:[%s19036_s19 + $0xbd4] sm:$0xf0]  ;;  %v11008_v54 = vor.u32 %v12955_v49, %v11007_v48  ;;  %v10920_v47 = vor.u32 %v12933_v25, %v10919_v24  ;;  %v11279_v23 = vld [vmem:[%s19036_s19 + $0xd70] sm:$0xf] }
  0xca   : > { %4123 = vmatpush.bf16.msra.mxu2 %v10720_v52  ;;  %v10880_v52 = vor.u32 %v12923_v44, %v10879_v43  ;;  %v11072_v58 = vor.u32 %v12971_v51, %v11071_v50  ;;  %v11047_v43 = vld [vmem:[%s19036_s19 + $0xba0] sm:$0xf]  ;;  %v12965_v44 = vld [vmem:[%s19036_s19 + $0xba4] sm:$0xf0]  ;;  %v12915_v49 = vld [vmem:[%s19036_s19 + $0xa14] sm:$0xf0] }
  0xcb   : > { %4136 = vmatpush.bf16.msra.mxu3 %v10784_v56  ;;  %v12921_v56 = vld [vmem:[%s19036_s19 + $0xa44] sm:$0xf0]  ;;  %v10911_v50 = vld [vmem:[%s19036_s19 + $0xa90] sm:$0xf]  ;;  %v13023_v24 = vld [vmem:[%s19036_s19 + $0xd74] sm:$0xf0] }
  0xcc   : > { %4098 = vmatpush.bf16.msra.mxu0 %v10584_v2  ;;  %v12969_v2 = vld [vmem:[%s19036_s19 + $0xbc4] sm:$0xf0]  ;;  %v10872_v3 = vor.u32 %v12921_v56, %v10871_v55  ;;  %v12947_v55 = vld [vmem:[%s19036_s19 + $0xb14] sm:$0xf0]  ;;  %v11039_v56 = vld [vmem:[%s19036_s19 + $0xb90] sm:$0xf] }
  0xcd   : > { %4111 = vmatpush.bf16.msra.mxu1 %v10648_v7  ;;  %v10863_v7 = vld [vmem:[%s19036_s19 + $0xa30] sm:$0xf]  ;;  %v11064_v10 = vor.u32 %v12969_v2, %v11063_v63  ;;  %v12929_v63 = vld [vmem:[%s19036_s19 + $0xa84] sm:$0xf0] }
  0xce   : > { %4124 = vmatpush.bf16.msra.mxu2 %v10712_v8  ;;  %v12919_v8 = vld [vmem:[%s19036_s19 + $0xa34] sm:$0xf0]  ;;  %v10904_v25 = vor.u32 %v12929_v63, %v10903_v62  ;;  %v11335_v62 = vld [vmem:[%s19036_s19 + $0xde0] sm:$0xf]  ;;  %v13037_v63 = vld [vmem:[%s19036_s19 + $0xde4] sm:$0xf0] }
  0xcf   : > { %4137 = vmatpush.bf16.msra.mxu3 %v10776_v11  ;;  %4099 = vmatmul.bf16.vlgmr.msra.gmra.mxu0 %v14760_v15  ;;  %v12935_v11 = vld [vmem:[%s19036_s19 + $0xab4] sm:$0xf0]  ;;  %v10864_v17 = vor.u32 %v12919_v8, %v10863_v7  ;;  %v12945_v7 = vld [vmem:[%s19036_s19 + $0xb04] sm:$0xf0]  ;;  %v11031_v8 = vld [vmem:[%s19036_s19 + $0xb80] sm:$0xf] }
  0xd0   : > { %4143 = vmatpush.bf16.msrb.mxu0 %v10896_v12  ;;  %4112 = vmatmul.bf16.vlgmr.msra.gmra.mxu1 %v14788_v30  ;;  %v10991_v12 = vld [vmem:[%s19036_s19 + $0xb30] sm:$0xf] }
  0xd1   : > { %4156 = vmatpush.bf16.msrb.mxu1 %v10960_v13  ;;  %4125 = vmatmul.bf16.vlgmr.msra.gmra.mxu2 %v14771_v20  ;;  %v12951_v13 = vld [vmem:[%s19036_s19 + $0xb34] sm:$0xf0] }
  0xd2   : > { %4169 = vmatpush.bf16.msrb.mxu2 %v11024_v14  ;;  %4138 = vmatmul.bf16.vlgmr.msra.gmra.mxu3 %v14790_v31  ;;  %v11055_v14 = vld [vmem:[%s19036_s19 + $0xbb0] sm:$0xf]  ;;  %v10992_v21 = vor.u32 %v12951_v13, %v10991_v12  ;;  %v12961_v12 = vld [vmem:[%s19036_s19 + $0xb84] sm:$0xf0] }
  0xd3   : > { %4182 = vmatpush.bf16.msrb.mxu3 %v11088_v19  ;;  %v10928_v19 = vor.u32 %v12935_v11, %v10927_v9  ;;  %v11056_v27 = vor.u32 %v12967_v16, %v11055_v14  ;;  %v3892_v2 = vpop.f32.mrf.mxu0  ;;  %v11040_v11 = vor.u32 %v12963_v57, %v11039_v56  ;;  %v11151_v13 = vld [vmem:[%s19036_s19 + $0xc70] sm:$0xf]  ;;  %v12991_v14 = vld [vmem:[%s19036_s19 + $0xc74] sm:$0xf0]  ;;  %v13005_v56 = vld [vmem:[%s19036_s19 + $0xce4] sm:$0xf0] }
  0xd4   : > { %4144 = vmatpush.bf16.msrb.mxu0 %v10888_v36  ;;  %v10983_v36 = vld [vmem:[%s19036_s19 + $0xb20] sm:$0xf]  ;;  %v11215_v16 = vld [vmem:[%s19036_s19 + $0xcf0] sm:$0xf] }
  0xd5   : > { %4157 = vmatpush.bf16.msrb.mxu1 %v10952_v39  ;;  %v12949_v39 = vld [vmem:[%s19036_s19 + $0xb24] sm:$0xf0]  ;;  %v11271_v57 = vld [vmem:[%s19036_s19 + $0xd60] sm:$0xf] }
  0xd6   : > { %4170 = vmatpush.bf16.msrb.mxu2 %v11016_v42  ;;  %v1382_v42 = vld [vmem:[%s19038_s20] sm:$0x3]  ;;  %v10984_v48 = vor.u32 %v12949_v39, %v10983_v36  ;;  %v11343_v36 = vld [vmem:[%s19036_s19 + $0xdf0] sm:$0xf]  ;;  %v13039_v39 = vld [vmem:[%s19036_s19 + $0xdf4] sm:$0xf0] }
  0xd7   : > { %4183 = vmatpush.bf16.msrb.mxu3 %v11080_v46  ;;  %v10847_v46 = vld [vmem:[%s19036_s19 + $0xa10] sm:$0xf]  ;;  %v1384_v51 = vperm.slane %v1382_v42, 0 }
  0xd8   : > { %4145 = vmatpush.bf16.msrb.mxu0 %v10880_v52  ;;  %v11048_v52 = vor.u32 %v12965_v44, %v11047_v43  ;;  %v10848_v59 = vor.u32 %v12915_v49, %v10847_v46  ;;  %v3918_v42 = vpop.f32.mrf.mxu2  ;;  %v11032_v43 = vor.u32 %v12961_v12, %v11031_v8  ;;  %v11152_v44 = vor.u32 %v12991_v14, %v11151_v13  ;;  %v13003_v13 = vld [vmem:[%s19036_s19 + $0xcd4] sm:$0xf0]  ;;  %v11263_v14 = vld [vmem:[%s19036_s19 + $0xd50] sm:$0xf] }
  0xd9   : > { %4158 = vmatpush.bf16.msrb.mxu1 %v10944_v53  ;;  %v12931_v53 = vld [vmem:[%s19036_s19 + $0xa94] sm:$0xf0]  ;;  %v3893_v9 = vadd.f32 %v3892_v2, %v1384_v51  ;;  %v11280_v49 = vor.u32 %v13023_v24, %v11279_v23  ;;  %v11143_v51 = vld [vmem:[%s19036_s19 + $0xc60] sm:$0xf]  ;;  %v11336_v12 = vor.u32 %v13037_v63, %v11335_v62  ;;  %v11247_v63 = vld [vmem:[%s19036_s19 + $0xd30] sm:$0xf] }
  0xda   : > { %4171 = vmatpush.bf16.msrb.mxu2 %v11008_v54  ;;  %v10975_v54 = vld [vmem:[%s19036_s19 + $0xb10] sm:$0xf]  ;;  %v12999_v62 = vld [vmem:[%s19036_s19 + $0xcb4] sm:$0xf0] }
  0xdb   : > { %4184 = vmatpush.bf16.msrb.mxu3 %v11072_v58  ;;  %v10839_v58 = vld [vmem:[%s19036_s19 + $0xa00] sm:$0xf]  ;;  %v3931_v46 = vpop.f32.mrf.mxu3 }
  0xdc   : > { %4146 = vmatpush.bf16.msrb.mxu0 %v10872_v3  ;;  %v10912_v3 = vor.u32 %v12931_v53, %v10911_v50  ;;  %v14973_v50 = vld.sshfl [vmem:[#allocation1 + $0x20] sm:$0xff pattern:$0x73625140] }
  0xdd   : > { %4159 = vmatpush.bf16.msrb.mxu1 %v10936_v4  ;;  %v10976_v4 = vor.u32 %v12947_v55, %v10975_v54  ;;  %v11207_v53 = vld [vmem:[%s19036_s19 + $0xce0] sm:$0xf]  ;;  %v11344_v54 = vor.u32 %v13039_v39, %v11343_v36  ;;  %v14984_v55 = vld.sshfl [vmem:[#allocation1 + $0x30] sm:$0xff pattern:$0x73625140] }
  0xde   : > { %4172 = vmatpush.bf16.msrb.mxu2 %v11000_v5  ;;  %v10967_v5 = vld [vmem:[%s19036_s19 + $0xb00] sm:$0xf]  ;;  %v12985_v36 = vld [vmem:[%s19036_s19 + $0xc44] sm:$0xf0] }
  0xdf   : > { %4185 = vmatpush.bf16.msrb.mxu3 %v11064_v10  ;;  %v3905_v10 = vpop.f32.mrf.mxu1  ;;  %v11191_v39 = vld [vmem:[%s19036_s19 + $0xcc0] sm:$0xf] }
  0xe0   : > { %4147 = vmatpush.bf16.msrb.mxu0 %v10864_v17  ;;  %v13007_v17 = vld [vmem:[%s19036_s19 + $0xcf4] sm:$0xf0]  ;;  %v3906_v18 = vadd.f32 %v3905_v10, %v3893_v9  ;;  %v11135_v9 = vld [vmem:[%s19036_s19 + $0xc50] sm:$0xf] }
  0xe1   : > { %4160 = vmatpush.bf16.msrb.mxu1 %v10928_v19  ;;  %v892_v19 = vld [vmem:[%s19037_s17 + $0x30] sm:$0xff]  ;;  %v12987_v10 = vld [vmem:[%s19036_s19 + $0xc54] sm:$0xf0] }
  0xe2   : > { %4173 = vmatpush.bf16.msrb.mxu2 %v10992_v21  ;;  %v10840_v21 = vor.u32 %v12913_v61, %v10839_v58  ;;  %1440 = vst [vmem:[#allocation1] ss:$4 sm:$0xff] %v892_v19  ;;  %v13021_v58 = vld [vmem:[%s19036_s19 + $0xd64] sm:$0xf0]  ;;  %v3894_v61 = vpop.f32.mrf.mxu0  ;;  %v3920_v19 = vpop.f32.mrf.mxu2 }
  0xe3   : > { %4186 = vmatpush.bf16.msrb.mxu3 %v11056_v27  ;;  %v10968_v27 = vor.u32 %v12945_v7, %v10967_v5  ;;  %v11208_v7 = vor.u32 %v13005_v56, %v11207_v53  ;;  %v11272_v8 = vor.u32 %v13021_v58, %v11271_v57  ;;  %v3933_v23 = vpop.f32.mrf.mxu3  ;;  %v11119_v53 = vld [vmem:[%s19036_s19 + $0xc30] sm:$0xf]  ;;  %v13013_v19 = vld [vmem:[%s19036_s19 + $0xd24] sm:$0xf0] }
  0xe4   : > { %4148 = vmatpush.bf16.msrb.mxu0 %v10856_v45  ;;  %v3919_v45 = vadd.f32 %v3918_v42, %v3906_v18  ;;  %v13035_v18 = vld [vmem:[%s19036_s19 + $0xdd4] sm:$0xf0]  ;;  %v11183_v56 = vld [vmem:[%s19036_s19 + $0xcb0] sm:$0xf] }
  0xe5   : > { %4161 = vmatpush.bf16.msrb.mxu1 %v10920_v47  ;;  %v900_v47 = vld [vmem:[%s19037_s17 + $0x6c] sm:$0xff] }
  0xe6   : > { %4174 = vmatpush.bf16.msrb.mxu2 %v10984_v48  ;;  %v11216_v48 = vor.u32 %v13007_v17, %v11215_v16  ;;  %1442 = vst [vmem:[#allocation1 + $0x1] ss:$4 sm:$0xff] %v900_v47  ;;  %v13019_v16 = vld [vmem:[%s19036_s19 + $0xd54] sm:$0xf0]  ;;  %v11327_v17 = vld [vmem:[%s19036_s19 + $0xdd0] sm:$0xf] }
  0xe7   : > { %4187 = vmatpush.bf16.msrb.mxu3 %v11048_v52  ;;  %v12989_v52 = vld [vmem:[%s19036_s19 + $0xc64] sm:$0xf0]  ;;  %v3907_v2 = vpop.f32.mrf.mxu1  ;;  %v11328_v42 = vor.u32 %v13035_v18, %v11327_v17  ;;  %v11239_v18 = vld [vmem:[%s19036_s19 + $0xd20] sm:$0xf] }
  0xe8   : > { %4149 = vmatpush.bf16.msrb.mxu0 %v10848_v59  ;;  %v3932_v59 = vadd.f32 %v3931_v46, %v3919_v45  ;;  %v11144_v5 = vor.u32 %v12989_v52, %v11143_v51  ;;  %v13017_v45 = vld [vmem:[%s19036_s19 + $0xd44] sm:$0xf0]  ;;  %v11319_v46 = vld [vmem:[%s19036_s19 + $0xdc0] sm:$0xf]  ;;  %v13015_v2 = vld [vmem:[%s19036_s19 + $0xd34] sm:$0xf0] }
  0xe9   : > { %4162 = vmatpush.bf16.msrb.mxu1 %v10912_v3  ;;  %v15001_v3 = vld.sshfl [vmem:[#allocation1 + $0x28] sm:$0xff pattern:$0x73625140] }
  0xea   : > { %4175 = vmatpush.bf16.msrb.mxu2 %v10976_v4  ;;  %v15003_v4 = vld.sshfl [vmem:[#allocation1 + $0x38] sm:$0xff pattern:$0x73625140]  ;;  %v13033_v47 = vld [vmem:[%s19036_s19 + $0xdc4] sm:$0xf0] }
  0xeb   : > { %4188 = vmatpush.bf16.msrb.mxu3 %v11040_v11  ;;  %v11199_v11 = vld [vmem:[%s19036_s19 + $0xcd0] sm:$0xf]  ;;  %v11320_v61 = vor.u32 %v13033_v47, %v11319_v46  ;;  %v12997_v17 = vld [vmem:[%s19036_s19 + $0xca4] sm:$0xf0] }
  0xec   : > { %4150 = vmatpush.bf16.msrb.mxu0 %v10840_v21  ;;  %v11136_v21 = vor.u32 %v12987_v10, %v11135_v9  ;;  %v11200_v24 = vor.u32 %v13003_v13, %v11199_v11  ;;  %v11184_v9 = vor.u32 %v12999_v62, %v11183_v56  ;;  %v11248_v10 = vor.u32 %v13015_v2, %v11247_v63  ;;  %v11111_v11 = vld [vmem:[%s19036_s19 + $0xc20] sm:$0xf]  ;;  %v11167_v46 = vld [vmem:[%s19036_s19 + $0xc90] sm:$0xf]  ;;  %v12993_v62 = vld [vmem:[%s19036_s19 + $0xc84] sm:$0xf0] }
  0xed   : > { %4163 = vmatpush.bf16.msrb.mxu1 %v10904_v25  ;;  %v11264_v25 = vor.u32 %v13019_v16, %v11263_v14  ;;  %v11175_v13 = vld [vmem:[%s19036_s19 + $0xca0] sm:$0xf] }
  0xee   : > { %4176 = vmatpush.bf16.msrb.mxu2 %v10968_v27  ;;  %v11127_v27 = vld [vmem:[%s19036_s19 + $0xc40] sm:$0xf] }
  0xef   : > { %4189 = vmatpush.bf16.msrb.mxu3 %v11032_v43  ;;  %4151 = vmatmul.bf16.vlgmr.msrb.gmra.mxu0 %v14973_v50  ;;  %v13001_v43 = vld [vmem:[%s19036_s19 + $0xcc4] sm:$0xf0]  ;;  %v3957_v58 = vpop.f32.mrf.mxu1  ;;  %v11095_v56 = vld [vmem:[%s19036_s19 + $0xc00] sm:$0xf] }
  0xf0   : > { %4195 = vmatpush.bf16.msra.mxu0 %v11152_v44  ;;  %4164 = vmatmul.bf16.vlgmr.msrb.gmra.mxu1 %v15001_v3  ;;  %v11255_v44 = vld [vmem:[%s19036_s19 + $0xd40] sm:$0xf]  ;;  %v11192_v51 = vor.u32 %v13001_v43, %v11191_v39  ;;  %v11240_v43 = vor.u32 %v13013_v19, %v11239_v18  ;;  %v12606_v19 = vld [vmem:[%s19036_s19 + $0x74] sm:$0xf] }
  0xf1   : > { %4208 = vmatpush.bf16.msra.mxu1 %v11216_v48  ;;  %4177 = vmatmul.bf16.vlgmr.msrb.gmra.mxu2 %v14984_v55  ;;  %v11128_v48 = vor.u32 %v12985_v36, %v11127_v27  ;;  %v11256_v52 = vor.u32 %v13017_v45, %v11255_v44  ;;  %v11103_v44 = vld [vmem:[%s19036_s19 + $0xc10] sm:$0xf]  ;;  %v12979_v45 = vld [vmem:[%s19036_s19 + $0xc14] sm:$0xf0] }
  0xf2   : > { %4221 = vmatpush.bf16.msra.mxu2 %v11280_v49  ;;  %4190 = vmatmul.bf16.vlgmr.msrb.gmra.mxu3 %v15003_v4  ;;  %v3944_v49 = vpop.f32.mrf.mxu0 }
  0xf3   : > { %4234 = vmatpush.bf16.msra.mxu3 %v11344_v54  ;;  %v12983_v54 = vld [vmem:[%s19036_s19 + $0xc34] sm:$0xf0]  ;;  %v3945_v57 = vadd.f32 %v3944_v49, %v3932_v59 }
  0xf4   : > { %4196 = vmatpush.bf16.msra.mxu0 %v11144_v5  ;;  %v11311_v5 = vld [vmem:[%s19036_s19 + $0xdb0] sm:$0xf]  ;;  %v13031_v59 = vld [vmem:[%s19036_s19 + $0xdb4] sm:$0xf0]  ;;  %v3970_v14 = vpop.f32.mrf.mxu2 }
  0xf5   : > { %4209 = vmatpush.bf16.msra.mxu1 %v11208_v7  ;;  %v3958_v7 = vadd.f32 %v3957_v58, %v3945_v57  ;;  %v11312_v16 = vor.u32 %v13031_v59, %v11311_v5  ;;  %v3983_v23 = vpop.f32.mrf.mxu3  ;;  %v12995_v49 = vld [vmem:[%s19036_s19 + $0xc94] sm:$0xf0]  ;;  %v11104_v57 = vor.u32 %v12979_v45, %v11103_v44  ;;  %v12977_v58 = vld [vmem:[%s19036_s19 + $0xc04] sm:$0xf0]  ;;  %v11223_v5 = vld [vmem:[%s19036_s19 + $0xd00] sm:$0xf] }
  0xf6   : > { %4222 = vmatpush.bf16.msra.mxu2 %v11272_v8  ;;  %v11120_v8 = vor.u32 %v12983_v54, %v11119_v53  ;;  %v11295_v53 = vld [vmem:[%s19036_s19 + $0xd90] sm:$0xf]  ;;  %v13027_v54 = vld [vmem:[%s19036_s19 + $0xd94] sm:$0xf0]  ;;  %v11168_v63 = vor.u32 %v12995_v49, %v11167_v46  ;;  %v13009_v59 = vld [vmem:[%s19036_s19 + $0xd04] sm:$0xf0]  ;;  %v11096_v18 = vor.u32 %v12977_v58, %v11095_v56 }
  0xf7   : > { %4235 = vmatpush.bf16.msra.mxu3 %v11336_v12  ;;  %v12981_v12 = vld [vmem:[%s19036_s19 + $0xc24] sm:$0xf0]  ;;  %v3959_v47 = vpop.f32.mrf.mxu1  ;;  %v901_v45 = vld [vmem:[%s19037_s17 + $0x74] sm:$0xf]  ;;  %v9673_v56 = vld [vmem:[%s19036_s19 + $0xe8] sm:$0xf0] }
  0xf8   : > { %4197 = vmatpush.bf16.msra.mxu0 %v11136_v21  ;;  %v3971_v21 = vadd.f32 %v3970_v14, %v3958_v7  ;;  %v11112_v27 = vor.u32 %v12981_v12, %v11111_v11  ;;  %v11287_v7 = vld [vmem:[%s19036_s19 + $0xd80] sm:$0xf]  ;;  %v11407_v11 = vld [vmem:[%s19036_s19 + $0xe70] sm:$0xf]  ;;  %v13055_v12 = vld [vmem:[%s19036_s19 + $0xe74] sm:$0xf0] }
  0xf9   : > { %4210 = vmatpush.bf16.msra.mxu1 %v11200_v24  ;;  %v11303_v24 = vld [vmem:[%s19036_s19 + $0xda0] sm:$0xf]  ;;  %v11471_v14 = vld [vmem:[%s19036_s19 + $0xef0] sm:$0xf]  ;;  %v13053_v44 = vld [vmem:[%s19036_s19 + $0xe64] sm:$0xf0] }
  0xfa   : > { %4223 = vmatpush.bf16.msra.mxu2 %v11264_v25  ;;  %v13029_v25 = vld [vmem:[%s19036_s19 + $0xda4] sm:$0xf0]  ;;  %v15105_v36 = vadd.f32 %v3983_v23, %v3971_v21  ;;  %v3946_v39 = vpop.f32.mrf.mxu0  ;;  %v9617_v21 = vld [vmem:[%s19036_s19 + $0x78] sm:$0xf0]  ;;  %v11391_v58 = vld [vmem:[%s19036_s19 + $0xe50] sm:$0xf] }
  0xfb   : > { %4236 = vmatpush.bf16.msra.mxu3 %v11328_v42  ;;  %v11176_v42 = vor.u32 %v12997_v17, %v11175_v13  ;;  %v893_v17 = vld [vmem:[%s19037_s17 + $0x38] sm:$0xf]  ;;  %v9620_v47 = vor.u32 %v12606_v19, %v9617_v21  ;;  %v13069_v49 = vld [vmem:[%s19036_s19 + $0xee4] sm:$0xf0]  ;;  %1446 = vst [vmem:[#allocation1 + $0x21] ss:$4 sm:$0xff] %v901_v45 }
  0xfc   : > { %4198 = vmatpush.bf16.msra.mxu0 %v11128_v48  ;;  %v11304_v48 = vor.u32 %v13029_v25, %v11303_v24  ;;  %1444 = vst [vmem:[#allocation1 + $0x20] ss:$4 sm:$0xff] %v893_v17  ;;  %v11224_v24 = vor.u32 %v13009_v59, %v11223_v5  ;;  %v12622_v25 = vld [vmem:[%s19036_s19 + $0xf4] sm:$0xf]  ;;  %v11383_v19 = vld [vmem:[%s19036_s19 + $0xe40] sm:$0xf] }
  0xfd   : > { %4211 = vmatpush.bf16.msra.mxu1 %v11192_v51  ;;  %v11231_v51 = vld [vmem:[%s19036_s19 + $0xd10] sm:$0xf]  ;;  %v3985_v13 = vpop.f32.mrf.mxu3  ;;  %v1450_v5 = vld.sshfl [vmem:[#allocation1 + $0x18] sm:$0xff pattern:$0x73625140] }
  0xfe   : > { %4224 = vmatpush.bf16.msra.mxu2 %v11256_v52  ;;  %v13011_v52 = vld [vmem:[%s19036_s19 + $0xd14] sm:$0xf0]  ;;  %v12618_v13 = vld [vmem:[%s19036_s19 + $0xd4] sm:$0xf]  ;;  %v13049_v21 = vld [vmem:[%s19036_s19 + $0xe44] sm:$0xf0] }
  0xff   : > { %4237 = vmatpush.bf16.msra.mxu3 %v11320_v61  ;;  %v11159_v61 = vld [vmem:[%s19036_s19 + $0xc80] sm:$0xf]  ;;  %v11232_v2 = vor.u32 %v13011_v52, %v11231_v51  ;;  %v12604_v51 = vld [vmem:[%s19036_s19 + $0x64] sm:$0xf] }
 0x100   : > { %4199 = vmatpush.bf16.msra.mxu0 %v11120_v8  ;;  %v3972_v8 = vpop.f32.mrf.mxu2  ;;  %v11160_v23 = vor.u32 %v12993_v62, %v11159_v61  ;;  %v13051_v61 = vld [vmem:[%s19036_s19 + $0xe54] sm:$0xf0]  ;;  %v1449_v62 = vld.sshfl [vmem:[#allocation1 + $0x10] sm:$0xff pattern:$0x73625140] }
 0x101   : > { %4212 = vmatpush.bf16.msra.mxu1 %v11184_v9  ;;  %v11296_v9 = vor.u32 %v13027_v54, %v11295_v53  ;;  %v9609_v53 = vld [vmem:[%s19036_s19 + $0x68] sm:$0xf0]  ;;  %v12620_v54 = vld [vmem:[%s19036_s19 + $0xe4] sm:$0xf]  ;;  %v11455_v8 = vld [vmem:[%s19036_s19 + $0xed0] sm:$0xf] }
 0x102   : > { %4225 = vmatpush.bf16.msra.mxu2 %v11248_v10  ;;  %v13025_v10 = vld [vmem:[%s19036_s19 + $0xd84] sm:$0xf0] }
 0x103   : > { %4238 = vmatpush.bf16.msra.mxu3 %v11312_v16  ;;  %v13071_v16 = vld [vmem:[%s19036_s19 + $0xef4] sm:$0xf0]  ;;  %v11288_v39 = vor.u32 %v13025_v10, %v11287_v7  ;;  %v9612_v7 = vor.u32 %v12604_v51, %v9609_v53  ;;  %v11375_v51 = vld [vmem:[%s19036_s19 + $0xe30] sm:$0xf] }
 0x104   : > { %4200 = vmatpush.bf16.msra.mxu0 %v11112_v27  ;;  %v9681_v27 = vld [vmem:[%s19036_s19 + $0xf8] sm:$0xf0]  ;;  %v11472_v46 = vor.u32 %v13071_v16, %v11471_v14  ;;  %v13067_v10 = vld [vmem:[%s19036_s19 + $0xed4] sm:$0xf0]  ;;  %v11392_v16 = vor.u32 %v13051_v61, %v11391_v58  ;;  %v11439_v53 = vld [vmem:[%s19036_s19 + $0xeb0] sm:$0xf] }
 0x105   : > { %4213 = vmatpush.bf16.msra.mxu1 %v11176_v42  ;;  %v11408_v42 = vor.u32 %v13055_v12, %v11407_v11  ;;  %v9684_v52 = vor.u32 %v12622_v25, %v9681_v27  ;;  %v12602_v11 = vld [vmem:[%s19036_s19 + $0x54] sm:$0xf]  ;;  %v9601_v12 = vld [vmem:[%s19036_s19 + $0x58] sm:$0xf0]  ;;  %v11456_v17 = vor.u32 %v13067_v10, %v11455_v8  ;;  %v13065_v25 = vld [vmem:[%s19036_s19 + $0xec4] sm:$0xf0] }
 0x106   : > { %4226 = vmatpush.bf16.msra.mxu2 %v11240_v43  ;;  %v11399_v43 = vld [vmem:[%s19036_s19 + $0xe60] sm:$0xf]  ;;  %v9665_v14 = vld [vmem:[%s19036_s19 + $0xd8] sm:$0xf0]  ;;  %v12600_v27 = vld [vmem:[%s19036_s19 + $0x44] sm:$0xf] }
 0x107   : > { %4239 = vmatpush.bf16.msra.mxu3 %v11304_v48  ;;  %v11463_v48 = vld [vmem:[%s19036_s19 + $0xee0] sm:$0xf]  ;;  %v9585_v58 = vld [vmem:[%s19036_s19 + $0x38] sm:$0xf0]  ;;  %v12614_v61 = vld [vmem:[%s19036_s19 + $0xb4] sm:$0xf] }
 0x108   : > { %4201 = vmatpush.bf16.msra.mxu0 %v11104_v57  ;;  %v1447_v57 = vld.sshfl [vmem:[#allocation1] sm:$0xff pattern:$0x73625140]  ;;  %v11464_v59 = vor.u32 %v13069_v49, %v11463_v48 }
 0x109   : > { %4214 = vmatpush.bf16.msra.mxu1 %v11168_v63  ;;  %v1448_v63 = vld.sshfl [vmem:[#allocation1 + $0x8] sm:$0xff pattern:$0x73625140]  ;;  %v11431_v8 = vld [vmem:[%s19036_s19 + $0xea0] sm:$0xf] }
 0x10a   : > { %4227 = vmatpush.bf16.msra.mxu2 %v11232_v2  ;;  %v11400_v2 = vor.u32 %v13053_v44, %v11399_v43  ;;  %v12616_v43 = vld [vmem:[%s19036_s19 + $0xc4] sm:$0xf]  ;;  %v9657_v44 = vld [vmem:[%s19036_s19 + $0xc8] sm:$0xf0] }
 0x10b   : > { %4240 = vmatpush.bf16.msra.mxu3 %v11296_v9  ;;  %v9676_v9 = vor.u32 %v12620_v54, %v9673_v56  ;;  %v13063_v56 = vld [vmem:[%s19036_s19 + $0xeb4] sm:$0xf0] }
 0x10c   : > { %4202 = vmatpush.bf16.msra.mxu0 %v11096_v18  ;;  %v9604_v18 = vor.u32 %v12602_v11, %v9601_v12  ;;  %v13061_v11 = vld [vmem:[%s19036_s19 + $0xea4] sm:$0xf0]  ;;  %v12596_v12 = vld [vmem:[%s19036_s19 + $0x24] sm:$0xf] }
 0x10d   : > { %4215 = vmatpush.bf16.msra.mxu1 %v11160_v23  ;;  %v11447_v23 = vld [vmem:[%s19036_s19 + $0xec0] sm:$0xf] }
 0x10e   : > { %4228 = vmatpush.bf16.msra.mxu2 %v11224_v24  ;;  %v9668_v24 = vor.u32 %v12618_v13, %v9665_v14  ;;  %v11448_v48 = vor.u32 %v13065_v25, %v11447_v23  ;;  %v9577_v13 = vld [vmem:[%s19036_s19 + $0x28] sm:$0xf0]  ;;  %v11432_v25 = vor.u32 %v13061_v11, %v11431_v8  ;;  %v12654_v8 = vld [vmem:[%s19036_s19 + $0x1f4] sm:$0xf]  ;;  %v9809_v11 = vld [vmem:[%s19036_s19 + $0x1f8] sm:$0xf0] }
 0x10f   : > { %4241 = vmatpush.bf16.msra.mxu3 %v11288_v39  ;;  %4203 = vmatmul.bf16.vlgmr.msra.gmra.mxu0 %v1447_v57  ;;  %v9593_v39 = vld [vmem:[%s19036_s19 + $0x48] sm:$0xf0]  ;;  %v12598_v57 = vld [vmem:[%s19036_s19 + $0x34] sm:$0xf] }
 0x110   : > { %4247 = vmatpush.bf16.msrb.mxu0 %v11408_v42  ;;  %4216 = vmatmul.bf16.vlgmr.msra.gmra.mxu1 %v1448_v63  ;;  %v3996_v42 = vpop.f32.mrf.mxu0  ;;  %v9596_v49 = vor.u32 %v12600_v27, %v9593_v39  ;;  %v9580_v27 = vor.u32 %v12596_v12, %v9577_v13  ;;  %v11359_v39 = vld [vmem:[%s19036_s19 + $0xe10] sm:$0xf]  ;;  %v12670_v12 = vld [vmem:[%s19036_s19 + $0x274] sm:$0xf]  ;;  %v9873_v13 = vld [vmem:[%s19036_s19 + $0x278] sm:$0xf0] }
 0x111   : > { %4260 = vmatpush.bf16.msrb.mxu1 %v11472_v46  ;;  %4229 = vmatmul.bf16.vlgmr.msra.gmra.mxu2 %v1449_v62  ;;  %v3997_v45 = vadd.f32 %v3996_v42, %v15105_v36  ;;  %v11384_v46 = vor.u32 %v13049_v21, %v11383_v19  ;;  %v9660_v36 = vor.u32 %v12616_v43, %v9657_v44  ;;  %v9649_v62 = vld [vmem:[%s19036_s19 + $0xb8] sm:$0xf0]  ;;  %v13043_v42 = vld [vmem:[%s19036_s19 + $0xe14] sm:$0xf0]  ;;  %v11423_v43 = vld [vmem:[%s19036_s19 + $0xe90] sm:$0xf] }
 0x112   : > { %4273 = vmatpush.bf16.msrb.mxu2 %v9620_v47  ;;  %4242 = vmatmul.bf16.vlgmr.msra.gmra.mxu3 %v1450_v5  ;;  %v4009_v47 = vpop.f32.mrf.mxu1  ;;  %v9588_v5 = vor.u32 %v12598_v57, %v9585_v58  ;;  %v13057_v57 = vld [vmem:[%s19036_s19 + $0xe84] sm:$0xf0]  ;;  %v12592_v58 = vld [vmem:[%s19036_s19 + $0x4] sm:$0xf] }
 0x113   : > { %4286 = vmatpush.bf16.msrb.mxu3 %v9684_v52  ;;  %v13047_v52 = vld [vmem:[%s19036_s19 + $0xe34] sm:$0xf0]  ;;  %v4010_v54 = vadd.f32 %v4009_v47, %v3997_v45  ;;  %v9569_v47 = vld [vmem:[%s19036_s19 + $0x18] sm:$0xf0] }
 0x114   : > { %4248 = vmatpush.bf16.msrb.mxu0 %v11400_v2  ;;  %v11376_v63 = vor.u32 %v13047_v52, %v11375_v51  ;;  %v11440_v2 = vor.u32 %v13063_v56, %v11439_v53  ;;  %v4022_v10 = vpop.f32.mrf.mxu2  ;;  %v13059_v45 = vld [vmem:[%s19036_s19 + $0xe94] sm:$0xf0]  ;;  %v11360_v51 = vor.u32 %v13043_v42, %v11359_v39  ;;  %v11351_v52 = vld [vmem:[%s19036_s19 + $0xe00] sm:$0xf]  ;;  %v13041_v53 = vld [vmem:[%s19036_s19 + $0xe04] sm:$0xf0] }
 0x115   : > { %4261 = vmatpush.bf16.msrb.mxu1 %v11464_v59  ;;  %v11367_v59 = vld [vmem:[%s19036_s19 + $0xe20] sm:$0xf]  ;;  %v4023_v14 = vadd.f32 %v4022_v10, %v4010_v54  ;;  %v11352_v10 = vor.u32 %v13041_v53, %v11351_v52  ;;  %v9737_v39 = vld [vmem:[%s19036_s19 + $0x168] sm:$0xf0]  ;;  %v12652_v42 = vld [vmem:[%s19036_s19 + $0x1e4] sm:$0xf] }
 0x116   : > { %4274 = vmatpush.bf16.msrb.mxu2 %v9612_v7  ;;  %v13045_v7 = vld [vmem:[%s19036_s19 + $0xe24] sm:$0xf0]  ;;  %v11415_v56 = vld [vmem:[%s19036_s19 + $0xe80] sm:$0xf] }
 0x117   : > { %4287 = vmatpush.bf16.msrb.mxu3 %v9676_v9  ;;  %v9652_v9 = vor.u32 %v12614_v61, %v9649_v62  ;;  %v11368_v21 = vor.u32 %v13045_v7, %v11367_v59  ;;  %v9561_v62 = vld [vmem:[%s19036_s19 + $0x8] sm:$0xf0]  ;;  %v12638_v59 = vld [vmem:[%s19036_s19 + $0x174] sm:$0xf]  ;;  %v9745_v7 = vld [vmem:[%s19036_s19 + $0x178] sm:$0xf0] }
 0x118   : > { %4249 = vmatpush.bf16.msrb.mxu0 %v11392_v16  ;;  %v4035_v16 = vpop.f32.mrf.mxu3  ;;  %v3998_v19 = vpop.f32.mrf.mxu0 }
 0x119   : > { %4262 = vmatpush.bf16.msrb.mxu1 %v11456_v17  ;;  %v12612_v17 = vld [vmem:[%s19036_s19 + $0xa4] sm:$0xf] }
 0x11a   : > { %4275 = vmatpush.bf16.msrb.mxu2 %v9604_v18  ;;  %v9641_v18 = vld [vmem:[%s19036_s19 + $0xa8] sm:$0xf0]  ;;  %v4011_v23 = vpop.f32.mrf.mxu1 }
 0x11b   : > { %4288 = vmatpush.bf16.msrb.mxu3 %v9668_v24  ;;  %v15306_v24 = vadd.f32 %v4035_v16, %v4023_v14  ;;  %v9644_v44 = vor.u32 %v12612_v17, %v9641_v18  ;;  %v11416_v14 = vor.u32 %v13057_v57, %v11415_v56  ;;  %v9564_v16 = vor.u32 %v12592_v58, %v9561_v62  ;;  %v12686_v17 = vld [vmem:[%s19036_s19 + $0x2f4] sm:$0xf]  ;;  %v9937_v18 = vld [vmem:[%s19036_s19 + $0x2f8] sm:$0xf0]  ;;  %v12636_v23 = vld [vmem:[%s19036_s19 + $0x164] sm:$0xf] }
 0x11c   : > { %4250 = vmatpush.bf16.msrb.mxu0 %v11384_v46  ;;  %v12594_v46 = vld [vmem:[%s19036_s19 + $0x14] sm:$0xf]  ;;  %v9740_v52 = vor.u32 %v12636_v23, %v9737_v39  ;;  %v9729_v56 = vld [vmem:[%s19036_s19 + $0x158] sm:$0xf0] }
 0x11d   : > { %4263 = vmatpush.bf16.msrb.mxu1 %v11448_v48  ;;  %v12610_v48 = vld [vmem:[%s19036_s19 + $0x94] sm:$0xf]  ;;  %v9572_v54 = vor.u32 %v12594_v46, %v9569_v47  ;;  %v9865_v46 = vld [vmem:[%s19036_s19 + $0x268] sm:$0xf0]  ;;  %v12684_v47 = vld [vmem:[%s19036_s19 + $0x2e4] sm:$0xf] }
 0x11e   : > { %4276 = vmatpush.bf16.msrb.mxu2 %v9596_v49  ;;  %v9633_v49 = vld [vmem:[%s19036_s19 + $0x98] sm:$0xf0]  ;;  %v12650_v57 = vld [vmem:[%s19036_s19 + $0x1d4] sm:$0xf] }
 0x11f   : > { %4289 = vmatpush.bf16.msrb.mxu3 %v9660_v36  ;;  %v11424_v36 = vor.u32 %v13059_v45, %v11423_v43  ;;  %v9636_v61 = vor.u32 %v12610_v48, %v9633_v49  ;;  %v9801_v43 = vld [vmem:[%s19036_s19 + $0x1e8] sm:$0xf0]  ;;  %v12668_v45 = vld [vmem:[%s19036_s19 + $0x264] sm:$0xf]  ;;  %v12666_v62 = vld [vmem:[%s19036_s19 + $0x254] sm:$0xf] }
 0x120   : > { %4251 = vmatpush.bf16.msrb.mxu0 %v11376_v63  ;;  %v12608_v63 = vld [vmem:[%s19036_s19 + $0x84] sm:$0xf]  ;;  %v9929_v49 = vld [vmem:[%s19036_s19 + $0x2e8] sm:$0xf0]  ;;  %v9804_v53 = vor.u32 %v12652_v42, %v9801_v43  ;;  %v9713_v39 = vld [vmem:[%s19036_s19 + $0x138] sm:$0xf0] }
 0x121   : > { %4264 = vmatpush.bf16.msrb.mxu1 %v11440_v2  ;;  %v9625_v2 = vld [vmem:[%s19036_s19 + $0x88] sm:$0xf0]  ;;  %v1451_v48 = vld.sshfl [vmem:[#allocation1 + $0x20] sm:$0xff pattern:$0x73625140]  ;;  %v9932_v58 = vor.u32 %v12684_v47, %v9929_v49 }
 0x122   : > { %4277 = vmatpush.bf16.msrb.mxu2 %v9588_v5  ;;  %v4024_v5 = vpop.f32.mrf.mxu2  ;;  %v9628_v19 = vor.u32 %v12608_v63, %v9625_v2  ;;  %v9857_v63 = vld [vmem:[%s19036_s19 + $0x258] sm:$0xf0]  ;;  %v12682_v2 = vld [vmem:[%s19036_s19 + $0x2d4] sm:$0xf] }
 0x123   : > { %4290 = vmatpush.bf16.msrb.mxu3 %v9652_v9  ;;  %v4037_v9 = vpop.f32.mrf.mxu3  ;;  %v9921_v5 = vld [vmem:[%s19036_s19 + $0x2d8] sm:$0xf0]  ;;  %v12646_v42 = vld [vmem:[%s19036_s19 + $0x1b4] sm:$0xf] }
 0x124   : > { %4252 = vmatpush.bf16.msrb.mxu0 %v11368_v21  ;;  %v9748_v21 = vor.u32 %v12638_v59, %v9745_v7  ;;  %v12632_v9 = vld [vmem:[%s19036_s19 + $0x144] sm:$0xf]  ;;  %v12678_v47 = vld [vmem:[%s19036_s19 + $0x2b4] sm:$0xf] }
 0x125   : > { %4265 = vmatpush.bf16.msrb.mxu1 %v11432_v25  ;;  %v9812_v25 = vor.u32 %v12654_v8, %v9809_v11  ;;  %v9860_v8 = vor.u32 %v12666_v62, %v9857_v63  ;;  %v9924_v11 = vor.u32 %v12682_v2, %v9921_v5  ;;  %v9833_v62 = vld [vmem:[%s19036_s19 + $0x228] sm:$0xf0]  ;;  %v12676_v5 = vld [vmem:[%s19036_s19 + $0x2a4] sm:$0xf] }
 0x126   : > { %4278 = vmatpush.bf16.msrb.mxu2 %v9580_v27  ;;  %v9876_v27 = vor.u32 %v12670_v12, %v9873_v13  ;;  %v12664_v12 = vld [vmem:[%s19036_s19 + $0x244] sm:$0xf]  ;;  %v9849_v13 = vld [vmem:[%s19036_s19 + $0x248] sm:$0xf0] }
 0x127   : > { %4291 = vmatpush.bf16.msrb.mxu3 %v9644_v44  ;;  %v9940_v44 = vor.u32 %v12686_v17, %v9937_v18  ;;  %v9913_v17 = vld [vmem:[%s19036_s19 + $0x2c8] sm:$0xf0] }
 0x128   : > { %4253 = vmatpush.bf16.msrb.mxu0 %v11360_v51  ;;  %v1452_v51 = vld.sshfl [vmem:[#allocation1 + $0x28] sm:$0xff pattern:$0x73625140] }
 0x129   : > { %4266 = vmatpush.bf16.msrb.mxu1 %v11424_v36  ;;  %v9868_v36 = vor.u32 %v12668_v45, %v9865_v46  ;;  %v12662_v45 = vld [vmem:[%s19036_s19 + $0x234] sm:$0xf]  ;;  %v9841_v46 = vld [vmem:[%s19036_s19 + $0x238] sm:$0xf0] }
 0x12a   : > { %4279 = vmatpush.bf16.msrb.mxu2 %v9572_v54  ;;  %v12634_v54 = vld [vmem:[%s19036_s19 + $0x154] sm:$0xf] }
 0x12b   : > { %4292 = vmatpush.bf16.msrb.mxu3 %v9636_v61  ;;  %v9793_v61 = vld [vmem:[%s19036_s19 + $0x1d8] sm:$0xf0]  ;;  %v9732_v59 = vor.u32 %v12634_v54, %v9729_v56  ;;  %v12644_v54 = vld [vmem:[%s19036_s19 + $0x1a4] sm:$0xf] }
 0x12c   : > { %4254 = vmatpush.bf16.msrb.mxu0 %v11352_v10  ;;  %v9796_v7 = vor.u32 %v12650_v57, %v9793_v61  ;;  %v9721_v10 = vld [vmem:[%s19036_s19 + $0x148] sm:$0xf0]  ;;  %v12660_v61 = vld [vmem:[%s19036_s19 + $0x224] sm:$0xf] }
 0x12d   : > { %4267 = vmatpush.bf16.msrb.mxu1 %v11416_v14  ;;  %v4048_v14 = vpop.f32.mrf.mxu0 }
 0x12e   : > { %4280 = vmatpush.bf16.msrb.mxu2 %v9564_v16  ;;  %v12680_v16 = vld [vmem:[%s19036_s19 + $0x2c4] sm:$0xf]  ;;  %v4049_v18 = vadd.f32 %v4048_v14, %v15306_v24 }
 0x12f   : > { %4293 = vmatpush.bf16.msrb.mxu3 %v9628_v19  ;;  %4255 = vmatmul.bf16.vlgmr.msrb.gmra.mxu0 %v1451_v48  ;;  %v9724_v19 = vor.u32 %v12632_v9, %v9721_v10  ;;  %v9916_v24 = vor.u32 %v12680_v16, %v9913_v17  ;;  %v9905_v48 = vld [vmem:[%s19036_s19 + $0x2b8] sm:$0xf0]  ;;  %v12658_v17 = vld [vmem:[%s19036_s19 + $0x214] sm:$0xf] }
 0x130   : > { %4299 = vmatpush.bf16.msra.mxu0 %v9748_v21  ;;  %4268 = vmatmul.bf16.vlgmr.msrb.gmra.mxu1 %v1452_v51  ;;  %v4061_v21 = vpop.f32.mrf.mxu1  ;;  %v9908_v56 = vor.u32 %v12678_v47, %v9905_v48  ;;  %v9761_v16 = vld [vmem:[%s19036_s19 + $0x198] sm:$0xf0]  ;;  %v12672_v47 = vld [vmem:[%s19036_s19 + $0x284] sm:$0xf]  ;;  %v9881_v48 = vld [vmem:[%s19036_s19 + $0x288] sm:$0xf0] }
 0x131   : > { %4312 = vmatpush.bf16.msra.mxu1 %v9812_v25  ;;  %4281 = vmatmul.bf16.vlgmr.msrb.gmra.mxu2 %v14036_v38  ;;  %v12648_v38 = vld [vmem:[%s19036_s19 + $0x1c4] sm:$0xf]  ;;  %v9852_v25 = vor.u32 %v12664_v12, %v9849_v13  ;;  %v4062_v43 = vadd.f32 %v4061_v21, %v4049_v18  ;;  %v9697_v12 = vld [vmem:[%s19036_s19 + $0x118] sm:$0xf0]  ;;  %v12642_v13 = vld [vmem:[%s19036_s19 + $0x194] sm:$0xf] }
 0x132   : > { %4325 = vmatpush.bf16.msra.mxu2 %v9876_v27  ;;  %4294 = vmatmul.bf16.vlgmr.msrb.gmra.mxu3 %v14041_v41  ;;  %v9785_v41 = vld [vmem:[%s19036_s19 + $0x1c8] sm:$0xf0]  ;;  %v12630_v27 = vld [vmem:[%s19036_s19 + $0x134] sm:$0xf]  ;;  %v9825_v18 = vld [vmem:[%s19036_s19 + $0x218] sm:$0xf0] }
 0x133   : > { %4338 = vmatpush.bf16.msra.mxu3 %v9940_v44  ;;  %v9788_v23 = vor.u32 %v12648_v38, %v9785_v41  ;;  %v9777_v44 = vld [vmem:[%s19036_s19 + $0x1b8] sm:$0xf0]  ;;  %v9716_v49 = vor.u32 %v12630_v27, %v9713_v39  ;;  %v12626_v41 = vld [vmem:[%s19036_s19 + $0x114] sm:$0xf]  ;;  %v9689_v27 = vld [vmem:[%s19036_s19 + $0x108] sm:$0xf0]  ;;  %v9764_v39 = vor.u32 %v12642_v13, %v9761_v16 }
 0x134   : > { %4300 = vmatpush.bf16.msra.mxu0 %v9740_v52  ;;  %v9780_v51 = vor.u32 %v12646_v42, %v9777_v44  ;;  %v9844_v52 = vor.u32 %v12662_v45, %v9841_v46  ;;  %v4074_v57 = vpop.f32.mrf.mxu2  ;;  %v9889_v21 = vld [vmem:[%s19036_s19 + $0x298] sm:$0xf0]  ;;  %v9828_v42 = vor.u32 %v12658_v17, %v9825_v18  ;;  %v12656_v44 = vld [vmem:[%s19036_s19 + $0x204] sm:$0xf]  ;;  %v9817_v46 = vld [vmem:[%s19036_s19 + $0x208] sm:$0xf0] }
 0x135   : > { %4313 = vmatpush.bf16.msra.mxu1 %v9804_v53  ;;  %v12628_v53 = vld [vmem:[%s19036_s19 + $0x124] sm:$0xf]  ;;  %v4075_v63 = vadd.f32 %v4074_v57, %v4062_v43  ;;  %v4087_v2 = vpop.f32.mrf.mxu3  ;;  %v9753_v43 = vld [vmem:[%s19036_s19 + $0x188] sm:$0xf0]  ;;  %v12734_v57 = vld [vmem:[%s19036_s19 + $0x474] sm:$0xf] }
 0x136   : > { %4326 = vmatpush.bf16.msra.mxu2 %v9868_v36  ;;  %v9705_v36 = vld [vmem:[%s19036_s19 + $0x128] sm:$0xf0]  ;;  %v12732_v13 = vld [vmem:[%s19036_s19 + $0x464] sm:$0xf] }
 0x137   : > { %4339 = vmatpush.bf16.msra.mxu3 %v9932_v58  ;;  %v9769_v58 = vld [vmem:[%s19036_s19 + $0x1a8] sm:$0xf0]  ;;  %v15503_v10 = vadd.f32 %v4087_v2, %v4075_v63  ;;  %v12750_v63 = vld [vmem:[%s19036_s19 + $0x4f4] sm:$0xf]  ;;  %v10193_v2 = vld [vmem:[%s19036_s19 + $0x4f8] sm:$0xf0] }
 0x138   : > { %4301 = vmatpush.bf16.msra.mxu0 %v9732_v59  ;;  %v9897_v59 = vld [vmem:[%s19036_s19 + $0x2a8] sm:$0xf0]  ;;  %v4063_v9 = vpop.f32.mrf.mxu1  ;;  %v9772_v38 = vor.u32 %v12644_v54, %v9769_v58  ;;  %v10129_v58 = vld [vmem:[%s19036_s19 + $0x478] sm:$0xf0]  ;;  %v12748_v16 = vld [vmem:[%s19036_s19 + $0x4e4] sm:$0xf] }
 0x139   : > { %4314 = vmatpush.bf16.msra.mxu1 %v9796_v7  ;;  %v4050_v7 = vpop.f32.mrf.mxu0  ;;  %v9900_v14 = vor.u32 %v12676_v5, %v9897_v59  ;;  %v9884_v5 = vor.u32 %v12672_v47, %v9881_v48  ;;  %v12700_v9 = vld [vmem:[%s19036_s19 + $0x364] sm:$0xf]  ;;  %v10185_v17 = vld [vmem:[%s19036_s19 + $0x4e8] sm:$0xf0] }
 0x13a   : > { %4327 = vmatpush.bf16.msra.mxu2 %v9860_v8  ;;  %v9708_v8 = vor.u32 %v12628_v53, %v9705_v36  ;;  %v12718_v53 = vld [vmem:[%s19036_s19 + $0x3f4] sm:$0xf]  ;;  %v12696_v48 = vld [vmem:[%s19036_s19 + $0x344] sm:$0xf] }
 0x13b   : > { %4340 = vmatpush.bf16.msra.mxu3 %v9924_v11  ;;  %v9836_v11 = vor.u32 %v12660_v61, %v9833_v62  ;;  %v9820_v62 = vor.u32 %v12656_v44, %v9817_v46  ;;  %v12746_v44 = vld [vmem:[%s19036_s19 + $0x4d4] sm:$0xf] }
 0x13c   : > { %4302 = vmatpush.bf16.msra.mxu0 %v9724_v19  ;;  %v12674_v19 = vld [vmem:[%s19036_s19 + $0x294] sm:$0xf] }
 0x13d   : > { %4315 = vmatpush.bf16.msra.mxu1 %v9788_v23  ;;  %v9700_v23 = vor.u32 %v12626_v41, %v9697_v12  ;;  %v9892_v45 = vor.u32 %v12674_v19, %v9889_v21  ;;  %v4089_v36 = vpop.f32.mrf.mxu3  ;;  %v10196_v41 = vor.u32 %v12750_v63, %v10193_v2  ;;  %v10057_v12 = vld [vmem:[%s19036_s19 + $0x3e8] sm:$0xf0]  ;;  %v12694_v63 = vld [vmem:[%s19036_s19 + $0x334] sm:$0xf]  ;;  %v9969_v2 = vld [vmem:[%s19036_s19 + $0x338] sm:$0xf0] }
 0x13e   : > { %4328 = vmatpush.bf16.msra.mxu2 %v9852_v25  ;;  %v12624_v25 = vld [vmem:[%s19036_s19 + $0x104] sm:$0xf] }
 0x13f   : > { %4341 = vmatpush.bf16.msra.mxu3 %v9916_v24  ;;  %v12640_v24 = vld [vmem:[%s19036_s19 + $0x184] sm:$0xf]  ;;  %v9692_v54 = vor.u32 %v12624_v25, %v9689_v27  ;;  %v9985_v25 = vld [vmem:[%s19036_s19 + $0x358] sm:$0xf0]  ;;  %v12714_v27 = vld [vmem:[%s19036_s19 + $0x3d4] sm:$0xf] }
 0x140   : > { %4303 = vmatpush.bf16.msra.mxu0 %v9716_v49  ;;  %v4076_v49 = vpop.f32.mrf.mxu2  ;;  %v9756_v61 = vor.u32 %v12640_v24, %v9753_v43  ;;  %v12730_v24 = vld [vmem:[%s19036_s19 + $0x454] sm:$0xf]  ;;  %v10113_v43 = vld [vmem:[%s19036_s19 + $0x458] sm:$0xf0]  ;;  %v12744_v36 = vld [vmem:[%s19036_s19 + $0x4c4] sm:$0xf] }
 0x141   : > { %4316 = vmatpush.bf16.msra.mxu1 %v9780_v51  ;;  %v12702_v51 = vld [vmem:[%s19036_s19 + $0x374] sm:$0xf]  ;;  %v10116_v47 = vor.u32 %v12730_v24, %v10113_v43  ;;  %v9977_v49 = vld [vmem:[%s19036_s19 + $0x348] sm:$0xf0] }
 0x142   : > { %4329 = vmatpush.bf16.msra.mxu2 %v9844_v52  ;;  %v10001_v52 = vld [vmem:[%s19036_s19 + $0x378] sm:$0xf0]  ;;  %v10153_v24 = vld [vmem:[%s19036_s19 + $0x4a8] sm:$0xf0] }
 0x143   : > { %4342 = vmatpush.bf16.msra.mxu3 %v9908_v56  ;;  %v10065_v56 = vld [vmem:[%s19036_s19 + $0x3f8] sm:$0xf0]  ;;  %v10004_v59 = vor.u32 %v12702_v51, %v10001_v52  ;;  %v12728_v51 = vld [vmem:[%s19036_s19 + $0x444] sm:$0xf]  ;;  %v10105_v52 = vld [vmem:[%s19036_s19 + $0x448] sm:$0xf0] }
 0x144   : > { %4304 = vmatpush.bf16.msra.mxu0 %v9708_v8  ;;  %v10068_v7 = vor.u32 %v12718_v53, %v10065_v56  ;;  %v10132_v8 = vor.u32 %v12734_v57, %v10129_v58  ;;  %v9980_v57 = vor.u32 %v12696_v48, %v9977_v49  ;;  %v12690_v48 = vld [vmem:[%s19036_s19 + $0x314] sm:$0xf]  ;;  %v9953_v49 = vld [vmem:[%s19036_s19 + $0x318] sm:$0xf0] }
 0x145   : > { %4317 = vmatpush.bf16.msra.mxu1 %v9772_v38  ;;  %v9993_v38 = vld [vmem:[%s19036_s19 + $0x368] sm:$0xf0] }
 0x146   : > { %4330 = vmatpush.bf16.msra.mxu2 %v9836_v11  ;;  %v12716_v11 = vld [vmem:[%s19036_s19 + $0x3e4] sm:$0xf]  ;;  %v9996_v18 = vor.u32 %v12700_v9, %v9993_v38  ;;  %v10097_v9 = vld [vmem:[%s19036_s19 + $0x438] sm:$0xf0]  ;;  %v12742_v38 = vld [vmem:[%s19036_s19 + $0x4b4] sm:$0xf] }
 0x147   : > { %4343 = vmatpush.bf16.msra.mxu3 %v9900_v14  ;;  %v10121_v14 = vld [vmem:[%s19036_s19 + $0x468] sm:$0xf0]  ;;  %v10060_v19 = vor.u32 %v12716_v11, %v10057_v12  ;;  %v10161_v11 = vld [vmem:[%s19036_s19 + $0x4b8] sm:$0xf0] }
 0x148   : > { %4305 = vmatpush.bf16.msra.mxu0 %v9700_v23  ;;  %v10124_v21 = vor.u32 %v12732_v13, %v10121_v14  ;;  %v12698_v23 = vld [vmem:[%s19036_s19 + $0x354] sm:$0xf]  ;;  %v12692_v14 = vld [vmem:[%s19036_s19 + $0x324] sm:$0xf] }
 0x149   : > { %4318 = vmatpush.bf16.msra.mxu1 %v9764_v39  ;;  %v10188_v39 = vor.u32 %v12748_v16, %v10185_v17  ;;  %v9961_v16 = vld [vmem:[%s19036_s19 + $0x328] sm:$0xf0]  ;;  %v12708_v17 = vld [vmem:[%s19036_s19 + $0x3a4] sm:$0xf] }
 0x14a   : > { %4331 = vmatpush.bf16.msra.mxu2 %v9828_v42  ;;  %v10049_v42 = vld [vmem:[%s19036_s19 + $0x3d8] sm:$0xf0] }
 0x14b   : > { %4344 = vmatpush.bf16.msra.mxu3 %v9892_v45  ;;  %v9988_v45 = vor.u32 %v12698_v23, %v9985_v25  ;;  %v10052_v46 = vor.u32 %v12714_v27, %v10049_v42  ;;  %v12724_v23 = vld [vmem:[%s19036_s19 + $0x424] sm:$0xf]  ;;  %v10089_v25 = vld [vmem:[%s19036_s19 + $0x428] sm:$0xf0] }
 0x14c   : > { %4306 = vmatpush.bf16.msra.mxu0 %v9692_v54  ;;  %v4100_v53 = vpop.f32.mrf.mxu0  ;;  %v10169_v54 = vld [vmem:[%s19036_s19 + $0x4c8] sm:$0xf0]  ;;  %v12740_v42 = vld [vmem:[%s19036_s19 + $0x4a4] sm:$0xf] }
 0x14d   : > { %4319 = vmatpush.bf16.msra.mxu1 %v9756_v61  ;;  %v4101_v56 = vadd.f32 %v4100_v53, %v15503_v10  ;;  %v4113_v58 = vpop.f32.mrf.mxu1  ;;  %v10172_v10 = vor.u32 %v12744_v36, %v10169_v54  ;;  %v12738_v53 = vld [vmem:[%s19036_s19 + $0x494] sm:$0xf]  ;;  %v10145_v36 = vld [vmem:[%s19036_s19 + $0x498] sm:$0xf0]  ;;  %v9956_v54 = vor.u32 %v12690_v48, %v9953_v49  ;;  %v12812_v48 = vld [vmem:[%s19036_s19 + $0x6e4] sm:$0xf] }
 0x14e   : > { %4332 = vmatpush.bf16.msra.mxu2 %v9820_v62  ;;  %v10108_v62 = vor.u32 %v12728_v51, %v10105_v52  ;;  %v12722_v51 = vld [vmem:[%s19036_s19 + $0x414] sm:$0xf]  ;;  %v10081_v52 = vld [vmem:[%s19036_s19 + $0x418] sm:$0xf0]  ;;  %v10441_v49 = vld [vmem:[%s19036_s19 + $0x6e8] sm:$0xf0] }
 0x14f   : > { %4345 = vmatpush.bf16.msra.mxu3 %v9884_v5  ;;  %4307 = vmatmul.bf16.vlgmr.msra.gmra.mxu0 %v14034_v37  ;;  %v12712_v37 = vld [vmem:[%s19036_s19 + $0x3c4] sm:$0xf]  ;;  %v12710_v5 = vld [vmem:[%s19036_s19 + $0x3b4] sm:$0xf] }
 0x150   : > { %4351 = vmatpush.bf16.msrb.mxu0 %v10004_v59  ;;  %4320 = vmatmul.bf16.vlgmr.msra.gmra.mxu1 %v14039_v40  ;;  %v10041_v40 = vld [vmem:[%s19036_s19 + $0x3c8] sm:$0xf0]  ;;  %v4114_v59 = vadd.f32 %v4113_v58, %v4101_v56  ;;  %v12688_v56 = vld [vmem:[%s19036_s19 + $0x304] sm:$0xf] }
 0x151   : > { %4364 = vmatpush.bf16.msrb.mxu1 %v10068_v7  ;;  %4333 = vmatmul.bf16.vlgmr.msra.gmra.mxu2 %v14162_v33  ;;  %v10177_v33 = vld [vmem:[%s19036_s19 + $0x4d8] sm:$0xf0]  ;;  %v10044_v61 = vor.u32 %v12712_v37, %v10041_v40  ;;  %v12706_v37 = vld [vmem:[%s19036_s19 + $0x394] sm:$0xf] }
 0x152   : > { %4377 = vmatpush.bf16.msrb.mxu2 %v10132_v8  ;;  %4346 = vmatmul.bf16.vlgmr.msra.gmra.mxu3 %v14166_v35  ;;  %v10180_v35 = vor.u32 %v12746_v44, %v10177_v33  ;;  %v10033_v7 = vld [vmem:[%s19036_s19 + $0x3b8] sm:$0xf0]  ;;  %v12726_v8 = vld [vmem:[%s19036_s19 + $0x434] sm:$0xf]  ;;  %v9964_v44 = vor.u32 %v12692_v14, %v9961_v16 }
 0x153   : > { %4390 = vmatpush.bf16.msrb.mxu3 %v10196_v41  ;;  %v9972_v41 = vor.u32 %v12694_v63, %v9969_v2  ;;  %v10036_v12 = vor.u32 %v12710_v5, %v10033_v7  ;;  %v10100_v13 = vor.u32 %v12726_v8, %v10097_v9  ;;  %v10017_v40 = vld [vmem:[%s19036_s19 + $0x398] sm:$0xf0]  ;;  %v10009_v63 = vld [vmem:[%s19036_s19 + $0x388] sm:$0xf0]  ;;  %v12720_v2 = vld [vmem:[%s19036_s19 + $0x404] sm:$0xf]  ;;  %v10148_v5 = vor.u32 %v12738_v53, %v10145_v36 }
 0x154   : > { %4352 = vmatpush.bf16.msrb.mxu0 %v9996_v18  ;;  %v10164_v18 = vor.u32 %v12742_v38, %v10161_v11  ;;  %v4102_v43 = vpop.f32.mrf.mxu0  ;;  %v10020_v58 = vor.u32 %v12706_v37, %v10017_v40  ;;  %v10137_v7 = vld [vmem:[%s19036_s19 + $0x488] sm:$0xf0]  ;;  %v12766_v9 = vld [vmem:[%s19036_s19 + $0x574] sm:$0xf]  ;;  %v10257_v38 = vld [vmem:[%s19036_s19 + $0x578] sm:$0xf0]  ;;  %v10444_v36 = vor.u32 %v12812_v48, %v10441_v49 }
 0x155   : > { %4365 = vmatpush.bf16.msrb.mxu1 %v10060_v19  ;;  %v4126_v19 = vpop.f32.mrf.mxu2  ;;  %v4115_v33 = vpop.f32.mrf.mxu1  ;;  %v12782_v11 = vld [vmem:[%s19036_s19 + $0x5f4] sm:$0xf]  ;;  %v10385_v16 = vld [vmem:[%s19036_s19 + $0x678] sm:$0xf0]  ;;  %v12780_v43 = vld [vmem:[%s19036_s19 + $0x5e4] sm:$0xf] }
 0x156   : > { %4378 = vmatpush.bf16.msrb.mxu2 %v10124_v21  ;;  %v10025_v21 = vld [vmem:[%s19036_s19 + $0x3a8] sm:$0xf0]  ;;  %v4127_v27 = vadd.f32 %v4126_v19, %v4114_v59  ;;  %v12736_v59 = vld [vmem:[%s19036_s19 + $0x484] sm:$0xf]  ;;  %v12798_v14 = vld [vmem:[%s19036_s19 + $0x674] sm:$0xf] }
 0x157   : > { %4391 = vmatpush.bf16.msrb.mxu3 %v10188_v39  ;;  %v4139_v39 = vpop.f32.mrf.mxu3  ;;  %v12814_v19 = vld [vmem:[%s19036_s19 + $0x6f4] sm:$0xf]  ;;  %v10313_v33 = vld [vmem:[%s19036_s19 + $0x5e8] sm:$0xf0]  ;;  %v12788_v49 = vld [vmem:[%s19036_s19 + $0x624] sm:$0xf] }
 0x158   : > { %4353 = vmatpush.bf16.msrb.mxu0 %v9988_v45  ;;  %v15702_v45 = vadd.f32 %v4139_v39, %v4127_v27  ;;  %v10388_v39 = vor.u32 %v12798_v14, %v10385_v16  ;;  %v12778_v53 = vld [vmem:[%s19036_s19 + $0x5d4] sm:$0xf]  ;;  %v10225_v16 = vld [vmem:[%s19036_s19 + $0x538] sm:$0xf0]  ;;  %v10281_v48 = vld [vmem:[%s19036_s19 + $0x5a8] sm:$0xf0] }
 0x159   : > { %4366 = vmatpush.bf16.msrb.mxu1 %v10052_v46  ;;  %v10028_v46 = vor.u32 %v12708_v17, %v10025_v21  ;;  %v10449_v21 = vld [vmem:[%s19036_s19 + $0x6f8] sm:$0xf0]  ;;  %v12758_v14 = vld [vmem:[%s19036_s19 + $0x534] sm:$0xf] }
 0x15a   : > { %4379 = vmatpush.bf16.msrb.mxu2 %v10116_v47  ;;  %v10092_v47 = vor.u32 %v12724_v23, %v10089_v25  ;;  %v10140_v23 = vor.u32 %v12736_v59, %v10137_v7  ;;  %v10260_v25 = vor.u32 %v12766_v9, %v10257_v38  ;;  %v10361_v59 = vld [vmem:[%s19036_s19 + $0x648] sm:$0xf0] }
 0x15b   : > { %4392 = vmatpush.bf16.msrb.mxu3 %v10180_v35  ;;  %v10156_v35 = vor.u32 %v12740_v42, %v10153_v24  ;;  %v12764_v42 = vld [vmem:[%s19036_s19 + $0x564] sm:$0xf]  ;;  %v10249_v24 = vld [vmem:[%s19036_s19 + $0x568] sm:$0xf0] }
 0x15c   : > { %4354 = vmatpush.bf16.msrb.mxu0 %v9980_v57  ;;  %v9945_v57 = vld [vmem:[%s19036_s19 + $0x308] sm:$0xf0]  ;;  %v10252_v37 = vor.u32 %v12764_v42, %v10249_v24 }
 0x15d   : > { %4367 = vmatpush.bf16.msrb.mxu1 %v10044_v61  ;;  %v10084_v61 = vor.u32 %v12722_v51, %v10081_v52  ;;  %v4128_v8 = vpop.f32.mrf.mxu2  ;;  %v12762_v51 = vld [vmem:[%s19036_s19 + $0x554] sm:$0xf]  ;;  %v10241_v52 = vld [vmem:[%s19036_s19 + $0x558] sm:$0xf0]  ;;  %v10425_v9 = vld [vmem:[%s19036_s19 + $0x6c8] sm:$0xf0] }
 0x15e   : > { %4380 = vmatpush.bf16.msrb.mxu2 %v10108_v62  ;;  %v12704_v62 = vld [vmem:[%s19036_s19 + $0x384] sm:$0xf] }
 0x15f   : > { %4393 = vmatpush.bf16.msrb.mxu3 %v10172_v10  ;;  %v10073_v10 = vld [vmem:[%s19036_s19 + $0x408] sm:$0xf0]  ;;  %v10012_v17 = vor.u32 %v12704_v62, %v10009_v63  ;;  %v12808_v8 = vld [vmem:[%s19036_s19 + $0x6c4] sm:$0xf] }
 0x160   : > { %4355 = vmatpush.bf16.msrb.mxu0 %v9972_v41  ;;  %v4141_v41 = vpop.f32.mrf.mxu3 }
 0x161   : > { %4368 = vmatpush.bf16.msrb.mxu1 %v10036_v12  ;;  %v9948_v12 = vor.u32 %v12688_v56, %v9945_v57  ;;  %v12794_v56 = vld [vmem:[%s19036_s19 + $0x654] sm:$0xf]  ;;  %v10369_v57 = vld [vmem:[%s19036_s19 + $0x658] sm:$0xf0] }
 0x162   : > { %4381 = vmatpush.bf16.msrb.mxu2 %v10100_v13  ;;  %v10321_v13 = vld [vmem:[%s19036_s19 + $0x5f8] sm:$0xf0]  ;;  %v10372_v63 = vor.u32 %v12794_v56, %v10369_v57 }
 0x163   : > { %4394 = vmatpush.bf16.msrb.mxu3 %v10164_v18  ;;  %v10076_v18 = vor.u32 %v12720_v2, %v10073_v10  ;;  %v10324_v27 = vor.u32 %v12782_v11, %v10321_v13  ;;  %v12776_v2 = vld [vmem:[%s19036_s19 + $0x5c4] sm:$0xf] }
 0x164   : > { %4356 = vmatpush.bf16.msrb.mxu0 %v9964_v44  ;;  %v10452_v44 = vor.u32 %v12814_v19, %v10449_v21  ;;  %v12792_v10 = vld [vmem:[%s19036_s19 + $0x644] sm:$0xf]  ;;  %v10289_v19 = vld [vmem:[%s19036_s19 + $0x5b8] sm:$0xf0]  ;;  %v12790_v21 = vld [vmem:[%s19036_s19 + $0x634] sm:$0xf] }
 0x165   : > { %4369 = vmatpush.bf16.msrb.mxu1 %v10028_v46  ;;  %v12796_v46 = vld [vmem:[%s19036_s19 + $0x664] sm:$0xf]  ;;  %v10364_v13 = vor.u32 %v12792_v10, %v10361_v59 }
 0x166   : > { %4382 = vmatpush.bf16.msrb.mxu2 %v10092_v47  ;;  %v10377_v47 = vld [vmem:[%s19036_s19 + $0x668] sm:$0xf0]  ;;  %v12752_v59 = vld [vmem:[%s19036_s19 + $0x504] sm:$0xf] }
 0x167   : > { %4395 = vmatpush.bf16.msrb.mxu3 %v10156_v35  ;;  %v10316_v35 = vor.u32 %v12780_v43, %v10313_v33  ;;  %v10380_v40 = vor.u32 %v12796_v46, %v10377_v47  ;;  %v12756_v43 = vld [vmem:[%s19036_s19 + $0x524] sm:$0xf] }
 0x168   : > { %4357 = vmatpush.bf16.msrb.mxu0 %v9956_v54  ;;  %v10305_v54 = vld [vmem:[%s19036_s19 + $0x5d8] sm:$0xf0]  ;;  %v12772_v33 = vld [vmem:[%s19036_s19 + $0x5a4] sm:$0xf] }
 0x169   : > { %4370 = vmatpush.bf16.msrb.mxu1 %v10020_v58  ;;  %v10433_v58 = vld [vmem:[%s19036_s19 + $0x6d8] sm:$0xf0]  ;;  %v10308_v62 = vor.u32 %v12778_v53, %v10305_v54  ;;  %v10284_v57 = vor.u32 %v12772_v33, %v10281_v48 }
 0x16a   : > { %4383 = vmatpush.bf16.msrb.mxu2 %v10084_v61  ;;  %v10244_v61 = vor.u32 %v12762_v51, %v10241_v52  ;;  %v12804_v51 = vld [vmem:[%s19036_s19 + $0x6a4] sm:$0xf]  ;;  %v10409_v52 = vld [vmem:[%s19036_s19 + $0x6a8] sm:$0xf0] }
 0x16b   : > { %4396 = vmatpush.bf16.msrb.mxu3 %v10148_v5  ;;  %v10297_v5 = vld [vmem:[%s19036_s19 + $0x5c8] sm:$0xf0] }
 0x16c   : > { %4358 = vmatpush.bf16.msrb.mxu0 %v9948_v12  ;;  %v4152_v7 = vpop.f32.mrf.mxu0  ;;  %v10300_v12 = vor.u32 %v12776_v2, %v10297_v5  ;;  %v10337_v2 = vld [vmem:[%s19036_s19 + $0x618] sm:$0xf0] }
 0x16d   : > { %4371 = vmatpush.bf16.msrb.mxu1 %v10012_v17  ;;  %v4153_v38 = vadd.f32 %v4152_v7, %v15702_v45  ;;  %v4165_v41 = vpop.f32.mrf.mxu1  ;;  %v12774_v17 = vld [vmem:[%s19036_s19 + $0x5b4] sm:$0xf]  ;;  %v10428_v45 = vor.u32 %v12808_v8, %v10425_v9  ;;  %v10401_v5 = vld [vmem:[%s19036_s19 + $0x698] sm:$0xf0]  ;;  %v10201_v7 = vld [vmem:[%s19036_s19 + $0x508] sm:$0xf0] }
 0x16e   : > { %4384 = vmatpush.bf16.msrb.mxu2 %v10076_v18  ;;  %v10292_v42 = vor.u32 %v12774_v17, %v10289_v19  ;;  %v12846_v19 = vld [vmem:[%s19036_s19 + $0x7f4] sm:$0xf] }
 0x16f   : > { %4397 = vmatpush.bf16.msrb.mxu3 %v10140_v23  ;;  %4359 = vmatmul.bf16.vlgmr.msrb.gmra.mxu0 %v14160_v32  ;;  %v12810_v32 = vld [vmem:[%s19036_s19 + $0x6d4] sm:$0xf]  ;;  %v4166_v18 = vadd.f32 %v4165_v41, %v4153_v38  ;;  %v10353_v23 = vld [vmem:[%s19036_s19 + $0x638] sm:$0xf0]  ;;  %v12768_v38 = vld [vmem:[%s19036_s19 + $0x584] sm:$0xf] }
 0x170   : > { %4403 = vmatpush.bf16.msra.mxu0 %v10260_v25  ;;  %4372 = vmatmul.bf16.vlgmr.msrb.gmra.mxu1 %v14164_v34  ;;  %v12760_v34 = vld [vmem:[%s19036_s19 + $0x544] sm:$0xf]  ;;  %v12806_v25 = vld [vmem:[%s19036_s19 + $0x6b4] sm:$0xf]  ;;  %v10356_v24 = vor.u32 %v12790_v21, %v10353_v23  ;;  %v10204_v23 = vor.u32 %v12752_v59, %v10201_v7 }
 0x171   : > { %4416 = vmatpush.bf16.msra.mxu1 %v10324_v27  ;;  %4385 = vmatmul.bf16.vlgmr.msrb.gmra.mxu2 %v14265_v22  ;;  %v10233_v22 = vld [vmem:[%s19036_s19 + $0x548] sm:$0xf0]  ;;  %v10417_v27 = vld [vmem:[%s19036_s19 + $0x6b8] sm:$0xf0]  ;;  %v12784_v41 = vld [vmem:[%s19036_s19 + $0x604] sm:$0xf] }
 0x172   : > { %4429 = vmatpush.bf16.msra.mxu2 %v10388_v39  ;;  %4398 = vmatmul.bf16.vlgmr.msrb.gmra.mxu3 %v14278_v28  ;;  %v10436_v28 = vor.u32 %v12810_v32, %v10433_v58  ;;  %v10236_v11 = vor.u32 %v12760_v34, %v10233_v22  ;;  %v10228_v39 = vor.u32 %v12758_v14, %v10225_v16  ;;  %v12754_v58 = vld [vmem:[%s19036_s19 + $0x514] sm:$0xf]  ;;  %v10273_v34 = vld [vmem:[%s19036_s19 + $0x598] sm:$0xf0]  ;;  %v12800_v14 = vld [vmem:[%s19036_s19 + $0x684] sm:$0xf] }
 0x173   : > { %4442 = vmatpush.bf16.msra.mxu3 %v10452_v44  ;;  %v10217_v44 = vld [vmem:[%s19036_s19 + $0x528] sm:$0xf0]  ;;  %v10420_v46 = vor.u32 %v12806_v25, %v10417_v27  ;;  %v12786_v22 = vld [vmem:[%s19036_s19 + $0x614] sm:$0xf]  ;;  %v10577_v25 = vld [vmem:[%s19036_s19 + $0x7f8] sm:$0xf0] }
 0x174   : > { %4404 = vmatpush.bf16.msra.mxu0 %v10252_v37  ;;  %v4178_v47 = vpop.f32.mrf.mxu2  ;;  %v10345_v37 = vld [vmem:[%s19036_s19 + $0x628] sm:$0xf0]  ;;  %v4154_v53 = vpop.f32.mrf.mxu0  ;;  %v10340_v9 = vor.u32 %v12786_v22, %v10337_v2  ;;  %v12862_v27 = vld [vmem:[%s19036_s19 + $0x874] sm:$0xf]  ;;  %v10561_v22 = vld [vmem:[%s19036_s19 + $0x7d8] sm:$0xf0] }
 0x175   : > { %4417 = vmatpush.bf16.msra.mxu1 %v10316_v35  ;;  %v4179_v35 = vadd.f32 %v4178_v47, %v4166_v18  ;;  %v4167_v54 = vpop.f32.mrf.mxu1  ;;  %v10348_v32 = vor.u32 %v12788_v49, %v10345_v37  ;;  %v10393_v16 = vld [vmem:[%s19036_s19 + $0x688] sm:$0xf0]  ;;  %v10513_v18 = vld [vmem:[%s19036_s19 + $0x778] sm:$0xf0]  ;;  %v10580_v47 = vor.u32 %v12846_v19, %v10577_v25  ;;  %v12828_v49 = vld [vmem:[%s19036_s19 + $0x764] sm:$0xf] }
 0x176   : > { %4430 = vmatpush.bf16.msra.mxu2 %v10380_v40  ;;  %v4191_v40 = vpop.f32.mrf.mxu3  ;;  %v10396_v33 = vor.u32 %v12800_v14, %v10393_v16  ;;  %v10505_v37 = vld [vmem:[%s19036_s19 + $0x768] sm:$0xf0]  ;;  %v12858_v2 = vld [vmem:[%s19036_s19 + $0x854] sm:$0xf] }
 0x177   : > { %4443 = vmatpush.bf16.msra.mxu3 %v10444_v36  ;;  %v10220_v36 = vor.u32 %v12756_v43, %v10217_v44  ;;  %v15901_v56 = vadd.f32 %v4191_v40, %v4179_v35  ;;  %v12878_v43 = vld [vmem:[%s19036_s19 + $0x8f4] sm:$0xf]  ;;  %v10705_v44 = vld [vmem:[%s19036_s19 + $0x8f8] sm:$0xf0]  ;;  %v12844_v35 = vld [vmem:[%s19036_s19 + $0x7e4] sm:$0xf] }
 0x178   : > { %4405 = vmatpush.bf16.msra.mxu0 %v10244_v61  ;;  %v10209_v61 = vld [vmem:[%s19036_s19 + $0x518] sm:$0xf0]  ;;  %v10708_v40 = vor.u32 %v12878_v43, %v10705_v44  ;;  %v10633_v53 = vld [vmem:[%s19036_s19 + $0x868] sm:$0xf0]  ;;  %v12822_v19 = vld [vmem:[%s19036_s19 + $0x734] sm:$0xf] }
 0x179   : > { %4418 = vmatpush.bf16.msra.mxu1 %v10308_v62  ;;  %v12770_v62 = vld [vmem:[%s19036_s19 + $0x594] sm:$0xf]  ;;  %v10212_v10 = vor.u32 %v12754_v58, %v10209_v61  ;;  %v10697_v54 = vld [vmem:[%s19036_s19 + $0x8e8] sm:$0xf0]  ;;  %v10673_v43 = vld [vmem:[%s19036_s19 + $0x8b8] sm:$0xf0] }
 0x17a   : > { %4431 = vmatpush.bf16.msra.mxu2 %v10372_v63  ;;  %v10412_v63 = vor.u32 %v12804_v51, %v10409_v52  ;;  %v10276_v8 = vor.u32 %v12770_v62, %v10273_v34  ;;  %v10569_v51 = vld [vmem:[%s19036_s19 + $0x7e8] sm:$0xf0]  ;;  %v12860_v52 = vld [vmem:[%s19036_s19 + $0x864] sm:$0xf]  ;;  %v12826_v61 = vld [vmem:[%s19036_s19 + $0x754] sm:$0xf] }
 0x17b   : > { %4444 = vmatpush.bf16.msra.mxu3 %v10436_v28  ;;  %v12802_v28 = vld [vmem:[%s19036_s19 + $0x694] sm:$0xf]  ;;  %v10636_v58 = vor.u32 %v12860_v52, %v10633_v53  ;;  %v10497_v62 = vld [vmem:[%s19036_s19 + $0x758] sm:$0xf0]  ;;  %v10601_v52 = vld [vmem:[%s19036_s19 + $0x828] sm:$0xf0] }
 0x17c   : > { %4406 = vmatpush.bf16.msra.mxu0 %v10236_v11  ;;  %v10265_v11 = vld [vmem:[%s19036_s19 + $0x588] sm:$0xf0]  ;;  %v4180_v17 = vpop.f32.mrf.mxu2 }
 0x17d   : > { %4419 = vmatpush.bf16.msra.mxu1 %v10300_v12  ;;  %v10404_v12 = vor.u32 %v12802_v28, %v10401_v5  ;;  %v10625_v28 = vld [vmem:[%s19036_s19 + $0x858] sm:$0xf0] }
 0x17e   : > { %4432 = vmatpush.bf16.msra.mxu2 %v10364_v13  ;;  %v10329_v13 = vld [vmem:[%s19036_s19 + $0x608] sm:$0xf0]  ;;  %v4193_v21 = vpop.f32.mrf.mxu3  ;;  %v10689_v5 = vld [vmem:[%s19036_s19 + $0x8d8] sm:$0xf0]  ;;  %v10628_v7 = vor.u32 %v12858_v2, %v10625_v28  ;;  %v12834_v28 = vld [vmem:[%s19036_s19 + $0x794] sm:$0xf] }
 0x17f   : > { %4445 = vmatpush.bf16.msra.mxu3 %v10428_v45  ;;  %v12830_v45 = vld [vmem:[%s19036_s19 + $0x774] sm:$0xf]  ;;  %v10481_v21 = vld [vmem:[%s19036_s19 + $0x738] sm:$0xf0] }
 0x180   : > { %4407 = vmatpush.bf16.msra.mxu0 %v10228_v39  ;;  %v10641_v39 = vld [vmem:[%s19036_s19 + $0x878] sm:$0xf0]  ;;  %v10484_v44 = vor.u32 %v12822_v19, %v10481_v21  ;;  %v12910_v21 = vld [vmem:[%s19036_s19 + $0x9f4] sm:$0xf] }
 0x181   : > { %4420 = vmatpush.bf16.msra.mxu1 %v10292_v42  ;;  %v10268_v42 = vor.u32 %v12768_v38, %v10265_v11  ;;  %v10644_v48 = vor.u32 %v12862_v27, %v10641_v39  ;;  %v12856_v38 = vld [vmem:[%s19036_s19 + $0x844] sm:$0xf]  ;;  %v10617_v11 = vld [vmem:[%s19036_s19 + $0x848] sm:$0xf0]  ;;  %v10545_v27 = vld [vmem:[%s19036_s19 + $0x7b8] sm:$0xf0] }
 0x182   : > { %4433 = vmatpush.bf16.msra.mxu2 %v10356_v24  ;;  %v10332_v24 = vor.u32 %v12784_v41, %v10329_v13  ;;  %v10681_v13 = vld [vmem:[%s19036_s19 + $0x8c8] sm:$0xf0]  ;;  %v12854_v39 = vld [vmem:[%s19036_s19 + $0x834] sm:$0xf]  ;;  %v10465_v2 = vld [vmem:[%s19036_s19 + $0x718] sm:$0xf0] }
 0x183   : > { %4446 = vmatpush.bf16.msra.mxu3 %v10420_v46  ;;  %v10516_v46 = vor.u32 %v12830_v45, %v10513_v18  ;;  %v10620_v18 = vor.u32 %v12856_v38, %v10617_v11  ;;  %v12832_v11 = vld [vmem:[%s19036_s19 + $0x784] sm:$0xf]  ;;  %v10769_v19 = vld [vmem:[%s19036_s19 + $0x978] sm:$0xf0] }
 0x184   : > { %4408 = vmatpush.bf16.msra.mxu0 %v10220_v36  ;;  %v12876_v36 = vld [vmem:[%s19036_s19 + $0x8e4] sm:$0xf] }
 0x185   : > { %4421 = vmatpush.bf16.msra.mxu1 %v10284_v57  ;;  %v10508_v57 = vor.u32 %v12828_v49, %v10505_v37  ;;  %v10700_v34 = vor.u32 %v12876_v36, %v10697_v54  ;;  %v12836_v49 = vld [vmem:[%s19036_s19 + $0x7a4] sm:$0xf] }
 0x186   : > { %4434 = vmatpush.bf16.msra.mxu2 %v10348_v32  ;;  %v10572_v32 = vor.u32 %v12844_v35, %v10569_v51  ;;  %v12852_v51 = vld [vmem:[%s19036_s19 + $0x824] sm:$0xf] }
 0x187   : > { %4447 = vmatpush.bf16.msra.mxu3 %v10412_v63  ;;  %v12842_v63 = vld [vmem:[%s19036_s19 + $0x7d4] sm:$0xf]  ;;  %v12868_v54 = vld [vmem:[%s19036_s19 + $0x8a4] sm:$0xf] }
 0x188   : > { %4409 = vmatpush.bf16.msra.mxu0 %v10212_v10  ;;  %v10500_v10 = vor.u32 %v12826_v61, %v10497_v62  ;;  %v10564_v59 = vor.u32 %v12842_v63, %v10561_v22  ;;  %v12818_v22 = vld [vmem:[%s19036_s19 + $0x714] sm:$0xf] }
 0x189   : > { %4422 = vmatpush.bf16.msra.mxu1 %v10276_v8  ;;  %v12840_v8 = vld [vmem:[%s19036_s19 + $0x7c4] sm:$0xf] }
 0x18a   : > { %4435 = vmatpush.bf16.msra.mxu2 %v10340_v9  ;;  %v10553_v9 = vld [vmem:[%s19036_s19 + $0x7c8] sm:$0xf0] }
 0x18b   : > { %4448 = vmatpush.bf16.msra.mxu3 %v10404_v12  ;;  %v12872_v12 = vld [vmem:[%s19036_s19 + $0x8c4] sm:$0xf]  ;;  %v10556_v45 = vor.u32 %v12840_v8, %v10553_v9 }
 0x18c   : > { %4410 = vmatpush.bf16.msra.mxu0 %v10204_v23  ;;  %v4204_v41 = vpop.f32.mrf.mxu0  ;;  %v12838_v23 = vld [vmem:[%s19036_s19 + $0x7b4] sm:$0xf]  ;;  %v12816_v8 = vld [vmem:[%s19036_s19 + $0x704] sm:$0xf] }
 0x18d   : > { %4423 = vmatpush.bf16.msra.mxu1 %v10268_v42  ;;  %v4205_v14 = vadd.f32 %v4204_v41, %v15901_v56  ;;  %v4217_v17 = vpop.f32.mrf.mxu1  ;;  %v10684_v56 = vor.u32 %v12872_v12, %v10681_v13  ;;  %v10609_v42 = vld [vmem:[%s19036_s19 + $0x838] sm:$0xf0]  ;;  %v10521_v41 = vld [vmem:[%s19036_s19 + $0x788] sm:$0xf0]  ;;  %v12848_v12 = vld [vmem:[%s19036_s19 + $0x804] sm:$0xf] }
 0x18e   : > { %4436 = vmatpush.bf16.msra.mxu2 %v10332_v24  ;;  %v12870_v24 = vld [vmem:[%s19036_s19 + $0x8b4] sm:$0xf] }
 0x18f   : > { %4449 = vmatpush.bf16.msra.mxu3 %v10396_v33  ;;  %4411 = vmatmul.bf16.vlgmr.msra.gmra.mxu0 %v14273_v26  ;;  %v12874_v26 = vld [vmem:[%s19036_s19 + $0x8d4] sm:$0xf]  ;;  %v4218_v25 = vadd.f32 %v4217_v17, %v4205_v14  ;;  %v10548_v33 = vor.u32 %v12838_v23, %v10545_v27  ;;  %v10676_v37 = vor.u32 %v12870_v24, %v10673_v43  ;;  %v10585_v14 = vld [vmem:[%s19036_s19 + $0x808] sm:$0xf0] }
 0x190   : > { %4455 = vmatpush.bf16.msrb.mxu0 %v10516_v46  ;;  %4424 = vmatmul.bf16.vlgmr.msra.gmra.mxu1 %v14280_v29  ;;  %v12824_v29 = vld [vmem:[%s19036_s19 + $0x744] sm:$0xf]  ;;  %v10612_v46 = vor.u32 %v12854_v39, %v10609_v42  ;;  %v10649_v17 = vld [vmem:[%s19036_s19 + $0x888] sm:$0xf0]  ;;  %v12926_v27 = vld [vmem:[%s19036_s19 + $0xa74] sm:$0xf]  ;;  %v10524_v42 = vor.u32 %v12832_v11, %v10521_v41  ;;  %v10588_v24 = vor.u32 %v12848_v12, %v10585_v14 }
 0x191   : > { %4468 = vmatpush.bf16.msrb.mxu1 %v10580_v47  ;;  %4437 = vmatmul.bf16.vlgmr.msra.gmra.mxu2 %v14436_v60  ;;  %v10489_v60 = vld [vmem:[%s19036_s19 + $0x748] sm:$0xf0]  ;;  %v12820_v47 = vld [vmem:[%s19036_s19 + $0x724] sm:$0xf]  ;;  %v10897_v39 = vld [vmem:[%s19036_s19 + $0xa78] sm:$0xf0] }
 0x192   : > { %4481 = vmatpush.bf16.msrb.mxu2 %v10644_v48  ;;  %4450 = vmatmul.bf16.vlgmr.msra.gmra.mxu3 %v14446_v1  ;;  %v10692_v1 = vor.u32 %v12874_v26, %v10689_v5  ;;  %v10492_v16 = vor.u32 %v12824_v29, %v10489_v60  ;;  %v10473_v48 = vld [vmem:[%s19036_s19 + $0x728] sm:$0xf0]  ;;  %v10529_v5 = vld [vmem:[%s19036_s19 + $0x798] sm:$0xf0]  ;;  %v10468_v60 = vor.u32 %v12818_v22, %v10465_v2  ;;  %v12942_v43 = vld [vmem:[%s19036_s19 + $0xaf4] sm:$0xf] }
 0x193   : > { %4494 = vmatpush.bf16.msrb.mxu3 %v10708_v40  ;;  %v10537_v40 = vld [vmem:[%s19036_s19 + $0x7a8] sm:$0xf0]  ;;  %v10657_v29 = vld [vmem:[%s19036_s19 + $0x898] sm:$0xf0]  ;;  %v10532_v9 = vor.u32 %v12834_v28, %v10529_v5  ;;  %v12922_v28 = vld [vmem:[%s19036_s19 + $0xa54] sm:$0xf] }
 0x194   : > { %4456 = vmatpush.bf16.msrb.mxu0 %v10508_v57  ;;  %v4230_v35 = vpop.f32.mrf.mxu2  ;;  %v10665_v57 = vld [vmem:[%s19036_s19 + $0x8a8] sm:$0xf0]  ;;  %v10540_v63 = vor.u32 %v12836_v49, %v10537_v40  ;;  %v12892_v49 = vld [vmem:[%s19036_s19 + $0x964] sm:$0xf]  ;;  %v10817_v2 = vld [vmem:[%s19036_s19 + $0x9d8] sm:$0xf0] }
 0x195   : > { %4469 = vmatpush.bf16.msrb.mxu1 %v10572_v32  ;;  %v4231_v53 = vadd.f32 %v4230_v35, %v4218_v25  ;;  %v4243_v36 = vpop.f32.mrf.mxu3  ;;  %v4206_v32 = vpop.f32.mrf.mxu0  ;;  %v10668_v26 = vor.u32 %v12868_v54, %v10665_v57  ;;  %v10833_v25 = vld [vmem:[%s19036_s19 + $0x9f8] sm:$0xf0]  ;;  %v12908_v35 = vld [vmem:[%s19036_s19 + $0x9e4] sm:$0xf]  ;;  %v10953_v54 = vld [vmem:[%s19036_s19 + $0xae8] sm:$0xf0] }
 0x196   : > { %4482 = vmatpush.bf16.msrb.mxu2 %v10636_v58  ;;  %v10476_v58 = vor.u32 %v12820_v47, %v10473_v48  ;;  %v4219_v61 = vpop.f32.mrf.mxu1  ;;  %v10836_v47 = vor.u32 %v12910_v21, %v10833_v25  ;;  %v10900_v48 = vor.u32 %v12926_v27, %v10897_v39  ;;  %v10945_v5 = vld [vmem:[%s19036_s19 + $0xad8] sm:$0xf0]  ;;  %v10937_v11 = vld [vmem:[%s19036_s19 + $0xac8] sm:$0xf0]  ;;  %v12934_v25 = vld [vmem:[%s19036_s19 + $0xab4] sm:$0xf] }
 0x197   : > { %4495 = vmatpush.bf16.msrb.mxu3 %v10700_v34  ;;  %v16100_v62 = vadd.f32 %v4243_v36, %v4231_v53  ;;  %v10604_v34 = vor.u32 %v12852_v51, %v10601_v52  ;;  %v10825_v51 = vld [vmem:[%s19036_s19 + $0x9e8] sm:$0xf0]  ;;  %v12924_v52 = vld [vmem:[%s19036_s19 + $0xa64] sm:$0xf]  ;;  %v12890_v61 = vld [vmem:[%s19036_s19 + $0x954] sm:$0xf] }
 0x198   : > { %4457 = vmatpush.bf16.msrb.mxu0 %v10500_v10  ;;  %v12850_v10 = vld [vmem:[%s19036_s19 + $0x814] sm:$0xf]  ;;  %v10889_v53 = vld [vmem:[%s19036_s19 + $0xa68] sm:$0xf0]  ;;  %v12940_v36 = vld [vmem:[%s19036_s19 + $0xae4] sm:$0xf]  ;;  %v10828_v32 = vor.u32 %v12908_v35, %v10825_v51 }
 0x199   : > { %4470 = vmatpush.bf16.msrb.mxu1 %v10564_v59  ;;  %v10593_v59 = vld [vmem:[%s19036_s19 + $0x818] sm:$0xf0]  ;;  %v10956_v22 = vor.u32 %v12940_v36, %v10953_v54  ;;  %v13375_v39 = vld [vmem:[%s19038_s20] sm:$0x3]  ;;  %v10857_v35 = vld [vmem:[%s19036_s19 + $0xa28] sm:$0xf0] }
 0x19a   : > { %4483 = vmatpush.bf16.msrb.mxu2 %v10628_v7  ;;  %v12866_v7 = vld [vmem:[%s19036_s19 + $0x894] sm:$0xf]  ;;  %v10596_v38 = vor.u32 %v12850_v10, %v10593_v59  ;;  %v10801_v21 = vld [vmem:[%s19036_s19 + $0x9b8] sm:$0xf0]  ;;  %v12932_v51 = vld [vmem:[%s19036_s19 + $0xaa4] sm:$0xf] }
 0x19b   : > { %4496 = vmatpush.bf16.msrb.mxu3 %v10692_v1  ;;  %v10457_v1 = vld [vmem:[%s19036_s19 + $0x708] sm:$0xf0]  ;;  %v10660_v13 = vor.u32 %v12866_v7, %v10657_v29  ;;  %v12904_v29 = vld [vmem:[%s19036_s19 + $0x9c4] sm:$0xf]  ;;  %v10929_v27 = vld [vmem:[%s19036_s19 + $0xab8] sm:$0xf0] }
 0x19c   : > { %4458 = vmatpush.bf16.msrb.mxu0 %v10492_v16  ;;  %v12864_v16 = vld [vmem:[%s19036_s19 + $0x884] sm:$0xf] }
 0x19d   : > { %4471 = vmatpush.bf16.msrb.mxu1 %v10556_v45  ;;  %v4232_v45 = vpop.f32.mrf.mxu2  ;;  %v4245_v23 = vpop.f32.mrf.mxu3 }
 0x19e   : > { %4484 = vmatpush.bf16.msrb.mxu2 %v10620_v18  ;;  %v12894_v18 = vld [vmem:[%s19036_s19 + $0x974] sm:$0xf]  ;;  %v10737_v45 = vld [vmem:[%s19036_s19 + $0x938] sm:$0xf0] }
 0x19f   : > { %4497 = vmatpush.bf16.msrb.mxu3 %v10684_v56  ;;  %v10460_v56 = vor.u32 %v12816_v8, %v10457_v1  ;;  %v12920_v8 = vld [vmem:[%s19036_s19 + $0xa44] sm:$0xf]  ;;  %v10873_v1 = vld [vmem:[%s19036_s19 + $0xa48] sm:$0xf0]  ;;  %v12918_v23 = vld [vmem:[%s19036_s19 + $0xa34] sm:$0xf] }
 0x1a0   : > { %4459 = vmatpush.bf16.msrb.mxu0 %v10484_v44  ;;  %v10961_v44 = vld [vmem:[%s19036_s19 + $0xaf8] sm:$0xf0] }
 0x1a1   : > { %4472 = vmatpush.bf16.msrb.mxu1 %v10548_v33  ;;  %v10652_v33 = vor.u32 %v12864_v16, %v10649_v17  ;;  %v10964_v40 = vor.u32 %v12942_v43, %v10961_v44  ;;  %v10876_v16 = vor.u32 %v12920_v8, %v10873_v1  ;;  %v12886_v17 = vld [vmem:[%s19036_s19 + $0x934] sm:$0xf]  ;;  %v10777_v8 = vld [vmem:[%s19036_s19 + $0x988] sm:$0xf0]  ;;  %v12912_v1 = vld [vmem:[%s19036_s19 + $0xa04] sm:$0xf] }
 0x1a2   : > { %4485 = vmatpush.bf16.msrb.mxu2 %v10612_v46  ;;  %v10772_v46 = vor.u32 %v12894_v18, %v10769_v19  ;;  %v12902_v18 = vld [vmem:[%s19036_s19 + $0x9b4] sm:$0xf] }
 0x1a3   : > { %4498 = vmatpush.bf16.msrb.mxu3 %v10676_v37  ;;  %v10761_v37 = vld [vmem:[%s19036_s19 + $0x968] sm:$0xf0]  ;;  %v10804_v43 = vor.u32 %v12902_v18, %v10801_v21  ;;  %v11089_v18 = vld [vmem:[%s19036_s19 + $0xbf8] sm:$0xf0] }
 0x1a4   : > { %4460 = vmatpush.bf16.msrb.mxu0 %v10476_v58  ;;  %v10764_v57 = vor.u32 %v12892_v49, %v10761_v37  ;;  %v10892_v58 = vor.u32 %v12924_v52, %v10889_v53  ;;  %v10793_v49 = vld [vmem:[%s19036_s19 + $0x9a8] sm:$0xf0]  ;;  %v12916_v37 = vld [vmem:[%s19036_s19 + $0xa24] sm:$0xf]  ;;  %v11153_v21 = vld [vmem:[%s19036_s19 + $0xc78] sm:$0xf0] }
 0x1a5   : > { %4473 = vmatpush.bf16.msrb.mxu1 %v10540_v63  ;;  %v10753_v63 = vld [vmem:[%s19036_s19 + $0x958] sm:$0xf0]  ;;  %v10921_v52 = vld [vmem:[%s19036_s19 + $0xaa8] sm:$0xf0] }
 0x1a6   : > { %4486 = vmatpush.bf16.msrb.mxu2 %v10604_v34  ;;  %v12906_v34 = vld [vmem:[%s19036_s19 + $0x9d4] sm:$0xf]  ;;  %v10756_v10 = vor.u32 %v12890_v61, %v10753_v63  ;;  %v10860_v61 = vor.u32 %v12916_v37, %v10857_v35  ;;  %v11145_v37 = vld [vmem:[%s19036_s19 + $0xc68] sm:$0xf0]  ;;  %v13004_v35 = vld [vmem:[%s19036_s19 + $0xce4] sm:$0xf] }
 0x1a7   : > { %4499 = vmatpush.bf16.msrb.mxu3 %v10668_v26  ;;  %v10881_v26 = vld [vmem:[%s19036_s19 + $0xa58] sm:$0xf0]  ;;  %v10820_v59 = vor.u32 %v12906_v34, %v10817_v2  ;;  %v12882_v63 = vld [vmem:[%s19036_s19 + $0x914] sm:$0xf] }
 0x1a8   : > { %4461 = vmatpush.bf16.msrb.mxu0 %v10468_v60  ;;  %v10884_v7 = vor.u32 %v12922_v28, %v10881_v26  ;;  %v10809_v60 = vld [vmem:[%s19036_s19 + $0x9c8] sm:$0xf0]  ;;  %v10721_v34 = vld [vmem:[%s19036_s19 + $0x918] sm:$0xf0]  ;;  %v10924_v28 = vor.u32 %v12932_v51, %v10921_v52 }
 0x1a9   : > { %4474 = vmatpush.bf16.msrb.mxu1 %v10532_v9  ;;  %v10812_v14 = vor.u32 %v12904_v29, %v10809_v60  ;;  %v10785_v26 = vld [vmem:[%s19036_s19 + $0x998] sm:$0xf0]  ;;  %v12896_v60 = vld [vmem:[%s19036_s19 + $0x984] sm:$0xf] }
 0x1aa   : > { %4487 = vmatpush.bf16.msrb.mxu2 %v10596_v38  ;;  %v12936_v38 = vld [vmem:[%s19036_s19 + $0xac4] sm:$0xf] }
 0x1ab   : > { %4500 = vmatpush.bf16.msrb.mxu3 %v10660_v13 }
 0x1ac   : > { %4462 = vmatpush.bf16.msrb.mxu0 %v10460_v56  ;;  %v4256_v9 = vpop.f32.mrf.mxu0  ;;  %v10865_v56 = vld [vmem:[%s19036_s19 + $0xa38] sm:$0xf0] }
 0x1ad   : > { %4475 = vmatpush.bf16.msrb.mxu1 %v10524_v42  ;;  %v4257_v41 = vadd.f32 %v4256_v9, %v16100_v62  ;;  %v4269_v13 = vpop.f32.mrf.mxu1  ;;  %v10940_v62 = vor.u32 %v12936_v38, %v10937_v11  ;;  %v1385_v42 = vperm.slane %v13375_v39, 1  ;;  %v10868_v44 = vor.u32 %v12918_v23, %v10865_v56  ;;  %v10841_v38 = vld [vmem:[%s19036_s19 + $0xa08] sm:$0xf0]  ;;  %v12928_v11 = vld [vmem:[%s19036_s19 + $0xa84] sm:$0xf] }
 0x1ae   : > { %4488 = vmatpush.bf16.msrb.mxu2 %v10588_v24  ;;  %v10740_v24 = vor.u32 %v12886_v17, %v10737_v45  ;;  %v10780_v23 = vor.u32 %v12896_v60, %v10777_v8  ;;  %v10844_v56 = vor.u32 %v12912_v1, %v10841_v38  ;;  %v12950_v8 = vld [vmem:[%s19036_s19 + $0xb34] sm:$0xf]  ;;  %v10993_v1 = vld [vmem:[%s19036_s19 + $0xb38] sm:$0xf0] }
 0x1af   : > { %4501 = vmatpush.bf16.msrb.mxu3 %v10652_v33  ;;  %4463 = vmatmul.bf16.vlgmr.msrb.gmra.mxu0 %v14444_v0  ;;  %v12938_v0 = vld [vmem:[%s19036_s19 + $0xad4] sm:$0xf]  ;;  %v16260_v19 = vadd.f32 %v4269_v13, %v4257_v41  ;;  %v12884_v33 = vld [vmem:[%s19036_s19 + $0x924] sm:$0xf]  ;;  %v10905_v41 = vld [vmem:[%s19036_s19 + $0xa88] sm:$0xf0] }
 0x1b0   : > { %4507 = vmatpush.bf16.msra.mxu0 %v10772_v46  ;;  %4476 = vmatmul.bf16.vlgmr.msrb.gmra.mxu1 %v14454_v6  ;;  %v12888_v6 = vld [vmem:[%s19036_s19 + $0x944] sm:$0xf]  ;;  %v10729_v46 = vld [vmem:[%s19036_s19 + $0x928] sm:$0xf0]  ;;  %v12958_v13 = vld [vmem:[%s19036_s19 + $0xb74] sm:$0xf]  ;;  %v10908_v39 = vor.u32 %v12928_v11, %v10905_v41 }
 0x1b1   : > { %4520 = vmatpush.bf16.msra.mxu1 %v10836_v47  ;;  %4489 = vmatmul.bf16.vlgmr.msrb.gmra.mxu2 %v14760_v15  ;;  %v10745_v15 = vld [vmem:[%s19036_s19 + $0x948] sm:$0xf0]  ;;  %v12900_v47 = vld [vmem:[%s19036_s19 + $0x9a4] sm:$0xf] }
 0x1b2   : > { %4533 = vmatpush.bf16.msra.mxu2 %v10900_v48  ;;  %4502 = vmatmul.bf16.vlgmr.msrb.gmra.mxu3 %v14788_v30  ;;  %v10948_v30 = vor.u32 %v12938_v0, %v10945_v5  ;;  %v10748_v12 = vor.u32 %v12888_v6, %v10745_v15  ;;  %v10932_v48 = vor.u32 %v12934_v25, %v10929_v27  ;;  %v12914_v0 = vld [vmem:[%s19036_s19 + $0xa14] sm:$0xf]  ;;  %v10849_v5 = vld [vmem:[%s19036_s19 + $0xa18] sm:$0xf0]  ;;  %v12880_v6 = vld [vmem:[%s19036_s19 + $0x904] sm:$0xf] }
 0x1b3   : > { %4546 = vmatpush.bf16.msra.mxu3 %v10964_v40  ;;  %v10713_v15 = vld [vmem:[%s19036_s19 + $0x908] sm:$0xf0]  ;;  %v13006_v25 = vld [vmem:[%s19036_s19 + $0xcf4] sm:$0xf]  ;;  %v11217_v27 = vld [vmem:[%s19036_s19 + $0xcf8] sm:$0xf0] }
 0x1b4   : > { %4508 = vmatpush.bf16.msra.mxu0 %v10764_v57  ;;  %v4282_v40 = vpop.f32.mrf.mxu2  ;;  %v4258_v54 = vpop.f32.mrf.mxu0  ;;  %v10732_v57 = vor.u32 %v12884_v33, %v10729_v46  ;;  %v10716_v45 = vor.u32 %v12880_v6, %v10713_v15  ;;  %v11017_v33 = vld [vmem:[%s19036_s19 + $0xb68] sm:$0xf0]  ;;  %v12972_v46 = vld [vmem:[%s19036_s19 + $0xbe4] sm:$0xf] }
 0x1b5   : > { %4521 = vmatpush.bf16.msra.mxu1 %v10828_v32  ;;  %v4283_v53 = vadd.f32 %v4282_v40, %v1385_v42  ;;  %v4295_v36 = vpop.f32.mrf.mxu3  ;;  %v4271_v32 = vpop.f32.mrf.mxu1  ;;  %v11209_v40 = vld [vmem:[%s19036_s19 + $0xce8] sm:$0xf0]  ;;  %v11009_v54 = vld [vmem:[%s19036_s19 + $0xb58] sm:$0xf0] }
 0x1b6   : > { %4534 = vmatpush.bf16.msra.mxu2 %v10892_v58  ;;  %v10796_v58 = vor.u32 %v12900_v47, %v10793_v49  ;;  %v11220_v47 = vor.u32 %v13006_v25, %v11217_v27  ;;  %v12988_v49 = vld [vmem:[%s19036_s19 + $0xc64] sm:$0xf]  ;;  %v11212_v32 = vor.u32 %v13004_v35, %v11209_v40  ;;  %v11193_v6 = vld [vmem:[%s19036_s19 + $0xcc8] sm:$0xf0]  ;;  %v12946_v40 = vld [vmem:[%s19036_s19 + $0xb14] sm:$0xf] }
 0x1b7   : > { %4547 = vmatpush.bf16.msra.mxu3 %v10956_v22  ;;  %v12898_v22 = vld [vmem:[%s19036_s19 + $0x994] sm:$0xf]  ;;  %v16313_v2 = vadd.f32 %v4295_v36, %v4283_v53  ;;  %v11148_v53 = vor.u32 %v12988_v49, %v11145_v37 }
 0x1b8   : > { %4509 = vmatpush.bf16.msra.mxu0 %v10756_v10  ;;  %v12930_v10 = vld [vmem:[%s19036_s19 + $0xa94] sm:$0xf]  ;;  %v10788_v29 = vor.u32 %v12898_v22, %v10785_v26 }
 0x1b9   : > { %4522 = vmatpush.bf16.msra.mxu1 %v10820_v59  ;;  %v10913_v59 = vld [vmem:[%s19036_s19 + $0xa98] sm:$0xf0]  ;;  %v12954_v36 = vld [vmem:[%s19036_s19 + $0xb54] sm:$0xf] }
 0x1ba   : > { %4535 = vmatpush.bf16.msra.mxu2 %v10884_v7  ;;  %v10724_v7 = vor.u32 %v12882_v63, %v10721_v34  ;;  %v10916_v9 = vor.u32 %v12930_v10, %v10913_v59  ;;  %v11137_v63 = vld [vmem:[%s19036_s19 + $0xc58] sm:$0xf0]  ;;  %v11012_v22 = vor.u32 %v12954_v36, %v11009_v54  ;;  %v12984_v10 = vld [vmem:[%s19036_s19 + $0xc44] sm:$0xf]  ;;  %v11129_v59 = vld [vmem:[%s19036_s19 + $0xc48] sm:$0xf0] }
 0x1bb   : > { %4548 = vmatpush.bf16.msra.mxu3 %v10948_v30  ;;  %v10852_v30 = vor.u32 %v12914_v0, %v10849_v5  ;;  %v11201_v34 = vld [vmem:[%s19036_s19 + $0xcd8] sm:$0xf0]  ;;  %v12968_v0 = vld [vmem:[%s19036_s19 + $0xbc4] sm:$0xf]  ;;  %v11065_v5 = vld [vmem:[%s19036_s19 + $0xbc8] sm:$0xf0]  ;;  %v11132_v60 = vor.u32 %v12984_v10, %v11129_v59 }
 0x1bc   : > { %4510 = vmatpush.bf16.msra.mxu0 %v10748_v12  ;;  %v4284_v12 = vpop.f32.mrf.mxu2  ;;  %v11041_v54 = vld [vmem:[%s19036_s19 + $0xb98] sm:$0xf0]  ;;  %v12992_v10 = vld [vmem:[%s19036_s19 + $0xc84] sm:$0xf]  ;;  %v11161_v59 = vld [vmem:[%s19036_s19 + $0xc88] sm:$0xf0] }
 0x1bd   : > { %4523 = vmatpush.bf16.msra.mxu1 %v10812_v14  ;;  %v11025_v14 = vld [vmem:[%s19036_s19 + $0xb78] sm:$0xf0]  ;;  %v4297_v17 = vpop.f32.mrf.mxu3 }
 0x1be   : > { %4536 = vmatpush.bf16.msra.mxu2 %v10876_v16  ;;  %v12974_v16 = vld [vmem:[%s19036_s19 + $0xbf4] sm:$0xf]  ;;  %v11028_v42 = vor.u32 %v12958_v13, %v11025_v14  ;;  %v11057_v12 = vld [vmem:[%s19036_s19 + $0xbb8] sm:$0xf0] }
 0x1bf   : > { %4549 = vmatpush.bf16.msra.mxu3 %v10940_v62  ;;  %v12990_v62 = vld [vmem:[%s19036_s19 + $0xc74] sm:$0xf]  ;;  %v11121_v14 = vld [vmem:[%s19036_s19 + $0xc38] sm:$0xf0] }
 0x1c0   : > { %4511 = vmatpush.bf16.msra.mxu0 %v10740_v24  ;;  %v11092_v24 = vor.u32 %v12974_v16, %v11089_v18  ;;  %v12982_v13 = vld [vmem:[%s19036_s19 + $0xc34] sm:$0xf] }
 0x1c1   : > { %4524 = vmatpush.bf16.msra.mxu1 %v10804_v43  ;;  %v11156_v43 = vor.u32 %v12990_v62, %v11153_v21  ;;  %v12998_v16 = vld [vmem:[%s19036_s19 + $0xcb4] sm:$0xf]  ;;  %v11124_v62 = vor.u32 %v12982_v13, %v11121_v14  ;;  %v12948_v21 = vld [vmem:[%s19036_s19 + $0xb24] sm:$0xf] }
 0x1c2   : > { %4537 = vmatpush.bf16.msra.mxu2 %v10868_v44  ;;  %v12956_v44 = vld [vmem:[%s19036_s19 + $0xb64] sm:$0xf] }
 0x1c3   : > { %4550 = vmatpush.bf16.msra.mxu3 %v10932_v48  ;;  %v11081_v48 = vld [vmem:[%s19036_s19 + $0xbe8] sm:$0xf0]  ;;  %v11020_v51 = vor.u32 %v12956_v44, %v11017_v33  ;;  %v12996_v33 = vld [vmem:[%s19036_s19 + $0xca4] sm:$0xf] }
 0x1c4   : > { %4512 = vmatpush.bf16.msra.mxu0 %v10732_v57  ;;  %v11084_v52 = vor.u32 %v12972_v46, %v11081_v48  ;;  %v12970_v57 = vld [vmem:[%s19036_s19 + $0xbd4] sm:$0xf]  ;;  %v11177_v46 = vld [vmem:[%s19036_s19 + $0xca8] sm:$0xf0] }
 0x1c5   : > { %4525 = vmatpush.bf16.msra.mxu1 %v10796_v58  ;;  %v11073_v58 = vld [vmem:[%s19036_s19 + $0xbd8] sm:$0xf0]  ;;  %v11180_v36 = vor.u32 %v12996_v33, %v11177_v46 }
 0x1c6   : > { %4538 = vmatpush.bf16.msra.mxu2 %v10860_v61  ;;  %v12986_v61 = vld [vmem:[%s19036_s19 + $0xc54] sm:$0xf]  ;;  %v11329_v46 = vld [vmem:[%s19036_s19 + $0xdd8] sm:$0xf0] }
 0x1c7   : > { %4551 = vmatpush.bf16.msra.mxu3 %v10924_v28  ;;  %v11076_v28 = vor.u32 %v12970_v57, %v11073_v58  ;;  %v11140_v26 = vor.u32 %v12986_v61, %v11137_v63  ;;  %v12978_v57 = vld [vmem:[%s19036_s19 + $0xc14] sm:$0xf]  ;;  %v11169_v61 = vld [vmem:[%s19036_s19 + $0xc98] sm:$0xf0] }
 0x1c8   : > { %4513 = vmatpush.bf16.msra.mxu0 %v10724_v7  ;;  %v13000_v7 = vld [vmem:[%s19036_s19 + $0xcc4] sm:$0xf]  ;;  %v12994_v58 = vld [vmem:[%s19036_s19 + $0xc94] sm:$0xf] }
 0x1c9   : > { %4526 = vmatpush.bf16.msra.mxu1 %v10788_v29  ;;  %v11196_v41 = vor.u32 %v13000_v7, %v11193_v6  ;;  %v13022_v6 = vld [vmem:[%s19036_s19 + $0xd74] sm:$0xf] }
 0x1ca   : > { %4539 = vmatpush.bf16.msra.mxu2 %v10852_v30  ;;  %v11068_v30 = vor.u32 %v12968_v0, %v11065_v5  ;;  %v11097_v5 = vld [vmem:[%s19036_s19 + $0xc08] sm:$0xf0] }
 0x1cb   : > { %4552 = vmatpush.bf16.msra.mxu3 %v10916_v9  ;;  %v12966_v9 = vld [vmem:[%s19036_s19 + $0xbb4] sm:$0xf] }
 0x1cc   : > { %4514 = vmatpush.bf16.msra.mxu0 %v10716_v45  ;;  %v4308_v29 = vpop.f32.mrf.mxu0  ;;  %v10996_v45 = vor.u32 %v12950_v8, %v10993_v1  ;;  %v11060_v18 = vor.u32 %v12966_v9, %v11057_v12  ;;  %v13054_v8 = vld [vmem:[%s19036_s19 + $0xe74] sm:$0xf]  ;;  %v11409_v1 = vld [vmem:[%s19036_s19 + $0xe78] sm:$0xf0]  ;;  %v11164_v12 = vor.u32 %v12992_v10, %v11161_v59 }
 0x1cd   : > { %4527 = vmatpush.bf16.msra.mxu1 %v10780_v23  ;;  %v4309_v38 = vadd.f32 %v4308_v29, %v16313_v2  ;;  %v4321_v11 = vpop.f32.mrf.mxu1  ;;  %v11185_v2 = vld [vmem:[%s19036_s19 + $0xcb8] sm:$0xf0]  ;;  %v10985_v23 = vld [vmem:[%s19036_s19 + $0xb28] sm:$0xf0]  ;;  %v13038_v29 = vld [vmem:[%s19036_s19 + $0xdf4] sm:$0xf] }
 0x1ce   : > { %4540 = vmatpush.bf16.msra.mxu2 %v10844_v56  ;;  %v12964_v56 = vld [vmem:[%s19036_s19 + $0xba4] sm:$0xf]  ;;  %v11188_v27 = vor.u32 %v12998_v16, %v11185_v2  ;;  %v11412_v16 = vor.u32 %v13054_v8, %v11409_v1  ;;  %v11313_v59 = vld [vmem:[%s19036_s19 + $0xdb8] sm:$0xf0] }
 0x1cf   : > { %4553 = vmatpush.bf16.msra.mxu3 %v10908_v39  ;;  %4515 = vmatmul.bf16.vlgmr.msra.gmra.mxu0 %v14771_v20  ;;  %v13002_v20 = vld [vmem:[%s19036_s19 + $0xcd4] sm:$0xf]  ;;  %v4322_v17 = vadd.f32 %v4321_v11, %v4309_v38  ;;  %v11049_v39 = vld [vmem:[%s19036_s19 + $0xba8] sm:$0xf0]  ;;  %v13020_v2 = vld [vmem:[%s19036_s19 + $0xd64] sm:$0xf] }
 0x1d0   : > { %4559 = vmatpush.bf16.msrb.mxu0 %v11028_v42  ;;  %4528 = vmatmul.bf16.vlgmr.msra.gmra.mxu1 %v14790_v31  ;;  %v12952_v31 = vld [vmem:[%s19036_s19 + $0xb44] sm:$0xf]  ;;  %v11052_v37 = vor.u32 %v12964_v56, %v11049_v39  ;;  %v13070_v11 = vld [vmem:[%s19036_s19 + $0xef4] sm:$0xf] }
 0x1d1   : > { %4572 = vmatpush.bf16.msrb.mxu1 %v11092_v24  ;;  %4541 = vmatmul.bf16.vlgmr.msra.gmra.mxu2 %v14973_v50  ;;  %v11001_v50 = vld [vmem:[%s19036_s19 + $0xb48] sm:$0xf0]  ;;  %v12980_v42 = vld [vmem:[%s19036_s19 + $0xc24] sm:$0xf] }
 0x1d2   : > { %4585 = vmatpush.bf16.msrb.mxu2 %v11156_v43  ;;  %4554 = vmatmul.bf16.vlgmr.msra.gmra.mxu3 %v15001_v3  ;;  %v11204_v3 = vor.u32 %v13002_v20, %v11201_v34  ;;  %v11004_v15 = vor.u32 %v12952_v31, %v11001_v50  ;;  %v11113_v24 = vld [vmem:[%s19036_s19 + $0xc28] sm:$0xf0]  ;;  %v12944_v20 = vld [vmem:[%s19036_s19 + $0xb04] sm:$0xf] }
 0x1d3   : > { %4598 = vmatpush.bf16.msrb.mxu3 %v11220_v47  ;;  %v10988_v47 = vor.u32 %v12948_v21, %v10985_v23  ;;  %v11116_v35 = vor.u32 %v12980_v42, %v11113_v24  ;;  %v10969_v34 = vld [vmem:[%s19036_s19 + $0xb08] sm:$0xf0]  ;;  %v12976_v50 = vld [vmem:[%s19036_s19 + $0xc04] sm:$0xf]  ;;  %v13018_v24 = vld [vmem:[%s19036_s19 + $0xd54] sm:$0xf] }
 0x1d4   : > { %4560 = vmatpush.bf16.msrb.mxu0 %v11020_v51  ;;  %v4334_v25 = vpop.f32.mrf.mxu2  ;;  %v4310_v49 = vpop.f32.mrf.mxu0  ;;  %v10977_v51 = vld [vmem:[%s19036_s19 + $0xb18] sm:$0xf0]  ;;  %v11033_v31 = vld [vmem:[%s19036_s19 + $0xb88] sm:$0xf0]  ;;  %v11100_v38 = vor.u32 %v12976_v50, %v11097_v5  ;;  %v13052_v21 = vld [vmem:[%s19036_s19 + $0xe64] sm:$0xf] }
 0x1d5   : > { %4573 = vmatpush.bf16.msrb.mxu1 %v11084_v52  ;;  %v4335_v43 = vadd.f32 %v4334_v25, %v4322_v17  ;;  %v4347_v44 = vpop.f32.mrf.mxu3  ;;  %v12962_v52 = vld [vmem:[%s19036_s19 + $0xb94] sm:$0xf]  ;;  %v10980_v63 = vor.u32 %v12946_v40, %v10977_v51  ;;  %v11273_v17 = vld [vmem:[%s19036_s19 + $0xd68] sm:$0xf0]  ;;  %v13068_v56 = vld [vmem:[%s19036_s19 + $0xee4] sm:$0xf] }
 0x1d6   : > { %4586 = vmatpush.bf16.msrb.mxu2 %v11148_v53  ;;  %v4323_v53 = vpop.f32.mrf.mxu1  ;;  %v11401_v23 = vld [vmem:[%s19036_s19 + $0xe68] sm:$0xf0]  ;;  %v11393_v49 = vld [vmem:[%s19036_s19 + $0xe58] sm:$0xf0]  ;;  %v13030_v5 = vld [vmem:[%s19036_s19 + $0xdb4] sm:$0xf] }
 0x1d7   : > { %4599 = vmatpush.bf16.msrb.mxu3 %v11212_v32  ;;  %v16503_v48 = vadd.f32 %v4347_v44, %v4335_v43  ;;  %v11105_v32 = vld [vmem:[%s19036_s19 + $0xc18] sm:$0xf0]  ;;  %v11465_v25 = vld [vmem:[%s19036_s19 + $0xee8] sm:$0xf0]  ;;  %v11404_v42 = vor.u32 %v13052_v21, %v11401_v23  ;;  %v13034_v44 = vld [vmem:[%s19036_s19 + $0xdd4] sm:$0xf] }
 0x1d8   : > { %4561 = vmatpush.bf16.msrb.mxu0 %v11012_v22  ;;  %v11044_v22 = vor.u32 %v12962_v52, %v11041_v54  ;;  %v11265_v43 = vld [vmem:[%s19036_s19 + $0xd58] sm:$0xf0]  ;;  %v11468_v33 = vor.u32 %v13068_v56, %v11465_v25  ;;  %v13377_v40 = vld.sshfl [vmem:[#allocation1 + $0x8] sm:$0xff pattern:$0x73625140]  ;;  %v11332_v52 = vor.u32 %v13034_v44, %v11329_v46 }
 0x1d9   : > { %4574 = vmatpush.bf16.msrb.mxu1 %v11076_v28  ;;  %v11108_v28 = vor.u32 %v12978_v57, %v11105_v32  ;;  %v11268_v51 = vor.u32 %v13018_v24, %v11265_v43  ;;  %v13032_v54 = vld [vmem:[%s19036_s19 + $0xdc4] sm:$0xf]  ;;  %v11321_v32 = vld [vmem:[%s19036_s19 + $0xdc8] sm:$0xf0]  ;;  %v11297_v43 = vld [vmem:[%s19036_s19 + $0xd98] sm:$0xf0] }
 0x1da   : > { %4587 = vmatpush.bf16.msrb.mxu2 %v11140_v26  ;;  %v12960_v26 = vld [vmem:[%s19036_s19 + $0xb84] sm:$0xf]  ;;  %v13042_v44 = vld [vmem:[%s19036_s19 + $0xe14] sm:$0xf] }
 0x1db   : > { %4600 = vmatpush.bf16.msrb.mxu3 %v11204_v3  ;;  %v11172_v3 = vor.u32 %v12994_v58, %v11169_v61  ;;  %v11036_v9 = vor.u32 %v12960_v26, %v11033_v31  ;;  %v13048_v58 = vld [vmem:[%s19036_s19 + $0xe44] sm:$0xf]  ;;  %v11385_v61 = vld [vmem:[%s19036_s19 + $0xe48] sm:$0xf0]  ;;  %v11324_v31 = vor.u32 %v13032_v54, %v11321_v32  ;;  %v13058_v46 = vld [vmem:[%s19036_s19 + $0xe94] sm:$0xf] }
 0x1dc   : > { %4562 = vmatpush.bf16.msrb.mxu0 %v11004_v15  ;;  %v4336_v0 = vpop.f32.mrf.mxu2  ;;  %v11281_v15 = vld [vmem:[%s19036_s19 + $0xd78] sm:$0xf0]  ;;  %v11388_v50 = vor.u32 %v13048_v58, %v11385_v61  ;;  %v13012_v1 = vld [vmem:[%s19036_s19 + $0xd24] sm:$0xf]  ;;  %v11417_v32 = vld [vmem:[%s19036_s19 + $0xe88] sm:$0xf0] }
 0x1dd   : > { %4575 = vmatpush.bf16.msrb.mxu1 %v11068_v30  ;;  %v4349_v7 = vpop.f32.mrf.mxu3  ;;  %v10972_v30 = vor.u32 %v12944_v20, %v10969_v34  ;;  %v11284_v13 = vor.u32 %v13022_v6, %v11281_v15  ;;  %v13064_v20 = vld [vmem:[%s19036_s19 + $0xec4] sm:$0xf]  ;;  %v11449_v34 = vld [vmem:[%s19036_s19 + $0xec8] sm:$0xf0]  ;;  %v13014_v0 = vld [vmem:[%s19036_s19 + $0xd34] sm:$0xf] }
 0x1de   : > { %4588 = vmatpush.bf16.msrb.mxu2 %v11132_v60  ;;  %v11345_v60 = vld [vmem:[%s19036_s19 + $0xdf8] sm:$0xf0]  ;;  %v13046_v7 = vld [vmem:[%s19036_s19 + $0xe34] sm:$0xf] }
 0x1df   : > { %4601 = vmatpush.bf16.msrb.mxu3 %v11196_v41  ;;  %v11473_v41 = vld [vmem:[%s19036_s19 + $0xef8] sm:$0xf0]  ;;  %v11348_v14 = vor.u32 %v13038_v29, %v11345_v60  ;;  %v13062_v15 = vld [vmem:[%s19036_s19 + $0xeb4] sm:$0xf]  ;;  %v11316_v60 = vor.u32 %v13030_v5, %v11313_v59 }
 0x1e0   : > { %4563 = vmatpush.bf16.msrb.mxu0 %v10996_v45  ;;  %v13036_v45 = vld [vmem:[%s19036_s19 + $0xde4] sm:$0xf]  ;;  %v11377_v6 = vld [vmem:[%s19036_s19 + $0xe38] sm:$0xf0] }
 0x1e1   : > { %4576 = vmatpush.bf16.msrb.mxu1 %v11060_v18  ;;  %v11476_v18 = vor.u32 %v13070_v11, %v11473_v41  ;;  %v11441_v29 = vld [vmem:[%s19036_s19 + $0xeb8] sm:$0xf0]  ;;  %v11380_v8 = vor.u32 %v13046_v7, %v11377_v6 }
 0x1e2   : > { %4589 = vmatpush.bf16.msrb.mxu2 %v11124_v62  ;;  %v11337_v62 = vld [vmem:[%s19036_s19 + $0xde8] sm:$0xf0]  ;;  %v11444_v11 = vor.u32 %v13062_v15, %v11441_v29 }
 0x1e3   : > { %4602 = vmatpush.bf16.msrb.mxu3 %v11188_v27  ;;  %v11276_v27 = vor.u32 %v13020_v2, %v11273_v17  ;;  %v11340_v39 = vor.u32 %v13036_v45, %v11337_v62  ;;  %v13060_v17 = vld [vmem:[%s19036_s19 + $0xea4] sm:$0xf]  ;;  %v11433_v45 = vld [vmem:[%s19036_s19 + $0xea8] sm:$0xf0] }
 0x1e4   : > { %4564 = vmatpush.bf16.msrb.mxu0 %v10988_v47  ;;  %v13050_v47 = vld [vmem:[%s19036_s19 + $0xe54] sm:$0xf]  ;;  %v11436_v24 = vor.u32 %v13060_v17, %v11433_v45 }
 0x1e5   : > { %4577 = vmatpush.bf16.msrb.mxu1 %v11052_v37  ;;  %v13376_v37 = vld.sshfl [vmem:[#allocation1] sm:$0xff pattern:$0x73625140]  ;;  %v11396_v53 = vor.u32 %v13050_v47, %v11393_v49  ;;  %v11425_v47 = vld [vmem:[%s19036_s19 + $0xe98] sm:$0xf0] }
 0x1e6   : > { %4590 = vmatpush.bf16.msrb.mxu2 %v11116_v35  ;;  %v11457_v35 = vld [vmem:[%s19036_s19 + $0xed8] sm:$0xf0] }
 0x1e7   : > { %4603 = vmatpush.bf16.msrb.mxu3 %v11180_v36  ;;  %v11257_v36 = vld [vmem:[%s19036_s19 + $0xd48] sm:$0xf0] }
 0x1e8   : > { %4565 = vmatpush.bf16.msrb.mxu0 %v10980_v63 }
 0x1e9   : > { %4578 = vmatpush.bf16.msrb.mxu1 %v11044_v22 }
 0x1ea   : > { %4591 = vmatpush.bf16.msrb.mxu2 %v11108_v28 }
 0x1eb   : > { %4604 = vmatpush.bf16.msrb.mxu3 %v11172_v3  ;;  %v11249_v3 = vld [vmem:[%s19036_s19 + $0xd38] sm:$0xf0] }
 0x1ec   : > { %4566 = vmatpush.bf16.msrb.mxu0 %v10972_v30  ;;  %v4360_v63 = vpop.f32.mrf.mxu0  ;;  %v11252_v30 = vor.u32 %v13014_v0, %v11249_v3 }
 0x1ed   : > { %4579 = vmatpush.bf16.msrb.mxu1 %v11036_v9  ;;  %v4361_v22 = vadd.f32 %v4360_v63, %v16503_v48  ;;  %v4373_v26 = vpop.f32.mrf.mxu1  ;;  %v11452_v48 = vor.u32 %v13064_v20, %v11449_v34  ;;  %v11241_v9 = vld [vmem:[%s19036_s19 + $0xd28] sm:$0xf0] }
 0x1ee   : > { %4592 = vmatpush.bf16.msrb.mxu2 %v11100_v38  ;;  %v13028_v38 = vld [vmem:[%s19036_s19 + $0xda4] sm:$0xf]  ;;  %v11244_v62 = vor.u32 %v13012_v1, %v11241_v9 }
 0x1ef   : > { %4605 = vmatpush.bf16.msrb.mxu3 %v11164_v12  ;;  %4567 = vmatmul.bf16.vlgmr.msrb.gmra.mxu0 %v14984_v55  ;;  %v13066_v55 = vld [vmem:[%s19036_s19 + $0xed4] sm:$0xf]  ;;  %v4374_v10 = vadd.f32 %v4373_v26, %v4361_v22  ;;  %v11305_v12 = vld [vmem:[%s19036_s19 + $0xda8] sm:$0xf0] }
 0x1f0   : > { %4611 = vmatpush.bf16.msra.mxu0 %v11284_v13  ;;  %4580 = vmatmul.bf16.vlgmr.msrb.gmra.mxu1 %v15003_v4  ;;  %v13016_v4 = vld [vmem:[%s19036_s19 + $0xd44] sm:$0xf]  ;;  %v11460_v57 = vor.u32 %v13066_v55, %v11457_v35  ;;  %v11308_v56 = vor.u32 %v13028_v38, %v11305_v12  ;;  %v13378_v22 = vld.sshfl [vmem:[#allocation1 + $0x10] sm:$0xff pattern:$0x73625140] }
 0x1f1   : > { %4624 = vmatpush.bf16.msra.mxu1 %v11348_v14  ;;  %4593 = vmatmul.bf16.vlgmr.msrb.gmra.mxu2 %v13376_v37  ;;  %v11260_v28 = vor.u32 %v13016_v4, %v11257_v36  ;;  %v13044_v13 = vld [vmem:[%s19036_s19 + $0xe24] sm:$0xf]  ;;  %v11369_v14 = vld [vmem:[%s19036_s19 + $0xe28] sm:$0xf0] }
 0x1f2   : > { %4637 = vmatpush.bf16.msra.mxu2 %v11412_v16  ;;  %4606 = vmatmul.bf16.vlgmr.msrb.gmra.mxu3 %v13377_v40  ;;  %v11372_v25 = vor.u32 %v13044_v13, %v11369_v14  ;;  %v13008_v35 = vld [vmem:[%s19036_s19 + $0xd04] sm:$0xf]  ;;  %v11225_v40 = vld [vmem:[%s19036_s19 + $0xd08] sm:$0xf0] }
 0x1f3   : > { %4650 = vmatpush.bf16.msra.mxu3 %v11476_v18  ;;  %v13040_v4 = vld [vmem:[%s19036_s19 + $0xe04] sm:$0xf]  ;;  %v11353_v36 = vld [vmem:[%s19036_s19 + $0xe08] sm:$0xf0]  ;;  %v11228_v61 = vor.u32 %v13008_v35, %v11225_v40 }
 0x1f4   : > { %4612 = vmatpush.bf16.msra.mxu0 %v11276_v27  ;;  %v4386_v41 = vpop.f32.mrf.mxu2  ;;  %v4362_v18 = vpop.f32.mrf.mxu0  ;;  %v13010_v27 = vld [vmem:[%s19036_s19 + $0xd14] sm:$0xf]  ;;  %v11356_v20 = vor.u32 %v13040_v4, %v11353_v36  ;;  %v13380_v26 = vld.sshfl [vmem:[#allocation1 + $0x20] sm:$0xff pattern:$0x73625140] }
 0x1f5   : > { %4625 = vmatpush.bf16.msra.mxu1 %v11340_v39  ;;  %v4387_v16 = vadd.f32 %v4386_v41, %v4374_v10  ;;  %v4399_v2 = vpop.f32.mrf.mxu3  ;;  %v4375_v21 = vpop.f32.mrf.mxu1  ;;  %v11233_v39 = vld [vmem:[%s19036_s19 + $0xd18] sm:$0xf0] }
 0x1f6   : > { %4638 = vmatpush.bf16.msra.mxu2 %v11404_v42  ;;  %v13026_v42 = vld [vmem:[%s19036_s19 + $0xd94] sm:$0xf]  ;;  %v11236_v49 = vor.u32 %v13010_v27, %v11233_v39 }
 0x1f7   : > { %4651 = vmatpush.bf16.msra.mxu3 %v11468_v33  ;;  %v4400_v23 = vadd.f32 %v4399_v2, %v4387_v16  ;;  %v11361_v33 = vld [vmem:[%s19036_s19 + $0xe18] sm:$0xf0]  ;;  %v11300_v37 = vor.u32 %v13026_v42, %v11297_v43 }
 0x1f8   : > { %4613 = vmatpush.bf16.msra.mxu0 %v11268_v51  ;;  %v11364_v55 = vor.u32 %v13042_v44, %v11361_v33  ;;  %v13024_v51 = vld [vmem:[%s19036_s19 + $0xd84] sm:$0xf] }
 0x1f9   : > { %4626 = vmatpush.bf16.msra.mxu1 %v11332_v52  ;;  %v11428_v52 = vor.u32 %v13058_v46, %v11425_v47 }
 0x1fa   : > { %4639 = vmatpush.bf16.msra.mxu2 %v11396_v53  ;;  %v11289_v53 = vld [vmem:[%s19036_s19 + $0xd88] sm:$0xf0] }
 0x1fb   : > { %4652 = vmatpush.bf16.msra.mxu3 %v11460_v57  ;;  %v13056_v57 = vld [vmem:[%s19036_s19 + $0xe84] sm:$0xf]  ;;  %v11292_v63 = vor.u32 %v13024_v51, %v11289_v53 }
 0x1fc   : > { %4614 = vmatpush.bf16.msra.mxu0 %v11260_v28  ;;  %v4388_v54 = vpop.f32.mrf.mxu2  ;;  %v11420_v34 = vor.u32 %v13056_v57, %v11417_v32  ;;  %v13379_v28 = vld.sshfl [vmem:[#allocation1 + $0x18] sm:$0xff pattern:$0x73625140] }
 0x1fd   : > { %4627 = vmatpush.bf16.msra.mxu1 %v11324_v31  ;;  %v4401_v58 = vpop.f32.mrf.mxu3  ;;  %v13381_v31 = vld.sshfl [vmem:[#allocation1 + $0x28] sm:$0xff pattern:$0x73625140] }
 0x1fe   : > { %4640 = vmatpush.bf16.msra.mxu2 %v11388_v50 }
 0x1ff   : > { %4653 = vmatpush.bf16.msra.mxu3 %v11452_v48 }
 0x200   : > { %4615 = vmatpush.bf16.msra.mxu0 %v11252_v30 }
 0x201   : > { %4628 = vmatpush.bf16.msra.mxu1 %v11316_v60 }
 0x202   : > { %4641 = vmatpush.bf16.msra.mxu2 %v11380_v8 }
 0x203   : > { %4654 = vmatpush.bf16.msra.mxu3 %v11444_v11 }
 0x204   : > { %4616 = vmatpush.bf16.msra.mxu0 %v11244_v62 }
 0x205   : > { %4629 = vmatpush.bf16.msra.mxu1 %v11308_v56 }
 0x206   : > { %4642 = vmatpush.bf16.msra.mxu2 %v11372_v25 }
 0x207   : > { %4655 = vmatpush.bf16.msra.mxu3 %v11436_v24 }
 0x208   : > { %4617 = vmatpush.bf16.msra.mxu0 %v11236_v49 }
 0x209   : > { %4630 = vmatpush.bf16.msra.mxu1 %v11300_v37 }
 0x20a   : > { %4643 = vmatpush.bf16.msra.mxu2 %v11364_v55 }
 0x20b   : > { %4656 = vmatpush.bf16.msra.mxu3 %v11428_v52 }
 0x20c   : > { %4618 = vmatpush.bf16.msra.mxu0 %v11228_v61  ;;  %v4412_v50 = vpop.f32.mrf.mxu0 }
 0x20d   : > { %4631 = vmatpush.bf16.msra.mxu1 %v11292_v63  ;;  %v4413_v0 = vadd.f32 %v4412_v50, %v4400_v23  ;;  %v4425_v3 = vpop.f32.mrf.mxu1 }
 0x20e   : > { %4644 = vmatpush.bf16.msra.mxu2 %v11356_v20 }
 0x20f   : > { %4657 = vmatpush.bf16.msra.mxu3 %v11420_v34  ;;  %4619 = vmatmul.bf16.vlgmr.msra.gmra.mxu0 %v13378_v22  ;;  %v4426_v5 = vadd.f32 %v4425_v3, %v4413_v0  ;;  %v4670_v0 = vld [vmem:[%s19039_s18] sm:$0x3] }
 0x210   : > { %4632 = vmatmul.bf16.vlgmr.msra.gmra.mxu1 %v13379_v28  ;;  %v4672_v3 = vperm.slane %v4670_v0, 0 }
 0x211   : > { %4645 = vmatmul.bf16.vlgmr.msra.gmra.mxu2 %v13380_v26 }
 0x212   : > { %4658 = vmatmul.bf16.vlgmr.msra.gmra.mxu3 %v13381_v31 }
 0x214   : > { %v4438_v48 = vpop.f32.mrf.mxu2  ;;  %v4414_v7 = vpop.f32.mrf.mxu0 }
 0x215   : > { %v4439_v10 = vadd.f32 %v4438_v48, %v4426_v5  ;;  %v4451_v59 = vpop.f32.mrf.mxu3  ;;  %v4427_v6 = vpop.f32.mrf.mxu1  ;;  %v4673_v5 = vperm.slane %v4670_v0, 1 }
 0x216   : > { %v4697_v6 = vld [vmem:[%s19040_s21 + $0x8] sm:$0x1f] }
 0x217   : > { %v4452_v15 = vadd.f32 %v4451_v59, %v4439_v10 }
 0x21c   : > { %v4440_v29 = vpop.f32.mrf.mxu2 }
 0x21d   : > { %v4453_v30 = vpop.f32.mrf.mxu3 }
 0x22c   : > { %v4464_v60 = vpop.f32.mrf.mxu0 }
 0x22d   : > { %v4465_v8 = vadd.f32 %v4464_v60, %v4452_v15  ;;  %v4477_v1 = vpop.f32.mrf.mxu1 }
 0x22f   : > { %v4478_v9 = vadd.f32 %v4477_v1, %v4465_v8 }
 0x234   : > { %v4490_v38 = vpop.f32.mrf.mxu2  ;;  %v4466_v12 = vpop.f32.mrf.mxu0 }
 0x235   : > { %v4491_v11 = vadd.f32 %v4490_v38, %v4478_v9  ;;  %v4503_v41 = vpop.f32.mrf.mxu3  ;;  %v4479_v13 = vpop.f32.mrf.mxu1 }
 0x237   : > { %v4504_v14 = vadd.f32 %v4503_v41, %v4491_v11 }
 0x23c   : > { %v4492_v16 = vpop.f32.mrf.mxu2 }
 0x23d   : > { %v4505_v2 = vpop.f32.mrf.mxu3 }
 0x24c   : > { %v4516_v17 = vpop.f32.mrf.mxu0 }
 0x24d   : > { %v4529_v45 = vpop.f32.mrf.mxu1  ;;  %v4517_v42 = vadd.f32 %v4516_v17, %v4504_v14 }
 0x24f   : > { %v4530_v46 = vadd.f32 %v4529_v45, %v4517_v42 }
 0x254   : > { %v4542_v18 = vpop.f32.mrf.mxu2  ;;  %v4518_v21 = vpop.f32.mrf.mxu0 }
 0x255   : > { %v4555_v62 = vpop.f32.mrf.mxu3  ;;  %v4531_v23 = vpop.f32.mrf.mxu1  ;;  %v4543_v47 = vadd.f32 %v4542_v18, %v4530_v46 }
 0x257   : > { %v4556_v55 = vadd.f32 %v4555_v62, %v4543_v47 }
 0x25c   : > { %v4544_v56 = vpop.f32.mrf.mxu2 }
 0x25d   : > { %v4557_v25 = vpop.f32.mrf.mxu3 }
 0x26c   : > { %v4568_v27 = vpop.f32.mrf.mxu0 }
 0x26d   : > { %v4581_v39 = vpop.f32.mrf.mxu1  ;;  %v4569_v35 = vadd.f32 %v4568_v27, %v4556_v55 }
 0x26f   : > { %v4582_v40 = vadd.f32 %v4581_v39, %v4569_v35 }
 0x274   : > { %v4594_v24 = vpop.f32.mrf.mxu2  ;;  %v4570_v44 = vpop.f32.mrf.mxu0 }
 0x275   : > { %v4607_v43 = vpop.f32.mrf.mxu3  ;;  %v4583_v33 = vpop.f32.mrf.mxu1  ;;  %v4595_v51 = vadd.f32 %v4594_v24, %v4582_v40 }
 0x277   : > { %v4608_v52 = vadd.f32 %v4607_v43, %v4595_v51 }
 0x27c   : > { %v4596_v49 = vpop.f32.mrf.mxu2 }
 0x27d   : > { %v4609_v37 = vpop.f32.mrf.mxu3 }
 0x28c   : > { %v4620_v53 = vpop.f32.mrf.mxu0 }
 0x28d   : > { %v4633_v4 = vpop.f32.mrf.mxu1  ;;  %v4621_v36 = vadd.f32 %v4620_v53, %v4608_v52 }
 0x28f   : > { %v4634_v54 = vadd.f32 %v4633_v4, %v4621_v36 }
 0x294   : > { %v4646_v57 = vpop.f32.mrf.mxu2  ;;  %v4622_v61 = vpop.f32.mrf.mxu0 }
 0x295   : > { %v4647_v32 = vadd.f32 %v4646_v57, %v4634_v54  ;;  %v4659_v58 = vpop.f32.mrf.mxu3  ;;  %v4635_v63 = vpop.f32.mrf.mxu1 }
 0x297   : > { %v4660_v20 = vadd.f32 %v4659_v58, %v4647_v32 }
 0x299   : > { %v4665_v34 = vrot.slane %v4660_v20, 4 }
 0x29b   : > { %v4667_v22 = vsel %vm4666_vm0, %v16260_v19, %v4665_v34  ;;  %v4668_v28 = vsel %vm4666_vm0, %v4665_v34, %v16260_v19  ;;  %v4696_v19 = vld [vmem:[%s19040_s21] sm:$0x1f] }
 0x29c   : > { %v4669_v26 = vrot.slane %v4668_v28, 4  ;;  %4676 = vst [vmem:[#allocation1] ss:$2 sm:$0xff] %v4667_v22  ;;  %v4648_v31 = vpop.f32.mrf.mxu2 }
 0x29d   : > { %v4661_v50 = vpop.f32.mrf.mxu3 }
 0x29e   : > { %4680 = vst [vmem:[#allocation1 + $0x10] ss:$2 sm:$0xff] %v4669_v26 }
 0x2a3   : > { %v4677_v48 = vld.sshfl [vmem:[#allocation1] sm:$0xff pattern:$0x75316420]  ;;  %v4678_v10 = vld.sshfl [vmem:[#allocation1 + $0x8] sm:$0xff pattern:$0x75316420] }
 0x2a4   : > { %v4683_v59 = vrot.slane %v4677_v48, 7  ;;  %v4684_v7 = vrot.slane %v4678_v10, 7 }
 0x2a5   : > { %v4681_v15 = vld.sshfl [vmem:[#allocation1 + $0x10] sm:$0xff pattern:$0x75316420]  ;;  %v4682_v29 = vld.sshfl [vmem:[#allocation1 + $0x18] sm:$0xff pattern:$0x75316420] }
 0x2a6   : > { %v4685_v30 = vrot.slane %v4681_v15, 7  ;;  %v4686_v60 = vrot.slane %v4682_v29, 7  ;;  %v4692_v8 = vsel %vm4691_vm1, %v4672_v3, %v4683_v59  ;;  %v4693_v1 = vsel %vm4691_vm1, %v4673_v5, %v4684_v7 }
 0x2a7   : > { %v4698_v9 = vadd.f32 %v4696_v19, %v4692_v8  ;;  %v4699_v38 = vadd.f32 %v4697_v6, %v4693_v1 }
 0x2a8   : > { %v4694_v11 = vsel %vm4691_vm1, %v4672_v3, %v4685_v30  ;;  %v4695_v41 = vsel %vm4691_vm1, %v4673_v5, %v4686_v60 }
 0x2a9   : > { %v4700_v12 = vadd.f32 %v4696_v19, %v4694_v11  ;;  %v4701_v13 = vadd.f32 %v4697_v6, %v4695_v41  ;;  %4702 = vst [vmem:[#allocation2] sm:$0x1f] %v4698_v9 }
 0x2aa   : > { %4704 = vst.msk [vmem:[#allocation2 + $0x8] sm:$0x1f] %vm4703_vm2, %v4699_v38 }
 0x2ab   : > { %4705 = vst [vmem:[#allocation2 + $0x10] sm:$0x1f] %v4700_v12 }
 0x2ac   : > { %4706 = vst.msk [vmem:[#allocation2 + $0x18] sm:$0x1f] %vm4703_vm2, %v4701_v13 }
 0x2ad PF: > { %vm19010_vm3 = vcmask 1040384   ;;  %vm4719_vm4 = vcmask 1041409   ;;  %vm4722_vm5 = vcmask 1042434   ;;  %vm4725_vm6 = vcmask 1043459   ;;  %s19042_s24 = sld [smem:[#allocation18_spill]]  ;;  %s19044_s18 = scalar_lea.vmem %s18983_s6, %s13635_s29 }
 0x2ae   : > { %vm4728_vm7 = vcmask 1044484   ;;  %vm19008_vm8 = vcmask 523264   ;;  %vm19009_vm9 = vcmask 1041408   ;;  %vm19007_vm10 = vcmask 517120   ;;  %s19069_s28 = scalar_lea.vmem %s18987_s10, %s13635_s29  ;;  %s19081_s2 = scalar_lea.vmem %s18988_s11, %s13635_s29 }
 0x2af   : > { %v13499_v58 = vmov 192.0   ;;  %vm4953_vm12 = vcmask 1045509   ;;  %vm4956_vm13 = vcmask 1046534   ;;  %vm4959_vm14 = vcmask 1046528  }
 0x2b0   : > { %v4707_v14 = vld [vmem:[#allocation2] sm:$0x1f]  ;;  %13382 = vrcp.f32 %v13499_v58  ;;  %v13104_v58 = vld [vmem:[%s13648_s25 + $0x100] sm:$0xf0] }
 0x2b1   : > { %v4708_v16 = vld [vmem:[#allocation2 + $0x8] sm:$0x1f] }
 0x2b2   : > { %v4715_v17 = vrot.slane %v4708_v16, 7  ;;  %v4709_v45 = vld [vmem:[#allocation2 + $0x10] sm:$0x1f] }
 0x2b3   : > { %v4710_v2 = vld [vmem:[#allocation2 + $0x18] sm:$0x1f]  ;;  %s19043_s1 = scalar_lea.vmem %s19042_s24, %s13635_s29  ;;  %s19082_s24 = scalar_lea.vmem %s18989_s12, %s13635_s29 }
 0x2b4   : > { %v4716_v18 = vrot.slane %v4710_v2, 7  ;;  %v16764_v62 = vsel %vm19010_vm3, %v4707_v14, %v4715_v17  ;;  %v4720_v21 = vsel %vm4719_vm4, %v4707_v14, %v4715_v17  ;;  %v4723_v23 = vsel %vm4722_vm5, %v4707_v14, %v4715_v17 }
 0x2b5   : > { %v4726_v56 = vsel %vm4725_vm6, %v4707_v14, %v4715_v17  ;;  %v16769_v25 = vrot.slane %v4720_v21, 1  ;;  %v16771_v27 = vrot.slane %v4723_v23, 2  ;;  %v4729_v42 = vsel %vm4728_vm7, %v4707_v14, %v4715_v17  ;;  %4752 = vst [vmem:[#allocation1] ss:$9 sm:$0xff] %v16764_v62 }
 0x2b6   : > { %v16773_v39 = vrot.slane %v4726_v56, 3  ;;  %v16777_v24 = vrot.slane %v4729_v42, 4  ;;  %v4732_v43 = vsel %vm4719_vm4, %v4709_v45, %v4716_v18  ;;  %v4734_v44 = vsel %vm4722_vm5, %v4709_v45, %v4716_v18  ;;  %v13383_v61 = vpop.eup %13382 }
 0x2b7   : > { %4754 = vst [vmem:[#allocation1 + $0x1] ss:$9 sm:$0xff] %v16769_v25  ;;  %v16783_v33 = vsel %vm19010_vm3, %v4709_v45, %v4716_v18  ;;  %v16785_v46 = vrot.slane %v4732_v43, 1  ;;  %v16788_v47 = vrot.slane %v4734_v44, 2  ;;  %v4736_v49 = vsel %vm4725_vm6, %v4709_v45, %v4716_v18 }
 0x2b8   : > { %4756 = vst [vmem:[#allocation1 + $0x2] ss:$9 sm:$0xff] %v16771_v27  ;;  %v4738_v37 = vsel %vm4728_vm7, %v4709_v45, %v4716_v18  ;;  %v16797_v55 = vrot.slane %v4736_v49, 3  ;;  %v4790_v63 = vmul.f32 192.0, %v13383_v61  ;;  %vm4794_vm11 = vweird.f32 %v13383_v61 }
 0x2b9   : > { %4758 = vst [vmem:[#allocation1 + $0x3] ss:$9 sm:$0xff] %v16773_v39  ;;  %v16799_v35 = vrot.slane %v4738_v37, 4 }
 0x2ba   : > { %4760 = vst [vmem:[#allocation1 + $0x4] ss:$9 sm:$0xff] %v16777_v24  ;;  %v4791_v20 = vsub.f32 1.0, %v4790_v63  ;;  %v11579_v63 = vld [vmem:[%s13648_s25 + $0xc8] sm:$0xf] }
 0x2bb   : > { %4762 = vst [vmem:[#allocation1 + $0x5] ss:$9 sm:$0xff] %v16783_v33 }
 0x2bc   : > { %4764 = vst [vmem:[#allocation1 + $0x6] ss:$9 sm:$0xff] %v16785_v46  ;;  %v4792_v34 = vmul.f32 %v13383_v61, %v4791_v20  ;;  %v13099_v20 = vld [vmem:[%s13648_s25 + $0xd8] sm:$0xf0] }
 0x2bd   : > { %4766 = vst [vmem:[#allocation1 + $0x7] ss:$9 sm:$0xff] %v16788_v47 }
 0x2be   : > { %v4793_v22 = vadd.f32 %v13383_v61, %v4792_v34  ;;  %v11580_v34 = vor.u32 %v13099_v20, %v11579_v63  ;;  %v13122_v63 = vld [vmem:[%s13648_s25 + $0x194] sm:$0xf]  ;;  %v11681_v20 = vld [vmem:[%s13648_s25 + $0x1a4] sm:$0xf0] }
 0x2c0   : > { %v16806_v28 = vsel %vm4794_vm11, %v13383_v61, %v4793_v22  ;;  %v4750_v22 = vld [vmem:[%s19043_s1] sm:$0x3] }
 0x2c1   : > { %19041 = vst [vmem:[#allocation10_spill] sm:$0xff] %v16806_v28 }
 0x2c4   : > { %v4767_v40 = vld [vmem:[#allocation1] sm:$0xff]  ;;  %v4768_v51 = vld [vmem:[#allocation1 + $0x9] sm:$0xff] }
 0x2c5   : > { %v4778_v52 = vsel %vm19008_vm8, %v4768_v51, 0.0  ;;  %4769 = vst [vmem:[#allocation1] ss:$9 sm:$0xff] %v16797_v55 }
 0x2c6   : > { %v4779_v53 = vadd.f32 %v4778_v52, %v4767_v40  ;;  %4770 = vst [vmem:[#allocation1 + $0x1] ss:$9 sm:$0xff] %v16799_v35 }
 0x2c8   : > { %4780 = vadd.xlane.f32.xlu0 %v4779_v53 }
 0x2cd   : > { %v4771_v4 = vld [vmem:[#allocation1] sm:$0xff]  ;;  %v4772_v36 = vld [vmem:[#allocation1 + $0x9] sm:$0xff] }
 0x2ce   : > { %v4783_v54 = vsel %vm19009_vm9, %v4771_v4, 0.0  ;;  %v4785_v57 = vsel %vm19007_vm10, %v4772_v36, 0.0  ;;  %v11619_v36 = vld [vmem:[%s13648_s25 + $0x118] sm:$0xf] }
 0x2cf   : > { %v4786_v32 = vadd.f32 %v4785_v57, %v4783_v54  ;;  %v13109_v54 = vld [vmem:[%s13648_s25 + $0x128] sm:$0xf0] }
 0x2d0   : > { %v11620_v57 = vor.u32 %v13109_v54, %v11619_v36  ;;  %v11581_v54 = vld [vmem:[%s13648_s25 + $0xdc] sm:$0xf0] }
 0x2d1   : > { %4787 = vadd.xlane.f32.xlu0 %v4786_v32  ;;  %v11599_v32 = vld [vmem:[%s13648_s25 + $0xf0] sm:$0xf] }
 0x2d2   : > { %5453 = vmatpush.bf16.msra.mxu0 %v11620_v57  ;;  %v11600_v61 = vor.u32 %v13104_v58, %v11599_v32 }
 0x2d6   : > { %5454 = vmatpush.bf16.msra.mxu0 %v11600_v61 }
 0x2da   : > { %5455 = vmatpush.bf16.msra.mxu0 %v11580_v34 }
 0x33b   : > { %v4781_v26 = vpop.xlane.xlu0 %4780 }
 0x33c   : > { %v4796_v31 = vmul.f32 %v16806_v28, %v4781_v26  ;;  %v11559_v26 = vld [vmem:[%s13648_s25 + $0xa0] sm:$0xf] }
 0x33e   : > { %v4800_v50 = vperm.slane %v4796_v31, 0  ;;  %v4801_v0 = vperm.slane %v4796_v31, 1  ;;  %v4802_v3 = vperm.slane %v4796_v31, 2  ;;  %v4803_v5 = vperm.slane %v4796_v31, 3 }
 0x33f   : > { %v4804_v48 = vperm.slane %v4796_v31, 4  ;;  %v4805_v10 = vperm.slane %v4796_v31, 5  ;;  %v4806_v59 = vperm.slane %v4796_v31, 6  ;;  %v4807_v7 = vperm.slane %v4796_v31, 7  ;;  %v13094_v31 = vld [vmem:[%s13648_s25 + $0xb0] sm:$0xf0] }
 0x340   : > { %v16810_v19 = vsub.f32 %v16771_v27, %v4802_v3  ;;  %v16813_v6 = vsub.f32 %v16773_v39, %v4803_v5  ;;  %v16828_v8 = vsub.f32 %v16764_v62, %v4800_v50  ;;  %v16835_v38 = vsub.f32 %v16769_v25, %v4801_v0  ;;  %v13107_v0 = vld [vmem:[%s13648_s25 + $0x11c] sm:$0xf]  ;;  %v11621_v3 = vld [vmem:[%s13648_s25 + $0x12c] sm:$0xf0] }
 0x341   : > { %v16816_v15 = vsub.f32 %v16777_v24, %v4804_v48  ;;  %v16819_v29 = vsub.f32 %v16783_v33, %v4805_v10  ;;  %v16822_v30 = vsub.f32 %v16785_v46, %v4806_v59  ;;  %v16825_v60 = vsub.f32 %v16788_v47, %v4807_v7  ;;  %v4751_v48 = vld [vmem:[%s19044_s18] sm:$0x3]  ;;  %v11539_v59 = vld [vmem:[%s13648_s25 + $0x78] sm:$0xf]  ;;  %v13089_v7 = vld [vmem:[%s13648_s25 + $0x88] sm:$0xf0] }
 0x342   : > { %v4832_v1 = vmul.f32 %v16810_v19, %v16810_v19  ;;  %v4833_v9 = vmul.f32 %v16813_v6, %v16813_v6  ;;  %v4830_v2 = vmul.f32 %v16828_v8, %v16828_v8  ;;  %v4831_v17 = vmul.f32 %v16835_v38, %v16835_v38 }
 0x343   : > { %v4834_v11 = vmul.f32 %v16816_v15, %v16816_v15  ;;  %v4835_v41 = vmul.f32 %v16819_v29, %v16819_v29  ;;  %v4836_v12 = vmul.f32 %v16822_v30, %v16822_v30  ;;  %v4837_v14 = vmul.f32 %v16825_v60, %v16825_v60 }
 0x344   : > { %4854 = vst [vmem:[#allocation1 + $0x2] ss:$9 sm:$0xff] %v4832_v1  ;;  %v4788_v13 = vpop.xlane.xlu0 %4787  ;;  %v11560_v50 = vor.u32 %v13094_v31, %v11559_v26  ;;  %v11624_v5 = vor.u32 %v13107_v0, %v11621_v3  ;;  %v4942_v10 = vperm.slane %v4750_v22, 1  ;;  %v11699_v1 = vld [vmem:[%s13648_s25 + $0x1b8] sm:$0xf]  ;;  %v11684_v26 = vor.u32 %v13122_v63, %v11681_v20 }
 0x345   : > { %4856 = vst [vmem:[#allocation1 + $0x3] ss:$9 sm:$0xff] %v4833_v9  ;;  %v4797_v16 = vmul.f32 %v16806_v28, %v4788_v13  ;;  %v11540_v9 = vor.u32 %v13089_v7, %v11539_v59  ;;  %v4982_v13 = vperm.slane %v4751_v48, 1  ;;  %v11499_v31 = vld [vmem:[%s13648_s25 + $0x28] sm:$0xf] }
 0x346   : > { %4858 = vst [vmem:[#allocation1 + $0x4] ss:$9 sm:$0xff] %v4834_v11  ;;  %5456 = vmatpush.bf16.msra.mxu0 %v11560_v50  ;;  %5481 = vmatpush.bf16.msra.mxu2 %v11624_v5  ;;  %v13129_v11 = vld [vmem:[%s13648_s25 + $0x1c8] sm:$0xf0]  ;;  %v13079_v50 = vld [vmem:[%s13648_s25 + $0x38] sm:$0xf0] }
 0x347   : > { %4860 = vst [vmem:[#allocation1 + $0x5] ss:$9 sm:$0xff] %v4835_v41  ;;  %v4808_v45 = vperm.slane %v4797_v16, 0  ;;  %v4809_v18 = vperm.slane %v4797_v16, 1  ;;  %v13102_v41 = vld [vmem:[%s13648_s25 + $0xf4] sm:$0xf]  ;;  %v11500_v3 = vor.u32 %v13079_v50, %v11499_v31 }
 0x348   : > { %4862 = vst [vmem:[#allocation1 + $0x6] ss:$9 sm:$0xff] %v4836_v12  ;;  %v11601_v12 = vld [vmem:[%s13648_s25 + $0x104] sm:$0xf0]  ;;  %v13119_v5 = vld [vmem:[%s13648_s25 + $0x178] sm:$0xf0] }
 0x349   : > { %4864 = vst [vmem:[#allocation1 + $0x7] ss:$9 sm:$0xff] %v4837_v14  ;;  %v16851_v21 = vsub.f32 %v16797_v55, %v4808_v45  ;;  %v16854_v23 = vsub.f32 %v16799_v35, %v4809_v18  ;;  %v11700_v14 = vor.u32 %v13129_v11, %v11699_v1  ;;  %v11604_v16 = vor.u32 %v13102_v41, %v11601_v12  ;;  %v13127_v45 = vld [vmem:[%s13648_s25 + $0x1bc] sm:$0xf]  ;;  %v11701_v18 = vld [vmem:[%s13648_s25 + $0x1cc] sm:$0xf0] }
 0x34a   : > { %4850 = vst [vmem:[#allocation1] ss:$9 sm:$0xff] %v4830_v2  ;;  %v16889_v2 = vperm.slane %v4750_v22, 0  ;;  %5457 = vmatpush.bf16.msra.mxu0 %v11540_v9  ;;  %v11659_v0 = vld [vmem:[%s13648_s25 + $0x168] sm:$0xf] }
 0x34b   : > { %4852 = vst [vmem:[#allocation1 + $0x1] ss:$9 sm:$0xff] %v4831_v17  ;;  %v4838_v56 = vmul.f32 %v16851_v21, %v16851_v21  ;;  %v4839_v42 = vmul.f32 %v16854_v23, %v16854_v23  ;;  %v16891_v17 = vrot.slane %v4942_v10, 7  ;;  %5471 = vmatpush.bf16.msra.mxu1 %v11700_v14  ;;  %5482 = vmatpush.bf16.msra.mxu2 %v11604_v16  ;;  %v11561_v10 = vld [vmem:[%s13648_s25 + $0xb4] sm:$0xf0] }
 0x34c   : > { %v11660_v1 = vor.u32 %v13119_v5, %v11659_v0  ;;  %v13117_v12 = vld [vmem:[%s13648_s25 + $0x16c] sm:$0xf]  ;;  %v11479_v16 = vld [vmem:[%s13648_s25] sm:$0xf]  ;;  %v11629_v31 = vld [vmem:[%s13648_s25 + $0x134] sm:$0xf0] }
 0x34d   : > { %v16909_v57 = vsel %vm4722_vm5, %v16889_v2, %v16891_v17  ;;  %v16914_v32 = vsel %vm4725_vm6, %v16889_v2, %v16891_v17  ;;  %v16923_v34 = vsel %vm4728_vm7, %v16889_v2, %v16891_v17  ;;  %v16928_v22 = vsel %vm4953_vm12, %v16889_v2, %v16891_v17  ;;  %v13112_v50 = vld [vmem:[%s13648_s25 + $0x144] sm:$0xf]  ;;  %v11641_v0 = vld [vmem:[%s13648_s25 + $0x154] sm:$0xf0] }
 0x34e   : > { %v4948_v59 = vrot.slane %v16909_v57, 2  ;;  %v4950_v7 = vrot.slane %v16914_v32, 3  ;;  %v4952_v11 = vrot.slane %v16923_v34, 4  ;;  %v4955_v41 = vrot.slane %v16928_v22, 5  ;;  %v13115_v22 = vld [vmem:[%s13648_s25 + $0x158] sm:$0xf0] }
 0x34f   : > { %v16963_v20 = vsel %vm4959_vm14, %v16891_v17, %v16889_v2 }
 0x350   : > { %v19046_v57 = vrot.slane %v16963_v20, 7  ;;  %v11547_v20 = vld [vmem:[%s13648_s25 + $0x80] sm:$0xf] }
 0x352   : > { %v4865_v43 = vld [vmem:[#allocation1] sm:$0xff]  ;;  %v4866_v44 = vld [vmem:[#allocation1 + $0x9] sm:$0xff] }
 0x353   : > { %4867 = vst [vmem:[#allocation1] ss:$9 sm:$0xff] %v4838_v56  ;;  %v4875_v49 = vsel %vm19008_vm8, %v4866_v44, 0.0  ;;  %v13084_v44 = vld [vmem:[%s13648_s25 + $0x60] sm:$0xf0] }
 0x354   : > { %4868 = vst [vmem:[#allocation1 + $0x1] ss:$9 sm:$0xff] %v4839_v42  ;;  %v4876_v37 = vadd.f32 %v4875_v49, %v4865_v43  ;;  %v11704_v42 = vor.u32 %v13127_v45, %v11701_v18  ;;  %v11519_v43 = vld [vmem:[%s13648_s25 + $0x50] sm:$0xf]  ;;  %v13074_v45 = vld [vmem:[%s13648_s25 + $0x10] sm:$0xf0] }
 0x355   : > { %v11639_v18 = vld [vmem:[%s13648_s25 + $0x140] sm:$0xf] }
 0x356   : > { %4877 = vadd.xlane.f32.xlu1 %v4876_v37  ;;  %v11520_v37 = vor.u32 %v13084_v44, %v11519_v43  ;;  %5499 = vmatpush.bf16.msra.mxu3 %v11704_v42  ;;  %v11480_v42 = vor.u32 %v13074_v45, %v11479_v16  ;;  %v13114_v43 = vld [vmem:[%s13648_s25 + $0x150] sm:$0xf0]  ;;  %v13087_v44 = vld [vmem:[%s13648_s25 + $0x7c] sm:$0xf] }
 0x357   : > { %v13082_v45 = vld [vmem:[%s13648_s25 + $0x54] sm:$0xf] }
 0x358   : > { %5458 = vmatpush.bf16.msra.mxu0 %v11520_v37  ;;  %v16952_v37 = vsel %vm4956_vm13, %v16889_v2, %v16891_v17 }
 0x35a   : > { %5500 = vmatpush.bf16.msra.mxu3 %v11684_v26 }
 0x35b   : > { %v4869_v40 = vld [vmem:[#allocation1] sm:$0xff]  ;;  %v4870_v51 = vld [vmem:[#allocation1 + $0x9] sm:$0xff] }
 0x35c   : > { %v4879_v52 = vsel %vm19009_vm9, %v4869_v40, 0.0  ;;  %v4880_v53 = vsel %vm19007_vm10, %v4870_v51, 0.0  ;;  %v11679_v40 = vld [vmem:[%s13648_s25 + $0x190] sm:$0xf]  ;;  %v13124_v51 = vld [vmem:[%s13648_s25 + $0x1a0] sm:$0xf0]  ;;  %5459 = vmatpush.bf16.msra.mxu0 %v11500_v3 }
 0x35d   : > { %v4881_v4 = vadd.f32 %v4880_v53, %v4879_v52  ;;  %v13097_v52 = vld [vmem:[%s13648_s25 + $0xcc] sm:$0xf]  ;;  %v16901_v53 = vperm.slane %v4751_v48, 0  ;;  %v11680_v36 = vor.u32 %v13124_v51, %v11679_v40  ;;  %v13092_v48 = vld [vmem:[%s13648_s25 + $0xa4] sm:$0xf]  ;;  %v11640_v51 = vor.u32 %v13114_v43, %v11639_v18 }
 0x35e   : > { %v11584_v61 = vor.u32 %v13097_v52, %v11581_v54  ;;  %v11564_v9 = vor.u32 %v13092_v48, %v11561_v10  ;;  %v13110_v54 = vld [vmem:[%s13648_s25 + $0x130] sm:$0xf0]  ;;  %v11521_v18 = vld [vmem:[%s13648_s25 + $0x64] sm:$0xf0]  ;;  %v11607_v43 = vld [vmem:[%s13648_s25 + $0xf8] sm:$0xf] }
 0x35f   : > { %4882 = vadd.xlane.f32.xlu1 %v4881_v4  ;;  %v16903_v4 = vrot.slane %v4982_v13, 7  ;;  %5472 = vmatpush.bf16.msra.mxu1 %v11680_v36  ;;  %v11661_v13 = vld [vmem:[%s13648_s25 + $0x17c] sm:$0xf0]  ;;  %vm5634_vm10 = vcmask 1045507  }
 0x360   : > { %5483 = vmatpush.bf16.msra.mxu2 %v11584_v61  ;;  %v11664_v14 = vor.u32 %v13117_v12, %v11661_v13  ;;  %v11627_v36 = vld [vmem:[%s13648_s25 + $0x120] sm:$0xf]  ;;  %v13108_v61 = vld [vmem:[%s13648_s25 + $0x124] sm:$0xf]  ;;  %5460 = vmatpush.bf16.msra.mxu0 %v11480_v42  ;;  %v11524_v42 = vor.u32 %v13082_v45, %v11521_v18  ;;  %v11587_v45 = vld [vmem:[%s13648_s25 + $0xd0] sm:$0xf] }
 0x361   : > { %v11628_v26 = vor.u32 %v13110_v54, %v11627_v36  ;;  %v16971_v3 = vsel %vm4722_vm5, %v16901_v53, %v16903_v4  ;;  %v11632_v10 = vor.u32 %v13108_v61, %v11629_v31  ;;  %v16983_v13 = vsel %vm4725_vm6, %v16901_v53, %v16903_v4  ;;  %v11609_v54 = vld [vmem:[%s13648_s25 + $0x10c] sm:$0xf0] }
 0x362   : > { %5501 = vmatpush.bf16.msra.mxu3 %v11664_v14  ;;  %v11644_v14 = vor.u32 %v13112_v50, %v11641_v0  ;;  %v11687_v0 = vld [vmem:[%s13648_s25 + $0x198] sm:$0xf] }
 0x363   : > { %5473 = vmatpush.bf16.msra.mxu1 %v11660_v1  ;;  %v11707_v1 = vld [vmem:[%s13648_s25 + $0x1c0] sm:$0xf] }
 0x364   : > { %5484 = vmatpush.bf16.msra.mxu2 %v11564_v9  ;;  %v13130_v9 = vld [vmem:[%s13648_s25 + $0x1d0] sm:$0xf0]  ;;  %5537 = vmatpush.bf16.msrb.mxu0 %v11632_v10  ;;  %v17011_v10 = vsel %vm4956_vm13, %v16901_v53, %v16903_v4 }
 0x365   : > { %v11708_v16 = vor.u32 %v13130_v9, %v11707_v1  ;;  %v17016_v1 = vsel %vm4959_vm14, %v16903_v4, %v16901_v53 }
 0x366   : > { %5502 = vmatpush.bf16.msra.mxu3 %v11644_v14  ;;  %v13077_v14 = vld [vmem:[%s13648_s25 + $0x2c] sm:$0xf] }
 0x367   : > { %5474 = vmatpush.bf16.msra.mxu1 %v11640_v51 }
 0x36a   : > { %5527 = vmatpush.bf16.msrb.mxu3 %v11708_v16  ;;  %v11501_v16 = vld [vmem:[%s13648_s25 + $0x3c] sm:$0xf0] }
 0x36b   : > { %5509 = vmatpush.bf16.msrb.mxu1 %v11628_v26  ;;  %v17004_v26 = vsel %vm4953_vm12, %v16901_v53, %v16903_v4 }
 0x3c9   : > { %v4878_v56 = vpop.xlane.xlu1 %4877 }
 0x3ca   : > { %v4884_v49 = vmul.f32 %v4878_v56, %v16806_v28 }
 0x3cc   : > { %v16916_v58 = vadd.f32 1e-06, %v4884_v49  ;;  %v11541_v49 = vld [vmem:[%s13648_s25 + $0x8c] sm:$0xf0] }
 0x3cd   : > { %v11544_v52 = vor.u32 %v13087_v44, %v11541_v49  ;;  %v13105_v44 = vld [vmem:[%s13648_s25 + $0x108] sm:$0xf0]  ;;  %v13103_v49 = vld [vmem:[%s13648_s25 + $0xfc] sm:$0xf] }
 0x3ce   : > { %13384 = vrsqrt.f32 %v16916_v58  ;;  %v11608_v36 = vor.u32 %v13105_v44, %v11607_v43  ;;  %v11612_v50 = vor.u32 %v13103_v49, %v11609_v54  ;;  %v11504_v43 = vor.u32 %v13077_v14, %v11501_v16  ;;  %v13100_v44 = vld [vmem:[%s13648_s25 + $0xe0] sm:$0xf0]  ;;  %v11667_v16 = vld [vmem:[%s13648_s25 + $0x170] sm:$0xf] }
 0x3cf   : > { %5485 = vmatpush.bf16.msra.mxu2 %v11544_v52  ;;  %v16997_v52 = vsel %vm4728_vm7, %v16901_v53, %v16903_v4  ;;  %v17034_v54 = vsel %vm4719_vm4, %v16901_v53, %v16903_v4  ;;  %vm4894_vm0 = vweird.f32 %v16916_v58 }
 0x3d0   : > { %5510 = vmatpush.bf16.msrb.mxu1 %v11608_v36  ;;  %5538 = vmatpush.bf16.msrb.mxu0 %v11612_v50  ;;  %v4992_v49 = vrot.slane %v16997_v52, 4  ;;  %v4996_v50 = vrot.slane %v17011_v10, 6  ;;  %v13120_v36 = vld [vmem:[%s13648_s25 + $0x180] sm:$0xf0] }
 0x3d2   : > { %v4883_v56 = vpop.xlane.xlu1 %4882 }
 0x3d3   : > { %v4885_v40 = vmul.f32 %v4883_v56, %v16806_v28  ;;  %5486 = vmatpush.bf16.msra.mxu2 %v11524_v42  ;;  %v13098_v42 = vld [vmem:[%s13648_s25 + $0xd4] sm:$0xf] }
 0x3d4   : > { %v16958_v63 = vpop.eup %13384 }
 0x3d5   : > { %v4889_v5 = vmul.f32 %v16958_v63, %v16916_v58  ;;  %v16975_v48 = vadd.f32 1e-06, %v4885_v40  ;;  %vm4895_vm15 = vweird.f32 %v16958_v63  ;;  %v13072_v58 = vld [vmem:[%s13648_s25 + $0x4] sm:$0xf] }
 0x3d6   : > { %vm4896_vm1 = vmor %vm4894_vm0, %vm4895_vm15  ;;  %vm5617_vm0 = vcmask 1042433  }
 0x3d7   : > { %v4890_v56 = vmul.f32 %v16958_v63, %v4889_v5  ;;  %13386 = vrsqrt.f32 %v16975_v48  ;;  %v13125_v5 = vld [vmem:[%s13648_s25 + $0x1a8] sm:$0xf0]  ;;  %5487 = vmatpush.bf16.msra.mxu2 %v11504_v43  ;;  %vm4904_vm11 = vweird.f32 %v16975_v48 }
 0x3d8   : > { %v11688_v9 = vor.u32 %v13125_v5, %v11687_v0  ;;  %v11589_v0 = vld [vmem:[%s13648_s25 + $0xe4] sm:$0xf0] }
 0x3d9   : > { %v4891_v31 = vmul.f32 0.5, %v4890_v56  ;;  %v17025_v56 = vsel %vm4719_vm4, %v16889_v2, %v16891_v17  ;;  %v11592_v52 = vor.u32 %v13098_v42, %v11589_v0  ;;  %v4986_v42 = vrot.slane %v17034_v54, 1 }
 0x3da   : > { %5528 = vmatpush.bf16.msrb.mxu3 %v11688_v9  ;;  %v11481_v9 = vld [vmem:[%s13648_s25 + $0x14] sm:$0xf0] }
 0x3db   : > { %v4892_v18 = vsub.f32 1.5, %v4891_v31  ;;  %v11588_v31 = vor.u32 %v13100_v44, %v11587_v45  ;;  %v17050_v45 = vsel %vm19010_vm3, %v16889_v2, %v16891_v17  ;;  %5539 = vmatpush.bf16.msrb.mxu0 %v11592_v52  ;;  %v11484_v61 = vor.u32 %v13072_v58, %v11481_v9 }
 0x3dd   : > { %v17037_v5 = vpop.eup %13386  ;;  %v4893_v14 = vmul.f32 %v16958_v63, %v4892_v18  ;;  %5511 = vmatpush.bf16.msrb.mxu1 %v11588_v31  ;;  %v11668_v18 = vor.u32 %v13120_v36, %v11667_v16  ;;  %5488 = vmatpush.bf16.msra.mxu2 %v11484_v61 }
 0x3de   : > { %v4899_v0 = vmul.f32 %v17037_v5, %v16975_v48  ;;  %vm4905_vm2 = vweird.f32 %v17037_v5  ;;  %v11509_v48 = vld [vmem:[%s13648_s25 + $0x44] sm:$0xf0] }
 0x3df   : > { %v4897_v44 = vsel %vm4896_vm1, %v16958_v63, %v4893_v14  ;;  %5529 = vmatpush.bf16.msrb.mxu3 %v11668_v18  ;;  %vm4906_vm15 = vmor %vm4904_vm11, %vm4905_vm2  ;;  %vm5631_vm1 = vcmask 1044483   ;;  %vm5624_vm2 = vcmask 1043458   ;;  %vm5614_vm11 = vcmask 1042432  }
 0x3e0   : > { %v4912_v51 = vperm.slane %v4897_v44, 2  ;;  %v4913_v40 = vperm.slane %v4897_v44, 3  ;;  %v4914_v2 = vperm.slane %v4897_v44, 4  ;;  %v4915_v17 = vperm.slane %v4897_v44, 5 }
 0x3e1   : > { %v4916_v12 = vperm.slane %v4897_v44, 6  ;;  %v4917_v10 = vperm.slane %v4897_v44, 7  ;;  %v4910_v43 = vperm.slane %v4897_v44, 0  ;;  %v4911_v36 = vperm.slane %v4897_v44, 1  ;;  %v11709_v44 = vld [vmem:[%s13648_s25 + $0x1d4] sm:$0xf0] }
 0x3e2   : > { %v4932_v63 = vmul.f32 %v4912_v51, %v16810_v19  ;;  %v4933_v31 = vmul.f32 %v4913_v40, %v16813_v6  ;;  %v4934_v14 = vmul.f32 %v4914_v2, %v16816_v15  ;;  %v4935_v52 = vmul.f32 %v4915_v17, %v16819_v29 }
 0x3e3   : > { %v4936_v16 = vmul.f32 %v4916_v12, %v16822_v30  ;;  %v4937_v58 = vmul.f32 %v4917_v10, %v16825_v60  ;;  %v4930_v9 = vmul.f32 %v4910_v43, %v16828_v8  ;;  %v4931_v18 = vmul.f32 %v4911_v36, %v16835_v38  ;;  %v11567_v30 = vld [vmem:[%s13648_s25 + $0xa8] sm:$0xf]  ;;  %v13095_v60 = vld [vmem:[%s13648_s25 + $0xb8] sm:$0xf0]  ;;  %v13093_v8 = vld [vmem:[%s13648_s25 + $0xac] sm:$0xf] }
 0x3e4   : > { %v4972_v19 = vmul.f32 %v4948_v59, %v4932_v63  ;;  %v4973_v6 = vmul.f32 %v4950_v7, %v4933_v31  ;;  %v4974_v15 = vmul.f32 %v4952_v11, %v4934_v14  ;;  %v4975_v29 = vmul.f32 %v4955_v41, %v4935_v52  ;;  %v11569_v59 = vld [vmem:[%s13648_s25 + $0xbc] sm:$0xf0]  ;;  %v11647_v7 = vld [vmem:[%s13648_s25 + $0x148] sm:$0xf]  ;;  %v13128_v10 = vld [vmem:[%s13648_s25 + $0x1c4] sm:$0xf] }
 0x3e5   : > { %v19045_v38 = vrot.slane %v16952_v37, 6  ;;  %v4977_v32 = vmul.f32 %v19046_v57, %v4937_v58  ;;  %v4970_v34 = vmul.f32 %v17050_v45, %v4930_v9  ;;  %v19047_v11 = vrot.slane %v16971_v3, 2  ;;  %v13090_v36 = vld [vmem:[%s13648_s25 + $0x90] sm:$0xf0]  ;;  %v11549_v63 = vld [vmem:[%s13648_s25 + $0x94] sm:$0xf0] }
 0x3e6   : > { %v19048_v40 = vrot.slane %v16983_v13, 3  ;;  %v5011_v61 = vadd.f32 %v4992_v49, %v4974_v15  ;;  %v17093_v37 = vsel %vm19010_vm3, %v16901_v53, %v16903_v4  ;;  %v19049_v2 = vrot.slane %v17004_v26, 5  ;;  %v13088_v49 = vld [vmem:[%s13648_s25 + $0x84] sm:$0xf]  ;;  %v13123_v52 = vld [vmem:[%s13648_s25 + $0x19c] sm:$0xf] }
 0x3e7   : > { %v4976_v12 = vmul.f32 %v19045_v38, %v4936_v16  ;;  %v5009_v41 = vadd.f32 %v19047_v11, %v4972_v19  ;;  %v19050_v3 = vrot.slane %v17025_v56, 1  ;;  %v4900_v31 = vmul.f32 %v17037_v5, %v4899_v0  ;;  %v11689_v16 = vld [vmem:[%s13648_s25 + $0x1ac] sm:$0xf0]  ;;  %v13085_v15 = vld [vmem:[%s13648_s25 + $0x68] sm:$0xf0] }
 0x3e8   : > { %v5010_v51 = vadd.f32 %v19048_v40, %v4973_v6  ;;  %v5012_v17 = vadd.f32 %v19049_v2, %v4975_v29  ;;  %v11568_v53 = vor.u32 %v13095_v60, %v11567_v30  ;;  %v11572_v4 = vor.u32 %v13093_v8, %v11569_v59  ;;  %5035 = vst [vmem:[#allocation1 + $0x4] ss:$9 sm:$0xff] %v5011_v61  ;;  %v13083_v29 = vld [vmem:[%s13648_s25 + $0x5c] sm:$0xf]  ;;  %v11529_v30 = vld [vmem:[%s13648_s25 + $0x6c] sm:$0xf0] }
 0x3e9   : > { %v5013_v43 = vadd.f32 %v4996_v50, %v4976_v12  ;;  %v4971_v13 = vmul.f32 %v19050_v3, %v4931_v18  ;;  %5031 = vst [vmem:[#allocation1 + $0x2] ss:$9 sm:$0xff] %v5009_v41  ;;  %v11648_v14 = vor.u32 %v13115_v22, %v11647_v7  ;;  %v19051_v26 = vrot.slane %v17016_v1, 7  ;;  %v11527_v18 = vld [vmem:[%s13648_s25 + $0x58] sm:$0xf] }
 0x3ea   : > { %5033 = vst [vmem:[#allocation1 + $0x3] ss:$9 sm:$0xff] %v5010_v51  ;;  %v5007_v50 = vadd.f32 %v17093_v37, %v4970_v34  ;;  %v11712_v9 = vor.u32 %v13128_v10, %v11709_v44  ;;  %v4901_v19 = vmul.f32 0.5, %v4900_v31  ;;  %5512 = vmatpush.bf16.msrb.mxu1 %v11568_v53  ;;  %5540 = vmatpush.bf16.msrb.mxu0 %v11572_v4  ;;  %v13118_v38 = vld [vmem:[%s13648_s25 + $0x174] sm:$0xf] }
 0x3eb   : > { %v5014_v58 = vadd.f32 %v19051_v26, %v4977_v32  ;;  %v11548_v0 = vor.u32 %v13090_v36, %v11547_v20  ;;  %v11552_v6 = vor.u32 %v13088_v49, %v11549_v63  ;;  %5037 = vst [vmem:[#allocation1 + $0x5] ss:$9 sm:$0xff] %v5012_v17  ;;  %v5008_v1 = vadd.f32 %v4986_v42, %v4971_v13  ;;  %v11669_v12 = vld [vmem:[%s13648_s25 + $0x184] sm:$0xf0]  ;;  %v11507_v59 = vld [vmem:[%s13648_s25 + $0x30] sm:$0xf] }
 0x3ec   : > { %5530 = vmatpush.bf16.msrb.mxu3 %v11648_v14  ;;  %5555 = vmatpush.bf16.msrb.mxu2 %v11712_v9  ;;  %v11692_v60 = vor.u32 %v13123_v52, %v11689_v16  ;;  %5039 = vst [vmem:[#allocation1 + $0x6] ss:$9 sm:$0xff] %v5013_v43  ;;  %v4902_v8 = vsub.f32 1.5, %v4901_v19  ;;  %v11528_v32 = vor.u32 %v13085_v15, %v11527_v18  ;;  %v13080_v7 = vld [vmem:[%s13648_s25 + $0x40] sm:$0xf0]  ;;  %v19052_v63 = vrot.slane %v17025_v56, 1 }
 0x3ed   : > { %5041 = vst [vmem:[#allocation1 + $0x7] ss:$9 sm:$0xff] %v5014_v58  ;;  %v11532_v34 = vor.u32 %v13083_v29, %v11529_v30  ;;  %v13078_v22 = vld [vmem:[%s13648_s25 + $0x34] sm:$0xf]  ;;  %v11672_v11 = vor.u32 %v13118_v38, %v11669_v12  ;;  %v13113_v40 = vld [vmem:[%s13648_s25 + $0x14c] sm:$0xf]  ;;  %v11508_v10 = vor.u32 %v13080_v7, %v11507_v59 }
 0x3ee   : > { %5027 = vst [vmem:[#allocation1] ss:$9 sm:$0xff] %v5007_v50  ;;  %v4903_v57 = vmul.f32 %v17037_v5, %v4902_v8  ;;  %5513 = vmatpush.bf16.msrb.mxu1 %v11548_v0  ;;  %5541 = vmatpush.bf16.msrb.mxu0 %v11552_v6  ;;  %v11649_v20 = vld [vmem:[%s13648_s25 + $0x15c] sm:$0xf0]  ;;  %v11512_v44 = vor.u32 %v13078_v22, %v11509_v48  ;;  %v11487_v2 = vld [vmem:[%s13648_s25 + $0x8] sm:$0xf] }
 0x3ef   : > { %5029 = vst [vmem:[#allocation1 + $0x1] ss:$9 sm:$0xff] %v5008_v1  ;;  %v13075_v3 = vld [vmem:[%s13648_s25 + $0x18] sm:$0xf0]  ;;  %v13073_v13 = vld [vmem:[%s13648_s25 + $0xc] sm:$0xf]  ;;  %v11652_v49 = vor.u32 %v13113_v40, %v11649_v20 }
 0x3f0   : > { %5556 = vmatpush.bf16.msrb.mxu2 %v11692_v60  ;;  %v4907_v41 = vsel %vm4906_vm15, %v17037_v5, %v4903_v57  ;;  %v11489_v36 = vld [vmem:[%s13648_s25 + $0x1c] sm:$0xf0]  ;;  %v11635_v56 = vld [vmem:[%s13648_s25 + $0x128] sm:$0xf]  ;;  %v13131_v26 = vld [vmem:[%s13648_s25 + $0x1d8] sm:$0xf0] }
 0x3f1   : > { %v4918_v51 = vperm.slane %v4907_v41, 0  ;;  %v4919_v61 = vperm.slane %v4907_v41, 1  ;;  %v11715_v16 = vld [vmem:[%s13648_s25 + $0x1c8] sm:$0xf]  ;;  %v13106_v19 = vld [vmem:[%s13648_s25 + $0x110] sm:$0xf0] }
 0x3f2   : > { %5514 = vmatpush.bf16.msrb.mxu1 %v11528_v32  ;;  %5542 = vmatpush.bf16.msrb.mxu0 %v11532_v34  ;;  %v11716_v18 = vor.u32 %v13131_v26, %v11715_v16  ;;  %v11695_v0 = vld [vmem:[%s13648_s25 + $0x1a0] sm:$0xf]  ;;  %v13126_v6 = vld [vmem:[%s13648_s25 + $0x1b0] sm:$0xf0]  ;;  %v11595_v1 = vld [vmem:[%s13648_s25 + $0xd8] sm:$0xf] }
 0x3f3   : > { %v4938_v17 = vmul.f32 %v4918_v51, %v16851_v21  ;;  %v4939_v43 = vmul.f32 %v4919_v61, %v16854_v23  ;;  %v11488_v21 = vor.u32 %v13075_v3, %v11487_v2  ;;  %v11492_v23 = vor.u32 %v13073_v13, %v11489_v36  ;;  %v13101_v30 = vld [vmem:[%s13648_s25 + $0xe8] sm:$0xf0]  ;;  %v11675_v60 = vld [vmem:[%s13648_s25 + $0x178] sm:$0xf]  ;;  %v11575_v12 = vld [vmem:[%s13648_s25 + $0xb0] sm:$0xf] }
 0x3f4   : > { %5557 = vmatpush.bf16.msrb.mxu2 %v11672_v11  ;;  %v11696_v29 = vor.u32 %v13126_v6, %v11695_v0  ;;  %v13121_v8 = vld [vmem:[%s13648_s25 + $0x188] sm:$0xf0]  ;;  %v11596_v38 = vor.u32 %v13101_v30, %v11595_v1  ;;  %v13096_v32 = vld [vmem:[%s13648_s25 + $0xc0] sm:$0xf0]  ;;  %v11655_v34 = vld [vmem:[%s13648_s25 + $0x150] sm:$0xf] }
 0x3f5   : > { %v4978_v5 = vmul.f32 %v17050_v45, %v4938_v17  ;;  %v4979_v31 = vmul.f32 %v19052_v63, %v4939_v43  ;;  %v13111_v45 = vld [vmem:[%s13648_s25 + $0x138] sm:$0xf0]  ;;  %v11676_v57 = vor.u32 %v13121_v8, %v11675_v60  ;;  %v13116_v59 = vld [vmem:[%s13648_s25 + $0x160] sm:$0xf0]  ;;  %v11576_v7 = vor.u32 %v13096_v32, %v11575_v12  ;;  %v11555_v48 = vld [vmem:[%s13648_s25 + $0x88] sm:$0xf] }
 0x3f6   : > { %v5042_v53 = vld [vmem:[#allocation1] sm:$0xff]  ;;  %v5043_v4 = vld [vmem:[#allocation1 + $0x9] sm:$0xff]  ;;  %5515 = vmatpush.bf16.msrb.mxu1 %v11508_v10  ;;  %5543 = vmatpush.bf16.msrb.mxu0 %v11512_v44  ;;  %v11636_v54 = vor.u32 %v13111_v45, %v11635_v56  ;;  %v11656_v22 = vor.u32 %v13116_v59, %v11655_v34  ;;  %v13091_v11 = vld [vmem:[%s13648_s25 + $0x98] sm:$0xf0]  ;;  %vm5620_vm15 = vcmask 1043457  }
 0x3f7   : > { %v5015_v14 = vadd.f32 %v17093_v37, %v4978_v5  ;;  %v5016_v52 = vadd.f32 %v4986_v42, %v4979_v31  ;;  %v11615_v42 = vld [vmem:[%s13648_s25 + $0x100] sm:$0xf]  ;;  %v11556_v41 = vor.u32 %v13091_v11, %v11555_v48  ;;  %v13086_v51 = vld [vmem:[%s13648_s25 + $0x70] sm:$0xf0]  ;;  %v11515_v20 = vld [vmem:[%s13648_s25 + $0x38] sm:$0xf] }
 0x3f8   : > { %5558 = vmatpush.bf16.msrb.mxu2 %v11652_v49  ;;  %v11616_v15 = vor.u32 %v13106_v19, %v11615_v42  ;;  %v11535_v40 = vld [vmem:[%s13648_s25 + $0x60] sm:$0xf]  ;;  %v13081_v10 = vld [vmem:[%s13648_s25 + $0x48] sm:$0xf0]  ;;  %v11495_v2 = vld [vmem:[%s13648_s25 + $0x10] sm:$0xf] }
 0x3f9   : > { %5044 = vst [vmem:[#allocation1] ss:$9 sm:$0xff] %v5015_v14  ;;  %v11536_v61 = vor.u32 %v13086_v51, %v11535_v40  ;;  %v11516_v44 = vor.u32 %v13081_v10, %v11515_v20  ;;  %v13076_v17 = vld [vmem:[%s13648_s25 + $0x20] sm:$0xf0]  ;;  %s13500_s25 = smov 64  }
 0x3fa   : > { %5045 = vst [vmem:[#allocation1 + $0x1] ss:$9 sm:$0xff] %v5016_v52  ;;  %5516 = vmatpush.bf16.msrb.mxu1 %v11488_v21  ;;  %5544 = vmatpush.bf16.msrb.mxu0 %v11492_v23  ;;  %v11496_v43 = vor.u32 %v13076_v17, %v11495_v2  ;;  %v5126_v21 = vld [vmem:[%s13657_s4] sm:$0x1f] }
 0x3fb   : > { %v5129_v23 = vperm.slane %v5126_v21, 1  ;;  %v5130_v45 = vperm.slane %v5126_v21, 2  ;;  %v5128_v16 = vperm.slane %v5126_v21, 0  ;;  %v5132_v19 = vperm.slane %v5126_v21, 4 }
 0x401   : > { %v5046_v58 = vld [vmem:[#allocation1] sm:$0xff]  ;;  %v5047_v50 = vld [vmem:[#allocation1 + $0x9] sm:$0xff] }
 0x402   : > { %v5052_v37 = vpack.c.bf16 %v5046_v58, %v5042_v53  ;;  %v5053_v9 = vpack.c.bf16 %v5047_v50, %v5043_v4 }
 0x404   : > { %5461 = vmatmul.bf16.vlgmr.msra.gmra.mxu0 %v5052_v37  ;;  %11717 = vmatmul.msk.bf16.vlgmr.msra.gmra.mxu1 %vm19008_vm8, %v5053_v9 }
 0x405   : > { %5489 = vmatmul.bf16.vlgmr.msra.gmra.mxu2 %v5052_v37  ;;  %11718 = vmatmul.msk.bf16.vlgmr.msra.gmra.mxu3 %vm19008_vm8, %v5053_v9 }
 0x406   : > { %5565 = vmatpush.bf16.msra.mxu3 %v11636_v54  ;;  %5583 = vmatpush.bf16.msra.mxu1 %v11716_v18 }
 0x40a   : > { %5566 = vmatpush.bf16.msra.mxu3 %v11616_v15  ;;  %5584 = vmatpush.bf16.msra.mxu1 %v11696_v29 }
 0x40e   : > { %5567 = vmatpush.bf16.msra.mxu3 %v11596_v38  ;;  %5585 = vmatpush.bf16.msra.mxu1 %v11676_v57 }
 0x412   : > { %5568 = vmatpush.bf16.msra.mxu3 %v11576_v7  ;;  %5586 = vmatpush.bf16.msra.mxu1 %v11656_v22 }
 0x414   : > { %5517 = vmatmul.bf16.vlgmr.msrb.gmra.mxu1 %v5052_v37  ;;  %5545 = vmatmul.bf16.vlgmr.msrb.gmra.mxu0 %v5052_v37 }
 0x415   : > { %11719 = vmatmul.msk.bf16.vlgmr.msrb.gmra.mxu3 %vm19008_vm8, %v5053_v9  ;;  %11720 = vmatmul.msk.bf16.vlgmr.msrb.gmra.mxu2 %vm19008_vm8, %v5053_v9 }
 0x416   : > { %5569 = vmatpush.bf16.msra.mxu3 %v11556_v41 }
 0x41a   : > { %5570 = vmatpush.bf16.msra.mxu3 %v11536_v61 }
 0x41e   : > { %5571 = vmatpush.bf16.msra.mxu3 %v11516_v44 }
 0x422   : > { %5572 = vmatpush.bf16.msra.mxu3 %v11496_v43 }
 0x424   : > { %11721 = vmatmul.msk.bf16.vlgmr.msra.gmra.mxu1 %vm19008_vm8, %v5053_v9  ;;  %v5131_v9 = vperm.slane %v5126_v21, 3  ;;  %vm5627_vm8 = vcmask 1044482  }
 0x425   : > { %5573 = vmatmul.bf16.vlgmr.msra.gmra.mxu3 %v5052_v37 }
 0x481   : > { %v5476_v3 = vpop.f32.mrf.mxu1  ;;  %v5462_v49 = vpop.f32.mrf.mxu0 }
 0x482   : > { %v5463_v54 = vadd.f32 %v5462_v49, %v5128_v16 }
 0x484   : > { %v17175_v15 = vadd.f32 %v5476_v3, %v5463_v54 }
 0x488   : > { %v5504_v13 = vpop.f32.mrf.mxu3  ;;  %v5490_v5 = vpop.f32.mrf.mxu2 }
 0x489   : > { %v17170_v36 = vpop.f32.mrf.mxu1  ;;  %v5464_v53 = vpop.f32.mrf.mxu0  ;;  %v5491_v52 = vadd.f32 %v5490_v5, %v5129_v23 }
 0x48a   : > { %v5465_v12 = vadd.f32 %v5464_v53, %v5128_v16 }
 0x48b   : > { %v5505_v50 = vadd.f32 %v5504_v13, %v5491_v52 }
 0x48d   : > { %v17173_v0 = vrot.slane %v5505_v50, 7 }
 0x48f   : > { %v5616_v32 = vsel %vm4719_vm4, %v17175_v15, %v17173_v0  ;;  %v5611_v59 = vsel %vm19010_vm3, %v17175_v15, %v17173_v0  ;;  %v5630_v7 = vsel %vm4725_vm6, %v17175_v15, %v17173_v0  ;;  %v5623_v11 = vsel %vm4722_vm5, %v17175_v15, %v17173_v0 }
 0x490   : > { %v5506_v63 = vpop.f32.mrf.mxu3  ;;  %v5492_v14 = vpop.f32.mrf.mxu2 }
 0x491   : > { %v5518_v31 = vpop.f32.mrf.mxu1  ;;  %v5546_v26 = vpop.f32.mrf.mxu0  ;;  %v5493_v1 = vadd.f32 %v5492_v14, %v5129_v23 }
 0x492   : > { %v5519_v37 = vadd.f32 %v5518_v31, %v5130_v45  ;;  %v5547_v6 = vadd.f32 %v5546_v26, %v5131_v9  ;;  %v5479_v26 = vadd.f32 %v17170_v36, %v5465_v12 }
 0x493   : > { %v17188_v22 = vadd.f32 %v5506_v63, %v5493_v1 }
 0x495   : > { %v5607_v21 = vrot.slane %v17188_v22, 7 }
 0x497   : > { %v5669_v36 = vsel %vm4719_vm4, %v5479_v26, %v5607_v21 }
 0x498   : > { %v5532_v4 = vpop.f32.mrf.mxu3  ;;  %v5560_v42 = vpop.f32.mrf.mxu2 }
 0x499   : > { %v5520_v56 = vpop.f32.mrf.mxu1  ;;  %v5533_v18 = vadd.f32 %v5532_v4, %v5519_v37  ;;  %v5561_v8 = vadd.f32 %v5560_v42, %v5547_v6  ;;  %v5548_v57 = vpop.f32.mrf.mxu0  ;;  %v5658_v37 = vsel %vm4959_vm14, %v17173_v0, %v17175_v15  ;;  %v5637_v42 = vsel %vm4728_vm7, %v17175_v15, %v17173_v0 }
 0x49a   : > { %v5521_v48 = vadd.f32 %v5520_v56, %v5130_v45  ;;  %v5549_v40 = vadd.f32 %v5548_v57, %v5131_v9 }
 0x49b   : > { %v17177_v60 = vrot.slane %v5533_v18, 6  ;;  %v17193_v41 = vrot.slane %v5561_v8, 5 }
 0x49d   : > { %v5618_v51 = vsel %vm5617_vm0, %v5616_v32, %v17177_v60  ;;  %v5612_v44 = vsel %vm19009_vm9, %v5611_v59, %v17177_v60  ;;  %v5632_v2 = vsel %vm5631_vm1, %v5630_v7, %v17177_v60  ;;  %v5625_v17 = vsel %vm5624_vm2, %v5623_v11, %v17177_v60 }
 0x49e   : > { %vm5662_vm1 = vcmask 1046530   ;;  %vm5641_vm2 = vcmask 1046532   ;;  %v5644_v7 = vsel %vm4953_vm12, %v17175_v15, %v17173_v0 }
 0x4a0   : > { %v5534_v58 = vpop.f32.mrf.mxu3  ;;  %v5562_v10 = vpop.f32.mrf.mxu2 }
 0x4a1   : > { %v5588_v29 = vpop.f32.mrf.mxu1  ;;  %v17199_v20 = vadd.f32 %v5534_v58, %v5521_v48  ;;  %v5563_v23 = vadd.f32 %v5562_v10, %v5549_v40 }
 0x4a3   : > { %v5608_v58 = vrot.slane %v17199_v20, 6  ;;  %v5609_v9 = vrot.slane %v5563_v23, 5 }
 0x4a8   : > { %v5574_v30 = vpop.f32.mrf.mxu3 }
 0x4a9   : > { %v5575_v38 = vadd.f32 %v5574_v30, %v5132_v19  ;;  %v5590_v56 = vpop.f32.mrf.mxu1 }
 0x4ab   : > { %v5589_v34 = vadd.f32 %v5588_v29, %v5575_v38  ;;  %v5670_v29 = vsel %vm5617_vm0, %v5669_v36, %v5608_v58  ;;  %vm5645_vm0 = vcmask 1046533  }
 0x4ac   : > { %v5646_v22 = vsel %vm5645_vm0, %v5644_v7, %v17177_v60 }
 0x4ad   : > { %v17197_v61 = vrot.slane %v5589_v34, 4 }
 0x4af   : > { %v5619_v43 = vsel %vm4728_vm7, %v17193_v41, %v17197_v61  ;;  %v5613_v3 = vsel %vm4725_vm6, %v17193_v41, %v17197_v61  ;;  %v5633_v13 = vsel %vm4956_vm13, %v17193_v41, %v17197_v61  ;;  %v5626_v49 = vsel %vm4953_vm12, %v17193_v41, %v17197_v61 }
 0x4b0   : > { %v5576_v5 = vpop.f32.mrf.mxu3  ;;  %v5621_v63 = vsel %vm5620_vm15, %v5618_v51, %v5619_v43  ;;  %v17221_v31 = vsel %vm5614_vm11, %v5612_v44, %v5613_v3  ;;  %v5635_v53 = vsel %vm5634_vm10, %v5632_v2, %v5633_v13  ;;  %v5628_v4 = vsel %vm5627_vm8, %v5625_v17, %v5626_v49 }
 0x4b1   : > { %v5577_v14 = vadd.f32 %v5576_v5, %v5132_v19  ;;  %v17226_v52 = vrot.slane %v5621_v63, 1  ;;  %5674 = vrot.lane.b32.xlu2 %v17221_v31, %s13500_s25  ;;  %5689 = vst [vmem:[#allocation1] ss:$9 sm:$0xff] %v17221_v31  ;;  %v17231_v45 = vrot.slane %v5635_v53, 3  ;;  %v17233_v16 = vrot.slane %v5628_v4, 2 }
 0x4b2   : > { %vm5659_vm10 = vcmask 1046529   ;;  %vm5638_vm8 = vcmask 1045508   ;;  %v5661_v19 = vsel %vm4722_vm5, %v17193_v41, %v17197_v61  ;;  %v5640_v1 = vsel %vm4959_vm14, %v17197_v61, %v17193_v41 }
 0x4b3   : > { %v5591_v50 = vadd.f32 %v5590_v56, %v5577_v14  ;;  %5691 = vst [vmem:[#allocation1 + $0x1] ss:$9 sm:$0xff] %v17226_v52  ;;  %5680 = vrot.lane.b32.xlu1 %v17231_v45, %s13500_s25  ;;  %5678 = vrot.lane.b32.xlu0 %v17233_v16, %s13500_s25  ;;  %v5660_v18 = vsel %vm5659_vm10, %v17177_v60, %v5658_v37  ;;  %vm5652_vm10 = vcmask 1045504  }
 0x4b4   : > { %5695 = vst [vmem:[#allocation1 + $0x3] ss:$9 sm:$0xff] %v17231_v45  ;;  %v5639_v6 = vsel %vm5638_vm8, %v5637_v42, %v17177_v60  ;;  %v5663_v8 = vsel %vm5662_vm1, %v5661_v19, %v5660_v18  ;;  %v5647_v59 = vsel %vm19010_vm3, %v17193_v41, %v17197_v61  ;;  %v5654_v40 = vsel %vm4719_vm4, %v17193_v41, %v17197_v61 }
 0x4b5   : > { %v5610_v54 = vrot.slane %v5591_v50, 4  ;;  %5693 = vst [vmem:[#allocation1 + $0x2] ss:$9 sm:$0xff] %v17233_v16  ;;  %v5642_v38 = vsel %vm5641_vm2, %v5639_v6, %v5640_v1  ;;  %v17269_v34 = vrot.slane %v5663_v8, 7  ;;  %vm5655_vm8 = vcmask 1045505  }
 0x4b6   : > { %v17263_v57 = vrot.slane %v5642_v38, 4  ;;  %v5651_v51 = vsel %vm4956_vm13, %v17175_v15, %v17173_v0  ;;  %v5665_v17 = vsel %vm19010_vm3, %v5479_v26, %v5607_v21  ;;  %v5841_v18 = vrot.slane %v17221_v31, 3 }
 0x4b7   : > { %v5671_v30 = vsel %vm4728_vm7, %v5609_v9, %v5610_v54  ;;  %v5653_v20 = vsel %vm5652_vm10, %v17177_v60, %v5651_v51  ;;  %v5667_v2 = vsel %vm4725_vm6, %v5609_v9, %v5610_v54  ;;  %v5666_v43 = vsel %vm19009_vm9, %v5665_v17, %v5608_v58 }
 0x4b8   : > { %v5672_v12 = vsel %vm5620_vm15, %v5670_v29, %v5671_v30  ;;  %5697 = vst [vmem:[#allocation1 + $0x4] ss:$9 sm:$0xff] %v17263_v57  ;;  %vm5648_vm15 = vcmask 1044480   ;;  %v5656_v10 = vsel %vm5655_vm8, %v5654_v40, %v5653_v20  ;;  %v17305_v41 = vsel %vm5614_vm11, %v5666_v43, %v5667_v2 }
 0x4b9   : > { %v17265_v32 = vrot.slane %v5672_v12, 1  ;;  %5676 = vrot.lane.b32.xlu2 %v17226_v52, %s13500_s25  ;;  %v5649_v48 = vsel %vm5648_vm15, %v5647_v59, %v5646_v22  ;;  %v17297_v44 = vrot.slane %v5656_v10, 6  ;;  %vm19053_vm11 = vcmask 523264  }
 0x4ba   : > { %v17286_v11 = vrot.slane %v5649_v48, 5  ;;  %vm19054_vm1 = vmmov %vm19053_vm11  ;;  %v5842_v19 = vrot.slane %v17226_v52, 3  ;;  %v5843_v1 = vrot.slane %v17233_v16, 3  ;;  %v5844_v29 = vrot.slane %v17231_v45, 3 }
 0x4bb   : > { %5741 = vrot.lane.b32.xlu1 %v17265_v32, %s13500_s25  ;;  %5737 = vrot.lane.b32.xlu0 %v17269_v34, %s13500_s25  ;;  %vm19055_vm2 = vmmov %vm19054_vm1  ;;  %v5845_v30 = vrot.slane %v17263_v57, 3  ;;  %v5883_v38 = vrot.slane %v17297_v44, 3  ;;  %v5884_v59 = vrot.slane %v17269_v34, 3  ;;  %v5885_v7 = vrot.slane %v17305_v41, 3 }
 0x4bc   : > { %vm19056_vm0 = vmmov %vm19054_vm1  ;;  %v5882_v8 = vrot.slane %v17286_v11, 3  ;;  %v5886_v22 = vrot.slane %v17265_v32, 3  ;;  %vm5792_vm10 = vcmask 36864  }
 0x4bf   : > { %v5698_v60 = vld [vmem:[#allocation1] sm:$0xff] }
 0x4c1   : > { %5682 = vrot.lane.b32.xlu2 %v17263_v57, %s13500_s25 }
 0x4c9   : > { %5733 = vrot.lane.b32.xlu2 %v17286_v11, %s13500_s25 }
 0x4d1   : > { %5735 = vrot.lane.b32.xlu2 %v17297_v44, %s13500_s25 }
 0x4d9   : > { %5739 = vrot.lane.b32.xlu2 %v17305_v41, %s13500_s25 }
 0x50b   : > { %v17309_v0 = vpop.permute.xlu2 %5674 }
 0x50c   : > { %v5684_v15 = vrot.slane %v17309_v0, 1 }
 0x50e   : > { %5699 = vst [vmem:[#allocation1] ss:$9 sm:$0xff] %v5684_v15 }
 0x513   : > { %v17312_v61 = vpop.permute.xlu2 %5676 }
 0x514   : > { %v5685_v3 = vrot.slane %v17312_v61, 1 }
 0x516   : > { %5701 = vst [vmem:[#allocation1 + $0x1] ss:$9 sm:$0xff] %v5685_v3 }
 0x51b   : > { %v17315_v13 = vpop.permute.xlu2 %5682 }
 0x51c   : > { %v5688_v49 = vrot.slane %v17315_v13, 1 }
 0x51e   : > { %5707 = vst [vmem:[#allocation1 + $0x4] ss:$9 sm:$0xff] %v5688_v49 }
 0x523   : > { %v17324_v21 = vpop.permute.xlu2 %5733 }
 0x524   : > { %v5743_v26 = vrot.slane %v17324_v21, 1 }
 0x525   : > { %v17318_v5 = vpop.permute.xlu1 %5680  ;;  %v17320_v63 = vpop.permute.xlu0 %5678 }
 0x526   : > { %v5687_v53 = vrot.slane %v17318_v5, 1  ;;  %v5686_v4 = vrot.slane %v17320_v63, 1 }
 0x528   : > { %5705 = vst [vmem:[#allocation1 + $0x3] ss:$9 sm:$0xff] %v5687_v53 }
 0x529   : > { %5703 = vst [vmem:[#allocation1 + $0x2] ss:$9 sm:$0xff] %v5686_v4 }
 0x52b   : > { %v17329_v14 = vpop.permute.xlu2 %5735 }
 0x52c   : > { %v5744_v37 = vrot.slane %v17329_v14, 1 }
 0x52d   : > { %v17335_v56 = vpop.permute.xlu1 %5741  ;;  %v17338_v58 = vpop.permute.xlu0 %5737 }
 0x52e   : > { %v5747_v9 = vrot.slane %v17335_v56, 1  ;;  %v5745_v54 = vrot.slane %v17338_v58, 1 }
 0x530   : > { %v5708_v23 = vld [vmem:[#allocation1] sm:$0xff] }
 0x531   : > { %5748 = vst [vmem:[#allocation1] ss:$9 sm:$0xff] %v17286_v11  ;;  %11722 = vmatpush.xpose.msk.msra.mxu2 %vm19053_vm11, %v5708_v23 }
 0x532   : > { %5750 = vst [vmem:[#allocation1 + $0x1] ss:$9 sm:$0xff] %v17297_v44 }
 0x533   : > { %5752 = vst [vmem:[#allocation1 + $0x2] ss:$9 sm:$0xff] %v17269_v34  ;;  %v17341_v36 = vpop.permute.xlu2 %5739 }
 0x534   : > { %5754 = vst [vmem:[#allocation1 + $0x3] ss:$9 sm:$0xff] %v17305_v41  ;;  %11723 = vmatmul.msk.f32.vlgmr.msra.gmra.mxu2 %vm19054_vm1, %v5698_v60  ;;  %v5746_v42 = vrot.slane %v17341_v36, 1 }
 0x535   : > { %5756 = vst [vmem:[#allocation1 + $0x4] ss:$9 sm:$0xff] %v17265_v32 }
 0x53c   : > { %v5757_v50 = vld [vmem:[#allocation1] sm:$0xff] }
 0x53d   : > { %5758 = vst [vmem:[#allocation1] ss:$9 sm:$0xff] %v5743_v26 }
 0x53e   : > { %5760 = vst [vmem:[#allocation1 + $0x1] ss:$9 sm:$0xff] %v5744_v37 }
 0x53f   : > { %5766 = vst [vmem:[#allocation1 + $0x4] ss:$9 sm:$0xff] %v5747_v9 }
 0x540   : > { %5762 = vst [vmem:[#allocation1 + $0x2] ss:$9 sm:$0xff] %v5745_v54 }
 0x541   : > { %5764 = vst [vmem:[#allocation1 + $0x3] ss:$9 sm:$0xff] %v5746_v42 }
 0x548   : > { %v5767_v6 = vld [vmem:[#allocation1] sm:$0xff] }
 0x549   : > { %5846 = vst [vmem:[#allocation1] ss:$9 sm:$0xff] %v5841_v18  ;;  %11724 = vmatpush.xpose.msk.msrb.mxu2 %vm19055_vm2, %v5767_v6 }
 0x54a   : > { %5848 = vst [vmem:[#allocation1 + $0x1] ss:$9 sm:$0xff] %v5842_v19 }
 0x54b   : > { %5850 = vst [vmem:[#allocation1 + $0x2] ss:$9 sm:$0xff] %v5843_v1 }
 0x54c   : > { %5852 = vst [vmem:[#allocation1 + $0x3] ss:$9 sm:$0xff] %v5844_v29  ;;  %11725 = vmatmul.msk.f32.vlgmr.msrb.gmra.mxu2 %vm19056_vm0, %v5757_v50  ;;  %vm5856_vm0 = vcmask 39936  }
 0x54d   : > { %5854 = vst [vmem:[#allocation1 + $0x4] ss:$9 sm:$0xff] %v5845_v30 }
 0x554   : > { %v5855_v12 = vld [vmem:[#allocation1] sm:$0xff] }
 0x555   : > { %5887 = vst [vmem:[#allocation1] ss:$9 sm:$0xff] %v5882_v8  ;;  %11726 = vmatpush.msk.msra.mxu0 %vm5648_vm15, %v5855_v12 }
 0x556   : > { %5889 = vst [vmem:[#allocation1 + $0x1] ss:$9 sm:$0xff] %v5883_v38 }
 0x557   : > { %5891 = vst [vmem:[#allocation1 + $0x2] ss:$9 sm:$0xff] %v5884_v59 }
 0x558   : > { %5893 = vst [vmem:[#allocation1 + $0x3] ss:$9 sm:$0xff] %v5885_v7 }
 0x559   : > { %5895 = vst [vmem:[#allocation1 + $0x4] ss:$9 sm:$0xff] %v5886_v22 }
 0x560   : > { %v5896_v48 = vld [vmem:[#allocation1] sm:$0xff] }
 0x561   : > { %11728 = vmatpush.msk.msrb.mxu1 %vm5648_vm15, %v5896_v48 }
 0x5b7   : > { %v5730_v40 = vpop.f32.mrf.mxu2 }
 0x5b8   : > { %v5793_v51 = vsel %vm5792_vm10, %v5730_v40, -inf }
 0x5b9   : > { %5794 = vmax.xlane.f32.xlu0 %v5793_v51 }
 0x5cf   : > { %v5789_v20 = vpop.f32.mrf.mxu2 }
 0x5d0   : > { %v5796_v10 = vsel %vm5792_vm10, %v5789_v20, -inf }
 0x5d1   : > { %5797 = vmax.xlane.f32.xlu2 %v5796_v10 }
 0x62c   : > { %v5795_v2 = vpop.xlane.xlu0 %5794 }
 0x62d   : > { %v5799_v17 = vsub.f32 %v5730_v40, %v5795_v2 }
 0x62f   : > { %v5801_v43 = vmul.f32 1.442695, %v5799_v17 }
 0x631   : > { %13388 = vpow2.f32 %v5801_v43 }
 0x637   : > { %v13389_v15 = vpop.eup %13388 }
 0x638   : > { %v5805_v60 = vsel %vm5792_vm10, %v13389_v15, 0.0 }
 0x639   : > { %5806 = vadd.xlane.f32.xlu1 %v5805_v60 }
 0x644   : > { %v5798_v3 = vpop.xlane.xlu2 %5797 }
 0x645   : > { %v5800_v49 = vsub.f32 %v5789_v20, %v5798_v3 }
 0x647   : > { %v5803_v53 = vmul.f32 1.442695, %v5800_v49 }
 0x649   : > { %13390 = vpow2.f32 %v5803_v53 }
 0x64f   : > { %v13391_v4 = vpop.eup %13390 }
 0x650   : > { %v5808_v23 = vsel %vm5792_vm10, %v13391_v4, 0.0 }
 0x651   : > { %5809 = vadd.xlane.f32.xlu0 %v5808_v23 }
 0x6ac   : > { %v5807_v26 = vpop.xlane.xlu1 %5806 }
 0x6ad   : > { %13392 = vrcp.f32 %v5807_v26  ;;  %v5822_v54 = vand.u32 2147483648, %v5807_v26  ;;  %v5820_v18 = vand.u32 2147483647, %v5807_v26  ;;  %vm5816_vm11 = vweird.f32 %v5807_v26 }
 0x6af   : > { %v5823_v6 = vor.u32 1.1754944e-38, %v5822_v54  ;;  %vm5821_vm2 = vcmp.eq.f32.partialorder %v5820_v18, 8.507059e+37  ;;  %v5963_v54 = vrot.slane %v17226_v52, 2  ;;  %v5964_v18 = vrot.slane %v17233_v16, 2 }
 0x6b3   : > { %v13393_v50 = vpop.eup %13392 }
 0x6b4   : > { %v5812_v37 = vmul.f32 %v13393_v50, %v5807_v26  ;;  %vm5817_vm8 = vweird.f32 %v13393_v50 }
 0x6b5   : > { %vm5818_vm1 = vmor %vm5816_vm11, %vm5817_vm8 }
 0x6b6   : > { %v5813_v9 = vsub.f32 1.0, %v5812_v37 }
 0x6b8   : > { %v5814_v42 = vmul.f32 %v13393_v50, %v5813_v9  ;;  %v5962_v9 = vrot.slane %v17221_v31, 2 }
 0x6ba   : > { %v5815_v19 = vadd.f32 %v13393_v50, %v5814_v42 }
 0x6bc   : > { %v5819_v1 = vsel %vm5818_vm1, %v13393_v50, %v5815_v19  ;;  %v5965_v19 = vrot.slane %v17231_v45, 2 }
 0x6bd   : > { %v5824_v29 = vsel %vm5821_vm2, %v5823_v6, %v5819_v1  ;;  %v5966_v6 = vrot.slane %v17263_v57, 2 }
 0x6be   : > { %v5825_v30 = vmul.f32 %v13389_v15, %v5824_v29  ;;  %v6013_v29 = vrot.slane %v17286_v11, 2 }
 0x6c0   : > { %11727 = vmatmul.msk.f32.vlgmr.msra.gmra.mxu0 %vm5856_vm0, %v5825_v30  ;;  %v6014_v30 = vrot.slane %v17297_v44, 2 }
 0x6c4   : > { %v5810_v8 = vpop.xlane.xlu0 %5809 }
 0x6c5   : > { %13394 = vrcp.f32 %v5810_v8  ;;  %v5837_v7 = vand.u32 2147483648, %v5810_v8  ;;  %v5835_v48 = vand.u32 2147483647, %v5810_v8  ;;  %vm5831_vm3 = vweird.f32 %v5810_v8 }
 0x6c7   : > { %v5838_v51 = vor.u32 1.1754944e-38, %v5837_v7  ;;  %vm5836_vm11 = vcmp.eq.f32.partialorder %v5835_v48, 8.507059e+37  ;;  %v6112_v7 = vrot.slane %v17309_v0, 3 }
 0x6cb   : > { %v13395_v38 = vpop.eup %13394 }
 0x6cc   : > { %v5827_v12 = vmul.f32 %v13395_v38, %v5810_v8  ;;  %vm5832_vm9 = vweird.f32 %v13395_v38 }
 0x6cd   : > { %vm5833_vm8 = vmor %vm5831_vm3, %vm5832_vm9  ;;  %vm19057_vm3 = vcmask 523264  }
 0x6ce   : > { %v5828_v59 = vsub.f32 1.0, %v5827_v12  ;;  %v6016_v12 = vrot.slane %v17305_v41, 2  ;;  %vm19058_vm9 = vmmov %vm19057_vm3 }
 0x6cf   : > { %vm19059_vm1 = vmmov %vm19057_vm3 }
 0x6d0   : > { %v5829_v22 = vmul.f32 %v13395_v38, %v5828_v59  ;;  %v6017_v59 = vrot.slane %v17265_v32, 2  ;;  %vm19060_vm2 = vmmov %vm19059_vm1 }
 0x6d2   : > { %v5830_v40 = vadd.f32 %v13395_v38, %v5829_v22  ;;  %v6113_v22 = vrot.slane %v17312_v61, 3 }
 0x6d4   : > { %v5834_v20 = vsel %vm5833_vm8, %v13395_v38, %v5830_v40  ;;  %v6015_v38 = vrot.slane %v17269_v34, 2  ;;  %v6114_v40 = vrot.slane %v17320_v63, 3 }
 0x6d5   : > { %v5839_v10 = vsel %vm5836_vm11, %v5838_v51, %v5834_v20  ;;  %v6115_v51 = vrot.slane %v17318_v5, 3  ;;  %v6116_v20 = vrot.slane %v17315_v13, 3 }
 0x6d6   : > { %v5840_v2 = vmul.f32 %v13391_v4, %v5839_v10  ;;  %v6152_v10 = vrot.slane %v17324_v21, 3 }
 0x6d8   : > { %11729 = vmatmul.msk.f32.vlgmr.msrb.gmra.mxu1 %vm5856_vm0, %v5840_v2  ;;  %v6153_v2 = vrot.slane %v17329_v14, 3 }
 0x73d   : > { %v5879_v17 = vpop.f32.mrf.mxu0 }
 0x73e   : > { %v5924_v43 = vrot.slane %v5879_v17, 1  ;;  %v5925_v15 = vrot.slane %v5879_v17, 2  ;;  %v5926_v60 = vrot.slane %v5879_v17, 3  ;;  %5932 = vst [vmem:[#allocation1] ss:$9 sm:$0xff] %v5879_v17  ;;  %v5927_v3 = vrot.slane %v5879_v17, 4 }
 0x740   : > { %5934 = vst [vmem:[#allocation1 + $0x1] ss:$9 sm:$0xff] %v5924_v43  ;;  %v6154_v43 = vrot.slane %v17338_v58, 3 }
 0x741   : > { %5936 = vst [vmem:[#allocation1 + $0x2] ss:$9 sm:$0xff] %v5925_v15  ;;  %v6155_v15 = vrot.slane %v17341_v36, 3 }
 0x742   : > { %5938 = vst [vmem:[#allocation1 + $0x3] ss:$9 sm:$0xff] %v5926_v60  ;;  %v6156_v60 = vrot.slane %v17335_v56, 3 }
 0x743   : > { %5940 = vst [vmem:[#allocation1 + $0x4] ss:$9 sm:$0xff] %v5927_v3 }
 0x755   : > { %v5919_v49 = vpop.f32.mrf.mxu1 }
 0x756   : > { %v5928_v53 = vrot.slane %v5919_v49, 1  ;;  %v5929_v23 = vrot.slane %v5919_v49, 2  ;;  %5942 = vst [vmem:[#allocation1 + $0x5] ss:$9 sm:$0xff] %v5919_v49  ;;  %v5930_v26 = vrot.slane %v5919_v49, 3  ;;  %v5931_v4 = vrot.slane %v5919_v49, 4 }
 0x758   : > { %5944 = vst [vmem:[#allocation1 + $0x6] ss:$9 sm:$0xff] %v5928_v53 }
 0x759   : > { %5946 = vst [vmem:[#allocation1 + $0x7] ss:$9 sm:$0xff] %v5929_v23 }
 0x760   : > { %v17366_v50 = vld [vmem:[#allocation1] sm:$0xff] }
 0x761   : > { %5948 = vst [vmem:[#allocation1] ss:$9 sm:$0xff] %v5930_v26 }
 0x762   : > { %5949 = vst [vmem:[#allocation1 + $0x1] ss:$9 sm:$0xff] %v5931_v4 }
 0x769   : > { %v17368_v37 = vld [vmem:[#allocation1] sm:$0xff] }
 0x76a   : > { %5967 = vst [vmem:[#allocation1] ss:$9 sm:$0xff] %v17221_v31 }
 0x76b   : > { %5969 = vst [vmem:[#allocation1 + $0x1] ss:$9 sm:$0xff] %v17226_v52 }
 0x76c   : > { %5971 = vst [vmem:[#allocation1 + $0x2] ss:$9 sm:$0xff] %v17233_v16 }
 0x76d   : > { %5973 = vst [vmem:[#allocation1 + $0x3] ss:$9 sm:$0xff] %v17231_v45 }
 0x76e   : > { %5975 = vst [vmem:[#allocation1 + $0x4] ss:$9 sm:$0xff] %v17263_v57 }
 0x775   : > { %v5976_v42 = vld [vmem:[#allocation1] sm:$0xff] }
 0x776   : > { %5979 = vst [vmem:[#allocation1] ss:$9 sm:$0xff] %v5962_v9  ;;  %5977 = vrot.lane.b32.xlu2 %v5976_v42, %s13500_s25 }
 0x777   : > { %5981 = vst [vmem:[#allocation1 + $0x1] ss:$9 sm:$0xff] %v5963_v54 }
 0x778   : > { %5983 = vst [vmem:[#allocation1 + $0x2] ss:$9 sm:$0xff] %v5964_v18 }
 0x779   : > { %5985 = vst [vmem:[#allocation1 + $0x3] ss:$9 sm:$0xff] %v5965_v19 }
 0x77a   : > { %5987 = vst [vmem:[#allocation1 + $0x4] ss:$9 sm:$0xff] %v5966_v6 }
 0x781   : > { %v5988_v1 = vld [vmem:[#allocation1] sm:$0xff] }
 0x782   : > { %6018 = vst [vmem:[#allocation1] ss:$9 sm:$0xff] %v17286_v11  ;;  %11730 = vmatpush.xpose.msk.msra.mxu2 %vm19057_vm3, %v5988_v1 }
 0x783   : > { %6020 = vst [vmem:[#allocation1 + $0x1] ss:$9 sm:$0xff] %v17297_v44 }
 0x784   : > { %6022 = vst [vmem:[#allocation1 + $0x2] ss:$9 sm:$0xff] %v17269_v34 }
 0x785   : > { %6024 = vst [vmem:[#allocation1 + $0x3] ss:$9 sm:$0xff] %v17305_v41 }
 0x786   : > { %6026 = vst [vmem:[#allocation1 + $0x4] ss:$9 sm:$0xff] %v17265_v32 }
 0x78d   : > { %v6027_v8 = vld [vmem:[#allocation1] sm:$0xff] }
 0x78e   : > { %6030 = vst [vmem:[#allocation1] ss:$9 sm:$0xff] %v6013_v29  ;;  %6028 = vrot.lane.b32.xlu1 %v6027_v8, %s13500_s25 }
 0x78f   : > { %6032 = vst [vmem:[#allocation1 + $0x1] ss:$9 sm:$0xff] %v6014_v30 }
 0x790   : > { %6034 = vst [vmem:[#allocation1 + $0x2] ss:$9 sm:$0xff] %v6015_v38 }
 0x791   : > { %6036 = vst [vmem:[#allocation1 + $0x3] ss:$9 sm:$0xff] %v6016_v12  ;;  %v11798_v12 = vld [vmem:[%s13666_s27 + $0x30] sm:$0xf] }
 0x792   : > { %6038 = vst [vmem:[#allocation1 + $0x4] ss:$9 sm:$0xff] %v6017_v59  ;;  %v13139_v59 = vld [vmem:[%s13666_s27 + $0x34] sm:$0xf0] }
 0x799   : > { %v6039_v48 = vld [vmem:[#allocation1] sm:$0xff] }
 0x79a   : > { %6117 = vst [vmem:[#allocation1] ss:$9 sm:$0xff] %v6112_v7  ;;  %11732 = vmatpush.xpose.msk.msrb.mxu3 %vm19058_vm9, %v6039_v48  ;;  %v11790_v7 = vld [vmem:[%s13666_s27 + $0x20] sm:$0xf]  ;;  %v13137_v48 = vld [vmem:[%s13666_s27 + $0x24] sm:$0xf0] }
 0x79b   : > { %6119 = vst [vmem:[#allocation1 + $0x1] ss:$9 sm:$0xff] %v6113_v22  ;;  %v11799_v22 = vor.u32 %v13139_v59, %v11798_v12  ;;  %v11792_v12 = vld [vmem:[%s13666_s27 + $0x28] sm:$0xf0] }
 0x79c   : > { %6121 = vst [vmem:[#allocation1 + $0x2] ss:$9 sm:$0xff] %v6114_v40  ;;  %v11791_v40 = vor.u32 %v13137_v48, %v11790_v7  ;;  %v13134_v7 = vld [vmem:[%s13666_s27 + $0x14] sm:$0xf] }
 0x79d   : > { %6123 = vst [vmem:[#allocation1 + $0x3] ss:$9 sm:$0xff] %v6115_v51  ;;  %v11782_v51 = vld [vmem:[%s13666_s27 + $0x10] sm:$0xf] }
 0x79e   : > { %6125 = vst [vmem:[#allocation1 + $0x4] ss:$9 sm:$0xff] %v6116_v20  ;;  %v13135_v20 = vld [vmem:[%s13666_s27 + $0x14] sm:$0xf0] }
 0x7a5   : > { %v6126_v17 = vld [vmem:[#allocation1] sm:$0xff] }
 0x7a6   : > { %6157 = vst [vmem:[#allocation1] ss:$9 sm:$0xff] %v6152_v10  ;;  %11734 = vmatpush.msk.msrb.mxu0 %vm5648_vm15, %v6126_v17  ;;  %v11783_v10 = vor.u32 %v13135_v20, %v11782_v51  ;;  %v13133_v17 = vld [vmem:[%s13666_s27 + $0x4] sm:$0xf0] }
 0x7a7   : > { %6159 = vst [vmem:[#allocation1 + $0x1] ss:$9 sm:$0xff] %v6153_v2  ;;  %v11774_v2 = vld [vmem:[%s13666_s27] sm:$0xf] }
 0x7a8   : > { %6161 = vst [vmem:[#allocation1 + $0x2] ss:$9 sm:$0xff] %v6154_v43  ;;  %6350 = vmatpush.bf16.msra.mxu0 %v11799_v22  ;;  %v11775_v43 = vor.u32 %v13133_v17, %v11774_v2  ;;  %v11784_v22 = vld [vmem:[%s13666_s27 + $0x18] sm:$0xf0] }
 0x7a9   : > { %6163 = vst [vmem:[#allocation1 + $0x3] ss:$9 sm:$0xff] %v6155_v15  ;;  %v11787_v48 = vor.u32 %v13134_v7, %v11784_v22  ;;  %v13145_v7 = vld [vmem:[%s13666_s27 + $0x64] sm:$0xf0]  ;;  %v13144_v22 = vld [vmem:[%s13666_s27 + $0x64] sm:$0xf] }
 0x7aa   : > { %6165 = vst [vmem:[#allocation1 + $0x4] ss:$9 sm:$0xff] %v6156_v60 }
 0x7ac   : > { %6351 = vmatpush.bf16.msra.mxu0 %v11791_v40  ;;  %v11776_v40 = vld [vmem:[%s13666_s27 + $0x8] sm:$0xf0] }
 0x7b0   : > { %6352 = vmatpush.bf16.msra.mxu0 %v11783_v10 }
 0x7b1   : > { %v6166_v3 = vld [vmem:[#allocation1] sm:$0xff] }
 0x7b2   : > { %11736 = vmatpush.msk.msra.mxu1 %vm5648_vm15, %v6166_v3 }
 0x7b4   : > { %6353 = vmatpush.bf16.msra.mxu0 %v11775_v43 }
 0x7d0   : > { %v5978_v49 = vpop.permute.xlu2 %5977 }
 0x7d1   : > { %11731 = vmatmul.msk.f32.vlgmr.msra.gmra.mxu2 %vm19059_vm1, %v5978_v49 }
 0x800   : > { %v6029_v53 = vpop.permute.xlu1 %6028 }
 0x801   : > { %11733 = vmatmul.msk.f32.vlgmr.msrb.gmra.mxu3 %vm19060_vm2, %v6029_v53 }
 0x854   : > { %v6010_v23 = vpop.f32.mrf.mxu2 }
 0x855   : > { %v6064_v26 = vsel %vm5792_vm10, %v6010_v23, -inf }
 0x856   : > { %6065 = vmax.xlane.f32.xlu0 %v6064_v26 }
 0x884   : > { %v6061_v4 = vpop.f32.mrf.mxu3 }
 0x885   : > { %v6067_v9 = vsel %vm5792_vm10, %v6061_v4, -inf }
 0x886   : > { %6068 = vmax.xlane.f32.xlu0 %v6067_v9 }
 0x8c9   : > { %v6066_v54 = vpop.xlane.xlu0 %6065 }
 0x8ca   : > { %v6070_v42 = vsub.f32 %v6010_v23, %v6066_v54 }
 0x8cc   : > { %v6072_v18 = vmul.f32 1.442695, %v6070_v42 }
 0x8ce   : > { %13396 = vpow2.f32 %v6072_v18 }
 0x8d4   : > { %v13397_v19 = vpop.eup %13396 }
 0x8d5   : > { %v6076_v6 = vsel %vm5792_vm10, %v13397_v19, 0.0 }
 0x8d6   : > { %6077 = vadd.xlane.f32.xlu0 %v6076_v6  ;;  %v5953_v6 = vpack.c.bf16 %v17368_v37, %v17366_v50 }
 0x8f9   : > { %v6069_v1 = vpop.xlane.xlu0 %6068 }
 0x8fa   : > { %v6071_v29 = vsub.f32 %v6061_v4, %v6069_v1  ;;  %v13138_v1 = vld [vmem:[%s13666_s27 + $0x34] sm:$0xf] }
 0x8fc   : > { %v6074_v30 = vmul.f32 1.442695, %v6071_v29  ;;  %v11800_v29 = vld [vmem:[%s13666_s27 + $0x38] sm:$0xf0] }
 0x8fe   : > { %13398 = vpow2.f32 %v6074_v30  ;;  %v13136_v30 = vld [vmem:[%s13666_s27 + $0x24] sm:$0xf] }
 0x8ff   : > { %v11795_v59 = vor.u32 %v13136_v30, %v11792_v12 }
 0x904   : > { %v17411_v8 = vpop.eup %13398 }
 0x905   : > { %v6079_v38 = vsel %vm5792_vm10, %v17411_v8, 0.0 }
 0x906   : > { %6080 = vadd.xlane.f32.xlu2 %v6079_v38  ;;  %v11803_v38 = vor.u32 %v13138_v1, %v11800_v29  ;;  %v11766_v29 = vld [vmem:[%s13666_s27 + $0x78] sm:$0xf0] }
 0x908   : > { %6364 = vmatpush.bf16.msrb.mxu1 %v11803_v38 }
 0x90c   : > { %6365 = vmatpush.bf16.msrb.mxu1 %v11795_v59  ;;  %v11756_v59 = vld [vmem:[%s13666_s27 + $0x60] sm:$0xf] }
 0x910   : > { %6366 = vmatpush.bf16.msrb.mxu1 %v11787_v48  ;;  %v11757_v48 = vor.u32 %v13145_v7, %v11756_v59  ;;  %v6383_v59 = vrot.slane %v17315_v13, 2  ;;  %v6428_v7 = vrot.slane %v17286_v11, 1  ;;  %v6433_v13 = vrot.slane %v17324_v21, 2 }
 0x911   : > { %v6532_v21 = vrot.slane %v17233_v16, 4 }
 0x949   : > { %v6078_v15 = vpop.xlane.xlu0 %6077 }
 0x94a   : > { %13400 = vrcp.f32 %v6078_v15  ;;  %v6093_v53 = vand.u32 2147483648, %v6078_v15  ;;  %v6091_v26 = vand.u32 2147483647, %v6078_v15  ;;  %vm6087_vm11 = vweird.f32 %v6078_v15 }
 0x94c   : > { %v6094_v9 = vor.u32 1.1754944e-38, %v6093_v53  ;;  %vm6092_vm9 = vcmp.eq.f32.partialorder %v6091_v26, 8.507059e+37 }
 0x950   : > { %v13401_v60 = vpop.eup %13400 }
 0x951   : > { %v6083_v3 = vmul.f32 %v13401_v60, %v6078_v15  ;;  %vm6088_vm8 = vweird.f32 %v13401_v60 }
 0x952   : > { %vm6089_vm3 = vmor %vm6087_vm11, %vm6088_vm8 }
 0x953   : > { %v6084_v49 = vsub.f32 1.0, %v6083_v3 }
 0x955   : > { %v6085_v23 = vmul.f32 %v13401_v60, %v6084_v49 }
 0x957   : > { %v6086_v4 = vadd.f32 %v13401_v60, %v6085_v23 }
 0x959   : > { %v6090_v54 = vsel %vm6089_vm3, %v13401_v60, %v6086_v4 }
 0x95a   : > { %v6095_v42 = vsel %vm6092_vm9, %v6094_v9, %v6090_v54  ;;  %vm19061_vm9 = vmmov %vm19059_vm1 }
 0x95b   : > { %v6096_v18 = vmul.f32 %v13397_v19, %v6095_v42  ;;  %v13132_v19 = vld [vmem:[%s13666_s27 + $0x4] sm:$0xf]  ;;  %v11764_v42 = vld [vmem:[%s13666_s27 + $0x70] sm:$0xf] }
 0x95c   : > { %v11779_v51 = vor.u32 %v13132_v19, %v11776_v40  ;;  %v11758_v19 = vld [vmem:[%s13666_s27 + $0x68] sm:$0xf0] }
 0x95d   : > { %11735 = vmatmul.msk.f32.vlgmr.msrb.gmra.mxu0 %vm5856_vm0, %v6096_v18  ;;  %v13146_v18 = vld [vmem:[%s13666_s27 + $0x74] sm:$0xf]  ;;  %v11761_v40 = vor.u32 %v13144_v22, %v11758_v19  ;;  %v6429_v22 = vrot.slane %v17297_v44, 1 }
 0x95e   : > { %6367 = vmatpush.bf16.msrb.mxu1 %v11779_v51  ;;  %v11748_v51 = vld [vmem:[%s13666_s27 + $0x50] sm:$0xf] }
 0x965   : > { %11804 = vmatmul.msk.bf16.vlgmr.msra.gmra.mxu0 %vm19059_vm1, %v5953_v6 }
 0x979   : > { %v6081_v20 = vpop.xlane.xlu2 %6080 }
 0x97a   : > { %13402 = vrcp.f32 %v6081_v20  ;;  %v6108_v2 = vand.u32 2147483648, %v6081_v20  ;;  %v6106_v43 = vand.u32 2147483647, %v6081_v20  ;;  %vm6102_vm8 = vweird.f32 %v6081_v20 }
 0x97c   : > { %v6109_v60 = vor.u32 1.1754944e-38, %v6108_v2  ;;  %vm6107_vm3 = vcmp.eq.f32.partialorder %v6106_v43, 8.507059e+37  ;;  %v13141_v43 = vld [vmem:[%s13666_s27 + $0x44] sm:$0xf0] }
 0x980   : > { %v13403_v50 = vpop.eup %13402 }
 0x981   : > { %v6098_v37 = vmul.f32 %v13403_v50, %v6081_v20  ;;  %vm6103_vm2 = vweird.f32 %v13403_v50  ;;  %v13143_v20 = vld [vmem:[%s13666_s27 + $0x54] sm:$0xf0] }
 0x982   : > { %vm6104_vm11 = vmor %vm6102_vm8, %vm6103_vm2 }
 0x983   : > { %v6099_v10 = vsub.f32 1.0, %v6098_v37  ;;  %v11749_v37 = vor.u32 %v13143_v20, %v11748_v51  ;;  %vm19062_vm2 = vmmov %vm19059_vm1  ;;  %v6436_v51 = vrot.slane %v17341_v36, 2  ;;  %v6437_v20 = vrot.slane %v17335_v56, 2 }
 0x984   : > { %vm19063_vm8 = vmmov %vm19059_vm1 }
 0x985   : > { %v6100_v17 = vmul.f32 %v13403_v50, %v6099_v10  ;;  %v11750_v10 = vld [vmem:[%s13666_s27 + $0x58] sm:$0xf0] }
 0x987   : > { %v6101_v15 = vadd.f32 %v13403_v50, %v6100_v17  ;;  %v11740_v17 = vld [vmem:[%s13666_s27 + $0x40] sm:$0xf] }
 0x989   : > { %v6105_v3 = vsel %vm6104_vm11, %v13403_v50, %v6101_v15  ;;  %v13142_v50 = vld [vmem:[%s13666_s27 + $0x54] sm:$0xf]  ;;  %v13140_v15 = vld [vmem:[%s13666_s27 + $0x44] sm:$0xf]  ;;  %vm19064_vm11 = vmmov %vm19059_vm1 }
 0x98a   : > { %v6110_v49 = vsel %vm6107_vm3, %v6109_v60, %v6105_v3  ;;  %v11753_v2 = vor.u32 %v13142_v50, %v11750_v10  ;;  %v11741_v3 = vor.u32 %v13141_v43, %v11740_v17  ;;  %v6530_v50 = vrot.slane %v17221_v31, 4  ;;  %vm19065_vm3 = vmmov %vm19059_vm1 }
 0x98b   : > { %v6111_v53 = vmul.f32 %v17411_v8, %v6110_v49  ;;  %v13147_v8 = vld [vmem:[%s13666_s27 + $0x74] sm:$0xf0]  ;;  %v11742_v49 = vld [vmem:[%s13666_s27 + $0x48] sm:$0xf0] }
 0x98c   : > { %v11765_v1 = vor.u32 %v13147_v8, %v11764_v42  ;;  %v6376_v42 = vrot.slane %v17233_v16, 1  ;;  %v6572_v16 = vrot.slane %v17269_v34, 4 }
 0x98d   : > { %11737 = vmatmul.msk.f32.vlgmr.msra.gmra.mxu1 %vm5856_vm0, %v6111_v53 }
 0x98e   : > { %6279 = vmatpush.bf16.msrb.mxu2 %v11765_v1  ;;  %v6378_v1 = vrot.slane %v17263_v57, 1 }
 0x992   : > { %6280 = vmatpush.bf16.msrb.mxu2 %v11757_v48 }
 0x995   : > { %11805 = vmatmul.msk.bf16.vlgmr.msrb.gmra.mxu1 %vm19061_vm9, %v5953_v6  ;;  %v11769_v6 = vor.u32 %v13146_v18, %v11766_v29  ;;  %v6377_v18 = vrot.slane %v17231_v45, 1  ;;  %v6379_v29 = vrot.slane %v17309_v0, 2  ;;  %v6430_v0 = vrot.slane %v17269_v34, 1  ;;  %vm19066_vm9 = vmmov %vm19059_vm1 }
 0x996   : > { %6281 = vmatpush.bf16.msrb.mxu2 %v11749_v37  ;;  %v6531_v37 = vrot.slane %v17226_v52, 4 }
 0x997   : > { %6293 = vmatpush.bf16.msra.mxu3 %v11769_v6  ;;  %v6380_v6 = vrot.slane %v17312_v61, 2  ;;  %v6431_v61 = vrot.slane %v17305_v41, 1 }
 0x99a   : > { %6282 = vmatpush.bf16.msrb.mxu2 %v11741_v3 }
 0x99b   : > { %6294 = vmatpush.bf16.msra.mxu3 %v11761_v40  ;;  %v6435_v40 = vrot.slane %v17338_v58, 2  ;;  %v6534_v58 = vrot.slane %v17263_v57, 4  ;;  %v6574_v57 = vrot.slane %v17265_v32, 4 }
 0x99f   : > { %6295 = vmatpush.bf16.msra.mxu3 %v11753_v2 }
 0x9da   : > { %v6149_v23 = vpop.f32.mrf.mxu0 }
 0x9db   : > { %v6194_v26 = vrot.slane %v6149_v23, 1  ;;  %v6195_v4 = vrot.slane %v6149_v23, 2  ;;  %v6196_v9 = vrot.slane %v6149_v23, 3  ;;  %6202 = vst [vmem:[#allocation1] ss:$9 sm:$0xff] %v6149_v23  ;;  %v6197_v54 = vrot.slane %v6149_v23, 4 }
 0x9dd   : > { %6204 = vst [vmem:[#allocation1 + $0x1] ss:$9 sm:$0xff] %v6194_v26  ;;  %v11745_v26 = vor.u32 %v13140_v15, %v11742_v49 }
 0x9de   : > { %6206 = vst [vmem:[#allocation1 + $0x2] ss:$9 sm:$0xff] %v6195_v4  ;;  %v6374_v4 = vrot.slane %v17221_v31, 1  ;;  %v6570_v31 = vrot.slane %v17286_v11, 4 }
 0x9df   : > { %6208 = vst [vmem:[#allocation1 + $0x3] ss:$9 sm:$0xff] %v6196_v9  ;;  %6296 = vmatpush.bf16.msra.mxu3 %v11745_v26  ;;  %v6375_v9 = vrot.slane %v17226_v52, 1  ;;  %v6571_v52 = vrot.slane %v17297_v44, 4 }
 0x9e0   : > { %6210 = vst [vmem:[#allocation1 + $0x4] ss:$9 sm:$0xff] %v6197_v54 }
 0xa0a   : > { %v6189_v30 = vpop.f32.mrf.mxu1 }
 0xa0b   : > { %v6198_v38 = vrot.slane %v6189_v30, 1  ;;  %v6199_v12 = vrot.slane %v6189_v30, 2  ;;  %6212 = vst [vmem:[#allocation1 + $0x5] ss:$9 sm:$0xff] %v6189_v30  ;;  %v6200_v60 = vrot.slane %v6189_v30, 3  ;;  %v6201_v53 = vrot.slane %v6189_v30, 4 }
 0xa0d   : > { %6214 = vst [vmem:[#allocation1 + $0x6] ss:$9 sm:$0xff] %v6198_v38  ;;  %v6381_v38 = vrot.slane %v17320_v63, 2  ;;  %v6434_v63 = vrot.slane %v17329_v14, 2  ;;  %v6533_v14 = vrot.slane %v17231_v45, 4  ;;  %v6573_v45 = vrot.slane %v17305_v41, 4 }
 0xa0e   : > { %6216 = vst [vmem:[#allocation1 + $0x7] ss:$9 sm:$0xff] %v6199_v12  ;;  %v6382_v12 = vrot.slane %v17318_v5, 2  ;;  %v6432_v5 = vrot.slane %v17265_v32, 1 }
 0xa12   : > { %v17492_v11 = vpop.f32.mrf.mxu1 }
 0xa15   : > { %v6217_v23 = vld [vmem:[#allocation1] sm:$0xff] }
 0xa16   : > { %6218 = vst [vmem:[#allocation1] ss:$9 sm:$0xff] %v6200_v60 }
 0xa17   : > { %6219 = vst [vmem:[#allocation1 + $0x1] ss:$9 sm:$0xff] %v6201_v53 }
 0xa1a   : > { %v6371_v2 = vpop.f32.mrf.mxu1 }
 0xa1e   : > { %v6220_v54 = vld [vmem:[#allocation1] sm:$0xff] }
 0xa1f   : > { %6384 = vst [vmem:[#allocation1] ss:$9 sm:$0xff] %v6374_v4  ;;  %v6223_v8 = vpack.c.bf16 %v6220_v54, %v6217_v23 }
 0xa20   : > { %6386 = vst [vmem:[#allocation1 + $0x1] ss:$9 sm:$0xff] %v6375_v9 }
 0xa21   : > { %6388 = vst [vmem:[#allocation1 + $0x2] ss:$9 sm:$0xff] %v6376_v42  ;;  %11770 = vmatmul.msk.bf16.vlgmr.msrb.gmra.mxu2 %vm19059_vm1, %v6223_v8  ;;  %11771 = vmatmul.msk.bf16.vlgmr.msra.gmra.mxu3 %vm19062_vm2, %v6223_v8 }
 0xa22   : > { %6390 = vst [vmem:[#allocation1 + $0x3] ss:$9 sm:$0xff] %v6377_v18 }
 0xa23   : > { %6392 = vst [vmem:[#allocation1 + $0x4] ss:$9 sm:$0xff] %v6378_v1 }
 0xa2a   : > { %v6393_v30 = vld [vmem:[#allocation1] sm:$0xff] }
 0xa2b   : > { %6394 = vst [vmem:[#allocation1] ss:$9 sm:$0xff] %v6379_v29 }
 0xa2c   : > { %6396 = vst [vmem:[#allocation1 + $0x1] ss:$9 sm:$0xff] %v6380_v6 }
 0xa2d   : > { %6398 = vst [vmem:[#allocation1 + $0x2] ss:$9 sm:$0xff] %v6381_v38 }
 0xa2e   : > { %6400 = vst [vmem:[#allocation1 + $0x3] ss:$9 sm:$0xff] %v6382_v12 }
 0xa2f   : > { %6402 = vst [vmem:[#allocation1 + $0x4] ss:$9 sm:$0xff] %v6383_v59 }
 0xa36   : > { %v6403_v48 = vld [vmem:[#allocation1] sm:$0xff] }
 0xa37   : > { %6438 = vst [vmem:[#allocation1] ss:$9 sm:$0xff] %v6428_v7  ;;  %11806 = vmatpush.xpose.msk.msra.mxu1 %vm19063_vm8, %v6403_v48 }
 0xa38   : > { %6440 = vst [vmem:[#allocation1 + $0x1] ss:$9 sm:$0xff] %v6429_v22 }
 0xa39   : > { %6442 = vst [vmem:[#allocation1 + $0x2] ss:$9 sm:$0xff] %v6430_v0 }
 0xa3a   : > { %6444 = vst [vmem:[#allocation1 + $0x3] ss:$9 sm:$0xff] %v6431_v61  ;;  %11807 = vmatmul.msk.f32.vlgmr.msra.gmra.mxu1 %vm19064_vm11, %v6393_v30 }
 0xa3b   : > { %6446 = vst [vmem:[#allocation1 + $0x4] ss:$9 sm:$0xff] %v6432_v5 }
 0xa42   : > { %v6447_v19 = vld [vmem:[#allocation1] sm:$0xff] }
 0xa43   : > { %6448 = vst [vmem:[#allocation1] ss:$9 sm:$0xff] %v6433_v13 }
 0xa44   : > { %6450 = vst [vmem:[#allocation1 + $0x1] ss:$9 sm:$0xff] %v6434_v63 }
 0xa45   : > { %6452 = vst [vmem:[#allocation1 + $0x2] ss:$9 sm:$0xff] %v6435_v40 }
 0xa46   : > { %6454 = vst [vmem:[#allocation1 + $0x3] ss:$9 sm:$0xff] %v6436_v51 }
 0xa47   : > { %6456 = vst [vmem:[#allocation1 + $0x4] ss:$9 sm:$0xff] %v6437_v20 }
 0xa4e   : > { %v6457_v10 = vld [vmem:[#allocation1] sm:$0xff] }
 0xa4f   : > { %6535 = vst [vmem:[#allocation1] ss:$9 sm:$0xff] %v6530_v50  ;;  %11808 = vmatpush.xpose.msk.msrb.mxu3 %vm19065_vm3, %v6457_v10 }
 0xa50   : > { %6537 = vst [vmem:[#allocation1 + $0x1] ss:$9 sm:$0xff] %v6531_v37 }
 0xa51   : > { %6539 = vst [vmem:[#allocation1 + $0x2] ss:$9 sm:$0xff] %v6532_v21  ;;  %v17504_v21 = vpop.f32.mrf.mxu0 }
 0xa52   : > { %6541 = vst [vmem:[#allocation1 + $0x3] ss:$9 sm:$0xff] %v6533_v14  ;;  %11809 = vmatmul.msk.f32.vlgmr.msrb.gmra.mxu3 %vm19066_vm9, %v6447_v19 }
 0xa53   : > { %6543 = vst [vmem:[#allocation1 + $0x4] ss:$9 sm:$0xff] %v6534_v58 }
 0xa59   : > { %v17506_v14 = vpop.f32.mrf.mxu0 }
 0xa5a   : > { %v6544_v56 = vld [vmem:[#allocation1] sm:$0xff] }
 0xa5b   : > { %6575 = vst [vmem:[#allocation1] ss:$9 sm:$0xff] %v6570_v31  ;;  %11810 = vmatpush.msk.msrb.mxu0 %vm5648_vm15, %v6544_v56 }
 0xa5c   : > { %6577 = vst [vmem:[#allocation1 + $0x1] ss:$9 sm:$0xff] %v6571_v52 }
 0xa5d   : > { %6579 = vst [vmem:[#allocation1 + $0x2] ss:$9 sm:$0xff] %v6572_v16 }
 0xa5e   : > { %6581 = vst [vmem:[#allocation1 + $0x3] ss:$9 sm:$0xff] %v6573_v45  ;;  %v11840_v45 = vld [vmem:[%s13666_s27 + $0xb0] sm:$0xf] }
 0xa5f   : > { %6583 = vst [vmem:[#allocation1 + $0x4] ss:$9 sm:$0xff] %v6574_v57  ;;  %v13155_v57 = vld [vmem:[%s13666_s27 + $0xb4] sm:$0xf0] }
 0xa66   : > { %v6584_v36 = vld [vmem:[#allocation1] sm:$0xff] }
 0xa67   : > { %11812 = vmatpush.msk.msrb.mxu1 %vm5648_vm15, %v6584_v36  ;;  %v13154_v36 = vld [vmem:[%s13666_s27 + $0xb4] sm:$0xf] }
 0xaa4   : > { %v17494_v44 = vpop.f32.mrf.mxu3 }
 0xaac   : > { %v6300_v34 = vpop.f32.mrf.mxu3 }
 0xaad   : > { %v17496_v17 = vadd.f32 %v6371_v2, %v6300_v34  ;;  %v11841_v2 = vor.u32 %v13155_v57, %v11840_v45  ;;  %v11842_v34 = vld [vmem:[%s13666_s27 + $0xb8] sm:$0xf0] }
 0xaaf   : > { %6697 = vmatpush.bf16.msra.mxu2 %v11841_v2 }
 0xab7   : > { %v6425_v43 = vpop.f32.mrf.mxu1 }
 0xab8   : > { %v6482_v41 = vsel %vm5792_vm10, %v6425_v43, -inf }
 0xab9   : > { %6483 = vmax.xlane.f32.xlu1 %v6482_v41  ;;  %v11832_v41 = vld [vmem:[%s13666_s27 + $0xa0] sm:$0xf] }
 0xad5   : > { %v6479_v15 = vpop.f32.mrf.mxu3 }
 0xad6   : > { %v6485_v32 = vsel %vm5792_vm10, %v6479_v15, -inf }
 0xad7   : > { %6486 = vmax.xlane.f32.xlu0 %v6485_v32  ;;  %v13152_v32 = vld [vmem:[%s13666_s27 + $0xa4] sm:$0xf] }
 0xb2c   : > { %v6484_v60 = vpop.xlane.xlu1 %6483 }
 0xb2d   : > { %v6488_v3 = vsub.f32 %v6425_v43, %v6484_v60  ;;  %v11845_v43 = vor.u32 %v13154_v36, %v11842_v34 }
 0xb2f   : > { %v6490_v49 = vmul.f32 1.442695, %v6488_v3  ;;  %6711 = vmatpush.bf16.msra.mxu3 %v11845_v43  ;;  %v11834_v3 = vld [vmem:[%s13666_s27 + $0xa8] sm:$0xf0] }
 0xb31   : > { %13404 = vpow2.f32 %v6490_v49  ;;  %v11837_v49 = vor.u32 %v13152_v32, %v11834_v3 }
 0xb33   : > { %6712 = vmatpush.bf16.msra.mxu3 %v11837_v49 }
 0xb37   : > { %v13405_v53 = vpop.eup %13404 }
 0xb38   : > { %v6494_v23 = vsel %vm5792_vm10, %v13405_v53, 0.0 }
 0xb39   : > { %6495 = vadd.xlane.f32.xlu0 %v6494_v23  ;;  %v13151_v23 = vld [vmem:[%s13666_s27 + $0x94] sm:$0xf0] }
 0xb4a   : > { %v6487_v26 = vpop.xlane.xlu0 %6486 }
 0xb4b   : > { %v6489_v4 = vsub.f32 %v6479_v15, %v6487_v26  ;;  %v13153_v15 = vld [vmem:[%s13666_s27 + $0xa4] sm:$0xf0]  ;;  %v13150_v26 = vld [vmem:[%s13666_s27 + $0x94] sm:$0xf] }
 0xb4c   : > { %v11833_v60 = vor.u32 %v13153_v15, %v11832_v41 }
 0xb4d   : > { %v6492_v9 = vmul.f32 1.442695, %v6489_v4 }
 0xb4e   : > { %6698 = vmatpush.bf16.msra.mxu2 %v11833_v60 }
 0xb4f   : > { %13406 = vpow2.f32 %v6492_v9  ;;  %v11826_v9 = vld [vmem:[%s13666_s27 + $0x98] sm:$0xf0] }
 0xb55   : > { %v13407_v54 = vpop.eup %13406 }
 0xb56   : > { %v6497_v42 = vsel %vm5792_vm10, %v13407_v54, 0.0 }
 0xb57   : > { %6498 = vadd.xlane.f32.xlu0 %v6497_v42  ;;  %v13149_v42 = vld [vmem:[%s13666_s27 + $0x84] sm:$0xf0] }
 0xbac   : > { %v6496_v8 = vpop.xlane.xlu0 %6495 }
 0xbad   : > { %13408 = vrcp.f32 %v6496_v8  ;;  %v6511_v6 = vand.u32 2147483648, %v6496_v8  ;;  %v6509_v38 = vand.u32 2147483647, %v6496_v8  ;;  %vm6505_vm1 = vweird.f32 %v6496_v8 }
 0xbaf   : > { %v6512_v59 = vor.u32 1.1754944e-38, %v6511_v6  ;;  %vm6510_vm8 = vcmp.eq.f32.partialorder %v6509_v38, 8.507059e+37 }
 0xbb3   : > { %v13409_v18 = vpop.eup %13408 }
 0xbb4   : > { %v6501_v1 = vmul.f32 %v13409_v18, %v6496_v8  ;;  %vm6506_vm15 = vweird.f32 %v13409_v18  ;;  %v11829_v8 = vor.u32 %v13150_v26, %v11826_v9 }
 0xbb5   : > { %vm6507_vm2 = vmor %vm6505_vm1, %vm6506_vm15  ;;  %vm19070_vm1 = vcmask 1040384  }
 0xbb6   : > { %v6502_v29 = vsub.f32 1.0, %v6501_v1  ;;  %v11818_v1 = vld [vmem:[%s13666_s27 + $0x88] sm:$0xf0]  ;;  %6713 = vmatpush.bf16.msra.mxu3 %v11829_v8 }
 0xbb8   : > { %v6503_v30 = vmul.f32 %v13409_v18, %v6502_v29 }
 0xbba   : > { %v6504_v12 = vadd.f32 %v13409_v18, %v6503_v30 }
 0xbbc   : > { %v6508_v7 = vsel %vm6507_vm2, %v13409_v18, %v6504_v12  ;;  %v13148_v18 = vld [vmem:[%s13666_s27 + $0x84] sm:$0xf]  ;;  %vm19071_vm2 = vmmov %vm19070_vm1 }
 0xbbd   : > { %v6513_v22 = vsel %vm6510_vm8, %v6512_v59, %v6508_v7  ;;  %v11821_v6 = vor.u32 %v13148_v18, %v11818_v1  ;;  %vm19072_vm8 = vmmov %vm19070_vm1 }
 0xbbe   : > { %v6514_v48 = vmul.f32 %v13405_v53, %v6513_v22  ;;  %v11824_v53 = vld [vmem:[%s13666_s27 + $0x90] sm:$0xf] }
 0xbbf   : > { %v11825_v4 = vor.u32 %v13151_v23, %v11824_v53  ;;  %6714 = vmatpush.bf16.msra.mxu3 %v11821_v6 }
 0xbc0   : > { %11811 = vmatmul.msk.f32.vlgmr.msrb.gmra.mxu0 %vm5856_vm0, %v6514_v48 }
 0xbc1   : > { %6699 = vmatpush.bf16.msra.mxu2 %v11825_v4 }
 0xbca   : > { %v6499_v0 = vpop.xlane.xlu0 %6498 }
 0xbcb   : > { %13410 = vrcp.f32 %v6499_v0  ;;  %v6526_v63 = vand.u32 2147483648, %v6499_v0  ;;  %v6524_v40 = vand.u32 2147483647, %v6499_v0  ;;  %vm6520_vm11 = vweird.f32 %v6499_v0 }
 0xbcd   : > { %v6527_v20 = vor.u32 1.1754944e-38, %v6526_v63  ;;  %vm6525_vm9 = vcmp.eq.f32.partialorder %v6524_v40, 8.507059e+37 }
 0xbd1   : > { %v13411_v61 = vpop.eup %13410 }
 0xbd2   : > { %v6516_v5 = vmul.f32 %v13411_v61, %v6499_v0  ;;  %vm6521_vm10 = vweird.f32 %v13411_v61 }
 0xbd3   : > { %vm6522_vm3 = vmor %vm6520_vm11, %vm6521_vm10  ;;  %vm19076_vm11 = vcmask 1041408  }
 0xbd4   : > { %v6517_v13 = vsub.f32 1.0, %v6516_v5  ;;  %v6769_v5 = vld [vmem:[%s19069_s28] sm:$0x3] }
 0xbd6   : > { %v6518_v19 = vmul.f32 %v13411_v61, %v6517_v13  ;;  %v6772_v13 = vperm.slane %v6769_v5, 1 }
 0xbd8   : > { %v6519_v51 = vadd.f32 %v13411_v61, %v6518_v19  ;;  %v6771_v19 = vperm.slane %v6769_v5, 0  ;;  %v6773_v40 = vrot.slane %v6772_v13, 7 }
 0xbda   : > { %v6523_v50 = vsel %vm6522_vm3, %v13411_v61, %v6519_v51  ;;  %v6284_v61 = vpop.f32.mrf.mxu2  ;;  %v6370_v51 = vadd.f32 %v17492_v11, %v17494_v44  ;;  %v6787_v45 = vsel %vm4959_vm14, %v6773_v40, %v6771_v19  ;;  %v6775_v57 = vsel %vm4719_vm4, %v6771_v19, %v6773_v40 }
 0xbdb   : > { %v6528_v37 = vsel %vm6525_vm9, %v6527_v20, %v6523_v50  ;;  %v6777_v20 = vsel %vm4722_vm5, %v6771_v19, %v6773_v40  ;;  %v6779_v50 = vsel %vm4725_vm6, %v6771_v19, %v6773_v40  ;;  %v6788_v15 = vrot.slane %v6787_v45, 7 }
 0xbdc   : > { %v6529_v10 = vmul.f32 %v13407_v54, %v6528_v37  ;;  %v11816_v54 = vld [vmem:[%s13666_s27 + $0x80] sm:$0xf]  ;;  %v6356_v37 = vadd.f32 %v17504_v21, %v6284_v61  ;;  %v6778_v44 = vrot.slane %v6777_v20, 2  ;;  %v6780_v36 = vrot.slane %v6779_v50, 3 }
 0xbdd   : > { %v11817_v29 = vor.u32 %v13149_v42, %v11816_v54  ;;  %v6774_v32 = vsel %vm19070_vm1, %v6771_v19, %v6773_v40  ;;  %v6776_v60 = vrot.slane %v6775_v57, 1  ;;  %vm19077_vm3 = vcmask 517120  }
 0xbde   : > { %11813 = vmatmul.msk.f32.vlgmr.msrb.gmra.mxu1 %vm5856_vm0, %v6529_v10  ;;  %vm19067_vm0 = vcmask 523264  }
 0xbdf   : > { %6700 = vmatpush.bf16.msra.mxu2 %v11817_v29  ;;  %vm19068_vm15 = vmmov %vm19067_vm0 }
 0xbe0   : > { %vm19075_vm10 = vmmov %vm19067_vm0 }
 0xbe1   : > { %vm19078_vm9 = vmmov %vm19067_vm0 }
 0xbe2   : > { %v6286_v63 = vpop.f32.mrf.mxu2 }
 0xbe3   : > { %v6358_v11 = vadd.f32 %v17506_v14, %v6286_v63 }
 0xc3d   : > { %v6567_v58 = vpop.f32.mrf.mxu0 }
 0xc3e   : > { %v6612_v31 = vrot.slane %v6567_v58, 1  ;;  %v6613_v52 = vrot.slane %v6567_v58, 2  ;;  %v6614_v56 = vrot.slane %v6567_v58, 3  ;;  %6620 = vst [vmem:[#allocation1] ss:$9 sm:$0xff] %v6567_v58  ;;  %v6615_v16 = vrot.slane %v6567_v58, 4 }
 0xc40   : > { %6622 = vst [vmem:[#allocation1 + $0x1] ss:$9 sm:$0xff] %v6612_v31  ;;  %v6781_v31 = vsel %vm4728_vm7, %v6771_v19, %v6773_v40 }
 0xc41   : > { %6624 = vst [vmem:[#allocation1 + $0x2] ss:$9 sm:$0xff] %v6613_v52  ;;  %v6783_v52 = vsel %vm4953_vm12, %v6771_v19, %v6773_v40  ;;  %v6782_v21 = vrot.slane %v6781_v31, 4 }
 0xc42   : > { %6626 = vst [vmem:[#allocation1 + $0x3] ss:$9 sm:$0xff] %v6614_v56  ;;  %v6784_v43 = vrot.slane %v6783_v52, 5 }
 0xc43   : > { %6628 = vst [vmem:[#allocation1 + $0x4] ss:$9 sm:$0xff] %v6615_v16  ;;  %v6785_v16 = vsel %vm4956_vm13, %v6771_v19, %v6773_v40 }
 0xc44   : > { %v6786_v41 = vrot.slane %v6785_v16, 6 }
 0xc5b   : > { %v6607_v30 = vpop.f32.mrf.mxu1 }
 0xc5c   : > { %v6616_v38 = vrot.slane %v6607_v30, 1  ;;  %v6617_v12 = vrot.slane %v6607_v30, 2  ;;  %6630 = vst [vmem:[#allocation1 + $0x5] ss:$9 sm:$0xff] %v6607_v30  ;;  %v6618_v59 = vrot.slane %v6607_v30, 3  ;;  %v6619_v7 = vrot.slane %v6607_v30, 4 }
 0xc5e   : > { %6632 = vst [vmem:[#allocation1 + $0x6] ss:$9 sm:$0xff] %v6616_v38 }
 0xc5f   : > { %6634 = vst [vmem:[#allocation1 + $0x7] ss:$9 sm:$0xff] %v6617_v12 }
 0xc66   : > { %v6635_v22 = vld [vmem:[#allocation1] sm:$0xff] }
 0xc67   : > { %6636 = vst [vmem:[#allocation1] ss:$9 sm:$0xff] %v6618_v59 }
 0xc68   : > { %6637 = vst [vmem:[#allocation1 + $0x1] ss:$9 sm:$0xff] %v6619_v7 }
 0xc6f   : > { %v6638_v48 = vld [vmem:[#allocation1] sm:$0xff] }
 0xc70   : > { %v6641_v0 = vpack.c.bf16 %v6638_v48, %v6635_v22 }
 0xc72   : > { %11846 = vmatmul.msk.bf16.vlgmr.msra.gmra.mxu2 %vm19067_vm0, %v6641_v0  ;;  %11847 = vmatmul.msk.bf16.vlgmr.msra.gmra.mxu3 %vm19068_vm15, %v6641_v0  ;;  %vm19079_vm0 = vmmov %vm19076_vm11 }
 0xc73   : > { %vm19080_vm15 = vmmov %vm19077_vm3 }
 0xcf5   : > { %v6702_v10 = vpop.f32.mrf.mxu2  ;;  %v6716_v58 = vpop.f32.mrf.mxu3 }
 0xcf6   : > { %v6722_v56 = vadd.f32 %v6716_v58, %v6370_v51  ;;  %v6721_v2 = vadd.f32 %v6702_v10, %v6356_v37 }
 0xcf8   : > { %v6729_v34 = vrot.slane %v6722_v56, 7 }
 0xcfa   : > { %v6734_v3 = vsel %vm4722_vm5, %v6721_v2, %v6729_v34  ;;  %v6736_v49 = vsel %vm4725_vm6, %v6721_v2, %v6729_v34  ;;  %v6738_v53 = vsel %vm4728_vm7, %v6721_v2, %v6729_v34  ;;  %v6740_v23 = vsel %vm4953_vm12, %v6721_v2, %v6729_v34 }
 0xcfb   : > { %v6735_v14 = vrot.slane %v6734_v3, 2  ;;  %v6737_v26 = vrot.slane %v6736_v49, 3  ;;  %v6739_v4 = vrot.slane %v6738_v53, 4  ;;  %v6741_v9 = vrot.slane %v6740_v23, 5 }
 0xcfc   : > { %v6742_v54 = vsel %vm4956_vm13, %v6721_v2, %v6729_v34  ;;  %v6744_v42 = vsel %vm4959_vm14, %v6729_v34, %v6721_v2  ;;  %v6731_v8 = vsel %vm19071_vm2, %v6721_v2, %v6729_v34  ;;  %v6732_v18 = vsel %vm4719_vm4, %v6721_v2, %v6729_v34 }
 0xcfd   : > { %v6743_v1 = vrot.slane %v6742_v54, 6  ;;  %v6745_v29 = vrot.slane %v6744_v42, 7  ;;  %v6761_v6 = vadd.f32 %v6735_v14, %v16771_v27  ;;  %v6762_v30 = vadd.f32 %v6737_v26, %v16773_v39  ;;  %v6704_v38 = vpop.f32.mrf.mxu2  ;;  %v6718_v12 = vpop.f32.mrf.mxu3 }
 0xcfe   : > { %v6763_v59 = vadd.f32 %v6739_v4, %v16777_v24  ;;  %v6764_v7 = vadd.f32 %v6741_v9, %v16783_v33  ;;  %v6723_v22 = vadd.f32 %v6704_v38, %v6358_v11  ;;  %v6724_v48 = vadd.f32 %v6718_v12, %v17496_v17 }
 0xcff   : > { %v6765_v0 = vadd.f32 %v6743_v1, %v16785_v46  ;;  %v6766_v61 = vadd.f32 %v6745_v29, %v16788_v47  ;;  %v17558_v5 = vadd.f32 %v6778_v44, %v6761_v6  ;;  %v17560_v13 = vadd.f32 %v6780_v36, %v6762_v30 }
 0xd00   : > { %v17562_v27 = vadd.f32 %v6782_v21, %v6763_v59  ;;  %v17564_v39 = vadd.f32 %v6784_v43, %v6764_v7  ;;  %v6730_v63 = vrot.slane %v6724_v48, 7  ;;  %v6733_v19 = vrot.slane %v6732_v18, 1 }
 0xd01   : > { %v17566_v24 = vadd.f32 %v6786_v41, %v6765_v0  ;;  %6823 = vst [vmem:[#allocation1 + $0x2] ss:$9 sm:$0xff] %v17558_v5  ;;  %v6759_v33 = vadd.f32 %v6731_v8, %v16764_v62  ;;  %v17570_v17 = vadd.f32 %v6788_v15, %v6766_v61 }
 0xd02   : > { %6825 = vst [vmem:[#allocation1 + $0x3] ss:$9 sm:$0xff] %v17560_v13  ;;  %v6747_v46 = vsel %vm4719_vm4, %v6723_v22, %v6730_v63  ;;  %v6760_v47 = vadd.f32 %v6733_v19, %v16769_v25  ;;  %v6746_v62 = vsel %vm19072_vm8, %v6723_v22, %v6730_v63 }
 0xd03   : > { %6827 = vst [vmem:[#allocation1 + $0x4] ss:$9 sm:$0xff] %v17562_v27  ;;  %v17576_v40 = vadd.f32 %v6774_v32, %v6759_v33  ;;  %v6748_v20 = vrot.slane %v6747_v46, 1  ;;  %v6767_v50 = vadd.f32 %v6746_v62, %v16797_v55 }
 0xd04   : > { %6829 = vst [vmem:[#allocation1 + $0x5] ss:$9 sm:$0xff] %v17564_v39  ;;  %v17579_v51 = vadd.f32 %v6776_v60, %v6760_v47 }
 0xd05   : > { %6831 = vst [vmem:[#allocation1 + $0x6] ss:$9 sm:$0xff] %v17566_v24  ;;  %v6768_v25 = vadd.f32 %v6748_v20, %v16799_v35  ;;  %v17590_v10 = vadd.f32 %v6774_v32, %v6767_v50  ;;  %v12018_v50 = vld [vmem:[%s13679_s30 + $0x150] sm:$0xf] }
 0xd06   : > { %6833 = vst [vmem:[#allocation1 + $0x7] ss:$9 sm:$0xff] %v17570_v17 }
 0xd07   : > { %6819 = vst [vmem:[#allocation1] ss:$9 sm:$0xff] %v17576_v40  ;;  %v17588_v37 = vadd.f32 %v6776_v60, %v6768_v25 }
 0xd08   : > { %6821 = vst [vmem:[#allocation1 + $0x1] ss:$9 sm:$0xff] %v17579_v51 }
 0xd09   : > { %19073 = vst [vmem:[#allocation11_spill] sm:$0xff] %v17588_v37 }
 0xd0a   : > { %19074 = vst [vmem:[#allocation12_spill] sm:$0xff] %v17590_v10 }
 0xd0f   : > { %v6834_v58 = vld [vmem:[#allocation1] sm:$0xff]  ;;  %v6835_v31 = vld [vmem:[#allocation1 + $0x9] sm:$0xff] }
 0xd10   : > { %v6844_v52 = vsel %vm19075_vm10, %v6835_v31, 0.0  ;;  %6836 = vst [vmem:[#allocation1] ss:$9 sm:$0xff] %v17590_v10  ;;  %vm19083_vm10 = vcmask 1040384  }
 0xd11   : > { %v6845_v56 = vadd.f32 %v6844_v52, %v6834_v58  ;;  %6837 = vst [vmem:[#allocation1 + $0x1] ss:$9 sm:$0xff] %v17588_v37  ;;  %v13201_v58 = vld [vmem:[%s13679_s30 + $0x164] sm:$0xf0]  ;;  %v13198_v52 = vld [vmem:[%s13679_s30 + $0x154] sm:$0xf] }
 0xd12   : > { %v12019_v31 = vor.u32 %v13201_v58, %v12018_v50 }
 0xd13   : > { %6846 = vadd.xlane.f32.xlu0 %v6845_v56  ;;  %v12020_v56 = vld [vmem:[%s13679_s30 + $0x168] sm:$0xf0] }
 0xd14   : > { %7557 = vmatpush.bf16.msra.mxu0 %v12019_v31 }
 0xd18   : > { %v6838_v16 = vld [vmem:[#allocation1] sm:$0xff]  ;;  %v6839_v45 = vld [vmem:[#allocation1 + $0x9] sm:$0xff] }
 0xd19   : > { %v6848_v35 = vsel %vm19076_vm11, %v6838_v16, 0.0  ;;  %v6849_v55 = vsel %vm19077_vm3, %v6839_v45, 0.0  ;;  %v12023_v16 = vor.u32 %v13198_v52, %v12020_v56  ;;  %v11994_v45 = vld [vmem:[%s13679_s30 + $0x120] sm:$0xf]  ;;  %v13174_v52 = vld [vmem:[%s13679_s30 + $0x94] sm:$0xf]  ;;  %vm19093_vm11 = vmmov %vm19083_vm10 }
 0xd1a   : > { %v6850_v57 = vadd.f32 %v6849_v55, %v6848_v35  ;;  %v13195_v35 = vld [vmem:[%s13679_s30 + $0x134] sm:$0xf0]  ;;  %v6807_v55 = vld [vmem:[%s19081_s2] sm:$0x3]  ;;  %v11924_v56 = vld [vmem:[%s13679_s30 + $0xa8] sm:$0xf0] }
 0xd1b   : > { %7585 = vmatpush.bf16.msrb.mxu2 %v12023_v16  ;;  %v11927_v16 = vor.u32 %v13174_v52, %v11924_v56 }
 0xd1c   : > { %6851 = vadd.xlane.f32.xlu0 %v6850_v57  ;;  %v11995_v57 = vor.u32 %v13195_v35, %v11994_v45  ;;  %v13222_v45 = vld [vmem:[%s13679_s30 + $0x214] sm:$0xf]  ;;  %v12116_v35 = vld [vmem:[%s13679_s30 + $0x228] sm:$0xf0] }
 0xd1e   : > { %7558 = vmatpush.bf16.msra.mxu0 %v11995_v57 }
 0xd86   : > { %v6847_v11 = vpop.xlane.xlu0 %6846 }
 0xd87   : > { %v6853_v44 = vmul.f32 %v6847_v11, %v16806_v28  ;;  %v13192_v11 = vld [vmem:[%s13679_s30 + $0x124] sm:$0xf] }
 0xd89   : > { %v6857_v36 = vperm.slane %v6853_v44, 0  ;;  %v6858_v2 = vperm.slane %v6853_v44, 1  ;;  %v6859_v34 = vperm.slane %v6853_v44, 2  ;;  %v6860_v21 = vperm.slane %v6853_v44, 3 }
 0xd8a   : > { %v6861_v43 = vperm.slane %v6853_v44, 4  ;;  %v6862_v41 = vperm.slane %v6853_v44, 5  ;;  %v6863_v15 = vperm.slane %v6853_v44, 6  ;;  %v6864_v32 = vperm.slane %v6853_v44, 7  ;;  %v11996_v44 = vld [vmem:[%s13679_s30 + $0x138] sm:$0xf0] }
 0xd8b   : > { %v17599_v60 = vsub.f32 %v17576_v40, %v6857_v36  ;;  %v17602_v3 = vsub.f32 %v17579_v51, %v6858_v2  ;;  %v17605_v49 = vsub.f32 %v17558_v5, %v6859_v34  ;;  %v17608_v53 = vsub.f32 %v17560_v13, %v6860_v21  ;;  %v11970_v34 = vld [vmem:[%s13679_s30 + $0xf0] sm:$0xf]  ;;  %v13189_v21 = vld [vmem:[%s13679_s30 + $0x104] sm:$0xf0] }
 0xd8c   : > { %v17611_v23 = vsub.f32 %v17562_v27, %v6861_v43  ;;  %v17614_v14 = vsub.f32 %v17564_v39, %v6862_v41  ;;  %v17617_v26 = vsub.f32 %v17566_v24, %v6863_v15  ;;  %v17626_v42 = vsub.f32 %v17570_v17, %v6864_v32  ;;  %v6808_v41 = vld [vmem:[%s19082_s24] sm:$0x3]  ;;  %v13186_v15 = vld [vmem:[%s13679_s30 + $0xf4] sm:$0xf]  ;;  %v11972_v32 = vld [vmem:[%s13679_s30 + $0x108] sm:$0xf0] }
 0xd8d   : > { %v6887_v4 = vmul.f32 %v17599_v60, %v17599_v60  ;;  %v6888_v9 = vmul.f32 %v17602_v3, %v17602_v3  ;;  %v6889_v54 = vmul.f32 %v17605_v49, %v17605_v49  ;;  %v6890_v8 = vmul.f32 %v17608_v53, %v17608_v53 }
 0xd8e   : > { %v6891_v18 = vmul.f32 %v17611_v23, %v17611_v23  ;;  %v6892_v29 = vmul.f32 %v17614_v14, %v17614_v14  ;;  %v6893_v30 = vmul.f32 %v17617_v26, %v17617_v26  ;;  %v6894_v38 = vmul.f32 %v17626_v42, %v17626_v42 }
 0xd8f   : > { %6907 = vst [vmem:[#allocation1] ss:$9 sm:$0xff] %v6887_v4  ;;  %v6852_v1 = vpop.xlane.xlu0 %6851  ;;  %v6999_v36 = vperm.slane %v6807_v55, 1  ;;  %v11999_v2 = vor.u32 %v13192_v11, %v11996_v44  ;;  %v11971_v43 = vor.u32 %v13189_v21, %v11970_v34  ;;  %v17674_v4 = vperm.slane %v6807_v55, 0  ;;  %v11898_v55 = vld [vmem:[%s13679_s30 + $0x60] sm:$0xf] }
 0xd90   : > { %6909 = vst [vmem:[#allocation1 + $0x1] ss:$9 sm:$0xff] %v6888_v9  ;;  %v6854_v6 = vmul.f32 %v6852_v1, %v16806_v28  ;;  %v12090_v34 = vld [vmem:[%s13679_s30 + $0x1e0] sm:$0xf]  ;;  %v11956_v21 = vld [vmem:[%s13679_s30 + $0xe0] sm:$0xf0] }
 0xd91   : > { %6911 = vst [vmem:[#allocation1 + $0x2] ss:$9 sm:$0xff] %v6889_v54  ;;  %7586 = vmatpush.bf16.msrb.mxu2 %v11999_v2  ;;  %7559 = vmatpush.bf16.msra.mxu0 %v11971_v43  ;;  %v17676_v9 = vrot.slane %v6999_v36, 7  ;;  %v11975_v54 = vor.u32 %v13186_v15, %v11972_v32  ;;  %v12119_v36 = vor.u32 %v13222_v45, %v12116_v35  ;;  %v13171_v2 = vld [vmem:[%s13679_s30 + $0x74] sm:$0xf0] }
 0xd92   : > { %6913 = vst [vmem:[#allocation1 + $0x3] ss:$9 sm:$0xff] %v6890_v8  ;;  %v6865_v12 = vperm.slane %v6854_v6, 0  ;;  %v6866_v59 = vperm.slane %v6854_v6, 1  ;;  %v11946_v8 = vld [vmem:[%s13679_s30 + $0xc0] sm:$0xf]  ;;  %v11899_v15 = vor.u32 %v13171_v2, %v11898_v55 }
 0xd93   : > { %6915 = vst [vmem:[#allocation1 + $0x4] ss:$9 sm:$0xff] %v6891_v18  ;;  %v13183_v18 = vld [vmem:[%s13679_s30 + $0xd4] sm:$0xf0]  ;;  %v13180_v6 = vld [vmem:[%s13679_s30 + $0xc4] sm:$0xf]  ;;  %v17715_v58 = vsel %vm4956_vm13, %v17674_v4, %v17676_v9  ;;  %v17720_v31 = vsel %vm4959_vm14, %v17676_v9, %v17674_v4  ;;  %7603 = vmatpush.bf16.msrb.mxu3 %v12119_v36 }
 0xd94   : > { %6917 = vst [vmem:[#allocation1 + $0x5] ss:$9 sm:$0xff] %v6892_v29  ;;  %v17640_v7 = vsub.f32 %v17590_v10, %v6865_v12  ;;  %v17643_v22 = vsub.f32 %v17588_v37, %v6866_v59  ;;  %v11947_v1 = vor.u32 %v13183_v18, %v11946_v8  ;;  %v7036_v29 = vperm.slane %v6808_v41, 1  ;;  %v13219_v32 = vld [vmem:[%s13679_s30 + $0x1f4] sm:$0xf0] }
 0xd95   : > { %6919 = vst [vmem:[#allocation1 + $0x6] ss:$9 sm:$0xff] %v6893_v30  ;;  %7587 = vmatpush.bf16.msrb.mxu2 %v11975_v54  ;;  %v11948_v30 = vld [vmem:[%s13679_s30 + $0xd8] sm:$0xf0]  ;;  %v17690_v12 = vsel %vm4725_vm6, %v17674_v4, %v17676_v9  ;;  %v12091_v8 = vor.u32 %v13219_v32, %v12090_v34  ;;  %v13168_v18 = vld [vmem:[%s13679_s30 + $0x64] sm:$0xf] }
 0xd96   : > { %6921 = vst [vmem:[#allocation1 + $0x7] ss:$9 sm:$0xff] %v6894_v38  ;;  %v6895_v48 = vmul.f32 %v17640_v7, %v17640_v7  ;;  %v6896_v0 = vmul.f32 %v17643_v22, %v17643_v22  ;;  %7560 = vmatpush.bf16.msra.mxu0 %v11947_v1  ;;  %v17685_v38 = vsel %vm4722_vm5, %v17674_v4, %v17676_v9  ;;  %v7007_v50 = vrot.slane %v17690_v12, 3  ;;  %v11900_v1 = vld [vmem:[%s13679_s30 + $0x78] sm:$0xf0] }
 0xd97   : > { %v11951_v59 = vor.u32 %v13180_v6, %v11948_v30  ;;  %v11903_v30 = vor.u32 %v13168_v18, %v11900_v1  ;;  %v11876_v45 = vld [vmem:[%s13679_s30 + $0x48] sm:$0xf0]  ;;  %v13210_v35 = vld [vmem:[%s13679_s30 + $0x1b4] sm:$0xf]  ;;  %v11850_v36 = vld [vmem:[%s13679_s30] sm:$0xf] }
 0xd98   : > { %v13159_v2 = vld [vmem:[%s13679_s30 + $0x14] sm:$0xf0]  ;;  %v13181_v43 = vld [vmem:[%s13679_s30 + $0xcc] sm:$0xf]  ;;  %v13321_v10 = vld [vmem:[%s13689_s0 + $0x2e4] sm:$0xf0] }
 0xd99   : > { %7588 = vmatpush.bf16.msrb.mxu2 %v11951_v59  ;;  %v12092_v59 = vld [vmem:[%s13679_s30 + $0x1f8] sm:$0xf0]  ;;  %v13207_v32 = vld [vmem:[%s13679_s30 + $0x194] sm:$0xf0]  ;;  %v13238_v37 = vld [vmem:[%s13689_s0 + $0x54] sm:$0xf] }
 0xd9d   : > { %v6922_v61 = vld [vmem:[#allocation1] sm:$0xff]  ;;  %v6923_v63 = vld [vmem:[#allocation1 + $0x9] sm:$0xff]  ;;  %7589 = vmatpush.bf16.msrb.mxu2 %v11927_v16  ;;  %v13162_v16 = vld [vmem:[%s13679_s30 + $0x34] sm:$0xf] }
 0xd9e   : > { %v6932_v19 = vsel %vm19078_vm9, %v6923_v63, 0.0  ;;  %6924 = vst [vmem:[#allocation1] ss:$9 sm:$0xff] %v6895_v48  ;;  %v11922_v48 = vld [vmem:[%s13679_s30 + $0x90] sm:$0xf]  ;;  %v17695_v63 = vperm.slane %v6808_v41, 0  ;;  %v11879_v55 = vor.u32 %v13162_v16, %v11876_v45 }
 0xd9f   : > { %v6933_v33 = vadd.f32 %v6932_v19, %v6922_v61  ;;  %6925 = vst [vmem:[#allocation1 + $0x1] ss:$9 sm:$0xff] %v6896_v0  ;;  %v13177_v0 = vld [vmem:[%s13679_s30 + $0xa4] sm:$0xf0]  ;;  %v12114_v61 = vld [vmem:[%s13679_s30 + $0x210] sm:$0xf] }
 0xda0   : > { %v11923_v19 = vor.u32 %v13177_v0, %v11922_v48  ;;  %v11874_v48 = vld [vmem:[%s13679_s30 + $0x30] sm:$0xf]  ;;  %v13204_v16 = vld [vmem:[%s13679_s30 + $0x184] sm:$0xf] }
 0xda1   : > { %6934 = vadd.xlane.f32.xlu2 %v6933_v33  ;;  %v13225_v33 = vld [vmem:[%s13679_s30 + $0x224] sm:$0xf0]  ;;  %7590 = vmatpush.bf16.msrb.mxu2 %v11903_v30  ;;  %v13202_v30 = vld [vmem:[%s13679_s30 + $0x16c] sm:$0xf0] }
 0xda2   : > { %7561 = vmatpush.bf16.msra.mxu0 %v11923_v19  ;;  %v12066_v19 = vld [vmem:[%s13679_s30 + $0x1b0] sm:$0xf] }
 0xda5   : > { %7591 = vmatpush.bf16.msrb.mxu2 %v11879_v55  ;;  %v12044_v55 = vld [vmem:[%s13679_s30 + $0x198] sm:$0xf0] }
 0xda6   : > { %v6926_v46 = vld [vmem:[#allocation1] sm:$0xff]  ;;  %v6927_v47 = vld [vmem:[#allocation1 + $0x9] sm:$0xff]  ;;  %7562 = vmatpush.bf16.msra.mxu0 %v11899_v15 }
 0xda7   : > { %v6936_v20 = vsel %vm19079_vm0, %v6926_v46, 0.0  ;;  %v6937_v62 = vsel %vm19080_vm15, %v6927_v47, 0.0  ;;  %v17701_v46 = vsel %vm4728_vm7, %v17674_v4, %v17676_v9  ;;  %v17706_v47 = vsel %vm4953_vm12, %v17674_v4, %v17676_v9  ;;  %v12042_v15 = vld [vmem:[%s13679_s30 + $0x180] sm:$0xf] }
 0xda8   : > { %v6938_v25 = vadd.f32 %v6937_v62, %v6936_v20  ;;  %v17708_v20 = vrot.slane %v7036_v29, 7  ;;  %v12115_v62 = vor.u32 %v13225_v33, %v12114_v61  ;;  %v13216_v29 = vld [vmem:[%s13679_s30 + $0x1e4] sm:$0xf]  ;;  %v13165_v61 = vld [vmem:[%s13679_s30 + $0x44] sm:$0xf0]  ;;  %vm19095_vm15 = vcmask 523264  }
 0xda9   : > { %v12095_v0 = vor.u32 %v13216_v29, %v12092_v59  ;;  %v13213_v33 = vld [vmem:[%s13679_s30 + $0x1c4] sm:$0xf0]  ;;  %v11875_v52 = vor.u32 %v13165_v61, %v11874_v48  ;;  %v12043_v29 = vor.u32 %v13207_v32, %v12042_v15  ;;  %v13199_v59 = vld [vmem:[%s13679_s30 + $0x15c] sm:$0xf]  ;;  %v12028_v48 = vld [vmem:[%s13679_s30 + $0x170] sm:$0xf0] }
 0xdaa   : > { %6939 = vadd.xlane.f32.xlu0 %v6938_v25  ;;  %v7005_v25 = vrot.slane %v17685_v38, 2  ;;  %7575 = vmatpush.bf16.msra.mxu1 %v12115_v62  ;;  %v17738_v54 = vsel %vm4722_vm5, %v17695_v63, %v17708_v20  ;;  %v12067_v56 = vor.u32 %v13213_v33, %v12066_v19  ;;  %v17764_v18 = vsel %vm4725_vm6, %v17695_v63, %v17708_v20  ;;  %v13223_v32 = vld [vmem:[%s13679_s30 + $0x21c] sm:$0xf] }
 0xdab   : > { %7604 = vmatpush.bf16.msrb.mxu3 %v12095_v0  ;;  %7563 = vmatpush.bf16.msra.mxu0 %v11875_v52  ;;  %v17772_v0 = vsel %vm4728_vm7, %v17695_v63, %v17708_v20  ;;  %v12031_v33 = vor.u32 %v13199_v59, %v12028_v48  ;;  %v13156_v52 = vld [vmem:[%s13679_s30 + $0x4] sm:$0xf]  ;;  %v19087_v38 = vrot.slane %v17720_v31, 7  ;;  %v11932_v31 = vld [vmem:[%s13679_s30 + $0xb0] sm:$0xf0] }
 0xdae   : > { %7576 = vmatpush.bf16.msra.mxu1 %v12091_v8  ;;  %v12026_v8 = vld [vmem:[%s13679_s30 + $0x158] sm:$0xf] }
 0xdaf   : > { %v12027_v19 = vor.u32 %v13202_v30, %v12026_v8  ;;  %v12124_v8 = vld [vmem:[%s13679_s30 + $0x230] sm:$0xf0]  ;;  %v13184_v30 = vld [vmem:[%s13679_s30 + $0xdc] sm:$0xf0] }
 0xdb0   : > { %v12127_v48 = vor.u32 %v13223_v32, %v12124_v8 }
 0xdb2   : > { %7577 = vmatpush.bf16.msra.mxu1 %v12067_v56  ;;  %v11852_v56 = vld [vmem:[%s13679_s30 + $0x18] sm:$0xf0] }
 0xdb6   : > { %7578 = vmatpush.bf16.msra.mxu1 %v12043_v29  ;;  %v13196_v29 = vld [vmem:[%s13679_s30 + $0x13c] sm:$0xf0] }
 0xdba   : > { %7613 = vmatpush.bf16.msrb.mxu1 %v12027_v19 }
 0xe14   : > { %v6935_v44 = vpop.xlane.xlu2 %6934 }
 0xe15   : > { %v6941_v41 = vmul.f32 %v6935_v44, %v16806_v28  ;;  %v12068_v44 = vld [vmem:[%s13679_s30 + $0x1c8] sm:$0xf0] }
 0xe16   : > { %v12071_v34 = vor.u32 %v13210_v35, %v12068_v44  ;;  %v11855_v35 = vor.u32 %v13156_v52, %v11852_v56  ;;  %v12122_v44 = vld [vmem:[%s13679_s30 + $0x218] sm:$0xf]  ;;  %v13193_v56 = vld [vmem:[%s13679_s30 + $0x12c] sm:$0xf] }
 0xe17   : > { %v17743_v6 = vadd.f32 1e-06, %v6941_v41  ;;  %v11851_v41 = vor.u32 %v13159_v2, %v11850_v36  ;;  %v13226_v36 = vld [vmem:[%s13679_s30 + $0x22c] sm:$0xf0]  ;;  %v17786_v2 = vsel %vm4953_vm12, %v17695_v63, %v17708_v20 }
 0xe18   : > { %7605 = vmatpush.bf16.msrb.mxu3 %v12071_v34  ;;  %7592 = vmatpush.bf16.msrb.mxu2 %v11855_v35  ;;  %v12123_v59 = vor.u32 %v13226_v36, %v12122_v44  ;;  %v13220_v35 = vld [vmem:[%s13679_s30 + $0x1fc] sm:$0xf0]  ;;  %v13217_v44 = vld [vmem:[%s13679_s30 + $0x1ec] sm:$0xf]  ;;  %v12100_v36 = vld [vmem:[%s13679_s30 + $0x200] sm:$0xf0] }
 0xe19   : > { %13412 = vrsqrt.f32 %v17743_v6  ;;  %7564 = vmatpush.bf16.msra.mxu0 %v11851_v41  ;;  %v12047_v41 = vor.u32 %v13204_v16, %v12044_v55  ;;  %v12004_v16 = vld [vmem:[%s13679_s30 + $0x140] sm:$0xf0]  ;;  %v12098_v55 = vld [vmem:[%s13679_s30 + $0x1e8] sm:$0xf]  ;;  %vm6951_vm2 = vweird.f32 %v17743_v6 }
 0xe1a   : > { %v12007_v19 = vor.u32 %v13193_v56, %v12004_v16  ;;  %v12099_v8 = vor.u32 %v13220_v35, %v12098_v55  ;;  %v13187_v56 = vld [vmem:[%s13679_s30 + $0xfc] sm:$0xf]  ;;  %v11980_v16 = vld [vmem:[%s13679_s30 + $0x110] sm:$0xf0]  ;;  %v12074_v55 = vld [vmem:[%s13679_s30 + $0x1b8] sm:$0xf] }
 0xe1c   : > { %7606 = vmatpush.bf16.msrb.mxu3 %v12047_v41  ;;  %7659 = vmatpush.bf16.msra.mxu2 %v12127_v48  ;;  %v12103_v41 = vor.u32 %v13217_v44, %v12100_v36  ;;  %v17817_v48 = vsel %vm4959_vm14, %v17708_v20, %v17695_v63  ;;  %v17826_v44 = vsel %vm4719_vm4, %v17674_v4, %v17676_v9 }
 0xe1d   : > { %v6940_v1 = vpop.xlane.xlu0 %6939  ;;  %7641 = vmatpush.bf16.msrb.mxu0 %v12031_v33  ;;  %v11983_v36 = vor.u32 %v13187_v56, %v11980_v16  ;;  %v7052_v11 = vrot.slane %v17817_v48, 7 }
 0xe1e   : > { %v6942_v61 = vmul.f32 %v6940_v1, %v16806_v28 }
 0xe1f   : > { %v17778_v45 = vpop.eup %13412 }
 0xe20   : > { %v6946_v34 = vmul.f32 %v17778_v45, %v17743_v6  ;;  %v17790_v15 = vadd.f32 1e-06, %v6942_v61  ;;  %v12002_v61 = vld [vmem:[%s13679_s30 + $0x128] sm:$0xf]  ;;  %7631 = vmatpush.bf16.msra.mxu3 %v12123_v59  ;;  %v17812_v59 = vsel %vm4956_vm13, %v17695_v63, %v17708_v20  ;;  %vm6952_vm1 = vweird.f32 %v17778_v45  ;;  %7660 = vmatpush.bf16.msra.mxu2 %v12103_v41 }
 0xe21   : > { %v12003_v52 = vor.u32 %v13196_v29, %v12002_v61  ;;  %v11978_v61 = vld [vmem:[%s13679_s30 + $0xf8] sm:$0xf]  ;;  %v13190_v29 = vld [vmem:[%s13679_s30 + $0x10c] sm:$0xf0]  ;;  %7642 = vmatpush.bf16.msrb.mxu0 %v12007_v19  ;;  %v17833_v19 = vsel %vm4719_vm4, %v17695_v63, %v17708_v20  ;;  %v7050_v62 = vrot.slane %v17812_v59, 6  ;;  %vm6953_vm8 = vmor %vm6951_vm2, %vm6952_vm1 }
 0xe22   : > { %v6947_v33 = vmul.f32 %v17778_v45, %v6946_v34  ;;  %13414 = vrsqrt.f32 %v17790_v15  ;;  %v13211_v34 = vld [vmem:[%s13679_s30 + $0x1bc] sm:$0xf]  ;;  %vm6961_vm9 = vweird.f32 %v17790_v15  ;;  %vm19096_vm1 = vmmov %vm19095_vm15 }
 0xe23   : > { %7614 = vmatpush.bf16.msrb.mxu1 %v12003_v52  ;;  %v13214_v52 = vld [vmem:[%s13679_s30 + $0x1cc] sm:$0xf0]  ;;  %vm19097_vm2 = vmmov %vm19096_vm1 }
 0xe24   : > { %v6948_v32 = vmul.f32 0.5, %v6947_v33  ;;  %v11979_v33 = vor.u32 %v13190_v29, %v11978_v61  ;;  %7632 = vmatpush.bf16.msra.mxu3 %v12099_v8  ;;  %v12076_v61 = vld [vmem:[%s13679_s30 + $0x1d0] sm:$0xf0]  ;;  %v11954_v29 = vld [vmem:[%s13679_s30 + $0xc8] sm:$0xf]  ;;  %v17851_v8 = vsel %vm19083_vm10, %v17674_v4, %v17676_v9  ;;  %vm19099_vm10 = vmmov %vm19096_vm1 }
 0xe25   : > { %v12079_v16 = vor.u32 %v13211_v34, %v12076_v61  ;;  %7643 = vmatpush.bf16.msrb.mxu0 %v11983_v36  ;;  %v11955_v59 = vor.u32 %v13184_v30, %v11954_v29  ;;  %v7040_v34 = vrot.slane %v17833_v19, 1 }
 0xe26   : > { %v6949_v35 = vsub.f32 1.5, %v6948_v32  ;;  %v12075_v32 = vor.u32 %v13214_v52, %v12074_v55  ;;  %v11959_v55 = vor.u32 %v13181_v43, %v11956_v21 }
 0xe27   : > { %7615 = vmatpush.bf16.msrb.mxu1 %v11979_v33  ;;  %7661 = vmatpush.bf16.msra.mxu2 %v12079_v16  ;;  %v13208_v16 = vld [vmem:[%s13679_s30 + $0x19c] sm:$0xf0] }
 0xe28   : > { %v17838_v1 = vpop.eup %13414  ;;  %v6950_v56 = vmul.f32 %v17778_v45, %v6949_v35  ;;  %7633 = vmatpush.bf16.msra.mxu3 %v12075_v32 }
 0xe29   : > { %v6956_v48 = vmul.f32 %v17838_v1, %v17790_v15  ;;  %7644 = vmatpush.bf16.msrb.mxu0 %v11959_v55  ;;  %vm6962_vm3 = vweird.f32 %v17838_v1 }
 0xe2a   : > { %v6954_v6 = vsel %vm6953_vm8, %v17778_v45, %v6950_v56  ;;  %vm6963_vm0 = vmor %vm6961_vm9, %vm6962_vm3 }
 0xe2b   : > { %v6969_v35 = vperm.slane %v6954_v6, 2  ;;  %v6970_v52 = vperm.slane %v6954_v6, 3  ;;  %v6971_v61 = vperm.slane %v6954_v6, 4  ;;  %v6972_v57 = vperm.slane %v6954_v6, 5  ;;  %7616 = vmatpush.bf16.msrb.mxu1 %v11955_v59  ;;  %v13178_v59 = vld [vmem:[%s13679_s30 + $0xac] sm:$0xf0]  ;;  %vm19098_vm8 = vmmov %vm19096_vm1 }
 0xe2c   : > { %v6973_v4 = vperm.slane %v6954_v6, 6  ;;  %v6974_v9 = vperm.slane %v6954_v6, 7  ;;  %v6967_v41 = vperm.slane %v6954_v6, 0  ;;  %v6968_v33 = vperm.slane %v6954_v6, 1 }
 0xe2d   : > { %v6989_v45 = vmul.f32 %v6969_v35, %v17605_v49  ;;  %v6990_v30 = vmul.f32 %v6970_v52, %v17608_v53  ;;  %v6991_v36 = vmul.f32 %v6971_v61, %v17611_v23  ;;  %v6992_v21 = vmul.f32 %v6972_v57, %v17614_v14  ;;  %v13175_v61 = vld [vmem:[%s13679_s30 + $0x9c] sm:$0xf] }
 0xe2e   : > { %v6993_v43 = vmul.f32 %v6973_v4, %v17617_v26  ;;  %v6994_v32 = vmul.f32 %v6974_v9, %v17626_v42  ;;  %v6987_v29 = vmul.f32 %v6967_v41, %v17599_v60  ;;  %v6988_v56 = vmul.f32 %v6968_v33, %v17602_v3  ;;  %v12050_v42 = vld [vmem:[%s13679_s30 + $0x188] sm:$0xf]  ;;  %v13205_v60 = vld [vmem:[%s13679_s30 + $0x18c] sm:$0xf] }
 0xe2f   : > { %v7026_v49 = vmul.f32 %v7005_v25, %v6989_v45  ;;  %v7027_v53 = vmul.f32 %v7007_v50, %v6990_v30  ;;  %v19084_v23 = vrot.slane %v17701_v46, 4  ;;  %v19085_v26 = vrot.slane %v17706_v47, 5  ;;  %v12052_v25 = vld [vmem:[%s13679_s30 + $0x1a0] sm:$0xf0]  ;;  %v11930_v50 = vld [vmem:[%s13679_s30 + $0x98] sm:$0xf] }
 0xe30   : > { %v19086_v3 = vrot.slane %v17715_v58, 6  ;;  %v7031_v12 = vmul.f32 %v19087_v38, %v6994_v32  ;;  %v19088_v46 = vrot.slane %v17738_v54, 2  ;;  %v19089_v47 = vrot.slane %v17764_v18, 3  ;;  %v11906_v30 = vld [vmem:[%s13679_s30 + $0x68] sm:$0xf] }
 0xe31   : > { %v7028_v14 = vmul.f32 %v19084_v23, %v6991_v36  ;;  %v7029_v57 = vmul.f32 %v19085_v26, %v6992_v21  ;;  %v19090_v35 = vrot.slane %v17772_v0, 4  ;;  %v7024_v58 = vmul.f32 %v17851_v8, %v6987_v29  ;;  %v13172_v0 = vld [vmem:[%s13679_s30 + $0x7c] sm:$0xf0]  ;;  %v13169_v29 = vld [vmem:[%s13679_s30 + $0x6c] sm:$0xf] }
 0xe32   : > { %v7030_v41 = vmul.f32 %v19086_v3, %v6993_v43  ;;  %v7063_v6 = vadd.f32 %v19088_v46, %v7026_v49  ;;  %v7064_v55 = vadd.f32 %v19089_v47, %v7027_v53  ;;  %v19091_v4 = vrot.slane %v17786_v2, 5  ;;  %v11908_v2 = vld [vmem:[%s13679_s30 + $0x80] sm:$0xf0]  ;;  %v11858_v3 = vld [vmem:[%s13679_s30 + $0x8] sm:$0xf] }
 0xe33   : > { %v7065_v52 = vadd.f32 %v19090_v35, %v7028_v14  ;;  %v19092_v45 = vrot.slane %v17826_v44, 1  ;;  %v7038_v18 = vsel %vm19093_vm11, %v17695_v63, %v17708_v20  ;;  %v6957_v36 = vmul.f32 %v17838_v1, %v6956_v48  ;;  %v11882_v20 = vld [vmem:[%s13679_s30 + $0x38] sm:$0xf]  ;;  %v13166_v14 = vld [vmem:[%s13679_s30 + $0x4c] sm:$0xf0]  ;;  %vm19100_vm11 = vmmov %vm19096_vm1 }
 0xe34   : > { %v7066_v9 = vadd.f32 %v19091_v4, %v7029_v57  ;;  %v7067_v33 = vadd.f32 %v7050_v62, %v7030_v41  ;;  %7085 = vst [vmem:[#allocation1 + $0x2] ss:$9 sm:$0xff] %v7063_v6  ;;  %v12051_v21 = vor.u32 %v13208_v16, %v12050_v42  ;;  %v12055_v43 = vor.u32 %v13205_v60, %v12052_v25  ;;  %v11884_v57 = vld [vmem:[%s13679_s30 + $0x50] sm:$0xf0]  ;;  %v13160_v41 = vld [vmem:[%s13679_s30 + $0x1c] sm:$0xf0] }
 0xe35   : > { %v7025_v54 = vmul.f32 %v19092_v45, %v6988_v56  ;;  %v11931_v32 = vor.u32 %v13178_v59, %v11930_v50  ;;  %v7068_v62 = vadd.f32 %v7052_v11, %v7031_v12  ;;  %7087 = vst [vmem:[#allocation1 + $0x3] ss:$9 sm:$0xff] %v7064_v55  ;;  %v11935_v56 = vor.u32 %v13175_v61, %v11932_v31  ;;  %v13163_v11 = vld [vmem:[%s13679_s30 + $0x3c] sm:$0xf]  ;;  %v13157_v12 = vld [vmem:[%s13679_s30 + $0xc] sm:$0xf] }
 0xe36   : > { %7089 = vst [vmem:[#allocation1 + $0x4] ss:$9 sm:$0xff] %v7065_v52  ;;  %v7061_v49 = vadd.f32 %v7038_v18, %v7024_v58  ;;  %v6958_v63 = vmul.f32 0.5, %v6957_v36  ;;  %7634 = vmatpush.bf16.msra.mxu3 %v12051_v21  ;;  %7662 = vmatpush.bf16.msra.mxu2 %v12055_v43  ;;  %v11907_v53 = vor.u32 %v13172_v0, %v11906_v30  ;;  %v11860_v25 = vld [vmem:[%s13679_s30 + $0x20] sm:$0xf0]  ;;  %v19094_v55 = vmov %v19092_v45 }
 0xe37   : > { %7091 = vst [vmem:[#allocation1 + $0x5] ss:$9 sm:$0xff] %v7066_v9  ;;  %v7062_v48 = vadd.f32 %v7040_v34, %v7025_v54  ;;  %7617 = vmatpush.bf16.msrb.mxu1 %v11931_v32  ;;  %7645 = vmatpush.bf16.msrb.mxu0 %v11935_v56  ;;  %v11911_v23 = vor.u32 %v13169_v29, %v11908_v2  ;;  %v12034_v61 = vld [vmem:[%s13679_s30 + $0x160] sm:$0xf]  ;;  %v13200_v44 = vld [vmem:[%s13679_s30 + $0x164] sm:$0xf] }
 0xe38   : > { %7093 = vst [vmem:[#allocation1 + $0x6] ss:$9 sm:$0xff] %v7067_v33  ;;  %v6959_v26 = vsub.f32 1.5, %v6958_v63  ;;  %v11883_v16 = vor.u32 %v13166_v14, %v11882_v20  ;;  %v11887_v60 = vor.u32 %v13163_v11, %v11884_v57  ;;  %v11859_v46 = vor.u32 %v13160_v41, %v11858_v3  ;;  %v12036_v31 = vld [vmem:[%s13679_s30 + $0x178] sm:$0xf0] }
 0xe39   : > { %7095 = vst [vmem:[#allocation1 + $0x7] ss:$9 sm:$0xff] %v7068_v62  ;;  %v11863_v47 = vor.u32 %v13157_v12, %v11860_v25  ;;  %v12130_v4 = vld [vmem:[%s13679_s30 + $0x220] sm:$0xf]  ;;  %v13227_v9 = vld [vmem:[%s13679_s30 + $0x234] sm:$0xf0]  ;;  %v12039_v0 = vor.u32 %v13200_v44, %v12036_v31 }
 0xe3a   : > { %v6960_v42 = vmul.f32 %v17838_v1, %v6959_v26  ;;  %7081 = vst [vmem:[#allocation1] ss:$9 sm:$0xff] %v7061_v49  ;;  %v13224_v33 = vld [vmem:[%s13679_s30 + $0x224] sm:$0xf]  ;;  %v12132_v45 = vld [vmem:[%s13679_s30 + $0x238] sm:$0xf0]  ;;  %v12131_v29 = vor.u32 %v13227_v9, %v12130_v4 }
 0xe3b   : > { %7083 = vst [vmem:[#allocation1 + $0x1] ss:$9 sm:$0xff] %v7062_v48  ;;  %7618 = vmatpush.bf16.msrb.mxu1 %v11907_v53  ;;  %7646 = vmatpush.bf16.msrb.mxu0 %v11911_v23  ;;  %v12010_v36 = vld [vmem:[%s13679_s30 + $0x130] sm:$0xf]  ;;  %v13197_v21 = vld [vmem:[%s13679_s30 + $0x144] sm:$0xf0]  ;;  %v12135_v2 = vor.u32 %v13224_v33, %v12132_v45 }
 0xe3c   : > { %v6964_v38 = vsel %vm6963_vm0, %v17838_v1, %v6960_v42  ;;  %v13194_v43 = vld [vmem:[%s13679_s30 + $0x134] sm:$0xf]  ;;  %v12012_v32 = vld [vmem:[%s13679_s30 + $0x148] sm:$0xf0]  ;;  %v12106_v62 = vld [vmem:[%s13679_s30 + $0x1f0] sm:$0xf]  ;;  %v12011_v20 = vor.u32 %v13197_v21, %v12010_v36 }
 0xe3d   : > { %v6975_v50 = vperm.slane %v6964_v38, 0  ;;  %v6976_v59 = vperm.slane %v6964_v38, 1  ;;  %v13221_v56 = vld [vmem:[%s13679_s30 + $0x204] sm:$0xf0]  ;;  %v13218_v49 = vld [vmem:[%s13679_s30 + $0x1f4] sm:$0xf]  ;;  %v12015_v48 = vor.u32 %v13194_v43, %v12012_v32 }
 0xe3e   : > { %v12108_v63 = vld [vmem:[%s13679_s30 + $0x208] sm:$0xf0]  ;;  %v11986_v53 = vld [vmem:[%s13679_s30 + $0x100] sm:$0xf]  ;;  %v13191_v23 = vld [vmem:[%s13679_s30 + $0x114] sm:$0xf0]  ;;  %v12107_v26 = vor.u32 %v13221_v56, %v12106_v62 }
 0xe3f   : > { %v6995_v6 = vmul.f32 %v6975_v50, %v17640_v7  ;;  %v6996_v15 = vmul.f32 %v6976_v59, %v17643_v22  ;;  %7619 = vmatpush.bf16.msrb.mxu1 %v11883_v16  ;;  %7647 = vmatpush.bf16.msrb.mxu0 %v11887_v60  ;;  %v13188_v14 = vld [vmem:[%s13679_s30 + $0x104] sm:$0xf]  ;;  %v11988_v11 = vld [vmem:[%s13679_s30 + $0x118] sm:$0xf0]  ;;  %v12111_v57 = vor.u32 %v13218_v49, %v12108_v63  ;;  %v12082_v42 = vld [vmem:[%s13679_s30 + $0x1c0] sm:$0xf] }
 0xe40   : > { %v13215_v16 = vld [vmem:[%s13679_s30 + $0x1d4] sm:$0xf0]  ;;  %v13212_v60 = vld [vmem:[%s13679_s30 + $0x1c4] sm:$0xf]  ;;  %v12084_v3 = vld [vmem:[%s13679_s30 + $0x1d8] sm:$0xf0]  ;;  %v11987_v41 = vor.u32 %v13191_v23, %v11986_v53  ;;  %v11991_v38 = vor.u32 %v13188_v14, %v11988_v11 }
 0xe41   : > { %v7032_v1 = vmul.f32 %v17851_v8, %v6995_v6  ;;  %v7033_v35 = vmul.f32 %v19094_v55, %v6996_v15  ;;  %v13203_v8 = vld [vmem:[%s13679_s30 + $0x174] sm:$0xf0]  ;;  %v11962_v12 = vld [vmem:[%s13679_s30 + $0xd0] sm:$0xf]  ;;  %v13185_v25 = vld [vmem:[%s13679_s30 + $0xe4] sm:$0xf0]  ;;  %v12087_v6 = vor.u32 %v13212_v60, %v12084_v3 }
 0xe42   : > { %v7096_v52 = vld [vmem:[#allocation1] sm:$0xff]  ;;  %v7097_v58 = vld [vmem:[#allocation1 + $0x9] sm:$0xff]  ;;  %v12035_v30 = vor.u32 %v13203_v8, %v12034_v61  ;;  %v13182_v50 = vld [vmem:[%s13679_s30 + $0xd4] sm:$0xf] }
 0xe43   : > { %v7069_v7 = vadd.f32 %v7038_v18, %v7032_v1  ;;  %v7070_v22 = vadd.f32 %v7040_v34, %v7033_v35  ;;  %7620 = vmatpush.bf16.msrb.mxu1 %v11859_v46  ;;  %7648 = vmatpush.bf16.msrb.mxu0 %v11863_v47  ;;  %v11964_v59 = vld [vmem:[%s13679_s30 + $0xe8] sm:$0xf0]  ;;  %v12083_v46 = vor.u32 %v13215_v16, %v12082_v42  ;;  %v12058_v15 = vld [vmem:[%s13679_s30 + $0x190] sm:$0xf]  ;;  %v13209_v47 = vld [vmem:[%s13679_s30 + $0x1a4] sm:$0xf0] }
 0xe44   : > { %v13206_v1 = vld [vmem:[%s13679_s30 + $0x194] sm:$0xf]  ;;  %v12060_v55 = vld [vmem:[%s13679_s30 + $0x1a8] sm:$0xf0]  ;;  %v11963_v35 = vor.u32 %v13185_v25, %v11962_v12  ;;  %v11940_v61 = vld [vmem:[%s13679_s30 + $0xb8] sm:$0xf0]  ;;  %v12059_v8 = vor.u32 %v13209_v47, %v12058_v15 }
 0xe45   : > { %7098 = vst [vmem:[#allocation1] ss:$9 sm:$0xff] %v7069_v7  ;;  %v13179_v7 = vld [vmem:[%s13679_s30 + $0xb4] sm:$0xf0]  ;;  %v12063_v44 = vor.u32 %v13206_v1, %v12060_v55  ;;  %v11914_v9 = vld [vmem:[%s13679_s30 + $0x70] sm:$0xf] }
 0xe46   : > { %7099 = vst [vmem:[#allocation1 + $0x1] ss:$9 sm:$0xff] %v7070_v22  ;;  %v13176_v22 = vld [vmem:[%s13679_s30 + $0xa4] sm:$0xf]  ;;  %v13173_v33 = vld [vmem:[%s13679_s30 + $0x84] sm:$0xf0] }
 0xe47   : > { %v11943_v4 = vor.u32 %v13176_v22, %v11940_v61  ;;  %v13170_v45 = vld [vmem:[%s13679_s30 + $0x74] sm:$0xf]  ;;  %v13167_v36 = vld [vmem:[%s13679_s30 + $0x54] sm:$0xf0]  ;;  %v13164_v21 = vld [vmem:[%s13679_s30 + $0x44] sm:$0xf] }
 0xe48   : > { %v11892_v43 = vld [vmem:[%s13679_s30 + $0x58] sm:$0xf0]  ;;  %v13161_v62 = vld [vmem:[%s13679_s30 + $0x24] sm:$0xf0]  ;;  %v13158_v56 = vld [vmem:[%s13679_s30 + $0x14] sm:$0xf] }
 0xe49   : > { %v11868_v49 = vld [vmem:[%s13679_s30 + $0x28] sm:$0xf0] }
 0xe4d   : > { %v7100_v19 = vld [vmem:[#allocation1] sm:$0xff]  ;;  %v7101_v34 = vld [vmem:[#allocation1 + $0x9] sm:$0xff] }
 0xe4e   : > { %v17934_v54 = vpack.c.bf16 %v7100_v19, %v7096_v52  ;;  %v17936_v18 = vpack.c.bf16 %v7101_v34, %v7097_v58  ;;  %v11967_v52 = vor.u32 %v13182_v50, %v11964_v59  ;;  %v11938_v58 = vld [vmem:[%s13679_s30 + $0xa0] sm:$0xf]  ;;  %v11916_v19 = vld [vmem:[%s13679_s30 + $0x88] sm:$0xf0]  ;;  %v11915_v34 = vor.u32 %v13173_v33, %v11914_v9 }
 0xe4f   : > { %v11939_v31 = vor.u32 %v13179_v7, %v11938_v58 }
 0xe50   : > { %7565 = vmatmul.bf16.vlgmr.msra.gmra.mxu0 %v17934_v54  ;;  %12136 = vmatmul.msk.bf16.vlgmr.msra.gmra.mxu1 %vm19095_vm15, %v17936_v18 }
 0xe51   : > { %7593 = vmatmul.bf16.vlgmr.msrb.gmra.mxu2 %v17934_v54  ;;  %12137 = vmatmul.msk.bf16.vlgmr.msrb.gmra.mxu3 %vm19096_vm1, %v17936_v18 }
 0xe52   : > { %7669 = vmatpush.bf16.msrb.mxu3 %v12035_v30  ;;  %7697 = vmatpush.bf16.msrb.mxu2 %v12039_v0  ;;  %v11919_v30 = vor.u32 %v13170_v45, %v11916_v19  ;;  %v11890_v0 = vld [vmem:[%s13679_s30 + $0x40] sm:$0xf] }
 0xe53   : > { %7687 = vmatpush.bf16.msra.mxu1 %v12131_v29  ;;  %7715 = vmatpush.bf16.msra.mxu0 %v12135_v2  ;;  %v11891_v32 = vor.u32 %v13167_v36, %v11890_v0  ;;  %v11895_v29 = vor.u32 %v13164_v21, %v11892_v43  ;;  %v11866_v2 = vld [vmem:[%s13679_s30 + $0x10] sm:$0xf] }
 0xe54   : > { %v11867_v63 = vor.u32 %v13161_v62, %v11866_v2 }
 0xe56   : > { %7670 = vmatpush.bf16.msrb.mxu3 %v12011_v20  ;;  %7698 = vmatpush.bf16.msrb.mxu2 %v12015_v48  ;;  %v11871_v20 = vor.u32 %v13158_v56, %v11868_v49  ;;  %v17997_v48 = vld [vmem:[%s13684_s26] sm:$0x3f] }
 0xe57   : > { %7688 = vmatpush.bf16.msra.mxu1 %v12107_v26  ;;  %7716 = vmatpush.bf16.msra.mxu0 %v12111_v57  ;;  %v7182_v53 = vperm.slane %v17997_v48, 0  ;;  %v7183_v57 = vperm.slane %v17997_v48, 1  ;;  %v7184_v19 = vperm.slane %v17997_v48, 2 }
 0xe5a   : > { %7671 = vmatpush.bf16.msrb.mxu3 %v11987_v41  ;;  %7699 = vmatpush.bf16.msrb.mxu2 %v11991_v38 }
 0xe5b   : > { %7689 = vmatpush.bf16.msra.mxu1 %v12083_v46  ;;  %7717 = vmatpush.bf16.msra.mxu0 %v12087_v6 }
 0xe5e   : > { %7672 = vmatpush.bf16.msrb.mxu3 %v11963_v35  ;;  %7700 = vmatpush.bf16.msrb.mxu2 %v11967_v52 }
 0xe5f   : > { %7690 = vmatpush.bf16.msra.mxu1 %v12059_v8  ;;  %7718 = vmatpush.bf16.msra.mxu0 %v12063_v44 }
 0xe60   : > { %7621 = vmatmul.bf16.vlgmr.msrb.gmra.mxu1 %v17934_v54  ;;  %7649 = vmatmul.bf16.vlgmr.msrb.gmra.mxu0 %v17934_v54 }
 0xe61   : > { %12138 = vmatmul.msk.bf16.vlgmr.msra.gmra.mxu3 %vm19097_vm2, %v17936_v18  ;;  %12139 = vmatmul.msk.bf16.vlgmr.msra.gmra.mxu2 %vm19098_vm8, %v17936_v18 }
 0xe62   : > { %7673 = vmatpush.bf16.msrb.mxu3 %v11939_v31  ;;  %7701 = vmatpush.bf16.msrb.mxu2 %v11943_v4 }
 0xe66   : > { %7674 = vmatpush.bf16.msrb.mxu3 %v11915_v34  ;;  %7702 = vmatpush.bf16.msrb.mxu2 %v11919_v30 }
 0xe6a   : > { %7675 = vmatpush.bf16.msrb.mxu3 %v11891_v32  ;;  %7703 = vmatpush.bf16.msrb.mxu2 %v11895_v29 }
 0xe6e   : > { %7676 = vmatpush.bf16.msrb.mxu3 %v11867_v63  ;;  %7704 = vmatpush.bf16.msrb.mxu2 %v11871_v20 }
 0xe70   : > { %12140 = vmatmul.msk.bf16.vlgmr.msra.gmra.mxu1 %vm19099_vm10, %v17936_v18  ;;  %12141 = vmatmul.msk.bf16.vlgmr.msra.gmra.mxu0 %vm19100_vm11, %v17936_v18 }
 0xe71   : > { %7677 = vmatmul.bf16.vlgmr.msrb.gmra.mxu3 %v17934_v54  ;;  %7705 = vmatmul.bf16.vlgmr.msrb.gmra.mxu2 %v17934_v54 }
 0xecd   : > { %v7566_v23 = vpop.f32.mrf.mxu0  ;;  %v7580_v14 = vpop.f32.mrf.mxu1 }
 0xece   : > { %v7567_v11 = vadd.f32 %v7566_v23, %v7182_v53 }
 0xed0   : > { %v18000_v26 = vadd.f32 %v7580_v14, %v7567_v11 }
 0xed2   : > { %v18004_v42 = vmul.f32 0.70710677, %v18000_v26 }
 0xed4   : > { %v7749_v18 = vmul.f32 %v18004_v42, %v18004_v42  ;;  %v7594_v16 = vpop.f32.mrf.mxu2  ;;  %v7608_v60 = vpop.f32.mrf.mxu3 }
 0xed5   : > { %v7595_v54 = vadd.f32 %v7594_v16, %v7183_v57  ;;  %v7568_v3 = vpop.f32.mrf.mxu0  ;;  %v7582_v25 = vpop.f32.mrf.mxu1 }
 0xed6   : > { %v18008_v41 = vmin.f32 %v7749_v18, 16.0  ;;  %v7569_v38 = vadd.f32 %v7568_v3, %v7182_v53 }
 0xed7   : > { %v18010_v12 = vadd.f32 %v7608_v60, %v7595_v54 }
 0xed8   : > { %v7751_v50 = vmul.f32 2.1237322e-06, %v18008_v41  ;;  %v7762_v59 = vmul.f32 3.8918573e-05, %v18008_v41  ;;  %v18014_v46 = vadd.f32 %v7582_v25, %v7569_v38 }
 0xed9   : > { %v18017_v6 = vmul.f32 0.70710677, %v18010_v12 }
 0xeda   : > { %v7763_v15 = vadd.f32 0.001143296, %v7762_v59  ;;  %v7752_v47 = vadd.f32 0.00028619796, %v7751_v50  ;;  %v18022_v55 = vmul.f32 0.70710677, %v18014_v46 }
 0xedb   : > { %v7789_v1 = vmul.f32 %v18017_v6, %v18017_v6 }
 0xedc   : > { %v7764_v35 = vmul.f32 %v7763_v15, %v18008_v41  ;;  %v7596_v52 = vpop.f32.mrf.mxu2  ;;  %v7610_v58 = vpop.f32.mrf.mxu3  ;;  %v7989_v22 = vmul.f32 %v18022_v55, %v18022_v55  ;;  %v7753_v44 = vmul.f32 %v7752_v47, %v18008_v41 }
 0xedd   : > { %v18025_v7 = vmin.f32 %v7789_v1, 16.0  ;;  %v7597_v61 = vadd.f32 %v7596_v52, %v7183_v57  ;;  %v7622_v36 = vpop.f32.mrf.mxu1 }
 0xede   : > { %v7765_v8 = vadd.f32 0.014752088, %v7764_v35  ;;  %v18032_v9 = vmin.f32 %v7989_v22, 16.0  ;;  %v7754_v32 = vadd.f32 0.0036580483, %v7753_v44  ;;  %v7623_v20 = vadd.f32 %v7622_v36, %v7184_v19 }
 0xedf   : > { %v7791_v31 = vmul.f32 2.1237322e-06, %v18025_v7  ;;  %v7802_v4 = vmul.f32 3.8918573e-05, %v18025_v7  ;;  %v18035_v45 = vadd.f32 %v7610_v58, %v7597_v61 }
 0xee0   : > { %v7766_v33 = vmul.f32 %v7765_v8, %v18008_v41  ;;  %v7991_v0 = vmul.f32 2.1237322e-06, %v18032_v9  ;;  %v8002_v43 = vmul.f32 3.8918573e-05, %v18032_v9  ;;  %v7755_v54 = vmul.f32 %v7754_v32, %v18008_v41 }
 0xee1   : > { %v7792_v34 = vadd.f32 0.00028619796, %v7791_v31  ;;  %v7803_v30 = vadd.f32 0.001143296, %v7802_v4  ;;  %v18044_v63 = vmul.f32 0.70710677, %v18035_v45 }
 0xee2   : > { %v7767_v21 = vadd.f32 0.112945676, %v7766_v33  ;;  %v7992_v62 = vadd.f32 0.00028619796, %v7991_v0  ;;  %v8003_v49 = vadd.f32 0.001143296, %v8002_v43 }
 0xee3   : > { %v7793_v29 = vmul.f32 %v7792_v34, %v18025_v7  ;;  %v7804_v2 = vmul.f32 %v7803_v30, %v18025_v7  ;;  %v8029_v16 = vmul.f32 %v18044_v63, %v18044_v63  ;;  %v7756_v22 = vadd.f32 0.05243302, %v7755_v54 }
 0xee4   : > { %v7768_v56 = vmul.f32 %v7767_v21, %v18008_v41  ;;  %v7636_v53 = vpop.f32.mrf.mxu3  ;;  %v7993_v11 = vmul.f32 %v7992_v62, %v18032_v9  ;;  %v8004_v18 = vmul.f32 %v8003_v49, %v18032_v9  ;;  %v7185_v21 = vperm.slane %v17997_v48, 3  ;;  %v7650_v49 = vpop.f32.mrf.mxu0 }
 0xee5   : > { %v7794_v23 = vadd.f32 0.0036580483, %v7793_v29  ;;  %v7805_v14 = vadd.f32 0.014752088, %v7804_v2  ;;  %v18052_v60 = vadd.f32 %v7636_v53, %v7623_v20  ;;  %v18057_v50 = vmin.f32 %v8029_v16, 16.0  ;;  %v7664_v16 = vpop.f32.mrf.mxu2 }
 0xee6   : > { %v7769_v57 = vadd.f32 0.4994258, %v7768_v56  ;;  %v8005_v25 = vadd.f32 0.014752088, %v8004_v18  ;;  %v7994_v47 = vadd.f32 0.0036580483, %v7993_v11  ;;  %v7757_v0 = vmul.f32 %v7756_v22, %v18008_v41 }
 0xee7   : > { %v7806_v3 = vmul.f32 %v7805_v14, %v18025_v7  ;;  %v7795_v59 = vmul.f32 %v7794_v23, %v18025_v7  ;;  %v8031_v52 = vmul.f32 2.1237322e-06, %v18057_v50  ;;  %v18065_v58 = vmul.f32 0.70710677, %v18052_v60 }
 0xee8   : > { %v7770_v38 = vmul.f32 %v7769_v57, %v18008_v41  ;;  %v8006_v35 = vmul.f32 %v8005_v25, %v18032_v9  ;;  %v8042_v8 = vmul.f32 3.8918573e-05, %v18057_v50  ;;  %v7995_v4 = vmul.f32 %v7994_v47, %v18032_v9 }
 0xee9   : > { %v7807_v15 = vadd.f32 0.112945676, %v7806_v3  ;;  %v7796_v44 = vadd.f32 0.05243302, %v7795_v59  ;;  %v8032_v34 = vadd.f32 0.00028619796, %v8031_v52  ;;  %v7829_v30 = vmul.f32 %v18065_v58, %v18065_v58 }
 0xeea   : > { %v18060_v1 = vadd.f32 1.0, %v7770_v38  ;;  %v8007_v33 = vadd.f32 0.112945676, %v8006_v35  ;;  %v8043_v29 = vadd.f32 0.001143296, %v8042_v8  ;;  %v7651_v3 = vadd.f32 %v7650_v49, %v7185_v21 }
 0xeeb   : > { %v7808_v61 = vmul.f32 %v7807_v15, %v18025_v7  ;;  %v8033_v32 = vmul.f32 %v8032_v34, %v18057_v50  ;;  %v18078_v2 = vmin.f32 %v7829_v30, 16.0  ;;  %v7797_v62 = vmul.f32 %v7796_v44, %v18025_v7 }
 0xeec   : > { %13416 = vrcp.f32 %v18060_v1  ;;  %v8008_v43 = vmul.f32 %v8007_v33, %v18032_v9  ;;  %v7996_v53 = vadd.f32 0.05243302, %v7995_v4  ;;  %v8044_v14 = vmul.f32 %v8043_v29, %v18057_v50 }
 0xeed   : > { %v7809_v31 = vadd.f32 0.4994258, %v7808_v61  ;;  %v7831_v11 = vmul.f32 2.1237322e-06, %v18078_v2  ;;  %v8034_v18 = vadd.f32 0.0036580483, %v8033_v32  ;;  %v18094_v22 = vadd.f32 %v7664_v16, %v7651_v3 }
 0xeee   : > { %v8009_v23 = vadd.f32 0.4994258, %v8008_v43  ;;  %v7758_v54 = vadd.f32 0.18741608, %v7757_v0  ;;  %v18090_v38 = vmul.f32 0.5, %v18000_v26  ;;  %v7997_v35 = vmul.f32 %v7996_v53, %v18032_v9 }
 0xeef   : > { %v7810_v36 = vmul.f32 %v7809_v31, %v18025_v7  ;;  %v8045_v15 = vadd.f32 0.014752088, %v8044_v14  ;;  %v7798_v47 = vadd.f32 0.18741608, %v7797_v62  ;;  %v7832_v52 = vadd.f32 0.00028619796, %v7831_v11 }
 0xef0   : > { %v8010_v59 = vmul.f32 %v8009_v23, %v18032_v9  ;;  %v8035_v44 = vmul.f32 %v8034_v18, %v18057_v50  ;;  %v7759_v26 = vmul.f32 %v7758_v54, %v18008_v41  ;;  %vm7777_vm3 = vweird.f32 %v18060_v1 }
 0xef1   : > { %v18081_v56 = vadd.f32 1.0, %v7810_v36  ;;  %v8046_v31 = vmul.f32 %v8045_v15, %v18057_v50  ;;  %v7781_v4 = vand.u32 2147483647, %v18060_v1  ;;  %v7833_v30 = vmul.f32 %v7832_v52, %v18078_v2 }
 0xef2   : > { %v13417_v20 = vpop.eup %13416  ;;  %v18096_v8 = vadd.f32 1.0, %v8010_v59  ;;  %v7842_v0 = vmul.f32 3.8918573e-05, %v18078_v2  ;;  %v7783_v36 = vand.u32 2147483648, %v18060_v1  ;;  %v7998_v41 = vadd.f32 0.18741608, %v7997_v35 }
 0xef3   : > { %v7773_v57 = vmul.f32 %v13417_v20, %v18060_v1  ;;  %13418 = vrcp.f32 %v18081_v56  ;;  %vm7778_vm9 = vweird.f32 %v13417_v20  ;;  %v18112_v32 = vmul.f32 0.70710677, %v18094_v22 }
 0xef4   : > { %13420 = vrcp.f32 %v18096_v8  ;;  %vm18114_vm0 = vmor %vm7777_vm3, %vm7778_vm9  ;;  %v18119_v62 = vmul.f32 0.5, %v18010_v12  ;;  %v7799_v49 = vmul.f32 %v7798_v47, %v18025_v7  ;;  %v8036_v53 = vadd.f32 0.05243302, %v8035_v44 }
 0xef5   : > { %v7774_v25 = vsub.f32 1.0, %v7773_v57  ;;  %v8047_v23 = vadd.f32 0.112945676, %v8046_v31  ;;  %v7760_v14 = vadd.f32 1.1283791, %v7759_v26  ;;  %v18125_v11 = vmul.f32 0.5, %v18014_v46 }
 0xef6   : > { %v18128_v57 = vmul.f32 0.5, %v18035_v45  ;;  %v7834_v54 = vadd.f32 0.0036580483, %v7833_v30  ;;  %v7843_v12 = vadd.f32 0.001143296, %v7842_v0  ;;  %vm7782_vm15 = vcmp.eq.f32.partialorder %v7781_v4, 8.507059e+37 }
 0xef7   : > { %v7775_v61 = vmul.f32 %v13417_v20, %v7774_v25  ;;  %v8048_v16 = vmul.f32 %v8047_v23, %v18057_v50  ;;  %v7784_v3 = vor.u32 1.1754944e-38, %v7783_v36  ;;  %v7999_v7 = vmul.f32 %v7998_v41, %v18032_v9 }
 0xef8   : > { %v7869_v25 = vmul.f32 %v18112_v32, %v18112_v32  ;;  %v8037_v46 = vmul.f32 %v8036_v53, %v18057_v50  ;;  %v7844_v45 = vmul.f32 %v7843_v12, %v18078_v2  ;;  %v7761_v47 = vmul.f32 %v7760_v14, %v18004_v42  ;;  %v12404_v12 = vld [vmem:[%s13689_s0 + $0x1f0] sm:$0xf] }
 0xef9   : > { %v18103_v33 = vpop.eup %13418  ;;  %v7776_v34 = vadd.f32 %v13417_v20, %v7775_v61  ;;  %v8049_v15 = vadd.f32 0.4994258, %v8048_v16  ;;  %v7821_v52 = vand.u32 2147483647, %v18081_v56  ;;  %v18141_v61 = vmul.f32 0.5, %v18052_v60 }
 0xefa   : > { %v7813_v43 = vmul.f32 %v18103_v33, %v18081_v56  ;;  %v18134_v59 = vpop.eup %13420  ;;  %v7835_v31 = vmul.f32 %v7834_v54, %v18078_v2  ;;  %v7845_v26 = vadd.f32 0.014752088, %v7844_v45  ;;  %v7823_v4 = vand.u32 2147483648, %v18081_v56  ;;  %v12340_v16 = vld [vmem:[%s13689_s0 + $0x170] sm:$0xf] }
 0xefb   : > { %v7780_v1 = vsel %vm18114_vm0, %v13417_v20, %v7776_v34  ;;  %v7800_v20 = vadd.f32 1.1283791, %v7799_v49  ;;  %v8050_v44 = vmul.f32 %v8049_v15, %v18057_v50  ;;  %v8000_v34 = vadd.f32 1.1283791, %v7999_v7  ;;  %v13275_v54 = vld [vmem:[%s13689_s0 + $0x174] sm:$0xf0] }
 0xefc   : > { %v7814_v18 = vsub.f32 1.0, %v7813_v43  ;;  %v7785_v35 = vsel %vm7782_vm15, %v7784_v3, %v7780_v1  ;;  %v8013_v30 = vmul.f32 %v18134_v59, %v18096_v8  ;;  %v18149_v42 = vmin.f32 %v7869_v25, 16.0 }
 0xefd   : > { %v18152_v0 = vmul.f32 %v7800_v20, %v18017_v6  ;;  %vm7817_vm1 = vweird.f32 %v18081_v56  ;;  %v8038_v60 = vadd.f32 0.18741608, %v8037_v46  ;;  %v18155_v36 = vadd.f32 1.0, %v8050_v44  ;;  %v7624_v46 = vpop.f32.mrf.mxu1 }
 0xefe   : > { %v7815_v9 = vmul.f32 %v18103_v33, %v7814_v18  ;;  %v7786_v43 = vmul.f32 %v7785_v35, %v7761_v47  ;;  %vm18157_vm2 = vcmp.eq.f32.partialorder %v7821_v52, 8.507059e+37  ;;  %v7846_v29 = vmul.f32 %v7845_v26, %v18078_v2  ;;  %v13291_v47 = vld [vmem:[%s13689_s0 + $0x1f4] sm:$0xf0] }
 0xeff   : > { %v7871_v49 = vmul.f32 2.1237322e-06, %v18149_v42  ;;  %vm7818_vm8 = vweird.f32 %v18103_v33  ;;  %13422 = vrcp.f32 %v18155_v36  ;;  %v7836_v53 = vadd.f32 0.05243302, %v7835_v31 }
 0xf00   : > { %v7816_v6 = vadd.f32 %v18103_v33, %v7815_v9  ;;  %v7824_v23 = vor.u32 1.1754944e-38, %v7823_v4  ;;  %v18167_v14 = vmul.f32 %v8000_v34, %v18022_v55  ;;  %v8014_v1 = vsub.f32 1.0, %v8013_v30  ;;  %vm18181_vm10 = vmor %vm7817_vm1, %vm7818_vm8  ;;  %v7638_v4 = vpop.f32.mrf.mxu3 }
 0xf01   : > { %v7847_v18 = vadd.f32 0.112945676, %v7846_v29  ;;  %v8039_v3 = vmul.f32 %v8038_v60, %v18057_v50  ;;  %v18174_v7 = vmul.f32 0.5, %v18094_v22  ;;  %v7872_v25 = vadd.f32 0.00028619796, %v7871_v49  ;;  %v7652_v60 = vpop.f32.mrf.mxu0 }
 0xf02   : > { %v7882_v20 = vmul.f32 3.8918573e-05, %v18149_v42  ;;  %v12142_v15 = vclamps-f32 %v7786_v43, 1.0  ;;  %vm8017_vm11 = vweird.f32 %v18096_v8  ;;  %v8021_v50 = vand.u32 2147483647, %v18096_v8 }
 0xf03   : > { %v8023_v22 = vand.u32 2147483648, %v18096_v8  ;;  %v7848_v45 = vmul.f32 %v7847_v18, %v18078_v2  ;;  %v7820_v35 = vsel %vm18181_vm10, %v18103_v33, %v7816_v6  ;;  %v7837_v56 = vmul.f32 %v7836_v53, %v18078_v2  ;;  %v12212_v49 = vld [vmem:[%s13689_s0 + $0x70] sm:$0xf]  ;;  %v13243_v6 = vld [vmem:[%s13689_s0 + $0x74] sm:$0xf0] }
 0xf04   : > { %v7873_v52 = vmul.f32 %v7872_v25, %v18149_v42  ;;  %v7883_v9 = vadd.f32 0.001143296, %v7882_v20  ;;  %v8015_v44 = vmul.f32 %v18134_v59, %v8014_v1  ;;  %vm8018_vm3 = vweird.f32 %v18134_v59 }
 0xf05   : > { %v7849_v31 = vadd.f32 0.4994258, %v7848_v45  ;;  %v7625_v26 = vadd.f32 %v7624_v46, %v7184_v19  ;;  %v18199_v34 = vpop.eup %13422  ;;  %v8040_v30 = vadd.f32 1.1283791, %v8039_v3  ;;  %v12341_v43 = vor.u32 %v13275_v54, %v12340_v16  ;;  %v7666_v16 = vpop.f32.mrf.mxu2  ;;  %vm18237_vm0 = vmor %vm8017_vm11, %vm8018_vm3 }
 0xf06   : > { %v7884_v33 = vmul.f32 %v7883_v9, %v18149_v42  ;;  %v12405_v29 = vor.u32 %v13291_v47, %v12404_v12  ;;  %v8229_v53 = vadd.f32 1.0, %v12142_v15  ;;  %v7825_v1 = vsel %vm18157_vm2, %v7824_v23, %v7820_v35 }
 0xf07   : > { %v8053_v18 = vmul.f32 %v18199_v34, %v18155_v36  ;;  %v7850_v19 = vmul.f32 %v7849_v31, %v18078_v2  ;;  %v7838_v25 = vadd.f32 0.18741608, %v7837_v56  ;;  %v7874_v20 = vadd.f32 0.0036580483, %v7873_v52  ;;  %8869 = vmatpush.bf16.msrb.mxu0 %v12341_v43  ;;  %v13259_v31 = vld [vmem:[%s13689_s0 + $0xf4] sm:$0xf0] }
 0xf08   : > { %v7885_v46 = vadd.f32 0.014752088, %v7884_v33  ;;  %8883 = vmatpush.bf16.msra.mxu2 %v12405_v29  ;;  %v18209_v3 = vadd.f32 %v7638_v4, %v7625_v26  ;;  %v8016_v54 = vadd.f32 %v18134_v59, %v8015_v44  ;;  %v7653_v41 = vadd.f32 %v7652_v60, %v7185_v21  ;;  %v12276_v44 = vld [vmem:[%s13689_s0 + $0xf0] sm:$0xf]  ;;  %v13273_v4 = vld [vmem:[%s13689_s0 + $0x164] sm:$0xf0] }
 0xf09   : > { %v18212_v12 = vadd.f32 1.0, %v7850_v19  ;;  %v12213_v23 = vor.u32 %v13243_v6, %v12212_v49  ;;  %vm18216_vm9 = vcmp.eq.f32.partialorder %v8021_v50, 8.507059e+37  ;;  %v8054_v55 = vsub.f32 1.0, %v8053_v18  ;;  %v12396_v6 = vld [vmem:[%s13689_s0 + $0x1e0] sm:$0xf] }
 0xf0a   : > { %v7886_v45 = vmul.f32 %v7885_v46, %v18149_v42  ;;  %v18222_v47 = vmul.f32 0.70710677, %v18209_v3  ;;  %v18225_v35 = vmul.f32 %v7825_v1, %v18152_v0  ;;  %v8024_v56 = vor.u32 1.1754944e-38, %v8023_v22 }
 0xf0b   : > { %13424 = vrcp.f32 %v18212_v12  ;;  %v18228_v21 = vadd.f32 %v7666_v16, %v7653_v41  ;;  %8841 = vmatpush.bf16.msrb.mxu1 %v12213_v23  ;;  %v18231_v50 = vmul.f32 %v8229_v53, %v18090_v38  ;;  %v18242_v0 = vmul.f32 %v8040_v30, %v18044_v63  ;;  %v12332_v63 = vld [vmem:[%s13689_s0 + $0x160] sm:$0xf] }
 0xf0c   : > { %v7875_v22 = vmul.f32 %v7874_v20, %v18149_v42  ;;  %v7887_v9 = vadd.f32 0.112945676, %v7886_v45  ;;  %v8020_v38 = vsel %vm18237_vm0, %v18134_v59, %v8016_v54  ;;  %vm8057_vm15 = vweird.f32 %v18155_v36 }
 0xf0d   : > { %v7839_v8 = vmul.f32 %v7838_v25, %v18078_v2  ;;  %v8069_v26 = vmul.f32 %v18222_v47, %v18222_v47  ;;  %v8055_v30 = vmul.f32 %v18199_v34, %v8054_v55  ;;  %v8061_v33 = vand.u32 2147483647, %v18155_v36  ;;  %v13289_v25 = vld [vmem:[%s13689_s0 + $0x1e4] sm:$0xf0] }
 0xf0e   : > { %v8063_v60 = vand.u32 2147483648, %v18155_v36  ;;  %v7888_v43 = vmul.f32 %v7887_v9, %v18149_v42  ;;  %v12143_v59 = vclamps-f32 %v18225_v35, 1.0  ;;  %v18264_v2 = vmul.f32 0.70710677, %v18228_v21 }
 0xf0f   : > { %v18261_v29 = vmin.f32 %v8069_v26, 16.0  ;;  %v12277_v49 = vor.u32 %v13259_v31, %v12276_v44  ;;  %v8025_v53 = vsel %vm18216_vm9, %v8024_v56, %v8020_v38  ;;  %v7876_v1 = vadd.f32 0.05243302, %v7875_v22 }
 0xf10   : > { %v7889_v18 = vadd.f32 0.4994258, %v7888_v43  ;;  %v12333_v19 = vor.u32 %v13273_v4, %v12332_v63  ;;  %v7840_v46 = vadd.f32 1.1283791, %v7839_v8  ;;  %v8109_v41 = vmul.f32 %v18264_v2, %v18264_v2  ;;  %v13241_v43 = vld [vmem:[%s13689_s0 + $0x64] sm:$0xf0] }
 0xf11   : > { %v18270_v20 = vpop.eup %13424  ;;  %v8071_v16 = vmul.f32 2.1237322e-06, %v18261_v29  ;;  %v8082_v54 = vmul.f32 3.8918573e-05, %v18261_v29  ;;  %8855 = vmatpush.bf16.msra.mxu3 %v12277_v49  ;;  %v8056_v23 = vadd.f32 %v18199_v34, %v8055_v30  ;;  %vm8058_vm1 = vweird.f32 %v18199_v34  ;;  %v12204_v30 = vld [vmem:[%s13689_s0 + $0x60] sm:$0xf] }
 0xf12   : > { %v7853_v15 = vmul.f32 %v18270_v20, %v18212_v12  ;;  %v7890_v55 = vmul.f32 %v7889_v18, %v18149_v42  ;;  %8870 = vmatpush.bf16.msrb.mxu0 %v12333_v19  ;;  %v8026_v45 = vmul.f32 %v8025_v53, %v18167_v14  ;;  %v18282_v22 = vmin.f32 %v8109_v41, 16.0  ;;  %vm18289_vm2 = vmor %vm8057_vm15, %vm8058_vm1  ;;  %v13257_v53 = vld [vmem:[%s13689_s0 + $0xe4] sm:$0xf0] }
 0xf13   : > { %v8072_v56 = vadd.f32 0.00028619796, %v8071_v16  ;;  %v8083_v52 = vadd.f32 0.001143296, %v8082_v54  ;;  %v7877_v44 = vmul.f32 %v7876_v1, %v18149_v42  ;;  %v12397_v38 = vor.u32 %v13289_v25, %v12396_v6 }
 0xf14   : > { %v7854_v9 = vsub.f32 1.0, %v7853_v15  ;;  %v18285_v31 = vadd.f32 1.0, %v7890_v55  ;;  %vm18293_vm8 = vcmp.eq.f32.partialorder %v8061_v33, 8.507059e+37  ;;  %v8111_v4 = vmul.f32 2.1237322e-06, %v18282_v22 }
 0xf15   : > { %v8073_v26 = vmul.f32 %v8072_v56, %v18261_v29  ;;  %v8084_v63 = vmul.f32 %v8083_v52, %v18261_v29  ;;  %v8060_v36 = vsel %vm18289_vm2, %v18199_v34, %v8056_v23  ;;  %v8064_v49 = vor.u32 1.1754944e-38, %v8063_v60  ;;  %8884 = vmatpush.bf16.msra.mxu2 %v12397_v38  ;;  %v12268_v33 = vld [vmem:[%s13689_s0 + $0xe0] sm:$0xf]  ;;  %v13271_v23 = vld [vmem:[%s13689_s0 + $0x154] sm:$0xf0] }
 0xf16   : > { %v7855_v6 = vmul.f32 %v18270_v20, %v7854_v9  ;;  %13426 = vrcp.f32 %v18285_v31  ;;  %v12148_v1 = vclamps-f32 %v8026_v45, 1.0  ;;  %v18310_v18 = vmul.f32 %v7840_v46, %v18065_v58  ;;  %v12324_v46 = vld [vmem:[%s13689_s0 + $0x150] sm:$0xf]  ;;  %v13287_v9 = vld [vmem:[%s13689_s0 + $0x1d4] sm:$0xf0] }
 0xf17   : > { %v8074_v19 = vadd.f32 0.0036580483, %v8073_v26  ;;  %v8085_v25 = vadd.f32 0.014752088, %v8084_v63  ;;  %vm7857_vm10 = vweird.f32 %v18212_v12  ;;  %v7878_v34 = vadd.f32 0.18741608, %v7877_v44 }
 0xf18   : > { %v8112_v60 = vadd.f32 0.00028619796, %v8111_v4  ;;  %v8122_v16 = vmul.f32 3.8918573e-05, %v18282_v22  ;;  %v8065_v54 = vsel %vm18293_vm8, %v8064_v49, %v8060_v36  ;;  %vm7858_vm11 = vweird.f32 %v18270_v20  ;;  %v12388_v52 = vld [vmem:[%s13689_s0 + $0x1d0] sm:$0xf] }
 0xf19   : > { %v8075_v41 = vmul.f32 %v8074_v19, %v18261_v29  ;;  %v8086_v58 = vmul.f32 %v8085_v25, %v18261_v29  ;;  %v7856_v15 = vadd.f32 %v18270_v20, %v7855_v6  ;;  %v12205_v56 = vor.u32 %v13241_v43, %v12204_v30  ;;  %vm18335_vm3 = vmor %vm7857_vm10, %vm7858_vm11  ;;  %v7678_v25 = vpop.f32.mrf.mxu3 }
 0xf1a   : > { %v8113_v55 = vmul.f32 %v8112_v60, %v18282_v22  ;;  %v8123_v45 = vadd.f32 0.001143296, %v8122_v16  ;;  %v7863_v44 = vand.u32 2147483648, %v18212_v12  ;;  %v12269_v14 = vor.u32 %v13257_v53, %v12268_v33 }
 0xf1b   : > { %v8076_v38 = vadd.f32 0.05243302, %v8075_v41  ;;  %v8087_v8 = vadd.f32 0.112945676, %v8086_v58  ;;  %v8066_v63 = vmul.f32 %v8065_v54, %v18242_v0  ;;  %v7861_v4 = vand.u32 2147483647, %v18212_v12  ;;  %8842 = vmatpush.bf16.msrb.mxu1 %v12205_v56  ;;  %v7706_v54 = vpop.f32.mrf.mxu2 }
 0xf1c   : > { %v18326_v26 = vpop.eup %13426  ;;  %v8124_v36 = vmul.f32 %v8123_v45, %v18282_v22  ;;  %v12325_v49 = vor.u32 %v13271_v23, %v12324_v46  ;;  %v8235_v6 = vadd.f32 1.0, %v12148_v1  ;;  %v7879_v43 = vmul.f32 %v7878_v34, %v18149_v42  ;;  %8856 = vmatpush.bf16.msra.mxu3 %v12269_v14  ;;  %v12196_v45 = vld [vmem:[%s13689_s0 + $0x50] sm:$0xf]  ;;  %v13239_v56 = vld [vmem:[%s13689_s0 + $0x54] sm:$0xf0] }
 0xf1d   : > { %v8088_v33 = vmul.f32 %v8087_v8, %v18261_v29  ;;  %v8114_v0 = vadd.f32 0.0036580483, %v8113_v55  ;;  %v7860_v53 = vsel %vm18335_vm3, %v18270_v20, %v7856_v15  ;;  %v7893_v1 = vmul.f32 %v18326_v26, %v18285_v31 }
 0xf1e   : > { %v8125_v19 = vadd.f32 0.014752088, %v8124_v36  ;;  %8871 = vmatpush.bf16.msrb.mxu0 %v12325_v49  ;;  %v12389_v12 = vor.u32 %v13287_v9, %v12388_v52  ;;  %v7864_v60 = vor.u32 1.1754944e-38, %v7863_v44  ;;  %v8077_v42 = vmul.f32 %v8076_v38, %v18261_v29  ;;  %v7692_v38 = vpop.f32.mrf.mxu1 }
 0xf1f   : > { %v8089_v34 = vadd.f32 0.4994258, %v8088_v33  ;;  %v7186_v16 = vperm.slane %v17997_v48, 4  ;;  %v12149_v41 = vclamps-f32 %v8066_v63, 1.0  ;;  %vm7862_vm9 = vcmp.eq.f32.partialorder %v7861_v4, 8.507059e+37  ;;  %v7720_v33 = vpop.f32.mrf.mxu0 }
 0xf20   : > { %v8126_v20 = vmul.f32 %v8125_v19, %v18282_v22  ;;  %8885 = vmatpush.bf16.msra.mxu2 %v12389_v12  ;;  %v7187_v58 = vperm.slane %v17997_v48, 5  ;;  %v7865_v46 = vsel %vm7862_vm9, %v7864_v60, %v7860_v53  ;;  %v8115_v15 = vmul.f32 %v8114_v0, %v18282_v22  ;;  %v13255_v19 = vld [vmem:[%s13689_s0 + $0xd4] sm:$0xf0]  ;;  %v12316_v12 = vld [vmem:[%s13689_s0 + $0x140] sm:$0xf] }
 0xf21   : > { %v8090_v23 = vmul.f32 %v8089_v34, %v18261_v29  ;;  %v7679_v55 = vadd.f32 %v7678_v25, %v7186_v16  ;;  %v7880_v52 = vadd.f32 1.1283791, %v7879_v43  ;;  %v7894_v9 = vsub.f32 1.0, %v7893_v1  ;;  %v12260_v1 = vld [vmem:[%s13689_s0 + $0xd0] sm:$0xf] }
 0xf22   : > { %v8127_v44 = vadd.f32 0.112945676, %v8126_v20  ;;  %v7707_v8 = vadd.f32 %v7706_v54, %v7187_v58  ;;  %v18360_v14 = vadd.f32 1.0, %v12143_v59  ;;  %v8078_v63 = vadd.f32 0.18741608, %v8077_v42 }
 0xf23   : > { %v18362_v4 = vadd.f32 1.0, %v8090_v23  ;;  %v18364_v36 = vadd.f32 %v7692_v38, %v7679_v55  ;;  %v8236_v49 = vadd.f32 1.0, %v12149_v41  ;;  %v7866_v30 = vmul.f32 %v7865_v46, %v18310_v18  ;;  %v12380_v42 = vld [vmem:[%s13689_s0 + $0x1c0] sm:$0xf]  ;;  %v13285_v34 = vld [vmem:[%s13689_s0 + $0x1c4] sm:$0xf0] }
 0xf24   : > { %v8128_v43 = vmul.f32 %v8127_v44, %v18282_v22  ;;  %v12197_v0 = vor.u32 %v13239_v56, %v12196_v45  ;;  %v18369_v35 = vmul.f32 0.5, %v18209_v3  ;;  %v8116_v59 = vadd.f32 0.05243302, %v8115_v15  ;;  %v13269_v3 = vld [vmem:[%s13689_s0 + $0x144] sm:$0xf0] }
 0xf25   : > { %13428 = vrcp.f32 %v18362_v4  ;;  %v18372_v53 = vadd.f32 %v7720_v33, %v7707_v8  ;;  %v18378_v18 = vmul.f32 %v8235_v6, %v18125_v11  ;;  %v18381_v25 = vmul.f32 %v7880_v52, %v18112_v32  ;;  %v12188_v23 = vld [vmem:[%s13689_s0 + $0x40] sm:$0xf]  ;;  %v13237_v15 = vld [vmem:[%s13689_s0 + $0x44] sm:$0xf0] }
 0xf26   : > { %v7895_v60 = vmul.f32 %v18326_v26, %v7894_v9  ;;  %vm7897_vm0 = vweird.f32 %v18285_v31  ;;  %8843 = vmatpush.bf16.msrb.mxu1 %v12197_v0  ;;  %v7901_v54 = vand.u32 2147483647, %v18285_v31  ;;  %v8079_v11 = vmul.f32 %v8078_v63, %v18261_v29  ;;  %v13253_v52 = vld [vmem:[%s13689_s0 + $0xc4] sm:$0xf0]  ;;  %v12308_v63 = vld [vmem:[%s13689_s0 + $0x130] sm:$0xf] }
 0xf27   : > { %v8129_v6 = vadd.f32 0.4994258, %v8128_v43  ;;  %v18391_v41 = vmul.f32 0.70710677, %v18364_v36  ;;  %v18394_v32 = vmul.f32 %v8236_v49, %v18128_v57  ;;  %v12144_v20 = vclamps-f32 %v7866_v30, 1.0 }
 0xf28   : > { %vm7898_vm15 = vweird.f32 %v18326_v26  ;;  %v7903_v46 = vand.u32 2147483648, %v18285_v31  ;;  %v8117_v55 = vmul.f32 %v8116_v59, %v18282_v22  ;;  %v18405_v56 = vmul.f32 0.70710677, %v18372_v53  ;;  %v12252_v57 = vld [vmem:[%s13689_s0 + $0xc0] sm:$0xf] }
 0xf29   : > { %v8130_v29 = vmul.f32 %v8129_v6, %v18282_v22  ;;  %v7909_v45 = vmul.f32 %v18391_v41, %v18391_v41  ;;  %v18410_v9 = vadd.f32 %v18326_v26, %v7895_v60  ;;  %v12261_v44 = vor.u32 %v13255_v19, %v12260_v1  ;;  %v13267_v59 = vld [vmem:[%s13689_s0 + $0x134] sm:$0xf0]  ;;  %vm18436_vm2 = vmor %vm7897_vm0, %vm7898_vm15 }
 0xf2a   : > { %v12317_v38 = vor.u32 %v13269_v3, %v12316_v12  ;;  %v12381_v8 = vor.u32 %v13285_v34, %v12380_v42  ;;  %v8080_v30 = vadd.f32 1.1283791, %v8079_v11  ;;  %v7949_v0 = vmul.f32 %v18405_v56, %v18405_v56  ;;  %v12372_v3 = vld [vmem:[%s13689_s0 + $0x1b0] sm:$0xf]  ;;  %v13283_v42 = vld [vmem:[%s13689_s0 + $0x1b4] sm:$0xf0] }
 0xf2b   : > { %v18413_v49 = vpop.eup %13428  ;;  %v18415_v43 = vadd.f32 1.0, %v8130_v29  ;;  %v18417_v33 = vmin.f32 %v7909_v45, 16.0  ;;  %vm18422_vm1 = vcmp.eq.f32.partialorder %v7901_v54, 8.507059e+37  ;;  %8857 = vmatpush.bf16.msra.mxu3 %v12261_v44  ;;  %v12189_v19 = vor.u32 %v13237_v15, %v12188_v23  ;;  %v7680_v29 = vpop.f32.mrf.mxu3  ;;  %v12180_v44 = vld [vmem:[%s13689_s0 + $0x30] sm:$0xf] }
 0xf2c   : > { %v8093_v1 = vmul.f32 %v18413_v49, %v18362_v4  ;;  %8872 = vmatpush.bf16.msrb.mxu0 %v12317_v38  ;;  %v12253_v12 = vor.u32 %v13253_v52, %v12252_v57  ;;  %v18430_v34 = vadd.f32 1.0, %v12144_v20  ;;  %v7904_v11 = vor.u32 1.1754944e-38, %v7903_v46  ;;  %8886 = vmatpush.bf16.msra.mxu2 %v12381_v8  ;;  %v7708_v52 = vpop.f32.mrf.mxu2  ;;  %v13235_v38 = vld [vmem:[%s13689_s0 + $0x34] sm:$0xf0] }
 0xf2d   : > { %v8118_v6 = vadd.f32 0.18741608, %v8117_v55  ;;  %13430 = vrcp.f32 %v18415_v43  ;;  %v7900_v20 = vsel %vm18436_vm2, %v18326_v26, %v18410_v9  ;;  %v7911_v15 = vmul.f32 2.1237322e-06, %v18417_v33  ;;  %8844 = vmatpush.bf16.msrb.mxu1 %v12189_v19 }
 0xf2e   : > { %v8094_v23 = vsub.f32 1.0, %v8093_v1  ;;  %v7922_v31 = vmul.f32 3.8918573e-05, %v18417_v33  ;;  %v18448_v45 = vmul.f32 %v8080_v30, %v18222_v47  ;;  %v18450_v46 = vmin.f32 %v7949_v0, 16.0 }
 0xf2f   : > { %v12309_v55 = vor.u32 %v13267_v59, %v12308_v63  ;;  %v12373_v57 = vor.u32 %v13283_v42, %v12372_v3  ;;  %vm8097_vm8 = vweird.f32 %v18362_v4  ;;  %v7912_v26 = vadd.f32 0.00028619796, %v7911_v15  ;;  %8858 = vmatpush.bf16.msra.mxu3 %v12253_v12  ;;  %v7694_v59 = vpop.f32.mrf.mxu1 }
 0xf30   : > { %v8095_v8 = vmul.f32 %v18413_v49, %v8094_v23  ;;  %v7923_v9 = vadd.f32 0.001143296, %v7922_v31  ;;  %vm8098_vm10 = vweird.f32 %v18413_v49  ;;  %v7951_v1 = vmul.f32 2.1237322e-06, %v18450_v46 }
 0xf31   : > { %v7962_v47 = vmul.f32 3.8918573e-05, %v18450_v46  ;;  %8873 = vmatpush.bf16.msrb.mxu0 %v12309_v55  ;;  %8887 = vmatpush.bf16.msra.mxu2 %v12373_v57  ;;  %v7681_v63 = vadd.f32 %v7680_v29, %v7186_v16  ;;  %v7913_v30 = vmul.f32 %v7912_v26, %v18417_v33  ;;  %v7709_v19 = vadd.f32 %v7708_v52, %v7187_v58  ;;  %vm18482_vm11 = vmor %vm8097_vm8, %vm8098_vm10 }
 0xf32   : > { %v7924_v0 = vmul.f32 %v7923_v9, %v18417_v33  ;;  %v12181_v12 = vor.u32 %v13235_v38, %v12180_v44  ;;  %v8096_v42 = vadd.f32 %v18413_v49, %v8095_v8  ;;  %v7952_v54 = vadd.f32 0.00028619796, %v7951_v1  ;;  %v7722_v44 = vpop.f32.mrf.mxu0 }
 0xf33   : > { %v18465_v3 = vpop.eup %13430  ;;  %v7963_v23 = vadd.f32 0.001143296, %v7962_v47  ;;  %v18468_v15 = vadd.f32 %v7694_v59, %v7681_v63  ;;  %v8101_v31 = vand.u32 2147483647, %v18362_v4  ;;  %v8103_v16 = vand.u32 2147483648, %v18362_v4 }
 0xf34   : > { %v8133_v29 = vmul.f32 %v18465_v3, %v18415_v43  ;;  %v7914_v55 = vadd.f32 0.0036580483, %v7913_v30  ;;  %8845 = vmatpush.bf16.msrb.mxu1 %v12181_v12  ;;  %v7905_v48 = vsel %vm18422_vm1, %v7904_v11, %v7900_v20  ;;  %v8119_v58 = vmul.f32 %v8118_v6, %v18282_v22 }
 0xf35   : > { %v7925_v57 = vadd.f32 0.014752088, %v7924_v0  ;;  %v7964_v52 = vmul.f32 %v7963_v23, %v18450_v46  ;;  %v7953_v60 = vmul.f32 %v7952_v54, %v18450_v46  ;;  %v18488_v11 = vadd.f32 %v7722_v44, %v7709_v19 }
 0xf36   : > { %v8134_v8 = vsub.f32 1.0, %v8133_v29  ;;  %v7915_v26 = vmul.f32 %v7914_v55, %v18417_v33  ;;  %v8100_v22 = vsel %vm18482_vm11, %v18413_v49, %v8096_v42  ;;  %v18495_v4 = vmul.f32 0.70710677, %v18468_v15 }
 0xf37   : > { %v7926_v6 = vmul.f32 %v7925_v57, %v18417_v33  ;;  %v7965_v20 = vadd.f32 0.014752088, %v7964_v52  ;;  %v7906_v9 = vmul.f32 %v7905_v48, %v18381_v25  ;;  %vm8102_vm3 = vcmp.eq.f32.partialorder %v8101_v31, 8.507059e+37 }
 0xf38   : > { %v8104_v1 = vor.u32 1.1754944e-38, %v8103_v16  ;;  %v8135_v47 = vmul.f32 %v18465_v3, %v8134_v8  ;;  %vm8138_vm9 = vweird.f32 %v18465_v3  ;;  %v8149_v49 = vmul.f32 %v18495_v4, %v18495_v4 }
 0xf39   : > { %v7927_v63 = vadd.f32 0.112945676, %v7926_v6  ;;  %v7966_v30 = vmul.f32 %v7965_v20, %v18450_v46  ;;  %v7916_v59 = vadd.f32 0.05243302, %v7915_v26  ;;  %v7954_v19 = vadd.f32 0.0036580483, %v7953_v60 }
 0xf3a   : > { %v8105_v0 = vsel %vm8102_vm3, %v8104_v1, %v8100_v22  ;;  %v18504_v12 = vmul.f32 0.70710677, %v18488_v11  ;;  %v8136_v25 = vadd.f32 %v18465_v3, %v8135_v47  ;;  %v18508_v23 = vmin.f32 %v8149_v49, 16.0 }
 0xf3b   : > { %v7928_v42 = vmul.f32 %v7927_v63, %v18417_v33  ;;  %v7967_v54 = vadd.f32 0.112945676, %v7966_v30  ;;  %v8120_v31 = vadd.f32 1.1283791, %v8119_v58  ;;  %v8141_v16 = vand.u32 2147483647, %v18415_v43 }
 0xf3c   : > { %v8143_v29 = vand.u32 2147483648, %v18415_v43  ;;  %v8189_v55 = vmul.f32 %v18504_v12, %v18504_v12  ;;  %v8106_v48 = vmul.f32 %v8105_v0, %v18448_v45  ;;  %vm8137_vm0 = vweird.f32 %v18415_v43 }
 0xf3d   : > { %v7929_v57 = vadd.f32 0.4994258, %v7928_v42  ;;  %v7968_v52 = vmul.f32 %v7967_v54, %v18450_v46  ;;  %v12145_v44 = vclamps-f32 %v7906_v9, 1.0  ;;  %vm18519_vm15 = vmor %vm8137_vm0, %vm8138_vm9  ;;  %v7917_v58 = vmul.f32 %v7916_v59, %v18417_v33  ;;  %v12244_v54 = vld [vmem:[%s13689_s0 + $0xb0] sm:$0xf] }
 0xf3e   : > { %v7955_v8 = vmul.f32 %v7954_v19, %v18450_v46  ;;  %v8151_v26 = vmul.f32 2.1237322e-06, %v18508_v23  ;;  %v8140_v43 = vsel %vm18519_vm15, %v18465_v3, %v8136_v25  ;;  %v8162_v22 = vmul.f32 3.8918573e-05, %v18508_v23 }
 0xf3f   : > { %v7930_v45 = vmul.f32 %v7929_v57, %v18417_v33  ;;  %v7969_v60 = vadd.f32 0.4994258, %v7968_v52  ;;  %vm8142_vm1 = vcmp.eq.f32.partialorder %v8141_v16, 8.507059e+37  ;;  %v8144_v6 = vor.u32 1.1754944e-38, %v8143_v29  ;;  %v13251_v57 = vld [vmem:[%s13689_s0 + $0xb4] sm:$0xf0] }
 0xf40   : > { %v8152_v20 = vadd.f32 0.00028619796, %v8151_v26  ;;  %v18531_v9 = vmin.f32 %v8189_v55, 16.0  ;;  %v12150_v1 = vclamps-f32 %v8106_v48, 1.0  ;;  %v8163_v30 = vadd.f32 0.001143296, %v8162_v22 }
 0xf41   : > { %v18533_v47 = vadd.f32 1.0, %v7930_v45  ;;  %v7970_v63 = vmul.f32 %v7969_v60, %v18450_v46  ;;  %v8145_v3 = vsel %vm8142_vm1, %v8144_v6, %v8140_v43  ;;  %v7956_v49 = vadd.f32 0.05243302, %v7955_v8  ;;  %v12172_v45 = vld [vmem:[%s13689_s0 + $0x20] sm:$0xf] }
 0xf42   : > { %v8153_v0 = vmul.f32 %v8152_v20, %v18508_v23  ;;  %v8191_v59 = vmul.f32 2.1237322e-06, %v18531_v9  ;;  %v8232_v19 = vadd.f32 1.0, %v12145_v44  ;;  %v8121_v25 = vmul.f32 %v8120_v31, %v18264_v2  ;;  %v12300_v2 = vld [vmem:[%s13689_s0 + $0x120] sm:$0xf] }
 0xf43   : > { %v7918_v42 = vadd.f32 0.18741608, %v7917_v58  ;;  %13432 = vrcp.f32 %v18533_v47  ;;  %v8242_v16 = vmul.f32 %v18360_v14, %v18119_v62  ;;  %v18545_v29 = vpack.c.bf16 %v18378_v18, %v18231_v50  ;;  %v13265_v62 = vld [vmem:[%s13689_s0 + $0x124] sm:$0xf0]  ;;  %v12364_v18 = vld [vmem:[%s13689_s0 + $0x1a0] sm:$0xf] }
 0xf44   : > { %v18548_v55 = vmul.f32 0.5, %v18228_v21  ;;  %v18550_v48 = vadd.f32 1.0, %v7970_v63  ;;  %v8237_v31 = vadd.f32 1.0, %v12150_v1  ;;  %v8146_v52 = vmul.f32 %v8145_v3, %v8121_v25  ;;  %v13281_v58 = vld [vmem:[%s13689_s0 + $0x1a4] sm:$0xf0] }
 0xf45   : > { %v8164_v44 = vmul.f32 %v8163_v30, %v18508_v23  ;;  %v8192_v38 = vadd.f32 0.00028619796, %v8191_v59  ;;  %v18557_v14 = vpack.c.bf16 %v18394_v32, %v8242_v16  ;;  %v7957_v50 = vmul.f32 %v7956_v49, %v18450_v46  ;;  %v13233_v60 = vld [vmem:[%s13689_s0 + $0x24] sm:$0xf0]  ;;  %v12236_v63 = vld [vmem:[%s13689_s0 + $0xa0] sm:$0xf] }
 0xf46   : > { %13434 = vrcp.f32 %v18550_v48  ;;  %v8154_v21 = vadd.f32 0.0036580483, %v8153_v0  ;;  %v8243_v8 = vmul.f32 %v18430_v34, %v18141_v61  ;;  %v18566_v26 = vmul.f32 %v8232_v19, %v18174_v7  ;;  %v13249_v61 = vld [vmem:[%s13689_s0 + $0xa4] sm:$0xf0]  ;;  %v12292_v49 = vld [vmem:[%s13689_s0 + $0x110] sm:$0xf] }
 0xf47   : > { %v7919_v43 = vmul.f32 %v7918_v42, %v18417_v33  ;;  %v8165_v32 = vadd.f32 0.014752088, %v8164_v44  ;;  %v8193_v22 = vmul.f32 %v8192_v38, %v18531_v9  ;;  %v8202_v6 = vmul.f32 3.8918573e-05, %v18531_v9  ;;  %v13263_v0 = vld [vmem:[%s13689_s0 + $0x114] sm:$0xf0] }
 0xf48   : > { %v12245_v20 = vor.u32 %v13251_v57, %v12244_v54  ;;  %v12301_v1 = vor.u32 %v13265_v62, %v12300_v2  ;;  %v8249_v7 = vmul.f32 %v8237_v31, %v18369_v35  ;;  %v12151_v30 = vclamps-f32 %v8146_v52, 1.0  ;;  %v12356_v35 = vld [vmem:[%s13689_s0 + $0x190] sm:$0xf]  ;;  %v13279_v54 = vld [vmem:[%s13689_s0 + $0x194] sm:$0xf0] }
 0xf49   : > { %v18575_v34 = vpop.eup %13432  ;;  %v18579_v33 = vmul.f32 0.5, %v18468_v15  ;;  %v8166_v3 = vmul.f32 %v8165_v32, %v18508_v23  ;;  %v7958_v19 = vadd.f32 0.18741608, %v7957_v50  ;;  %v8155_v25 = vmul.f32 %v8154_v21, %v18508_v23  ;;  %v12164_v31 = vld [vmem:[%s13689_s0 + $0x10] sm:$0xf] }
 0xf4a   : > { %v7933_v59 = vmul.f32 %v18575_v34, %v18533_v47  ;;  %v8203_v42 = vadd.f32 0.001143296, %v8202_v6  ;;  %8859 = vmatpush.bf16.msra.mxu3 %v12245_v20  ;;  %8874 = vmatpush.bf16.msrb.mxu0 %v12301_v1  ;;  %v7920_v16 = vadd.f32 1.1283791, %v7919_v43  ;;  %v12365_v57 = vor.u32 %v13281_v58, %v12364_v18  ;;  %v13231_v21 = vld [vmem:[%s13689_s0 + $0x14] sm:$0xf0] }
 0xf4b   : > { %v8167_v15 = vadd.f32 0.112945676, %v8166_v3  ;;  %v12173_v2 = vor.u32 %v13233_v60, %v12172_v45  ;;  %v8194_v38 = vadd.f32 0.0036580483, %v8193_v22  ;;  %v12237_v50 = vor.u32 %v13249_v61, %v12236_v63  ;;  %v12228_v58 = vld [vmem:[%s13689_s0 + $0x90] sm:$0xf] }
 0xf4c   : > { %v18590_v52 = vpop.eup %13434  ;;  %v7934_v44 = vsub.f32 1.0, %v7933_v59  ;;  %v8204_v62 = vmul.f32 %v8203_v42, %v18531_v9  ;;  %v18594_v32 = vpack.c.bf16 %v8249_v7, %v8243_v8  ;;  %v8238_v6 = vadd.f32 1.0, %v12151_v30  ;;  %8888 = vmatpush.bf16.msra.mxu2 %v12365_v57  ;;  %v13247_v45 = vld [vmem:[%s13689_s0 + $0x94] sm:$0xf0]  ;;  %v12284_v63 = vld [vmem:[%s13689_s0 + $0x100] sm:$0xf] }
 0xf4d   : > { %v7973_v43 = vmul.f32 %v18590_v52, %v18550_v48  ;;  %v8168_v18 = vmul.f32 %v8167_v15, %v18508_v23  ;;  %8846 = vmatpush.bf16.msrb.mxu1 %v12173_v2  ;;  %v7959_v60 = vmul.f32 %v7958_v19, %v18450_v46  ;;  %v8156_v22 = vadd.f32 0.05243302, %v8155_v25  ;;  %v13261_v3 = vld [vmem:[%s13689_s0 + $0x104] sm:$0xf0] }
 0xf4e   : > { %v8205_v20 = vadd.f32 0.014752088, %v8204_v62  ;;  %8860 = vmatpush.bf16.msra.mxu3 %v12237_v50  ;;  %v12293_v1 = vor.u32 %v13263_v0, %v12292_v49  ;;  %v18604_v8 = vmul.f32 %v7920_v16, %v18391_v41  ;;  %v12357_v30 = vor.u32 %v13279_v54, %v12356_v35  ;;  %v12348_v35 = vld [vmem:[%s13689_s0 + $0x180] sm:$0xf]  ;;  %v13277_v54 = vld [vmem:[%s13689_s0 + $0x184] sm:$0xf0] }
 0xf4f   : > { %v7974_v61 = vsub.f32 1.0, %v7973_v43  ;;  %v8169_v7 = vadd.f32 0.4994258, %v8168_v18  ;;  %v7935_v59 = vmul.f32 %v18575_v34, %v7934_v44  ;;  %v8195_v42 = vmul.f32 %v8194_v38, %v18531_v9  ;;  %v13258_v62 = vld [vmem:[%s13689_s0 + $0xf4] sm:$0xf] }
 0xf50   : > { %v8206_v46 = vmul.f32 %v8205_v20, %v18531_v9  ;;  %8875 = vmatpush.bf16.msrb.mxu0 %v12293_v1  ;;  %v12165_v49 = vor.u32 %v13231_v21, %v12164_v31  ;;  %v8250_v0 = vmul.f32 %v8238_v6, %v18548_v55  ;;  %v7941_v41 = vand.u32 2147483647, %v18533_v47  ;;  %8889 = vmatpush.bf16.msra.mxu2 %v12357_v30  ;;  %v13242_v55 = vld [vmem:[%s13689_s0 + $0x74] sm:$0xf]  ;;  %v12214_v31 = vld [vmem:[%s13689_s0 + $0x78] sm:$0xf0] }
 0xf51   : > { %v8170_v19 = vmul.f32 %v8169_v7, %v18508_v23  ;;  %v12229_v25 = vor.u32 %v13247_v45, %v12228_v58  ;;  %v7943_v16 = vand.u32 2147483648, %v18533_v47  ;;  %v8157_v15 = vmul.f32 %v8156_v22, %v18508_v23  ;;  %v12278_v50 = vld [vmem:[%s13689_s0 + $0xf8] sm:$0xf0]  ;;  %v12156_v58 = vld [vmem:[%s13689_s0] sm:$0xf] }
 0xf52   : > { %v8207_v57 = vadd.f32 0.112945676, %v8206_v46  ;;  %8847 = vmatpush.bf16.msrb.mxu1 %v12165_v49  ;;  %v12285_v2 = vor.u32 %v13261_v3, %v12284_v63  ;;  %vm7937_vm2 = vweird.f32 %v18533_v47  ;;  %vm7938_vm8 = vweird.f32 %v18575_v34  ;;  %v13229_v45 = vld [vmem:[%s13689_s0 + $0x4] sm:$0xf0]  ;;  %v12220_v22 = vld [vmem:[%s13689_s0 + $0x80] sm:$0xf] }
 0xf53   : > { %v7975_v44 = vmul.f32 %v18590_v52, %v7974_v61  ;;  %v18622_v38 = vadd.f32 1.0, %v8170_v19  ;;  %8861 = vmatpush.bf16.msra.mxu3 %v12229_v25  ;;  %v7936_v21 = vadd.f32 %v18575_v34, %v7935_v59  ;;  %v8196_v6 = vadd.f32 0.05243302, %v8195_v42  ;;  %v13245_v20 = vld [vmem:[%s13689_s0 + $0x84] sm:$0xf0]  ;;  %vm18655_vm3 = vmor %vm7937_vm2, %vm7938_vm8 }
 0xf54   : > { %v8208_v43 = vmul.f32 %v8207_v57, %v18531_v9  ;;  %8876 = vmatpush.bf16.msrb.mxu0 %v12285_v2  ;;  %v12349_v18 = vor.u32 %v13277_v54, %v12348_v35  ;;  %v18633_v1 = vpack.c.bf16 %v8250_v0, %v18566_v26  ;;  %v18635_v63 = vadd.f32 1.1283791, %v7959_v60  ;;  %v12468_v7 = vld [vmem:[%s13689_s0 + $0x270] sm:$0xf]  ;;  %v13307_v30 = vld [vmem:[%s13689_s0 + $0x274] sm:$0xf0] }
 0xf55   : > { %v7983_v61 = vand.u32 2147483648, %v18550_v48  ;;  %13436 = vrcp.f32 %v18622_v38  ;;  %v12532_v3 = vld [vmem:[%s13689_s0 + $0x2f0] sm:$0xf]  ;;  %v13323_v59 = vld [vmem:[%s13689_s0 + $0x2f4] sm:$0xf0]  ;;  %vm18645_vm10 = vcmp.eq.f32.partialorder %v7941_v41, 8.507059e+37  ;;  %vm7977_vm11 = vweird.f32 %v18550_v48 }
 0xf56   : > { %v13240_v42 = vld [vmem:[%s13689_s0 + $0x64] sm:$0xf]  ;;  %v12206_v46 = vld [vmem:[%s13689_s0 + $0x68] sm:$0xf0]  ;;  %v7944_v26 = vor.u32 1.1754944e-38, %v7943_v16  ;;  %8890 = vmatpush.bf16.msra.mxu2 %v12349_v18  ;;  %v7976_v41 = vadd.f32 %v18590_v52, %v7975_v44  ;;  %vm7978_vm9 = vweird.f32 %v18590_v52  ;;  %v12217_v35 = vor.u32 %v13242_v55, %v12214_v31 }
 0xf57   : > { %v8158_v60 = vadd.f32 0.18741608, %v8157_v15  ;;  %v13256_v0 = vld [vmem:[%s13689_s0 + $0xe4] sm:$0xf]  ;;  %v8209_v25 = vadd.f32 0.4994258, %v8208_v43  ;;  %8877 = vmatmul.bf16.vlgmr.msrb.gmra.mxu0 %v18594_v32  ;;  %v7940_v47 = vsel %vm18655_vm3, %v18575_v34, %v7936_v21  ;;  %v8197_v57 = vmul.f32 %v8196_v6, %v18531_v9  ;;  %vm18679_vm0 = vmor %vm7977_vm11, %vm7978_vm9 }
 0xf58   : > { %v12270_v54 = vld [vmem:[%s13689_s0 + $0xe8] sm:$0xf0]  ;;  %v12460_v16 = vld [vmem:[%s13689_s0 + $0x260] sm:$0xf]  ;;  %v7981_v15 = vand.u32 2147483647, %v18550_v48  ;;  %v12281_v2 = vor.u32 %v13258_v62, %v12278_v50  ;;  %8925 = vmatpush.bf16.msra.mxu0 %v12217_v35  ;;  %v12157_v31 = vor.u32 %v13229_v45, %v12156_v58  ;;  %v12221_v28 = vor.u32 %v13245_v20, %v12220_v22 }
 0xf59   : > { %v13305_v44 = vld [vmem:[%s13689_s0 + $0x264] sm:$0xf0]  ;;  %v12524_v18 = vld [vmem:[%s13689_s0 + $0x2e0] sm:$0xf]  ;;  %v7984_v43 = vor.u32 1.1754944e-38, %v7983_v61  ;;  %v8210_v55 = vmul.f32 %v8209_v25, %v18531_v9  ;;  %8891 = vmatmul.bf16.vlgmr.msra.gmra.mxu2 %v18633_v1  ;;  %v8159_v62 = vmul.f32 %v8158_v60, %v18508_v23  ;;  %v12469_v50 = vor.u32 %v13307_v30, %v12468_v7 }
 0xf5a   : > { %8939 = vmatpush.bf16.msrb.mxu2 %v12281_v2  ;;  %v12533_v21 = vor.u32 %v13323_v59, %v12532_v3  ;;  %v12209_v6 = vor.u32 %v13240_v42, %v12206_v46  ;;  %v12198_v58 = vld [vmem:[%s13689_s0 + $0x58] sm:$0xf0]  ;;  %v13254_v45 = vld [vmem:[%s13689_s0 + $0xd4] sm:$0xf]  ;;  %v7945_v48 = vsel %vm18645_vm10, %v7944_v26, %v7940_v47  ;;  %v7980_v20 = vsel %vm18679_vm0, %v18590_v52, %v7976_v41  ;;  %v12452_v30 = vld [vmem:[%s13689_s0 + $0x250] sm:$0xf] }
 0xf5b   : > { %v18686_v22 = vpop.eup %13436  ;;  %v18693_v61 = vadd.f32 1.0, %v8210_v55  ;;  %8848 = vmatpush.bf16.msrb.mxu1 %v12157_v31  ;;  %8862 = vmatpush.bf16.msra.mxu3 %v12221_v28  ;;  %v12273_v23 = vor.u32 %v13256_v0, %v12270_v54  ;;  %v12262_v7 = vld [vmem:[%s13689_s0 + $0xd8] sm:$0xf0]  ;;  %v12461_v59 = vor.u32 %v13305_v44, %v12460_v16  ;;  %v12525_v42 = vor.u32 %v13321_v10, %v12524_v18  ;;  %v13303_v46 = vld [vmem:[%s13689_s0 + $0x254] sm:$0xf0] }
 0xf5c   : > { %v8173_v3 = vmul.f32 %v18686_v22, %v18622_v38  ;;  %v12516_v52 = vld [vmem:[%s13689_s0 + $0x2d0] sm:$0xf]  ;;  %v13319_v49 = vld [vmem:[%s13689_s0 + $0x2d4] sm:$0xf0]  ;;  %v8198_v26 = vadd.f32 0.18741608, %v8197_v57  ;;  %8926 = vmatpush.bf16.msra.mxu0 %v12209_v6  ;;  %v12201_v28 = vor.u32 %v13238_v37, %v12198_v58  ;;  %v7946_v19 = vmul.f32 %v7945_v48, %v18604_v8 }
 0xf5d   : > { %13438 = vrcp.f32 %v18693_v61  ;;  %v13236_v60 = vld [vmem:[%s13689_s0 + $0x44] sm:$0xf]  ;;  %v12190_v0 = vld [vmem:[%s13689_s0 + $0x48] sm:$0xf0]  ;;  %vm7982_vm15 = vcmp.eq.f32.partialorder %v7981_v15, 8.507059e+37  ;;  %v12265_v10 = vor.u32 %v13254_v45, %v12262_v7  ;;  %v8183_v37 = vand.u32 2147483648, %v18622_v38 }
 0xf5e   : > { %v8174_v41 = vsub.f32 1.0, %v8173_v3  ;;  %8940 = vmatpush.bf16.msrb.mxu2 %v12273_v23  ;;  %8849 = vmatmul.bf16.vlgmr.msrb.gmra.mxu1 %v18545_v29  ;;  %v13252_v25 = vld [vmem:[%s13689_s0 + $0xc4] sm:$0xf]  ;;  %v12254_v35 = vld [vmem:[%s13689_s0 + $0xc8] sm:$0xf0]  ;;  %v7985_v54 = vsel %vm7982_vm15, %v7984_v43, %v7980_v20  ;;  %vm8178_vm1 = vweird.f32 %v18686_v22  ;;  %v12453_v15 = vor.u32 %v13303_v46, %v12452_v30 }
 0xf5f   : > { %8897 = vmatpush.bf16.msra.mxu1 %v12469_v50  ;;  %8911 = vmatpush.bf16.msrb.mxu3 %v12533_v21  ;;  %v8160_v16 = vadd.f32 1.1283791, %v8159_v62  ;;  %v8181_v47 = vand.u32 2147483647, %v18622_v38  ;;  %v12517_v57 = vor.u32 %v13319_v49, %v12516_v52  ;;  %v12444_v2 = vld [vmem:[%s13689_s0 + $0x240] sm:$0xf]  ;;  %v7961_v18 = vmul.f32 %v18635_v63, %v18405_v56 }
 0xf60   : > { %8863 = vmatmul.bf16.vlgmr.msra.gmra.mxu3 %v18557_v14  ;;  %v8175_v8 = vmul.f32 %v18686_v22, %v8174_v41  ;;  %v13301_v44 = vld [vmem:[%s13689_s0 + $0x244] sm:$0xf0]  ;;  %v8199_v43 = vmul.f32 %v8198_v26, %v18531_v9  ;;  %8927 = vmatpush.bf16.msra.mxu0 %v12201_v28  ;;  %v12193_v55 = vor.u32 %v13236_v60, %v12190_v0  ;;  %v12508_v31 = vld [vmem:[%s13689_s0 + $0x2c0] sm:$0xf]  ;;  %v13234_v62 = vld [vmem:[%s13689_s0 + $0x34] sm:$0xf]  ;;  %vm8177_vm2 = vweird.f32 %v18622_v38 }
 0xf61   : > { %v13317_v34 = vld [vmem:[%s13689_s0 + $0x2c4] sm:$0xf0]  ;;  %v12146_v50 = vclamps-f32 %v7946_v19, 1.0  ;;  %v12257_v6 = vor.u32 %v13252_v25, %v12254_v35  ;;  %v12182_v58 = vld [vmem:[%s13689_s0 + $0x38] sm:$0xf0]  ;;  %v18728_v9 = vmul.f32 %v7985_v54, %v7961_v18  ;;  %vm8179_vm8 = vmor %vm8177_vm2, %vm8178_vm1  ;;  %v8184_v63 = vor.u32 1.1754944e-38, %v8183_v37 }
 0xf62   : > { %v8176_v21 = vadd.f32 %v18686_v22, %v8175_v8  ;;  %8941 = vmatpush.bf16.msrb.mxu2 %v12265_v10  ;;  %v13250_v45 = vld [vmem:[%s13689_s0 + $0xb4] sm:$0xf]  ;;  %v18733_v48 = vmul.f32 0.5, %v18488_v11  ;;  %v12445_v20 = vor.u32 %v13301_v44, %v12444_v2  ;;  %v12246_v38 = vld [vmem:[%s13689_s0 + $0xb8] sm:$0xf0]  ;;  %vm8182_vm10 = vcmp.eq.f32.partialorder %v8181_v47, 8.507059e+37 }
 0xf63   : > { %8898 = vmatpush.bf16.msra.mxu1 %v12461_v59  ;;  %8912 = vmatpush.bf16.msrb.mxu3 %v12525_v42  ;;  %v18726_v56 = vpop.eup %13438  ;;  %v12436_v23 = vld [vmem:[%s13689_s0 + $0x230] sm:$0xf]  ;;  %v12509_v3 = vor.u32 %v13317_v34, %v12508_v31  ;;  %v13299_v59 = vld [vmem:[%s13689_s0 + $0x234] sm:$0xf0]  ;;  %v8200_v46 = vadd.f32 1.1283791, %v8199_v43  ;;  %v12185_v52 = vor.u32 %v13234_v62, %v12182_v58  ;;  %v12249_v0 = vor.u32 %v13250_v45, %v12246_v38 }
 0xf64   : > { %v8180_v7 = vsel %vm8179_vm8, %v18686_v22, %v8176_v21  ;;  %v8213_v30 = vmul.f32 %v18726_v56, %v18693_v61  ;;  %v12500_v42 = vld [vmem:[%s13689_s0 + $0x2b0] sm:$0xf]  ;;  %8928 = vmatpush.bf16.msra.mxu0 %v12193_v55  ;;  %v13315_v49 = vld [vmem:[%s13689_s0 + $0x2b4] sm:$0xf0]  ;;  %v13232_v26 = vld [vmem:[%s13689_s0 + $0x24] sm:$0xf]  ;;  %v8161_v22 = vmul.f32 %v8160_v16, %v18495_v4  ;;  %v12437_v54 = vor.u32 %v13299_v59, %v12436_v23 }
 0xf65   : > { %v8185_v11 = vsel %vm8182_vm10, %v8184_v63, %v8180_v7  ;;  %v18744_v28 = vadd.f32 1.0, %v12146_v50  ;;  %v12174_v19 = vld [vmem:[%s13689_s0 + $0x28] sm:$0xf0]  ;;  %v13248_v41 = vld [vmem:[%s13689_s0 + $0xa4] sm:$0xf]  ;;  %v12147_v10 = vclamps-f32 %v18728_v9, 1.0  ;;  %vm8218_vm11 = vweird.f32 %v18726_v56 }
 0xf66   : > { %v8214_v60 = vsub.f32 1.0, %v8213_v30  ;;  %8942 = vmatpush.bf16.msrb.mxu2 %v12257_v6  ;;  %v8221_v25 = vand.u32 2147483647, %v18693_v61  ;;  %v8223_v35 = vand.u32 2147483648, %v18693_v61  ;;  %v12238_v47 = vld [vmem:[%s13689_s0 + $0xa8] sm:$0xf0]  ;;  %v8186_v37 = vmul.f32 %v8185_v11, %v8161_v22 }
 0xf67   : > { %8899 = vmatpush.bf16.msra.mxu1 %v12453_v15  ;;  %8913 = vmatpush.bf16.msrb.mxu3 %v12517_v57  ;;  %v12501_v16 = vor.u32 %v13315_v49, %v12500_v42  ;;  %v12428_v8 = vld [vmem:[%s13689_s0 + $0x220] sm:$0xf]  ;;  %v13297_v15 = vld [vmem:[%s13689_s0 + $0x224] sm:$0xf0]  ;;  %v12177_v57 = vor.u32 %v13232_v26, %v12174_v19  ;;  %v13230_v18 = vld [vmem:[%s13689_s0 + $0x14] sm:$0xf]  ;;  %vm8217_vm3 = vweird.f32 %v18693_v61  ;;  %v12241_v55 = vor.u32 %v13248_v41, %v12238_v47 }
 0xf68   : > { %v8215_v4 = vmul.f32 %v18726_v56, %v8214_v60  ;;  %8929 = vmatpush.bf16.msra.mxu0 %v12185_v52  ;;  %v12492_v2 = vld [vmem:[%s13689_s0 + $0x2a0] sm:$0xf]  ;;  %v13313_v44 = vld [vmem:[%s13689_s0 + $0x2a4] sm:$0xf0]  ;;  %v12166_v31 = vld [vmem:[%s13689_s0 + $0x18] sm:$0xf0]  ;;  %v8201_v50 = vmul.f32 %v8200_v46, %v18504_v12  ;;  %v12429_v63 = vor.u32 %v13297_v15, %v12428_v8 }
 0xf69   : > { %v13246_v34 = vld [vmem:[%s13689_s0 + $0x94] sm:$0xf]  ;;  %v12230_v62 = vld [vmem:[%s13689_s0 + $0x98] sm:$0xf0]  ;;  %vm8219_vm9 = vmor %vm8217_vm3, %vm8218_vm11  ;;  %vm8222_vm0 = vcmp.eq.f32.partialorder %v8221_v25, 8.507059e+37  ;;  %v8224_v21 = vor.u32 1.1754944e-38, %v8223_v35  ;;  %v12493_v12 = vor.u32 %v13313_v44, %v12492_v2  ;;  %v12169_v7 = vor.u32 %v13230_v18, %v12166_v31 }
 0xf6a   : > { %v8216_v43 = vadd.f32 %v18726_v56, %v8215_v4  ;;  %8943 = vmatpush.bf16.msrb.mxu2 %v12249_v0  ;;  %v12420_v6 = vld [vmem:[%s13689_s0 + $0x210] sm:$0xf]  ;;  %v13295_v58 = vld [vmem:[%s13689_s0 + $0x214] sm:$0xf0]  ;;  %v12152_v61 = vclamps-f32 %v8186_v37, 1.0  ;;  %v12233_v42 = vor.u32 %v13246_v34, %v12230_v62  ;;  %v7729_v18 = vmul.f32 0.5, %v18364_v36 }
 0xf6b   : > { %8900 = vmatpush.bf16.msra.mxu1 %v12445_v20  ;;  %8914 = vmatpush.bf16.msrb.mxu3 %v12509_v3  ;;  %v12484_v20 = vld [vmem:[%s13689_s0 + $0x290] sm:$0xf]  ;;  %v13311_v38 = vld [vmem:[%s13689_s0 + $0x294] sm:$0xf0]  ;;  %v13228_v30 = vld [vmem:[%s13689_s0 + $0x4] sm:$0xf]  ;;  %v12421_v19 = vor.u32 %v13295_v58, %v12420_v6 }
 0xf6c   : > { %v8220_v45 = vsel %vm8219_vm9, %v18726_v56, %v8216_v43  ;;  %8930 = vmatpush.bf16.msra.mxu0 %v12177_v57  ;;  %v12158_v3 = vld [vmem:[%s13689_s0 + $0x8] sm:$0xf0]  ;;  %v13244_v59 = vld [vmem:[%s13689_s0 + $0x84] sm:$0xf]  ;;  %v13306_v46 = vld [vmem:[%s13689_s0 + $0x274] sm:$0xf]  ;;  %v12485_v41 = vor.u32 %v13311_v38, %v12484_v20 }
 0xf6d   : > { %v8225_v23 = vsel %vm8222_vm0, %v8224_v21, %v8220_v45  ;;  %v12222_v11 = vld [vmem:[%s13689_s0 + $0x88] sm:$0xf0]  ;;  %v12470_v52 = vld [vmem:[%s13689_s0 + $0x278] sm:$0xf0]  ;;  %v13322_v49 = vld [vmem:[%s13689_s0 + $0x2f4] sm:$0xf] }
 0xf6e   : > { %v8226_v56 = vmul.f32 %v8225_v23, %v8201_v50  ;;  %8944 = vmatpush.bf16.msrb.mxu2 %v12241_v55  ;;  %v12534_v26 = vld [vmem:[%s13689_s0 + $0x2f8] sm:$0xf0]  ;;  %v12412_v22 = vld [vmem:[%s13689_s0 + $0x200] sm:$0xf]  ;;  %v8239_v60 = vadd.f32 1.0, %v12152_v61  ;;  %v12225_v15 = vor.u32 %v13244_v59, %v12222_v11  ;;  %v12473_v57 = vor.u32 %v13306_v46, %v12470_v52 }
 0xf6f   : > { %8901 = vmatpush.bf16.msra.mxu1 %v12437_v54  ;;  %8915 = vmatpush.bf16.msrb.mxu3 %v12501_v16  ;;  %v13293_v25 = vld [vmem:[%s13689_s0 + $0x204] sm:$0xf0]  ;;  %v12476_v35 = vld [vmem:[%s13689_s0 + $0x280] sm:$0xf]  ;;  %v12161_v54 = vor.u32 %v13228_v30, %v12158_v3  ;;  %v13274_v37 = vld [vmem:[%s13689_s0 + $0x174] sm:$0xf]  ;;  %v12537_v43 = vor.u32 %v13322_v49, %v12534_v26 }
 0xf70   : > { %v12153_v0 = vclamps-f32 %v8226_v56, 1.0  ;;  %8931 = vmatpush.bf16.msra.mxu0 %v12169_v7  ;;  %v13309_v47 = vld [vmem:[%s13689_s0 + $0x284] sm:$0xf0]  ;;  %v12342_v4 = vld [vmem:[%s13689_s0 + $0x178] sm:$0xf0]  ;;  %v8234_v16 = vadd.f32 1.0, %v12147_v10  ;;  %v12413_v55 = vor.u32 %v13293_v25, %v12412_v22  ;;  %v8251_v9 = vmul.f32 %v8239_v60, %v18579_v33 }
 0xf71   : > { %v13290_v2 = vld [vmem:[%s13689_s0 + $0x1f4] sm:$0xf]  ;;  %v12406_v44 = vld [vmem:[%s13689_s0 + $0x1f8] sm:$0xf0]  ;;  %v13304_v31 = vld [vmem:[%s13689_s0 + $0x264] sm:$0xf]  ;;  %v12477_v50 = vor.u32 %v13309_v47, %v12476_v35  ;;  %v12345_v6 = vor.u32 %v13274_v37, %v12342_v4 }
 0xf72   : > { %v8240_v8 = vadd.f32 1.0, %v12153_v0  ;;  %8945 = vmatpush.bf16.msrb.mxu2 %v12233_v42  ;;  %v12462_v34 = vld [vmem:[%s13689_s0 + $0x268] sm:$0xf0]  ;;  %v7730_v62 = vmul.f32 0.5, %v18372_v53  ;;  %v13320_v21 = vld [vmem:[%s13689_s0 + $0x2e4] sm:$0xf]  ;;  %v12409_v58 = vor.u32 %v13290_v2, %v12406_v44  ;;  %v8245_v53 = vmul.f32 %v18744_v28, %v7729_v18 }
 0xf73   : > { %8902 = vmatpush.bf16.msra.mxu1 %v12429_v63  ;;  %8916 = vmatpush.bf16.msrb.mxu3 %v12493_v12  ;;  %v12526_v36 = vld [vmem:[%s13689_s0 + $0x2e8] sm:$0xf0]  ;;  %v13272_v61 = vld [vmem:[%s13689_s0 + $0x164] sm:$0xf]  ;;  %v13302_v38 = vld [vmem:[%s13689_s0 + $0x254] sm:$0xf] }
 0xf74   : > { %v8252_v10 = vmul.f32 %v8240_v8, %v18733_v48  ;;  %8932 = vmatpush.bf16.msra.mxu0 %v12161_v54  ;;  %v8246_v33 = vmul.f32 %v8234_v16, %v7730_v62  ;;  %v12465_v48 = vor.u32 %v13304_v31, %v12462_v34  ;;  %v12334_v45 = vld [vmem:[%s13689_s0 + $0x168] sm:$0xf0]  ;;  %v13288_v63 = vld [vmem:[%s13689_s0 + $0x1e4] sm:$0xf]  ;;  %v12529_v20 = vor.u32 %v13320_v21, %v12526_v36  ;;  %v12454_v23 = vld [vmem:[%s13689_s0 + $0x258] sm:$0xf0] }
 0xf75   : > { %v12398_v12 = vld [vmem:[%s13689_s0 + $0x1e8] sm:$0xf0]  ;;  %v13318_v7 = vld [vmem:[%s13689_s0 + $0x2d4] sm:$0xf]  ;;  %v12518_v30 = vld [vmem:[%s13689_s0 + $0x2d8] sm:$0xf0]  ;;  %v18808_v28 = vpack.c.bf16 %v8251_v9, %v8245_v53  ;;  %v12337_v59 = vor.u32 %v13272_v61, %v12334_v45  ;;  %v12457_v11 = vor.u32 %v13302_v38, %v12454_v23 }
 0xf76   : > { %8946 = vmatpush.bf16.msrb.mxu2 %v12225_v15  ;;  %v18810_v3 = vpack.c.bf16 %v8252_v10, %v8246_v33  ;;  %v12401_v56 = vor.u32 %v13288_v63, %v12398_v12  ;;  %v13270_v42 = vld [vmem:[%s13689_s0 + $0x154] sm:$0xf]  ;;  %v12326_v46 = vld [vmem:[%s13689_s0 + $0x158] sm:$0xf0]  ;;  %v12521_v26 = vor.u32 %v13318_v7, %v12518_v30  ;;  %v13300_v22 = vld [vmem:[%s13689_s0 + $0x244] sm:$0xf] }
 0xf77   : > { %8903 = vmatpush.bf16.msra.mxu1 %v12421_v19  ;;  %8917 = vmatpush.bf16.msrb.mxu3 %v12485_v41  ;;  %v13286_v52 = vld [vmem:[%s13689_s0 + $0x1d4] sm:$0xf]  ;;  %v12390_v49 = vld [vmem:[%s13689_s0 + $0x1d8] sm:$0xf0]  ;;  %v12446_v60 = vld [vmem:[%s13689_s0 + $0x248] sm:$0xf0] }
 0xf78   : > { %8981 = vmatpush.bf16.msrb.mxu0 %v12473_v57  ;;  %v13316_v0 = vld [vmem:[%s13689_s0 + $0x2c4] sm:$0xf]  ;;  %v12510_v19 = vld [vmem:[%s13689_s0 + $0x2c8] sm:$0xf0]  ;;  %v12393_v41 = vor.u32 %v13286_v52, %v12390_v49  ;;  %v12449_v35 = vor.u32 %v13300_v22, %v12446_v60  ;;  %v13298_v4 = vld [vmem:[%s13689_s0 + $0x234] sm:$0xf] }
 0xf79   : > { %8947 = vmatmul.bf16.vlgmr.msrb.gmra.mxu2 %v18557_v14  ;;  %8933 = vmatmul.bf16.vlgmr.msra.gmra.mxu0 %v18545_v29  ;;  %v12329_v14 = vor.u32 %v13270_v42, %v12326_v46  ;;  %v13268_v25 = vld [vmem:[%s13689_s0 + $0x144] sm:$0xf]  ;;  %v12318_v54 = vld [vmem:[%s13689_s0 + $0x148] sm:$0xf0]  ;;  %v12513_v37 = vor.u32 %v13316_v0, %v12510_v19  ;;  %v12438_v16 = vld [vmem:[%s13689_s0 + $0x238] sm:$0xf0] }
 0xf7a   : > { %8995 = vmatpush.bf16.msra.mxu2 %v12537_v43  ;;  %v13284_v29 = vld [vmem:[%s13689_s0 + $0x1c4] sm:$0xf]  ;;  %v12382_v47 = vld [vmem:[%s13689_s0 + $0x1c8] sm:$0xf0]  ;;  %v13314_v8 = vld [vmem:[%s13689_s0 + $0x2b4] sm:$0xf]  ;;  %v12321_v57 = vor.u32 %v13268_v25, %v12318_v54  ;;  %v12441_v18 = vor.u32 %v13298_v4, %v12438_v16 }
 0xf7b   : > { %8904 = vmatpush.bf16.msra.mxu1 %v12413_v55  ;;  %8918 = vmatpush.bf16.msrb.mxu3 %v12477_v50  ;;  %v12502_v15 = vld [vmem:[%s13689_s0 + $0x2b8] sm:$0xf0]  ;;  %v12385_v2 = vor.u32 %v13284_v29, %v12382_v47  ;;  %v13266_v44 = vld [vmem:[%s13689_s0 + $0x134] sm:$0xf]  ;;  %v13296_v62 = vld [vmem:[%s13689_s0 + $0x224] sm:$0xf] }
 0xf7c   : > { %8982 = vmatpush.bf16.msrb.mxu0 %v12465_v48  ;;  %v12310_v43 = vld [vmem:[%s13689_s0 + $0x138] sm:$0xf0]  ;;  %v13282_v55 = vld [vmem:[%s13689_s0 + $0x1b4] sm:$0xf]  ;;  %v12505_v34 = vor.u32 %v13314_v8, %v12502_v15  ;;  %v12430_v9 = vld [vmem:[%s13689_s0 + $0x228] sm:$0xf0] }
 0xf7d   : > { %v12374_v31 = vld [vmem:[%s13689_s0 + $0x1b8] sm:$0xf0]  ;;  %v13312_v10 = vld [vmem:[%s13689_s0 + $0x2a4] sm:$0xf]  ;;  %v12494_v50 = vld [vmem:[%s13689_s0 + $0x2a8] sm:$0xf0]  ;;  %v12313_v21 = vor.u32 %v13266_v44, %v12310_v43 }
 0xf7e   : > { %8996 = vmatpush.bf16.msra.mxu2 %v12529_v20  ;;  %8905 = vmatmul.bf16.vlgmr.msra.gmra.mxu1 %v18808_v28  ;;  %v12377_v36 = vor.u32 %v13282_v55, %v12374_v31  ;;  %v12302_v61 = vld [vmem:[%s13689_s0 + $0x128] sm:$0xf0]  ;;  %v13280_v53 = vld [vmem:[%s13689_s0 + $0x1a4] sm:$0xf]  ;;  %v12497_v48 = vor.u32 %v13312_v10, %v12494_v50  ;;  %v13294_v45 = vld [vmem:[%s13689_s0 + $0x214] sm:$0xf] }
 0xf7f   : > { %8953 = vmatpush.bf16.msrb.mxu1 %v12345_v6  ;;  %8967 = vmatpush.bf16.msra.mxu3 %v12409_v58  ;;  %v13264_v6 = vld [vmem:[%s13689_s0 + $0x124] sm:$0xf]  ;;  %v12433_v58 = vor.u32 %v13296_v62, %v12430_v9  ;;  %v12366_v33 = vld [vmem:[%s13689_s0 + $0x1a8] sm:$0xf0]  ;;  %v12422_v63 = vld [vmem:[%s13689_s0 + $0x218] sm:$0xf0] }
 0xf80   : > { %8919 = vmatmul.bf16.vlgmr.msrb.gmra.mxu3 %v18810_v3  ;;  %8983 = vmatpush.bf16.msrb.mxu0 %v12457_v11  ;;  %v13310_v12 = vld [vmem:[%s13689_s0 + $0x294] sm:$0xf]  ;;  %v12486_v20 = vld [vmem:[%s13689_s0 + $0x298] sm:$0xf0]  ;;  %v12305_v38 = vor.u32 %v13264_v6, %v12302_v61  ;;  %v12369_v23 = vor.u32 %v13280_v53, %v12366_v33  ;;  %v12425_v30 = vor.u32 %v13294_v45, %v12422_v63  ;;  %v13292_v46 = vld [vmem:[%s13689_s0 + $0x204] sm:$0xf] }
 0xf81   : > { %v13262_v7 = vld [vmem:[%s13689_s0 + $0x114] sm:$0xf]  ;;  %v12358_v42 = vld [vmem:[%s13689_s0 + $0x198] sm:$0xf0]  ;;  %v12489_v11 = vor.u32 %v13310_v12, %v12486_v20  ;;  %v12414_v52 = vld [vmem:[%s13689_s0 + $0x208] sm:$0xf0] }
 0xf82   : > { %8997 = vmatpush.bf16.msra.mxu2 %v12521_v26  ;;  %v13308_v49 = vld [vmem:[%s13689_s0 + $0x284] sm:$0xf]  ;;  %v12478_v26 = vld [vmem:[%s13689_s0 + $0x288] sm:$0xf0]  ;;  %v12417_v19 = vor.u32 %v13292_v46, %v12414_v52  ;;  %vm19132_vm15 = vcmask 1040384  }
 0xf83   : > { %8954 = vmatpush.bf16.msrb.mxu1 %v12337_v59  ;;  %8968 = vmatpush.bf16.msra.mxu3 %v12401_v56  ;;  %v12294_v59 = vld [vmem:[%s13689_s0 + $0x118] sm:$0xf0]  ;;  %v13278_v56 = vld [vmem:[%s13689_s0 + $0x194] sm:$0xf]  ;;  %v13260_v0 = vld [vmem:[%s13689_s0 + $0x104] sm:$0xf] }
 0xf84   : > { %8984 = vmatpush.bf16.msrb.mxu0 %v12449_v35  ;;  %v12297_v22 = vor.u32 %v13262_v7, %v12294_v59  ;;  %v12361_v60 = vor.u32 %v13278_v56, %v12358_v42  ;;  %v12350_v25 = vld [vmem:[%s13689_s0 + $0x188] sm:$0xf0]  ;;  %v12481_v35 = vor.u32 %v13308_v49, %v12478_v26 }
 0xf86   : > { %8998 = vmatpush.bf16.msra.mxu2 %v12513_v37 }
 0xf87   : > { %8955 = vmatpush.bf16.msrb.mxu1 %v12329_v14  ;;  %8969 = vmatpush.bf16.msra.mxu3 %v12393_v41  ;;  %v12286_v14 = vld [vmem:[%s13689_s0 + $0x108] sm:$0xf0]  ;;  %v13276_v41 = vld [vmem:[%s13689_s0 + $0x184] sm:$0xf]  ;;  %s19131_s0 = scalar_lea.vmem %s18993_s16, %s13635_s29  ;;  %s19136_s29 = sld [smem:[#allocation6_spill]] }
 0xf88   : > { %8985 = vmatpush.bf16.msrb.mxu0 %v12441_v18  ;;  %v12289_v54 = vor.u32 %v13260_v0, %v12286_v14  ;;  %v12353_v29 = vor.u32 %v13276_v41, %v12350_v25 }
 0xf8a   : > { %8999 = vmatpush.bf16.msra.mxu2 %v12505_v34 }
 0xf8b   : > { %8956 = vmatpush.bf16.msrb.mxu1 %v12321_v57  ;;  %8970 = vmatpush.bf16.msra.mxu3 %v12385_v2 }
 0xf8c   : > { %8986 = vmatpush.bf16.msrb.mxu0 %v12433_v58 }
 0xf8d   : > { %p12538_p6 = scmp.ne.s32.totalorder %s19136_s29, 11 }
 0xf8e   : > { %9000 = vmatpush.bf16.msra.mxu2 %v12497_v48  ;;  %s19142_s7 = sld [smem:[#allocation23_spill]] (!%p12538_p6) }
 0xf8f   : > { %8957 = vmatpush.bf16.msrb.mxu1 %v12313_v21  ;;  %8971 = vmatpush.bf16.msra.mxu3 %v12377_v36  ;;  %s19143_s2 = sld [smem:[#allocation21_spill]] (!%p12538_p6) }
 0xf90   : > { %8987 = vmatpush.bf16.msrb.mxu0 %v12425_v30  ;;  %s19144_s24 = sld [smem:[#allocation22_spill]] (!%p12538_p6) }
 0xf92   : > { %9001 = vmatpush.bf16.msra.mxu2 %v12489_v11 }
 0xf93   : > { %8958 = vmatpush.bf16.msrb.mxu1 %v12305_v38  ;;  %8972 = vmatpush.bf16.msra.mxu3 %v12369_v23 }
 0xf94   : > { %8988 = vmatpush.bf16.msrb.mxu0 %v12417_v19 }
 0xf96   : > { %9002 = vmatpush.bf16.msra.mxu2 %v12481_v35 }
 0xf97   : > { %8959 = vmatpush.bf16.msrb.mxu1 %v12297_v22  ;;  %8973 = vmatpush.bf16.msra.mxu3 %v12361_v60 }
 0xf98   : > { %8989 = vmatmul.bf16.vlgmr.msrb.gmra.mxu0 %v18808_v28 }
 0xf99   : > { %9003 = vmatmul.bf16.vlgmr.msra.gmra.mxu2 %v18810_v3 }
 0xf9b   : > { %8960 = vmatpush.bf16.msrb.mxu1 %v12289_v54  ;;  %8974 = vmatpush.bf16.msra.mxu3 %v12353_v29 }
 0xf9e   : > { %8961 = vmatmul.bf16.vlgmr.msrb.gmra.mxu1 %v18594_v32  ;;  %8975 = vmatmul.bf16.vlgmr.msra.gmra.mxu3 %v18633_v1  ;;  %v8355_v32 = vld [vmem:[%s19131_s0] sm:$0x3]  ;;  %s19148_s0 = sld [smem:[#allocation24_spill]] (!%p12538_p6) }
 0xf9f   : > { %v8358_v1 = vperm.slane %v8355_v32, 1  ;;  %v8357_v34 = vperm.slane %v8355_v32, 0 }
 0xfd4   : > { %v8878_v4 = vpop.f32.mrf.mxu0 }
 0xfdb   : > { %v8850_v47 = vpop.f32.mrf.mxu1 }
 0xfdc   : > { %v8892_v16 = vpop.f32.mrf.mxu2  ;;  %v8880_v57 = vpop.f32.mrf.mxu0  ;;  %v8851_v50 = vadd.f32 %v8850_v47, %v8357_v34 }
 0xfe3   : > { %v8864_v37 = vpop.f32.mrf.mxu3  ;;  %v8852_v8 = vpop.f32.mrf.mxu1 }
 0xfe4   : > { %v8894_v2 = vpop.f32.mrf.mxu2  ;;  %v8865_v36 = vadd.f32 %v8864_v37, %v8851_v50  ;;  %v8853_v30 = vadd.f32 %v8852_v8, %v8357_v34 }
 0xfe6   : > { %v8879_v61 = vadd.f32 %v8878_v4, %v8865_v36 }
 0xfe8   : > { %v8893_v48 = vadd.f32 %v8892_v16, %v8879_v61 }
 0xfeb   : > { %v8866_v15 = vpop.f32.mrf.mxu3 }
 0xfec   : > { %v8867_v14 = vadd.f32 %v8866_v15, %v8853_v30 }
 0xfee   : > { %v8881_v47 = vadd.f32 %v8880_v57, %v8867_v14 }
 0xff0   : > { %v8895_v8 = vadd.f32 %v8894_v2, %v8881_v47 }
 0xff6   : > { %v8934_v43 = vpop.f32.mrf.mxu0 }
 0xff7   : > { %v8935_v9 = vadd.f32 %v8934_v43, %v8358_v1 }
 0xffb   : > { %v8906_v44 = vpop.f32.mrf.mxu1 }
 0xffc   : > { %v8948_v55 = vpop.f32.mrf.mxu2  ;;  %v8907_v12 = vadd.f32 %v8906_v44, %v8893_v48 }
 0xffd   : > { %v8949_v21 = vadd.f32 %v8948_v55, %v8935_v9 }
 0xffe   : > { %v8936_v31 = vpop.f32.mrf.mxu0 }
 0xfff   : > { %v8937_v38 = vadd.f32 %v8936_v31, %v8358_v1 }
0x1003   : > { %v8920_v18 = vpop.f32.mrf.mxu3  ;;  %v8908_v28 = vpop.f32.mrf.mxu1 }
0x1004   : > { %v8950_v62 = vpop.f32.mrf.mxu2  ;;  %v8921_v23 = vadd.f32 %v8920_v18, %v8907_v12 }
0x1005   : > { %v8951_v59 = vadd.f32 %v8950_v62, %v8937_v38 }
0x100b   : > { %v8922_v3 = vpop.f32.mrf.mxu3 }
0x1015   : > { %v8990_v33 = vpop.f32.mrf.mxu0 }
0x101b   : > { %v8962_v10 = vpop.f32.mrf.mxu1 }
0x101c   : > { %v8963_v6 = vadd.f32 %v8962_v10, %v8949_v21  ;;  %v9004_v63 = vpop.f32.mrf.mxu2  ;;  %v19135_v21 = vld [vmem:[#allocation12_spill] sm:$0xff] }
0x101d   : > { %v8992_v16 = vpop.f32.mrf.mxu0 }
0x1021   : > { %v8976_v58 = vpop.f32.mrf.mxu3 }
0x1022   : > { %v8977_v53 = vadd.f32 %v8976_v58, %v8963_v6 }
0x1023   : > { %v8964_v52 = vpop.f32.mrf.mxu1 }
0x1024   : > { %v8991_v45 = vadd.f32 %v8990_v33, %v8977_v53  ;;  %v8965_v25 = vadd.f32 %v8964_v52, %v8951_v59  ;;  %v9006_v44 = vpop.f32.mrf.mxu2 }
0x1026   : > { %v9005_v20 = vadd.f32 %v9004_v63, %v8991_v45 }
0x1028   : > { %v9013_v7 = vrot.slane %v9005_v20, 7 }
0x1029   : > { %v8978_v19 = vpop.f32.mrf.mxu3 }
0x102a   : > { %v9015_v56 = vsel %vm19132_vm15, %v8921_v23, %v9013_v7  ;;  %v9016_v42 = vsel %vm4719_vm4, %v8921_v23, %v9013_v7  ;;  %v9018_v11 = vsel %vm4722_vm5, %v8921_v23, %v9013_v7  ;;  %v9020_v46 = vsel %vm4725_vm6, %v8921_v23, %v9013_v7  ;;  %vm19133_vm5 = vmmov %vm19132_vm15 }
0x102b   : > { %v9017_v49 = vrot.slane %v9016_v42, 1  ;;  %v9019_v26 = vrot.slane %v9018_v11, 2  ;;  %v9021_v22 = vrot.slane %v9020_v46, 3  ;;  %v9022_v60 = vsel %vm4728_vm7, %v8921_v23, %v9013_v7 }
0x102c   : > { %v9023_v0 = vrot.slane %v9022_v60, 4  ;;  %v18875_v41 = vadd.f32 %v9015_v56, %v17576_v40  ;;  %v8979_v4 = vadd.f32 %v8978_v19, %v8965_v25  ;;  %v9024_v40 = vsel %vm4953_vm12, %v8921_v23, %v9013_v7 }
0x102d   : > { %v9044_v35 = vadd.f32 %v9017_v49, %v17579_v51  ;;  %v9045_v54 = vadd.f32 %v9019_v26, %v17558_v5  ;;  %v9046_v29 = vadd.f32 %v9021_v22, %v17560_v13  ;;  %v8909_v51 = vadd.f32 %v8908_v28, %v8895_v8 }
0x102e   : > { %v9047_v37 = vadd.f32 %v9023_v0, %v17562_v27  ;;  %9063 = vst [vmem:[#allocation1] ss:$9 sm:$0xff] %v18875_v41  ;;  %v8993_v15 = vadd.f32 %v8992_v16, %v8979_v4  ;;  %v9026_v5 = vsel %vm4956_vm13, %v8921_v23, %v9013_v7  ;;  %v9028_v57 = vsel %vm4959_vm14, %v9013_v7, %v8921_v23 }
0x102f   : > { %9065 = vst [vmem:[#allocation1 + $0x1] ss:$9 sm:$0xff] %v9044_v35  ;;  %v8923_v27 = vadd.f32 %v8922_v3, %v8909_v51  ;;  %v9025_v18 = vrot.slane %v9024_v40, 5  ;;  %v9027_v55 = vrot.slane %v9026_v5, 6  ;;  %v9029_v32 = vrot.slane %v9028_v57, 7  ;;  %v19134_v3 = vld [vmem:[#allocation11_spill] sm:$0xff] }
0x1030   : > { %9067 = vst [vmem:[#allocation1 + $0x2] ss:$9 sm:$0xff] %v9045_v54  ;;  %v9007_v13 = vadd.f32 %v9006_v44, %v8993_v15  ;;  %vm9086_vm6 = vcmask 520192  }
0x1031   : > { %9069 = vst [vmem:[#allocation1 + $0x3] ss:$9 sm:$0xff] %v9046_v29  ;;  %v9048_v1 = vadd.f32 %v9025_v18, %v17564_v39  ;;  %v9049_v34 = vadd.f32 %v9027_v55, %v17566_v24  ;;  %v9050_v9 = vadd.f32 %v9029_v32, %v17570_v17 }
0x1032   : > { %9071 = vst [vmem:[#allocation1 + $0x4] ss:$9 sm:$0xff] %v9047_v37  ;;  %v9014_v43 = vrot.slane %v9007_v13, 7 }
0x1034   : > { %v9031_v2 = vsel %vm4719_vm4, %v8923_v27, %v9014_v43  ;;  %v9030_v10 = vsel %vm19133_vm5, %v8923_v27, %v9014_v43 }
0x1035   : > { %v9032_v31 = vrot.slane %v9031_v2, 1  ;;  %v9051_v36 = vadd.f32 %v9030_v10, %v19135_v21 }
0x1037   : > { %v9052_v50 = vadd.f32 %v9032_v31, %v19134_v3 }
0x1039   : > { %v9072_v62 = vld [vmem:[#allocation1] sm:$0xff]  ;;  %v9073_v28 = vld [vmem:[#allocation1 + $0x9] sm:$0xff] }
0x103a   : > { %9074 = vst [vmem:[#allocation1] ss:$9 sm:$0xff] %v9048_v1 }
0x103b   : > { %9075 = vst [vmem:[#allocation1 + $0x1] ss:$9 sm:$0xff] %v9049_v34 }
0x103c   : > { %9076 = vst [vmem:[#allocation1 + $0x2] ss:$9 sm:$0xff] %v9050_v9 }
0x103d   : > { %9085 = vst [vmem:[#allocation2] sm:$0x1f] %v9072_v62 }
0x103e   : > { %9087 = vst.msk [vmem:[#allocation2 + $0x8] sm:$0x1f] %vm9086_vm6, %v9073_v28 }
0x103f   : > { %9077 = vst [vmem:[#allocation1 + $0x3] ss:$9 sm:$0xff] %v9051_v36 }
0x1040   : > { %9078 = vst [vmem:[#allocation1 + $0x4] ss:$9 sm:$0xff] %v9052_v50 }
0x1045   : > { %9093 = sbr.rel (%p12538_p6) target bundleno = 4609 (0x1201), region = 112 }
0x1047   : > { %v9079_v39 = vld [vmem:[#allocation1] sm:$0xff]  ;;  %v9080_v24 = vld [vmem:[#allocation1 + $0x9] sm:$0xff] }
0x1048   : > { %9088 = vst [vmem:[#allocation2 + $0x10] sm:$0x1f] %v9079_v39 }
0x1049   : > { %9089 = vst.msk [vmem:[#allocation2 + $0x18] sm:$0x1f] %vm9086_vm6, %v9080_v24 }
0x104a   : > { %9096 = vst [vmem:[#allocation1] ss:$9 sm:$0xff] %v18875_v41  ;;  %vm19137_vm7 = vcmask 1041408   ;;  %vm19138_vm12 = vcmask 517120   ;;  %v19139_v48 = vld [vmem:[#allocation10_spill] sm:$0xff]  ;;  %v13331_v46 = vld [vmem:[%s19142_s7 + $0x38] sm:$0xff] }
0x104b   : > { %9098 = vst [vmem:[#allocation1 + $0x1] ss:$9 sm:$0xff] %v9048_v1  ;;  %vm19140_vm13 = vmmov %vm19137_vm7  ;;  %9305 = vmatpush.bf16.msra.mxu0 %v13331_v46  ;;  %v13330_v52 = vld [vmem:[%s19142_s7 + $0x30] sm:$0xff]  ;;  %v13329_v49 = vld [vmem:[%s19142_s7 + $0x28] sm:$0xff]  ;;  %vm19145_vm10 = vcmask 1040384   ;;  %vm19147_vm3 = vcmask 523264  }
0x104c   : > { %vm19141_vm14 = vmmov %vm19138_vm12  ;;  %v13328_v26 = vld [vmem:[%s19142_s7 + $0x20] sm:$0xff]  ;;  %v13327_v22 = vld [vmem:[%s19142_s7 + $0x18] sm:$0xff]  ;;  %vm9331_vm9 = vcmask 705536  }
0x104d   : > { %v13335_v60 = vld [vmem:[%s19142_s7 + $0x58] sm:$0xff]  ;;  %v13326_v0 = vld [vmem:[%s19142_s7 + $0x10] sm:$0xff]  ;;  %v13325_v14 = vld [vmem:[%s19142_s7 + $0x8] sm:$0xff] }
0x104e   : > { %9322 = vmatpush.bf16.msra.mxu1 %v13335_v60  ;;  %v13334_v19 = vld [vmem:[%s19142_s7 + $0x50] sm:$0xff]  ;;  %v13324_v29 = vld [vmem:[%s19142_s7] sm:$0xff]  ;;  %vm19146_vm11 = vmmov %vm19145_vm10 }
0x104f   : > { %9306 = vmatpush.bf16.msra.mxu0 %v13330_v52  ;;  %v13332_v47 = vld [vmem:[%s19142_s7 + $0x40] sm:$0xff] }
0x1050   : > { %v9094_v37 = vld [vmem:[%s19143_s2] sm:$0x3] }
0x1051   : > { %v9095_v16 = vld [vmem:[%s19144_s24] sm:$0x3]  ;;  %v9153_v15 = vperm.slane %v9094_v37, 1  ;;  %v9152_v5 = vperm.slane %v9094_v37, 0 }
0x1052   : > { %v9099_v17 = vld [vmem:[#allocation1] sm:$0xff]  ;;  %v9100_v6 = vld [vmem:[#allocation1 + $0x9] sm:$0xff]  ;;  %9323 = vmatpush.bf16.msra.mxu1 %v13334_v19  ;;  %v9164_v44 = vperm.slane %v9095_v16, 1  ;;  %v9163_v27 = vperm.slane %v9095_v16, 0 }
0x1053   : > { %v9103_v58 = vsel %vm19137_vm7, %v9099_v17, 0.0  ;;  %v9104_v61 = vsel %vm19138_vm12, %v9100_v6, 0.0  ;;  %9307 = vmatpush.bf16.msra.mxu0 %v13329_v49  ;;  %v9154_v13 = vrot.slane %v9153_v15, 7 }
0x1054   : > { %v9105_v53 = vadd.f32 %v9104_v61, %v9103_v58  ;;  %v9165_v18 = vrot.slane %v9164_v44, 7 }
0x1055   : > { %v9156_v55 = vsel %vm4719_vm4, %v9152_v5, %v9154_v13  ;;  %v9155_v62 = vsel %vm19145_vm10, %v9152_v5, %v9154_v13 }
0x1056   : > { %9106 = vadd.xlane.f32.xlu0 %v9105_v53  ;;  %v9167_v2 = vsel %vm4719_vm4, %v9163_v27, %v9165_v18  ;;  %v9157_v34 = vrot.slane %v9156_v55, 1  ;;  %v9166_v3 = vsel %vm19146_vm11, %v9163_v27, %v9165_v18 }
0x1057   : > { %9308 = vmatpush.bf16.msra.mxu0 %v13328_v26  ;;  %v9168_v10 = vrot.slane %v9167_v2, 1 }
0x105b   : > { %9309 = vmatpush.bf16.msra.mxu0 %v13327_v22 }
0x105f   : > { %9310 = vmatpush.bf16.msra.mxu0 %v13326_v0 }
0x1063   : > { %9311 = vmatpush.bf16.msra.mxu0 %v13325_v14 }
0x1067   : > { %9312 = vmatpush.bf16.msra.mxu0 %v13324_v29 }
0x10c9   : > { %v9107_v33 = vpop.xlane.xlu0 %9106 }
0x10ca   : > { %v9108_v45 = vmul.f32 %v9107_v33, %v19139_v48 }
0x10cc   : > { %v9110_v63 = vperm.slane %v9108_v45, 0  ;;  %v9111_v12 = vperm.slane %v9108_v45, 1 }
0x10ce   : > { %v18898_v20 = vsub.f32 %v18875_v41, %v9110_v63  ;;  %v18900_v38 = vsub.f32 %v9048_v1, %v9111_v12  ;;  %v13333_v41 = vld [vmem:[%s19142_s7 + $0x48] sm:$0xff] }
0x10cf   : > { %9324 = vmatpush.bf16.msra.mxu1 %v13333_v41 }
0x10d0   : > { %v9116_v23 = vmul.f32 %v18898_v20, %v18898_v20  ;;  %v9117_v7 = vmul.f32 %v18900_v38, %v18900_v38 }
0x10d2   : > { %9120 = vst [vmem:[#allocation1] ss:$9 sm:$0xff] %v9116_v23 }
0x10d3   : > { %9122 = vst [vmem:[#allocation1 + $0x1] ss:$9 sm:$0xff] %v9117_v7  ;;  %9325 = vmatpush.bf16.msra.mxu1 %v13332_v47 }
0x10da   : > { %v9123_v30 = vld [vmem:[#allocation1] sm:$0xff]  ;;  %v9124_v59 = vld [vmem:[#allocation1 + $0x9] sm:$0xff] }
0x10db   : > { %v9127_v56 = vsel %vm19140_vm13, %v9123_v30, 0.0  ;;  %v9128_v42 = vsel %vm19141_vm14, %v9124_v59, 0.0 }
0x10dc   : > { %v9129_v11 = vadd.f32 %v9128_v42, %v9127_v56  ;;  %v13440_v42 = vld [vmem:[%s19148_s0] ss:$0 sm:$0xff] }
0x10de   : > { %9130 = vadd.xlane.f32.xlu0 %v9129_v11 }
0x1151   : > { %v9131_v25 = vpop.xlane.xlu0 %9130 }
0x1152   : > { %v9132_v35 = vmul.f32 %v9131_v25, %v19139_v48 }
0x1154   : > { %v9133_v54 = vadd.f32 1e-06, %v9132_v35 }
0x1156   : > { %13441 = vrsqrt.f32 %v9133_v54  ;;  %vm9140_vm2 = vweird.f32 %v9133_v54 }
0x115c   : > { %v13442_v4 = vpop.eup %13441 }
0x115d   : > { %v9135_v8 = vmul.f32 %v13442_v4, %v9133_v54  ;;  %vm9141_vm1 = vweird.f32 %v13442_v4 }
0x115e   : > { %vm9142_vm8 = vmor %vm9140_vm2, %vm9141_vm1 }
0x115f   : > { %v9136_v40 = vmul.f32 %v13442_v4, %v9135_v8 }
0x1161   : > { %v9137_v51 = vmul.f32 0.5, %v9136_v40 }
0x1163   : > { %v9138_v57 = vsub.f32 1.5, %v9137_v51 }
0x1165   : > { %v9139_v43 = vmul.f32 %v13442_v4, %v9138_v57 }
0x1167   : > { %v9143_v32 = vsel %vm9142_vm8, %v13442_v4, %v9139_v43 }
0x1168   : > { %v9145_v1 = vperm.slane %v9143_v32, 0  ;;  %v9146_v31 = vperm.slane %v9143_v32, 1 }
0x116a   : > { %v9150_v28 = vmul.f32 %v9146_v31, %v18900_v38  ;;  %v9149_v9 = vmul.f32 %v9145_v1, %v18898_v20 }
0x116c   : > { %v9160_v50 = vmul.f32 %v9155_v62, %v9149_v9  ;;  %v9161_v21 = vmul.f32 %v9157_v34, %v9150_v28 }
0x116e   : > { %v9171_v36 = vadd.f32 %v9166_v3, %v9160_v50  ;;  %v9172_v39 = vadd.f32 %v9168_v10, %v9161_v21 }
0x1170   : > { %v9175_v24 = vperm.slane %v9171_v36, 0  ;;  %v9177_v17 = vperm.slane %v9172_v39, 0  ;;  %v9176_v6 = vperm.slane %v9171_v36, 1  ;;  %v9178_v58 = vperm.slane %v9172_v39, 1 }
0x1172   : > { %v9183_v61 = vpack.c.bf16 %v9175_v24, %v9175_v24  ;;  %v9185_v53 = vpack.c.bf16 %v9177_v17, %v9177_v17  ;;  %v9184_v33 = vpack.c.bf16 %v9176_v6, %v9176_v6  ;;  %v9186_v48 = vpack.c.bf16 %v9178_v58, %v9178_v58 }
0x1174   : > { %v9221_v45 = vunpack.c.l.b16 %v9185_v53  ;;  %v9222_v63 = vunpack.c.l.b16 %v9186_v48  ;;  %v9219_v12 = vunpack.c.l.b16 %v9183_v61  ;;  %v9220_v20 = vunpack.c.l.b16 %v9184_v33 }
0x1176   : > { %v9223_v38 = vrot.slane %v9221_v45, 7  ;;  %v9225_v23 = vrot.slane %v9222_v63, 7 }
0x1178   : > { %v9224_v7 = vsel %vm4719_vm4, %v9223_v38, %v9219_v12  ;;  %v9226_v30 = vsel %vm4719_vm4, %v9225_v23, %v9220_v20 }
0x1179   : > { %v9227_v59 = vpack.c.b16 %v9224_v7, %v9224_v7  ;;  %v9228_v56 = vpack.c.b16 %v9226_v30, %v9226_v30 }
0x117b   : > { %9313 = vmatmul.bf16.vlgmr.msra.gmra.mxu0 %v9227_v59  ;;  %12587 = vmatmul.msk.bf16.vlgmr.msra.gmra.mxu1 %vm19147_vm3, %v9228_v56 }
0x11f8   : > { %v9314_v11 = vpop.f32.mrf.mxu0  ;;  %v9327_v46 = vpop.f32.mrf.mxu1 }
0x11f9   : > { %v9315_v52 = vadd.f32 %v13440_v42, %v9314_v11 }
0x11fb   : > { %v9328_v49 = vadd.f32 %v9327_v46, %v9315_v52 }
0x11fd   : > { %9332 = vst.msk [vmem:[#allocation3] sm:$0x3] %vm9331_vm9, %v9328_v49 }
0x1200   : > { %v9316_v26 = vpop.f32.mrf.mxu0  ;;  %v9329_v22 = vpop.f32.mrf.mxu1 }
0x1201 PF: > { %s19149_s29 = sld [smem:[#allocation8_spill]]  ;;  %s13501_s27 = smov [#allocation3]  }
0x1202   : > { %s19151_s25 = sld [smem:[#allocation25_spill]]  ;;  %s9341_s28 = sshll.u32 %s13501_s27, 4  ;;  %s9342_s28 = int_to_ptr.vmem [resolvable:$true] %s9341_s28 }
0x1207   : > { %s19150_s1 = sadd.s32 4294967295, %s19149_s29  }
0x1208   : > { %p13346_p7 = scmp.eq.s32.totalorder %s19150_s1, 11  ;;  %s9343_s4 = sshll.u32 %s19151_s25, 4  ;;  %s9344_s4 = int_to_ptr.hbm [resolvable:$true] %s9343_s4 }
0x120a   : > { %13343 = dma.vmem_to_hbm [thread:$0]  (%p13346_p7), %s9342_s28, 32, %s9344_s4, [#allocation4]  }
0x120b   : > { %13484 = dma.done.wait (%p13346_p7), [#allocation4], 32  }
0x120c   : > { %13486 = vsyncadd (%p13346_p7), [#allocation4], 4294967264 }
0x120d PF: > { %s19152_s23 = sld [smem:[#allocation8_spill]] }
0x120e   : > { %s19153_s2 = sld [smem:[#allocation7_spill]] }
0x120f   : > { %s19154_s25 = sld [smem:[#allocation9_spill]] }
0x1213   : > { %s32_s26 = sadd.s32 1, %s19152_s23  }
0x1214   : > { %p29_p8 = scmp.ge.s32.totalorder %s32_s26, 14  }
0x1216   :  { %31 = sbr.rel (!%p29_p8) target bundleno = 16 (0x10), region = 321 }
0x121b   :  { %9357 = vsyncpa [#allocation4], 1 }
0x121c   :  { %9359 = vsyncpa [#allocation4 + $0x1], 1 }

</bundles_post_ra>
